<compile_context>
chip_gen: v6e
topology: v6e:2x2x1
jax: 0.10.0
libtpu: 0.0.40
codegen_flags: <defaults>
</compile_context>

<pallas_src>
import functools

import numpy as np
import jax
import jax.numpy as jnp
from jax.experimental import pallas as pl
from jax.experimental.pallas import tpu as pltpu


# ---------------------------------------------------------------------------
# Kernel 1: fused ASPP head (all 5 branches + fused concat-1x1 + BN + ReLU)
# ---------------------------------------------------------------------------
def _aspp_head_kernel(x_ref, w1_ref, b1_ref,
                      w6_ref, b6_ref, w12_ref, b12_ref, w18_ref, b18_ref,
                      wp_ref, bp_ref, w3_ref, b3_ref,
                      o_ref, acc_ref, tot_ref, *, dilations):
    f32 = jnp.float32
    _, H, W, Cin = x_ref.shape
    Cm = w1_ref.shape[1]
    HW = H * W

    x = x_ref[0]                                   # (H, W, Cin), compute dtype
    cdt = x.dtype
    xf = x.reshape(HW, Cin)

    # -- image-pooling branch: global mean -> 1x1 conv -> ReLU.  The bilinear
    #    upsample of a 1x1 map is a constant broadcast. --
    xm = jnp.mean(xf.astype(f32), axis=0, keepdims=True)            # (1, Cin)
    p = jnp.maximum(
        jnp.dot(xm.astype(cdt), wp_ref[...], preferred_element_type=f32)
        + bp_ref[...], 0.0)                                          # (1, Cm)

    # -- branch 0: 1x1 conv -> ReLU --
    h1 = jnp.maximum(
        jnp.dot(xf, w1_ref[...], preferred_element_type=f32) + b1_ref[...],
        0.0)                                                         # (HW, Cm)

    # concat([b0..b4]) followed by conv_1x1_3  ==  sum_k  b_k @ W3_chunk_k
    # (the 1280-channel concat is never materialized).
    tot_ref[...] = (
        jnp.dot(h1.astype(cdt), w3_ref[0], preferred_element_type=f32)
        + jnp.dot(p.astype(cdt), w3_ref[4], preferred_element_type=f32))

    # -- branches 1..3: 3x3 dilated convs.  Every tap is a full-image pointwise
    #    matmul; zero padding is handled by statically restricting the shifted
    #    accumulation region, so no padded scratch / zero-fill is needed. --
    branch_w = (w6_ref, w12_ref, w18_ref)
    branch_b = (b6_ref, b12_ref, b18_ref)
    for bi, d in enumerate(dilations):
        w_taps = branch_w[bi]
        # centre tap (kh=kw=1) covers every output pixel -> initializes the
        # accumulator (no memset).
        acc_ref[...] = jnp.dot(xf, w_taps[4],
                               preferred_element_type=f32).reshape(H, W, Cm)
        for kh in range(3):
            dy = (kh - 1) * d
            if abs(dy) >= H:
                continue                      # tap entirely outside the image
            for kw in range(3):
                dx = (kw - 1) * d
                if (kh == 1 and kw == 1) or abs(dx) >= W:
                    continue
                t_full = jnp.dot(xf, w_taps[kh * 3 + kw],
                                 preferred_element_type=f32).reshape(H, W, Cm)
                ys0, ye0 = max(0, -dy), H - max(0, dy)
                xs0, xe0 = max(0, -dx), W - max(0, dx)
                acc_ref[ys0:ye0, xs0:xe0, :] = (
                    acc_ref[ys0:ye0, xs0:xe0, :]
                    + t_full[ys0 + dy:ye0 + dy, xs0 + dx:xe0 + dx, :])
        hb = jnp.maximum(acc_ref[...].reshape(HW, Cm) + branch_b[bi][...], 0.0)
        tot_ref[...] = tot_ref[...] + jnp.dot(hb.astype(cdt), w3_ref[1 + bi],
                                              preferred_element_type=f32)

    out = jnp.maximum(tot_ref[...] + b3_ref[...], 0.0)
    o_ref[...] = out.reshape(1, H, W, Cm).astype(o_ref.dtype)


# ---------------------------------------------------------------------------
# Kernel 2: bilinear upsample (align_corners=False) as two matmuls per channel
# ---------------------------------------------------------------------------
def _bilinear_upsample_kernel(f_ref, ry_ref, rxT_ref, o_ref):
    cT = f_ref.shape[1]
    ry = ry_ref[...]            # (out_h, H)
    rxT = rxT_ref[...]          # (W, out_w)
    for c in range(cT):
        t = jnp.dot(f_ref[0, c], rxT, preferred_element_type=jnp.float32)
        o_ref[0, c] = jnp.dot(ry, t,
                              preferred_element_type=jnp.float32
                              ).astype(o_ref.dtype)


def _bilinear_matrix(n_in, n_out):
    """Row-interpolation matrix matching F.interpolate(bilinear, align_corners=False)."""
    m = np.zeros((n_out, n_in), dtype=np.float32)
    if n_in == 1:
        m[:, 0] = 1.0
        return m
    scale = n_in / n_out
    for i in range(n_out):
        src = (i + 0.5) * scale - 0.5
        src = min(max(src, 0.0), n_in - 1.0)
        i0 = min(int(np.floor(src)), n_in - 1)
        i1 = min(i0 + 1, n_in - 1)
        frac = src - i0
        m[i, i0] += 1.0 - frac
        m[i, i1] += frac
    return m


def _vmem_limit(nbytes):
    # Per-step footprint with 2x headroom, clamped to be valid on v5e/v6e/v7x.
    return int(min(64 * 1024 * 1024, max(16 * 1024 * 1024, 2 * int(nbytes))))


# ---------------------------------------------------------------------------
# Wrapper: NCHW in / NCHW out
# ---------------------------------------------------------------------------
def aspp_bottleneck_forward(x_nchw, params, *, dilations=(6, 12, 18),
                            out_h, out_w, compute_dtype=jnp.float32):
    (w1, b1, w6, b6, w12, b12, w18, b18, wp, bp, w3, b3) = params
    N, Cin, H, W = x_nchw.shape
    Cm = w1.shape[1]
    f32 = jnp.float32

    x = jnp.transpose(x_nchw, (0, 2, 3, 1)).astype(compute_dtype)   # NHWC
    cast = lambda a: a.astype(compute_dtype)
    w1c, w6c, w12c, w18c, wpc, w3c = map(cast, (w1, w6, w12, w18, wp, w3))
    weight_args = (w1c, b1, w6c, b6, w12c, b12, w18c, b18, wpc, bp, w3c, b3)

    def const_spec(arr):
        nd = arr.ndim
        return pl.BlockSpec(arr.shape, lambda n, _nd=nd: (0,) * _nd)

    itemsize = jnp.dtype(compute_dtype).itemsize
    param_bytes = sum(int(np.prod(a.shape)) * a.dtype.itemsize
                      for a in weight_args)
    vmem1 = _vmem_limit(2 * H * W * Cin * itemsize      # input block (x2 buffers)
                        + param_bytes                    # constant-index params
                        + 2 * H * W * Cm * 4             # output block (x2)
                        + 2 * H * W * Cm * 4)            # acc + tot scratch

    feat_nhwc = pl.pallas_call(
        functools.partial(_aspp_head_kernel, dilations=dilations),
        out_shape=jax.ShapeDtypeStruct((N, H, W, Cm), f32),
        grid_spec=pltpu.PrefetchScalarGridSpec(
            num_scalar_prefetch=0,
            grid=(N,),
            in_specs=[pl.BlockSpec((1, H, W, Cin), lambda n: (n, 0, 0, 0))]
                     + [const_spec(a) for a in weight_args],
            out_specs=pl.BlockSpec((1, H, W, Cm), lambda n: (n, 0, 0, 0)),
            scratch_shapes=[pltpu.VMEM((H, W, Cm), f32),
                            pltpu.VMEM((H * W, Cm), f32)]),
        compiler_params=pltpu.CompilerParams(
            dimension_semantics=("parallel",),
            vmem_limit_bytes=vmem1),
    )(x, *weight_args)

    # Channels-first for the resize kernel so the (large) upsampled output is
    # produced directly in NCHW with the wide W axis on the lanes.
    feat_nchw = jnp.transpose(feat_nhwc, (0, 3, 1, 2))

    ry = jnp.asarray(_bilinear_matrix(H, out_h))          # (out_h, H)
    rxT = jnp.asarray(_bilinear_matrix(W, out_w).T)       # (W, out_w)

    cT = next(t for t in (16, 8, 4, 2, 1) if Cm % t == 0)
    vmem2 = _vmem_limit(2 * cT * H * W * 4
                        + 2 * cT * out_h * out_w * 4
                        + int(np.prod(ry.shape) + np.prod(rxT.shape)) * 4)

    def const_spec2(arr):
        nd = arr.ndim
        return pl.BlockSpec(arr.shape, lambda n, c, _nd=nd: (0,) * _nd)

    out = pl.pallas_call(
        _bilinear_upsample_kernel,
        out_shape=jax.ShapeDtypeStruct((N, Cm, out_h, out_w), f32),
        grid_spec=pltpu.PrefetchScalarGridSpec(
            num_scalar_prefetch=0,
            grid=(N, Cm // cT),
            in_specs=[pl.BlockSpec((1, cT, H, W), lambda n, c: (n, c, 0, 0)),
                      const_spec2(ry), const_spec2(rxT)],
            out_specs=pl.BlockSpec((1, cT, out_h, out_w),
                                   lambda n, c: (n, c, 0, 0))),
        compiler_params=pltpu.CompilerParams(
            dimension_semantics=("parallel", "parallel"),
            vmem_limit_bytes=vmem2),
    )(feat_nchw, ry, rxT)

    return out


# ---------------------------------------------------------------------------
# Synthetic parameters (conv bias + BatchNorm folded; BN scale folded into W)
# ---------------------------------------------------------------------------
def init_params(key, in_channels=2048, mid_channels=256):
    ks = jax.random.split(key, 18)
    f32 = jnp.float32
    it = iter(range(18))
    nxt = lambda: ks[next(it)]

    def conv_w(k, shape):
        fan_in = float(np.prod(shape[:-1]))
        return jax.random.normal(k, shape, f32) / np.sqrt(fan_in)

    def conv_b(k, c):
        return 0.05 * jax.random.normal(k, (c,), f32)

    def bn_fold(k, c):
        kg, kb, km, kv = jax.random.split(k, 4)
        gamma = 1.0 + 0.1 * jax.random.normal(kg, (c,), f32)
        beta = 0.1 * jax.random.normal(kb, (c,), f32)
        mean = 0.1 * jax.random.normal(km, (c,), f32)
        var = jnp.abs(jax.random.normal(kv, (c,), f32)) + 0.5
        scale = gamma / jnp.sqrt(var + 1e-5)
        return scale, beta - mean * scale

    def fold(w, cb, s, b):
        # y = (conv(x, w) + cb) * s + b  ->  conv(x, w*s) + (cb*s + b)
        return w * s, (cb * s + b).reshape(1, -1)

    # conv_1x1_1 + bn
    w1, b1 = fold(conv_w(nxt(), (in_channels, mid_channels)),
                  conv_b(nxt(), mid_channels), *bn_fold(nxt(), mid_channels))

    def dil_branch():
        return fold(conv_w(nxt(), (9, in_channels, mid_channels)),
                    conv_b(nxt(), mid_channels), *bn_fold(nxt(), mid_channels))

    w6, b6 = dil_branch()      # conv_3x3_1 (dilation 6)
    w12, b12 = dil_branch()    # conv_3x3_2 (dilation 12)
    w18, b18 = dil_branch()    # conv_3x3_3 (dilation 18)

    # conv_1x1_2 (image pooling branch) + bn
    wp, bp = fold(conv_w(nxt(), (in_channels, mid_channels)),
                  conv_b(nxt(), mid_channels), *bn_fold(nxt(), mid_channels))

    # conv_1x1_3 (after concat) + bn; stored as (5, Cm, Cm): chunk k == branch k
    w3, b3 = fold(conv_w(nxt(), (5, mid_channels, mid_channels)),
                  conv_b(nxt(), mid_channels), *bn_fold(nxt(), mid_channels))

    # NOTE: conv_1x1_4 of the PyTorch module is never used in forward(); omitted.
    return (w1, b1, w6, b6, w12, b12, w18, b18, wp, bp, w3, b3)


# ---------------------------------------------------------------------------
# Pure-JAX reference (for correctness checking of the Pallas kernels)
# ---------------------------------------------------------------------------
def _ref_forward(x_nchw, params, dilations, out_h, out_w, compute_dtype):
    (w1, b1, w6, b6, w12, b12, w18, b18, wp, bp, w3, b3) = params
    f32 = jnp.float32
    hp = jax.lax.Precision.HIGHEST
    x = jnp.transpose(x_nchw, (0, 2, 3, 1)).astype(compute_dtype)
    N, H, W, Cin = x.shape
    Cm = w1.shape[1]

    def pw(inp, w):
        return jnp.einsum('nhwi,io->nhwo', inp, w.astype(compute_dtype),
                          preferred_element_type=f32, precision=hp)

    def dil(inp, w, d):
        wf = w.reshape(3, 3, Cin, Cm).astype(compute_dtype)
        return jax.lax.conv_general_dilated(
            inp, wf, window_strides=(1, 1),
            padding=[(d, d), (d, d)], rhs_dilation=(d, d),
            dimension_numbers=('NHWC', 'HWIO', 'NHWC'),
            preferred_element_type=f32, precision=hp)

    o0 = jnp.maximum(pw(x, w1) + b1[0], 0.0)
    o1 = jnp.maximum(dil(x, w6, dilations[0]) + b6[0], 0.0)
    o2 = jnp.maximum(dil(x, w12, dilations[1]) + b12[0], 0.0)
    o3 = jnp.maximum(dil(x, w18, dilations[2]) + b18[0], 0.0)
    xm = jnp.mean(x.astype(f32), axis=(1, 2), keepdims=True).astype(compute_dtype)
    o4 = jnp.broadcast_to(jnp.maximum(pw(xm, wp) + bp[0], 0.0), (N, H, W, Cm))
    cat = jnp.concatenate([o0, o1, o2, o3, o4], axis=-1).astype(compute_dtype)
    feat = jnp.maximum(
        jnp.einsum('nhwi,io->nhwo', cat,
                   w3.reshape(5 * Cm, Cm).astype(compute_dtype),
                   preferred_element_type=f32, precision=hp) + b3[0], 0.0)
    feat = jnp.transpose(feat, (0, 3, 1, 2))                        # NCHW
    ry = jnp.asarray(_bilinear_matrix(H, out_h))
    rx = jnp.asarray(_bilinear_matrix(W, out_w))
    return jnp.einsum('nchw,yh,xw->ncyx', feat, ry, rx, precision=hp)


if __name__ == "__main__":
    key = jax.random.PRNGKey(0)
    # Small test shapes (module defaults are Cin=2048, Cm=256, upsample 800x1024).
    N, Cin, H, W = 2, 64, 16, 24
    Cm = 128
    OUT_H, OUT_W = 40, 56
    DILS = (6, 12, 18)

    kx, kp = jax.random.split(key)
    x_nchw = jax.random.normal(kx, (N, Cin, H, W), jnp.float32)
    params = init_params(kp, in_channels=Cin, mid_channels=Cm)

    # --- f32 path: tight correctness check against the pure-JAX reference ---
    out = aspp_bottleneck_forward(x_nchw, params, dilations=DILS,
                                  out_h=OUT_H, out_w=OUT_W,
                                  compute_dtype=jnp.float32)
    out = jax.block_until_ready(out)
    assert out.shape == (N, Cm, OUT_H, OUT_W)
    ref = _ref_forward(x_nchw, params, DILS, OUT_H, OUT_W, jnp.float32)
    err = float(jnp.max(jnp.abs(out - ref)) / (jnp.max(jnp.abs(ref)) + 1e-6))
    assert err < 3e-2, f"f32 mismatch vs reference: normalized max err {err}"

    # --- bf16 path (recommended for v6e/v7x MXU): looser sanity check ---
    out_bf = aspp_bottleneck_forward(x_nchw, params, dilations=DILS,
                                     out_h=OUT_H, out_w=OUT_W,
                                     compute_dtype=jnp.bfloat16)
    out_bf = jax.block_until_ready(out_bf)
    ref_bf = _ref_forward(x_nchw, params, DILS, OUT_H, OUT_W, jnp.bfloat16)
    err_bf = float(jnp.max(jnp.abs(out_bf - ref_bf))
                   / (jnp.max(jnp.abs(ref_bf)) + 1e-6))
    assert err_bf < 8e-2, f"bf16 mismatch vs reference: normalized max err {err_bf}"

    print("KERNEL_OK")
</pallas_src>

<mosaic_0001>
module attributes {stable_mosaic.version = 11 : i64} {
  func.func @_aspp_head_kernel(%arg0: i32, %arg1: memref<1x16x24x64xf32, #tpu.memory_space<vmem>>, %arg2: memref<64x128xf32, #tpu.memory_space<vmem>>, %arg3: memref<1x128xf32, #tpu.memory_space<vmem>>, %arg4: memref<9x64x128xf32, #tpu.memory_space<vmem>>, %arg5: memref<1x128xf32, #tpu.memory_space<vmem>>, %arg6: memref<9x64x128xf32, #tpu.memory_space<vmem>>, %arg7: memref<1x128xf32, #tpu.memory_space<vmem>>, %arg8: memref<9x64x128xf32, #tpu.memory_space<vmem>>, %arg9: memref<1x128xf32, #tpu.memory_space<vmem>>, %arg10: memref<64x128xf32, #tpu.memory_space<vmem>>, %arg11: memref<1x128xf32, #tpu.memory_space<vmem>>, %arg12: memref<5x128x128xf32, #tpu.memory_space<vmem>>, %arg13: memref<1x128xf32, #tpu.memory_space<vmem>>, %arg14: memref<1x16x24x128xf32, #tpu.memory_space<vmem>>, %arg15: memref<16x24x128xf32, #tpu.memory_space<vmem>>, %arg16: memref<384x128xf32, #tpu.memory_space<vmem>>) attributes {dimension_semantics = [#tpu.dimension_semantics<parallel>], iteration_bounds = array<i64: 2>, scalar_prefetch = 0 : i64, scratch_operands = 2 : i64, tpu.core_type = #tpu.core_type<tc>, window_params = [{transform_indices = @transform_0, window_bounds = array<i64: 1, 16, 24, 64>}, {pipeline_mode = #tpu.pipeline_mode<synchronous>, transform_indices = @transform_1, window_bounds = array<i64: 64, 128>}, {pipeline_mode = #tpu.pipeline_mode<synchronous>, transform_indices = @transform_2, window_bounds = array<i64: 1, 128>}, {pipeline_mode = #tpu.pipeline_mode<synchronous>, transform_indices = @transform_3, window_bounds = array<i64: 9, 64, 128>}, {pipeline_mode = #tpu.pipeline_mode<synchronous>, transform_indices = @transform_4, window_bounds = array<i64: 1, 128>}, {pipeline_mode = #tpu.pipeline_mode<synchronous>, transform_indices = @transform_5, window_bounds = array<i64: 9, 64, 128>}, {pipeline_mode = #tpu.pipeline_mode<synchronous>, transform_indices = @transform_6, window_bounds = array<i64: 1, 128>}, {pipeline_mode = #tpu.pipeline_mode<synchronous>, transform_indices = @transform_7, window_bounds = array<i64: 9, 64, 128>}, {pipeline_mode = #tpu.pipeline_mode<synchronous>, transform_indices = @transform_8, window_bounds = array<i64: 1, 128>}, {pipeline_mode = #tpu.pipeline_mode<synchronous>, transform_indices = @transform_9, window_bounds = array<i64: 64, 128>}, {pipeline_mode = #tpu.pipeline_mode<synchronous>, transform_indices = @transform_10, window_bounds = array<i64: 1, 128>}, {pipeline_mode = #tpu.pipeline_mode<synchronous>, transform_indices = @transform_11, window_bounds = array<i64: 5, 128, 128>}, {pipeline_mode = #tpu.pipeline_mode<synchronous>, transform_indices = @transform_12, window_bounds = array<i64: 1, 128>}, {transform_indices = @transform_13, window_bounds = array<i64: 1, 16, 24, 128>}]} {
    %c0 = arith.constant 0 : index
    %c0_0 = arith.constant 0 : index
    %c0_1 = arith.constant 0 : index
    %c0_2 = arith.constant 0 : index
    %0 = vector.load %arg1[%c0, %c0_0, %c0_1, %c0_2] : memref<1x16x24x64xf32, #tpu.memory_space<vmem>>, vector<1x16x24x64xf32>
    %1 = vector.shape_cast %0 : vector<1x16x24x64xf32> to vector<16x24x64xf32>
    %2 = vector.shape_cast %1 : vector<16x24x64xf32> to vector<384x64xf32>
    %cst = arith.constant dense<0.000000e+00> : vector<64xf32>
    %3 = vector.multi_reduction <add>, %2, %cst [0] : vector<384x64xf32> to vector<64xf32>
    %4 = vector.shape_cast %3 : vector<64xf32> to vector<1x64xf32>
    %cst_3 = arith.constant 3.840000e+02 : f32
    %5 = vector.broadcast %cst_3 : f32 to vector<1x64xf32>
    %6 = arith.divf %4, %5 : vector<1x64xf32>
    %c0_4 = arith.constant 0 : index
    %c0_5 = arith.constant 0 : index
    %7 = vector.load %arg10[%c0_4, %c0_5] : memref<64x128xf32, #tpu.memory_space<vmem>>, vector<64x128xf32>
    %cst_6 = arith.constant dense<0.000000e+00> : vector<1x128xf32>
    %8 = tpu.matmul %6, %7, %cst_6 {dimension_numbers = #tpu.dot_dimension_numbers<[1], [0], [0], [1], [0, 0, 1, 1], [], []>} : vector<1x64xf32>, vector<64x128xf32>, vector<1x128xf32> -> vector<1x128xf32>
    %c0_7 = arith.constant 0 : index
    %c0_8 = arith.constant 0 : index
    %9 = vector.load %arg11[%c0_7, %c0_8] : memref<1x128xf32, #tpu.memory_space<vmem>>, vector<1x128xf32>
    %10 = arith.addf %8, %9 : vector<1x128xf32>
    %cst_9 = arith.constant 0.000000e+00 : f32
    %11 = vector.broadcast %cst_9 : f32 to vector<1x128xf32>
    %12 = arith.maximumf %10, %11 : vector<1x128xf32>
    %c0_10 = arith.constant 0 : index
    %c0_11 = arith.constant 0 : index
    %13 = vector.load %arg2[%c0_10, %c0_11] : memref<64x128xf32, #tpu.memory_space<vmem>>, vector<64x128xf32>
    %cst_12 = arith.constant dense<0.000000e+00> : vector<384x128xf32>
    %14 = tpu.matmul %2, %13, %cst_12 {dimension_numbers = #tpu.dot_dimension_numbers<[1], [0], [0], [1], [0, 0, 1, 1], [], []>} : vector<384x64xf32>, vector<64x128xf32>, vector<384x128xf32> -> vector<384x128xf32>
    %c0_13 = arith.constant 0 : index
    %c0_14 = arith.constant 0 : index
    %15 = vector.load %arg3[%c0_13, %c0_14] : memref<1x128xf32, #tpu.memory_space<vmem>>, vector<1x128xf32>
    %16 = vector.broadcast %15 : vector<1x128xf32> to vector<384x128xf32>
    %17 = arith.addf %14, %16 : vector<384x128xf32>
    %cst_15 = arith.constant 0.000000e+00 : f32
    %18 = vector.broadcast %cst_15 : f32 to vector<384x128xf32>
    %19 = arith.maximumf %17, %18 : vector<384x128xf32>
    %c0_16 = arith.constant 0 : index
    %c0_17 = arith.constant 0 : index
    %c0_18 = arith.constant 0 : index
    %20 = vector.load %arg12[%c0_16, %c0_17, %c0_18] : memref<5x128x128xf32, #tpu.memory_space<vmem>>, vector<1x128x128xf32>
    %21 = vector.shape_cast %20 : vector<1x128x128xf32> to vector<128x128xf32>
    %cst_19 = arith.constant dense<0.000000e+00> : vector<384x128xf32>
    %22 = tpu.matmul %19, %21, %cst_19 {dimension_numbers = #tpu.dot_dimension_numbers<[1], [0], [0], [1], [0, 0, 1, 1], [], []>} : vector<384x128xf32>, vector<128x128xf32>, vector<384x128xf32> -> vector<384x128xf32>
    %c4 = arith.constant 4 : index
    %c0_20 = arith.constant 0 : index
    %c0_21 = arith.constant 0 : index
    %23 = vector.load %arg12[%c4, %c0_20, %c0_21] : memref<5x128x128xf32, #tpu.memory_space<vmem>>, vector<1x128x128xf32>
    %24 = vector.shape_cast %23 : vector<1x128x128xf32> to vector<128x128xf32>
    %cst_22 = arith.constant dense<0.000000e+00> : vector<1x128xf32>
    %25 = tpu.matmul %12, %24, %cst_22 {dimension_numbers = #tpu.dot_dimension_numbers<[1], [0], [0], [1], [0, 0, 1, 1], [], []>} : vector<1x128xf32>, vector<128x128xf32>, vector<1x128xf32> -> vector<1x128xf32>
    %26 = vector.broadcast %25 : vector<1x128xf32> to vector<384x128xf32>
    %27 = arith.addf %22, %26 : vector<384x128xf32>
    %c0_23 = arith.constant 0 : index
    %c0_24 = arith.constant 0 : index
    %28 = vector.load %arg16[%c0_23, %c0_24] : memref<384x128xf32, #tpu.memory_space<vmem>>, vector<384x128xf32>
    tpu.vector_store %arg16[%c0_23, %c0_24], %27 {strides = array<i32>} : memref<384x128xf32, #tpu.memory_space<vmem>>, vector<384x128xf32>,
    %c4_25 = arith.constant 4 : index
    %c0_26 = arith.constant 0 : index
    %c0_27 = arith.constant 0 : index
    %29 = vector.load %arg4[%c4_25, %c0_26, %c0_27] : memref<9x64x128xf32, #tpu.memory_space<vmem>>, vector<1x64x128xf32>
    %30 = vector.shape_cast %29 : vector<1x64x128xf32> to vector<64x128xf32>
    %cst_28 = arith.constant dense<0.000000e+00> : vector<384x128xf32>
    %31 = tpu.matmul %2, %30, %cst_28 {dimension_numbers = #tpu.dot_dimension_numbers<[1], [0], [0], [1], [0, 0, 1, 1], [], []>} : vector<384x64xf32>, vector<64x128xf32>, vector<384x128xf32> -> vector<384x128xf32>
    %32 = vector.shape_cast %31 : vector<384x128xf32> to vector<16x24x128xf32>
    %c0_29 = arith.constant 0 : index
    %c0_30 = arith.constant 0 : index
    %c0_31 = arith.constant 0 : index
    %33 = vector.load %arg15[%c0_29, %c0_30, %c0_31] : memref<16x24x128xf32, #tpu.memory_space<vmem>>, vector<16x24x128xf32>
    tpu.vector_store %arg15[%c0_29, %c0_30, %c0_31], %32 {strides = array<i32>} : memref<16x24x128xf32, #tpu.memory_space<vmem>>, vector<16x24x128xf32>,
    %c0_32 = arith.constant 0 : index
    %c0_33 = arith.constant 0 : index
    %c0_34 = arith.constant 0 : index
    %34 = vector.load %arg4[%c0_32, %c0_33, %c0_34] : memref<9x64x128xf32, #tpu.memory_space<vmem>>, vector<1x64x128xf32>
    %35 = vector.shape_cast %34 : vector<1x64x128xf32> to vector<64x128xf32>
    %cst_35 = arith.constant dense<0.000000e+00> : vector<384x128xf32>
    %36 = tpu.matmul %2, %35, %cst_35 {dimension_numbers = #tpu.dot_dimension_numbers<[1], [0], [0], [1], [0, 0, 1, 1], [], []>} : vector<384x64xf32>, vector<64x128xf32>, vector<384x128xf32> -> vector<384x128xf32>
    %37 = vector.shape_cast %36 : vector<384x128xf32> to vector<16x24x128xf32>
    %c6 = arith.constant 6 : index
    %c6_36 = arith.constant 6 : index
    %c0_37 = arith.constant 0 : index
    %38 = vector.load %arg15[%c6, %c6_36, %c0_37] : memref<16x24x128xf32, #tpu.memory_space<vmem>>, vector<10x18x128xf32>
    %39 = vector.extract_strided_slice %37 {offsets = [0, 0, 0], sizes = [10, 18, 128], strides = [1, 1, 1]} : vector<16x24x128xf32> to vector<10x18x128xf32>
    %40 = arith.addf %38, %39 : vector<10x18x128xf32>
    %c6_38 = arith.constant 6 : index
    %c6_39 = arith.constant 6 : index
    %c0_40 = arith.constant 0 : index
    %41 = vector.load %arg15[%c6_38, %c6_39, %c0_40] : memref<16x24x128xf32, #tpu.memory_space<vmem>>, vector<10x18x128xf32>
    tpu.vector_store %arg15[%c6_38, %c6_39, %c0_40], %40 {strides = array<i32>} : memref<16x24x128xf32, #tpu.memory_space<vmem>>, vector<10x18x128xf32>,
    %c1 = arith.constant 1 : index
    %c0_41 = arith.constant 0 : index
    %c0_42 = arith.constant 0 : index
    %42 = vector.load %arg4[%c1, %c0_41, %c0_42] : memref<9x64x128xf32, #tpu.memory_space<vmem>>, vector<1x64x128xf32>
    %43 = vector.shape_cast %42 : vector<1x64x128xf32> to vector<64x128xf32>
    %cst_43 = arith.constant dense<0.000000e+00> : vector<384x128xf32>
    %44 = tpu.matmul %2, %43, %cst_43 {dimension_numbers = #tpu.dot_dimension_numbers<[1], [0], [0], [1], [0, 0, 1, 1], [], []>} : vector<384x64xf32>, vector<64x128xf32>, vector<384x128xf32> -> vector<384x128xf32>
    %45 = vector.shape_cast %44 : vector<384x128xf32> to vector<16x24x128xf32>
    %c6_44 = arith.constant 6 : index
    %c0_45 = arith.constant 0 : index
    %c0_46 = arith.constant 0 : index
    %46 = vector.load %arg15[%c6_44, %c0_45, %c0_46] : memref<16x24x128xf32, #tpu.memory_space<vmem>>, vector<10x24x128xf32>
    %47 = vector.extract_strided_slice %45 {offsets = [0, 0, 0], sizes = [10, 24, 128], strides = [1, 1, 1]} : vector<16x24x128xf32> to vector<10x24x128xf32>
    %48 = arith.addf %46, %47 : vector<10x24x128xf32>
    %c6_47 = arith.constant 6 : index
    %c0_48 = arith.constant 0 : index
    %c0_49 = arith.constant 0 : index
    %49 = vector.load %arg15[%c6_47, %c0_48, %c0_49] : memref<16x24x128xf32, #tpu.memory_space<vmem>>, vector<10x24x128xf32>
    tpu.vector_store %arg15[%c6_47, %c0_48, %c0_49], %48 {strides = array<i32>} : memref<16x24x128xf32, #tpu.memory_space<vmem>>, vector<10x24x128xf32>,
    %c2 = arith.constant 2 : index
    %c0_50 = arith.constant 0 : index
    %c0_51 = arith.constant 0 : index
    %50 = vector.load %arg4[%c2, %c0_50, %c0_51] : memref<9x64x128xf32, #tpu.memory_space<vmem>>, vector<1x64x128xf32>
    %51 = vector.shape_cast %50 : vector<1x64x128xf32> to vector<64x128xf32>
    %cst_52 = arith.constant dense<0.000000e+00> : vector<384x128xf32>
    %52 = tpu.matmul %2, %51, %cst_52 {dimension_numbers = #tpu.dot_dimension_numbers<[1], [0], [0], [1], [0, 0, 1, 1], [], []>} : vector<384x64xf32>, vector<64x128xf32>, vector<384x128xf32> -> vector<384x128xf32>
    %53 = vector.shape_cast %52 : vector<384x128xf32> to vector<16x24x128xf32>
    %c6_53 = arith.constant 6 : index
    %c0_54 = arith.constant 0 : index
    %c0_55 = arith.constant 0 : index
    %54 = vector.load %arg15[%c6_53, %c0_54, %c0_55] : memref<16x24x128xf32, #tpu.memory_space<vmem>>, vector<10x18x128xf32>
    %55 = vector.extract_strided_slice %53 {offsets = [0, 6, 0], sizes = [10, 18, 128], strides = [1, 1, 1]} : vector<16x24x128xf32> to vector<10x18x128xf32>
    %56 = arith.addf %54, %55 : vector<10x18x128xf32>
    %c6_56 = arith.constant 6 : index
    %c0_57 = arith.constant 0 : index
    %c0_58 = arith.constant 0 : index
    %57 = vector.load %arg15[%c6_56, %c0_57, %c0_58] : memref<16x24x128xf32, #tpu.memory_space<vmem>>, vector<10x18x128xf32>
    tpu.vector_store %arg15[%c6_56, %c0_57, %c0_58], %56 {strides = array<i32>} : memref<16x24x128xf32, #tpu.memory_space<vmem>>, vector<10x18x128xf32>,
    %c3 = arith.constant 3 : index
    %c0_59 = arith.constant 0 : index
    %c0_60 = arith.constant 0 : index
    %58 = vector.load %arg4[%c3, %c0_59, %c0_60] : memref<9x64x128xf32, #tpu.memory_space<vmem>>, vector<1x64x128xf32>
    %59 = vector.shape_cast %58 : vector<1x64x128xf32> to vector<64x128xf32>
    %cst_61 = arith.constant dense<0.000000e+00> : vector<384x128xf32>
    %60 = tpu.matmul %2, %59, %cst_61 {dimension_numbers = #tpu.dot_dimension_numbers<[1], [0], [0], [1], [0, 0, 1, 1], [], []>} : vector<384x64xf32>, vector<64x128xf32>, vector<384x128xf32> -> vector<384x128xf32>
    %61 = vector.shape_cast %60 : vector<384x128xf32> to vector<16x24x128xf32>
    %c0_62 = arith.constant 0 : index
    %c6_63 = arith.constant 6 : index
    %c0_64 = arith.constant 0 : index
    %62 = vector.load %arg15[%c0_62, %c6_63, %c0_64] : memref<16x24x128xf32, #tpu.memory_space<vmem>>, vector<16x18x128xf32>
    %63 = vector.extract_strided_slice %61 {offsets = [0, 0, 0], sizes = [16, 18, 128], strides = [1, 1, 1]} : vector<16x24x128xf32> to vector<16x18x128xf32>
    %64 = arith.addf %62, %63 : vector<16x18x128xf32>
    %c0_65 = arith.constant 0 : index
    %c6_66 = arith.constant 6 : index
    %c0_67 = arith.constant 0 : index
    %65 = vector.load %arg15[%c0_65, %c6_66, %c0_67] : memref<16x24x128xf32, #tpu.memory_space<vmem>>, vector<16x18x128xf32>
    tpu.vector_store %arg15[%c0_65, %c6_66, %c0_67], %64 {strides = array<i32>} : memref<16x24x128xf32, #tpu.memory_space<vmem>>, vector<16x18x128xf32>,
    %c5 = arith.constant 5 : index
    %c0_68 = arith.constant 0 : index
    %c0_69 = arith.constant 0 : index
    %66 = vector.load %arg4[%c5, %c0_68, %c0_69] : memref<9x64x128xf32, #tpu.memory_space<vmem>>, vector<1x64x128xf32>
    %67 = vector.shape_cast %66 : vector<1x64x128xf32> to vector<64x128xf32>
    %cst_70 = arith.constant dense<0.000000e+00> : vector<384x128xf32>
    %68 = tpu.matmul %2, %67, %cst_70 {dimension_numbers = #tpu.dot_dimension_numbers<[1], [0], [0], [1], [0, 0, 1, 1], [], []>} : vector<384x64xf32>, vector<64x128xf32>, vector<384x128xf32> -> vector<384x128xf32>
    %69 = vector.shape_cast %68 : vector<384x128xf32> to vector<16x24x128xf32>
    %c0_71 = arith.constant 0 : index
    %c0_72 = arith.constant 0 : index
    %c0_73 = arith.constant 0 : index
    %70 = vector.load %arg15[%c0_71, %c0_72, %c0_73] : memref<16x24x128xf32, #tpu.memory_space<vmem>>, vector<16x18x128xf32>
    %71 = vector.extract_strided_slice %69 {offsets = [0, 6, 0], sizes = [16, 18, 128], strides = [1, 1, 1]} : vector<16x24x128xf32> to vector<16x18x128xf32>
    %72 = arith.addf %70, %71 : vector<16x18x128xf32>
    %c0_74 = arith.constant 0 : index
    %c0_75 = arith.constant 0 : index
    %c0_76 = arith.constant 0 : index
    %73 = vector.load %arg15[%c0_74, %c0_75, %c0_76] : memref<16x24x128xf32, #tpu.memory_space<vmem>>, vector<16x18x128xf32>
    tpu.vector_store %arg15[%c0_74, %c0_75, %c0_76], %72 {strides = array<i32>} : memref<16x24x128xf32, #tpu.memory_space<vmem>>, vector<16x18x128xf32>,
    %c6_77 = arith.constant 6 : index
    %c0_78 = arith.constant 0 : index
    %c0_79 = arith.constant 0 : index
    %74 = vector.load %arg4[%c6_77, %c0_78, %c0_79] : memref<9x64x128xf32, #tpu.memory_space<vmem>>, vector<1x64x128xf32>
    %75 = vector.shape_cast %74 : vector<1x64x128xf32> to vector<64x128xf32>
    %cst_80 = arith.constant dense<0.000000e+00> : vector<384x128xf32>
    %76 = tpu.matmul %2, %75, %cst_80 {dimension_numbers = #tpu.dot_dimension_numbers<[1], [0], [0], [1], [0, 0, 1, 1], [], []>} : vector<384x64xf32>, vector<64x128xf32>, vector<384x128xf32> -> vector<384x128xf32>
    %77 = vector.shape_cast %76 : vector<384x128xf32> to vector<16x24x128xf32>
    %c0_81 = arith.constant 0 : index
    %c6_82 = arith.constant 6 : index
    %c0_83 = arith.constant 0 : index
    %78 = vector.load %arg15[%c0_81, %c6_82, %c0_83] : memref<16x24x128xf32, #tpu.memory_space<vmem>>, vector<10x18x128xf32>
    %79 = vector.extract_strided_slice %77 {offsets = [6, 0, 0], sizes = [10, 18, 128], strides = [1, 1, 1]} : vector<16x24x128xf32> to vector<10x18x128xf32>
    %80 = arith.addf %78, %79 : vector<10x18x128xf32>
    %c0_84 = arith.constant 0 : index
    %c6_85 = arith.constant 6 : index
    %c0_86 = arith.constant 0 : index
    %81 = vector.load %arg15[%c0_84, %c6_85, %c0_86] : memref<16x24x128xf32, #tpu.memory_space<vmem>>, vector<10x18x128xf32>
    tpu.vector_store %arg15[%c0_84, %c6_85, %c0_86], %80 {strides = array<i32>} : memref<16x24x128xf32, #tpu.memory_space<vmem>>, vector<10x18x128xf32>,
    %c7 = arith.constant 7 : index
    %c0_87 = arith.constant 0 : index
    %c0_88 = arith.constant 0 : index
    %82 = vector.load %arg4[%c7, %c0_87, %c0_88] : memref<9x64x128xf32, #tpu.memory_space<vmem>>, vector<1x64x128xf32>
    %83 = vector.shape_cast %82 : vector<1x64x128xf32> to vector<64x128xf32>
    %cst_89 = arith.constant dense<0.000000e+00> : vector<384x128xf32>
    %84 = tpu.matmul %2, %83, %cst_89 {dimension_numbers = #tpu.dot_dimension_numbers<[1], [0], [0], [1], [0, 0, 1, 1], [], []>} : vector<384x64xf32>, vector<64x128xf32>, vector<384x128xf32> -> vector<384x128xf32>
    %85 = vector.shape_cast %84 : vector<384x128xf32> to vector<16x24x128xf32>
    %c0_90 = arith.constant 0 : index
    %c0_91 = arith.constant 0 : index
    %c0_92 = arith.constant 0 : index
    %86 = vector.load %arg15[%c0_90, %c0_91, %c0_92] : memref<16x24x128xf32, #tpu.memory_space<vmem>>, vector<10x24x128xf32>
    %87 = vector.extract_strided_slice %85 {offsets = [6, 0, 0], sizes = [10, 24, 128], strides = [1, 1, 1]} : vector<16x24x128xf32> to vector<10x24x128xf32>
    %88 = arith.addf %86, %87 : vector<10x24x128xf32>
    %c0_93 = arith.constant 0 : index
    %c0_94 = arith.constant 0 : index
    %c0_95 = arith.constant 0 : index
    %89 = vector.load %arg15[%c0_93, %c0_94, %c0_95] : memref<16x24x128xf32, #tpu.memory_space<vmem>>, vector<10x24x128xf32>
    tpu.vector_store %arg15[%c0_93, %c0_94, %c0_95], %88 {strides = array<i32>} : memref<16x24x128xf32, #tpu.memory_space<vmem>>, vector<10x24x128xf32>,
    %c8 = arith.constant 8 : index
    %c0_96 = arith.constant 0 : index
    %c0_97 = arith.constant 0 : index
    %90 = vector.load %arg4[%c8, %c0_96, %c0_97] : memref<9x64x128xf32, #tpu.memory_space<vmem>>, vector<1x64x128xf32>
    %91 = vector.shape_cast %90 : vector<1x64x128xf32> to vector<64x128xf32>
    %cst_98 = arith.constant dense<0.000000e+00> : vector<384x128xf32>
    %92 = tpu.matmul %2, %91, %cst_98 {dimension_numbers = #tpu.dot_dimension_numbers<[1], [0], [0], [1], [0, 0, 1, 1], [], []>} : vector<384x64xf32>, vector<64x128xf32>, vector<384x128xf32> -> vector<384x128xf32>
    %93 = vector.shape_cast %92 : vector<384x128xf32> to vector<16x24x128xf32>
    %c0_99 = arith.constant 0 : index
    %c0_100 = arith.constant 0 : index
    %c0_101 = arith.constant 0 : index
    %94 = vector.load %arg15[%c0_99, %c0_100, %c0_101] : memref<16x24x128xf32, #tpu.memory_space<vmem>>, vector<10x18x128xf32>
    %95 = vector.extract_strided_slice %93 {offsets = [6, 6, 0], sizes = [10, 18, 128], strides = [1, 1, 1]} : vector<16x24x128xf32> to vector<10x18x128xf32>
    %96 = arith.addf %94, %95 : vector<10x18x128xf32>
    %c0_102 = arith.constant 0 : index
    %c0_103 = arith.constant 0 : index
    %c0_104 = arith.constant 0 : index
    %97 = vector.load %arg15[%c0_102, %c0_103, %c0_104] : memref<16x24x128xf32, #tpu.memory_space<vmem>>, vector<10x18x128xf32>
    tpu.vector_store %arg15[%c0_102, %c0_103, %c0_104], %96 {strides = array<i32>} : memref<16x24x128xf32, #tpu.memory_space<vmem>>, vector<10x18x128xf32>,
    %c0_105 = arith.constant 0 : index
    %c0_106 = arith.constant 0 : index
    %c0_107 = arith.constant 0 : index
    %98 = vector.load %arg15[%c0_105, %c0_106, %c0_107] : memref<16x24x128xf32, #tpu.memory_space<vmem>>, vector<16x24x128xf32>
    %99 = vector.shape_cast %98 : vector<16x24x128xf32> to vector<384x128xf32>
    %c0_108 = arith.constant 0 : index
    %c0_109 = arith.constant 0 : index
    %100 = vector.load %arg5[%c0_108, %c0_109] : memref<1x128xf32, #tpu.memory_space<vmem>>, vector<1x128xf32>
    %101 = vector.broadcast %100 : vector<1x128xf32> to vector<384x128xf32>
    %102 = arith.addf %99, %101 : vector<384x128xf32>
    %cst_110 = arith.constant 0.000000e+00 : f32
    %103 = vector.broadcast %cst_110 : f32 to vector<384x128xf32>
    %104 = arith.maximumf %102, %103 : vector<384x128xf32>
    %c0_111 = arith.constant 0 : index
    %c0_112 = arith.constant 0 : index
    %105 = vector.load %arg16[%c0_111, %c0_112] : memref<384x128xf32, #tpu.memory_space<vmem>>, vector<384x128xf32>
    %c1_113 = arith.constant 1 : index
    %c0_114 = arith.constant 0 : index
    %c0_115 = arith.constant 0 : index
    %106 = vector.load %arg12[%c1_113, %c0_114, %c0_115] : memref<5x128x128xf32, #tpu.memory_space<vmem>>, vector<1x128x128xf32>
    %107 = vector.shape_cast %106 : vector<1x128x128xf32> to vector<128x128xf32>
    %cst_116 = arith.constant dense<0.000000e+00> : vector<384x128xf32>
    %108 = tpu.matmul %104, %107, %cst_116 {dimension_numbers = #tpu.dot_dimension_numbers<[1], [0], [0], [1], [0, 0, 1, 1], [], []>} : vector<384x128xf32>, vector<128x128xf32>, vector<384x128xf32> -> vector<384x128xf32>
    %109 = arith.addf %105, %108 : vector<384x128xf32>
    %c0_117 = arith.constant 0 : index
    %c0_118 = arith.constant 0 : index
    %110 = vector.load %arg16[%c0_117, %c0_118] : memref<384x128xf32, #tpu.memory_space<vmem>>, vector<384x128xf32>
    tpu.vector_store %arg16[%c0_117, %c0_118], %109 {strides = array<i32>} : memref<384x128xf32, #tpu.memory_space<vmem>>, vector<384x128xf32>,
    %c4_119 = arith.constant 4 : index
    %c0_120 = arith.constant 0 : index
    %c0_121 = arith.constant 0 : index
    %111 = vector.load %arg6[%c4_119, %c0_120, %c0_121] : memref<9x64x128xf32, #tpu.memory_space<vmem>>, vector<1x64x128xf32>
    %112 = vector.shape_cast %111 : vector<1x64x128xf32> to vector<64x128xf32>
    %cst_122 = arith.constant dense<0.000000e+00> : vector<384x128xf32>
    %113 = tpu.matmul %2, %112, %cst_122 {dimension_numbers = #tpu.dot_dimension_numbers<[1], [0], [0], [1], [0, 0, 1, 1], [], []>} : vector<384x64xf32>, vector<64x128xf32>, vector<384x128xf32> -> vector<384x128xf32>
    %114 = vector.shape_cast %113 : vector<384x128xf32> to vector<16x24x128xf32>
    %c0_123 = arith.constant 0 : index
    %c0_124 = arith.constant 0 : index
    %c0_125 = arith.constant 0 : index
    %115 = vector.load %arg15[%c0_123, %c0_124, %c0_125] : memref<16x24x128xf32, #tpu.memory_space<vmem>>, vector<16x24x128xf32>
    tpu.vector_store %arg15[%c0_123, %c0_124, %c0_125], %114 {strides = array<i32>} : memref<16x24x128xf32, #tpu.memory_space<vmem>>, vector<16x24x128xf32>,
    %c0_126 = arith.constant 0 : index
    %c0_127 = arith.constant 0 : index
    %c0_128 = arith.constant 0 : index
    %116 = vector.load %arg6[%c0_126, %c0_127, %c0_128] : memref<9x64x128xf32, #tpu.memory_space<vmem>>, vector<1x64x128xf32>
    %117 = vector.shape_cast %116 : vector<1x64x128xf32> to vector<64x128xf32>
    %cst_129 = arith.constant dense<0.000000e+00> : vector<384x128xf32>
    %118 = tpu.matmul %2, %117, %cst_129 {dimension_numbers = #tpu.dot_dimension_numbers<[1], [0], [0], [1], [0, 0, 1, 1], [], []>} : vector<384x64xf32>, vector<64x128xf32>, vector<384x128xf32> -> vector<384x128xf32>
    %119 = vector.shape_cast %118 : vector<384x128xf32> to vector<16x24x128xf32>
    %c12 = arith.constant 12 : index
    %c12_130 = arith.constant 12 : index
    %c0_131 = arith.constant 0 : index
    %120 = vector.load %arg15[%c12, %c12_130, %c0_131] : memref<16x24x128xf32, #tpu.memory_space<vmem>>, vector<4x12x128xf32>
    %121 = vector.extract_strided_slice %119 {offsets = [0, 0, 0], sizes = [4, 12, 128], strides = [1, 1, 1]} : vector<16x24x128xf32> to vector<4x12x128xf32>
    %122 = arith.addf %120, %121 : vector<4x12x128xf32>
    %c12_132 = arith.constant 12 : index
    %c12_133 = arith.constant 12 : index
    %c0_134 = arith.constant 0 : index
    %123 = vector.load %arg15[%c12_132, %c12_133, %c0_134] : memref<16x24x128xf32, #tpu.memory_space<vmem>>, vector<4x12x128xf32>
    tpu.vector_store %arg15[%c12_132, %c12_133, %c0_134], %122 {strides = array<i32>} : memref<16x24x128xf32, #tpu.memory_space<vmem>>, vector<4x12x128xf32>,
    %c1_135 = arith.constant 1 : index
    %c0_136 = arith.constant 0 : index
    %c0_137 = arith.constant 0 : index
    %124 = vector.load %arg6[%c1_135, %c0_136, %c0_137] : memref<9x64x128xf32, #tpu.memory_space<vmem>>, vector<1x64x128xf32>
    %125 = vector.shape_cast %124 : vector<1x64x128xf32> to vector<64x128xf32>
    %cst_138 = arith.constant dense<0.000000e+00> : vector<384x128xf32>
    %126 = tpu.matmul %2, %125, %cst_138 {dimension_numbers = #tpu.dot_dimension_numbers<[1], [0], [0], [1], [0, 0, 1, 1], [], []>} : vector<384x64xf32>, vector<64x128xf32>, vector<384x128xf32> -> vector<384x128xf32>
    %127 = vector.shape_cast %126 : vector<384x128xf32> to vector<16x24x128xf32>
    %c12_139 = arith.constant 12 : index
    %c0_140 = arith.constant 0 : index
    %c0_141 = arith.constant 0 : index
    %128 = vector.load %arg15[%c12_139, %c0_140, %c0_141] : memref<16x24x128xf32, #tpu.memory_space<vmem>>, vector<4x24x128xf32>
    %129 = vector.extract_strided_slice %127 {offsets = [0, 0, 0], sizes = [4, 24, 128], strides = [1, 1, 1]} : vector<16x24x128xf32> to vector<4x24x128xf32>
    %130 = arith.addf %128, %129 : vector<4x24x128xf32>
    %c12_142 = arith.constant 12 : index
    %c0_143 = arith.constant 0 : index
    %c0_144 = arith.constant 0 : index
    %131 = vector.load %arg15[%c12_142, %c0_143, %c0_144] : memref<16x24x128xf32, #tpu.memory_space<vmem>>, vector<4x24x128xf32>
    tpu.vector_store %arg15[%c12_142, %c0_143, %c0_144], %130 {strides = array<i32>} : memref<16x24x128xf32, #tpu.memory_space<vmem>>, vector<4x24x128xf32>,
    %c2_145 = arith.constant 2 : index
    %c0_146 = arith.constant 0 : index
    %c0_147 = arith.constant 0 : index
    %132 = vector.load %arg6[%c2_145, %c0_146, %c0_147] : memref<9x64x128xf32, #tpu.memory_space<vmem>>, vector<1x64x128xf32>
    %133 = vector.shape_cast %132 : vector<1x64x128xf32> to vector<64x128xf32>
    %cst_148 = arith.constant dense<0.000000e+00> : vector<384x128xf32>
    %134 = tpu.matmul %2, %133, %cst_148 {dimension_numbers = #tpu.dot_dimension_numbers<[1], [0], [0], [1], [0, 0, 1, 1], [], []>} : vector<384x64xf32>, vector<64x128xf32>, vector<384x128xf32> -> vector<384x128xf32>
    %135 = vector.shape_cast %134 : vector<384x128xf32> to vector<16x24x128xf32>
    %c12_149 = arith.constant 12 : index
    %c0_150 = arith.constant 0 : index
    %c0_151 = arith.constant 0 : index
    %136 = vector.load %arg15[%c12_149, %c0_150, %c0_151] : memref<16x24x128xf32, #tpu.memory_space<vmem>>, vector<4x12x128xf32>
    %137 = vector.extract_strided_slice %135 {offsets = [0, 12, 0], sizes = [4, 12, 128], strides = [1, 1, 1]} : vector<16x24x128xf32> to vector<4x12x128xf32>
    %138 = arith.addf %136, %137 : vector<4x12x128xf32>
    %c12_152 = arith.constant 12 : index
    %c0_153 = arith.constant 0 : index
    %c0_154 = arith.constant 0 : index
    %139 = vector.load %arg15[%c12_152, %c0_153, %c0_154] : memref<16x24x128xf32, #tpu.memory_space<vmem>>, vector<4x12x128xf32>
    tpu.vector_store %arg15[%c12_152, %c0_153, %c0_154], %138 {strides = array<i32>} : memref<16x24x128xf32, #tpu.memory_space<vmem>>, vector<4x12x128xf32>,
    %c3_155 = arith.constant 3 : index
    %c0_156 = arith.constant 0 : index
    %c0_157 = arith.constant 0 : index
    %140 = vector.load %arg6[%c3_155, %c0_156, %c0_157] : memref<9x64x128xf32, #tpu.memory_space<vmem>>, vector<1x64x128xf32>
    %141 = vector.shape_cast %140 : vector<1x64x128xf32> to vector<64x128xf32>
    %cst_158 = arith.constant dense<0.000000e+00> : vector<384x128xf32>
    %142 = tpu.matmul %2, %141, %cst_158 {dimension_numbers = #tpu.dot_dimension_numbers<[1], [0], [0], [1], [0, 0, 1, 1], [], []>} : vector<384x64xf32>, vector<64x128xf32>, vector<384x128xf32> -> vector<384x128xf32>
    %143 = vector.shape_cast %142 : vector<384x128xf32> to vector<16x24x128xf32>
    %c0_159 = arith.constant 0 : index
    %c12_160 = arith.constant 12 : index
    %c0_161 = arith.constant 0 : index
    %144 = vector.load %arg15[%c0_159, %c12_160, %c0_161] : memref<16x24x128xf32, #tpu.memory_space<vmem>>, vector<16x12x128xf32>
    %145 = vector.extract_strided_slice %143 {offsets = [0, 0, 0], sizes = [16, 12, 128], strides = [1, 1, 1]} : vector<16x24x128xf32> to vector<16x12x128xf32>
    %146 = arith.addf %144, %145 : vector<16x12x128xf32>
    %c0_162 = arith.constant 0 : index
    %c12_163 = arith.constant 12 : index
    %c0_164 = arith.constant 0 : index
    %147 = vector.load %arg15[%c0_162, %c12_163, %c0_164] : memref<16x24x128xf32, #tpu.memory_space<vmem>>, vector<16x12x128xf32>
    tpu.vector_store %arg15[%c0_162, %c12_163, %c0_164], %146 {strides = array<i32>} : memref<16x24x128xf32, #tpu.memory_space<vmem>>, vector<16x12x128xf32>,
    %c5_165 = arith.constant 5 : index
    %c0_166 = arith.constant 0 : index
    %c0_167 = arith.constant 0 : index
    %148 = vector.load %arg6[%c5_165, %c0_166, %c0_167] : memref<9x64x128xf32, #tpu.memory_space<vmem>>, vector<1x64x128xf32>
    %149 = vector.shape_cast %148 : vector<1x64x128xf32> to vector<64x128xf32>
    %cst_168 = arith.constant dense<0.000000e+00> : vector<384x128xf32>
    %150 = tpu.matmul %2, %149, %cst_168 {dimension_numbers = #tpu.dot_dimension_numbers<[1], [0], [0], [1], [0, 0, 1, 1], [], []>} : vector<384x64xf32>, vector<64x128xf32>, vector<384x128xf32> -> vector<384x128xf32>
    %151 = vector.shape_cast %150 : vector<384x128xf32> to vector<16x24x128xf32>
    %c0_169 = arith.constant 0 : index
    %c0_170 = arith.constant 0 : index
    %c0_171 = arith.constant 0 : index
    %152 = vector.load %arg15[%c0_169, %c0_170, %c0_171] : memref<16x24x128xf32, #tpu.memory_space<vmem>>, vector<16x12x128xf32>
    %153 = vector.extract_strided_slice %151 {offsets = [0, 12, 0], sizes = [16, 12, 128], strides = [1, 1, 1]} : vector<16x24x128xf32> to vector<16x12x128xf32>
    %154 = arith.addf %152, %153 : vector<16x12x128xf32>
    %c0_172 = arith.constant 0 : index
    %c0_173 = arith.constant 0 : index
    %c0_174 = arith.constant 0 : index
    %155 = vector.load %arg15[%c0_172, %c0_173, %c0_174] : memref<16x24x128xf32, #tpu.memory_space<vmem>>, vector<16x12x128xf32>
    tpu.vector_store %arg15[%c0_172, %c0_173, %c0_174], %154 {strides = array<i32>} : memref<16x24x128xf32, #tpu.memory_space<vmem>>, vector<16x12x128xf32>,
    %c6_175 = arith.constant 6 : index
    %c0_176 = arith.constant 0 : index
    %c0_177 = arith.constant 0 : index
    %156 = vector.load %arg6[%c6_175, %c0_176, %c0_177] : memref<9x64x128xf32, #tpu.memory_space<vmem>>, vector<1x64x128xf32>
    %157 = vector.shape_cast %156 : vector<1x64x128xf32> to vector<64x128xf32>
    %cst_178 = arith.constant dense<0.000000e+00> : vector<384x128xf32>
    %158 = tpu.matmul %2, %157, %cst_178 {dimension_numbers = #tpu.dot_dimension_numbers<[1], [0], [0], [1], [0, 0, 1, 1], [], []>} : vector<384x64xf32>, vector<64x128xf32>, vector<384x128xf32> -> vector<384x128xf32>
    %159 = vector.shape_cast %158 : vector<384x128xf32> to vector<16x24x128xf32>
    %c0_179 = arith.constant 0 : index
    %c12_180 = arith.constant 12 : index
    %c0_181 = arith.constant 0 : index
    %160 = vector.load %arg15[%c0_179, %c12_180, %c0_181] : memref<16x24x128xf32, #tpu.memory_space<vmem>>, vector<4x12x128xf32>
    %161 = vector.extract_strided_slice %159 {offsets = [12, 0, 0], sizes = [4, 12, 128], strides = [1, 1, 1]} : vector<16x24x128xf32> to vector<4x12x128xf32>
    %162 = arith.addf %160, %161 : vector<4x12x128xf32>
    %c0_182 = arith.constant 0 : index
    %c12_183 = arith.constant 12 : index
    %c0_184 = arith.constant 0 : index
    %163 = vector.load %arg15[%c0_182, %c12_183, %c0_184] : memref<16x24x128xf32, #tpu.memory_space<vmem>>, vector<4x12x128xf32>
    tpu.vector_store %arg15[%c0_182, %c12_183, %c0_184], %162 {strides = array<i32>} : memref<16x24x128xf32, #tpu.memory_space<vmem>>, vector<4x12x128xf32>,
    %c7_185 = arith.constant 7 : index
    %c0_186 = arith.constant 0 : index
    %c0_187 = arith.constant 0 : index
    %164 = vector.load %arg6[%c7_185, %c0_186, %c0_187] : memref<9x64x128xf32, #tpu.memory_space<vmem>>, vector<1x64x128xf32>
    %165 = vector.shape_cast %164 : vector<1x64x128xf32> to vector<64x128xf32>
    %cst_188 = arith.constant dense<0.000000e+00> : vector<384x128xf32>
    %166 = tpu.matmul %2, %165, %cst_188 {dimension_numbers = #tpu.dot_dimension_numbers<[1], [0], [0], [1], [0, 0, 1, 1], [], []>} : vector<384x64xf32>, vector<64x128xf32>, vector<384x128xf32> -> vector<384x128xf32>
    %167 = vector.shape_cast %166 : vector<384x128xf32> to vector<16x24x128xf32>
    %c0_189 = arith.constant 0 : index
    %c0_190 = arith.constant 0 : index
    %c0_191 = arith.constant 0 : index
    %168 = vector.load %arg15[%c0_189, %c0_190, %c0_191] : memref<16x24x128xf32, #tpu.memory_space<vmem>>, vector<4x24x128xf32>
    %169 = vector.extract_strided_slice %167 {offsets = [12, 0, 0], sizes = [4, 24, 128], strides = [1, 1, 1]} : vector<16x24x128xf32> to vector<4x24x128xf32>
    %170 = arith.addf %168, %169 : vector<4x24x128xf32>
    %c0_192 = arith.constant 0 : index
    %c0_193 = arith.constant 0 : index
    %c0_194 = arith.constant 0 : index
    %171 = vector.load %arg15[%c0_192, %c0_193, %c0_194] : memref<16x24x128xf32, #tpu.memory_space<vmem>>, vector<4x24x128xf32>
    tpu.vector_store %arg15[%c0_192, %c0_193, %c0_194], %170 {strides = array<i32>} : memref<16x24x128xf32, #tpu.memory_space<vmem>>, vector<4x24x128xf32>,
    %c8_195 = arith.constant 8 : index
    %c0_196 = arith.constant 0 : index
    %c0_197 = arith.constant 0 : index
    %172 = vector.load %arg6[%c8_195, %c0_196, %c0_197] : memref<9x64x128xf32, #tpu.memory_space<vmem>>, vector<1x64x128xf32>
    %173 = vector.shape_cast %172 : vector<1x64x128xf32> to vector<64x128xf32>
    %cst_198 = arith.constant dense<0.000000e+00> : vector<384x128xf32>
    %174 = tpu.matmul %2, %173, %cst_198 {dimension_numbers = #tpu.dot_dimension_numbers<[1], [0], [0], [1], [0, 0, 1, 1], [], []>} : vector<384x64xf32>, vector<64x128xf32>, vector<384x128xf32> -> vector<384x128xf32>
    %175 = vector.shape_cast %174 : vector<384x128xf32> to vector<16x24x128xf32>
    %c0_199 = arith.constant 0 : index
    %c0_200 = arith.constant 0 : index
    %c0_201 = arith.constant 0 : index
    %176 = vector.load %arg15[%c0_199, %c0_200, %c0_201] : memref<16x24x128xf32, #tpu.memory_space<vmem>>, vector<4x12x128xf32>
    %177 = vector.extract_strided_slice %175 {offsets = [12, 12, 0], sizes = [4, 12, 128], strides = [1, 1, 1]} : vector<16x24x128xf32> to vector<4x12x128xf32>
    %178 = arith.addf %176, %177 : vector<4x12x128xf32>
    %c0_202 = arith.constant 0 : index
    %c0_203 = arith.constant 0 : index
    %c0_204 = arith.constant 0 : index
    %179 = vector.load %arg15[%c0_202, %c0_203, %c0_204] : memref<16x24x128xf32, #tpu.memory_space<vmem>>, vector<4x12x128xf32>
    tpu.vector_store %arg15[%c0_202, %c0_203, %c0_204], %178 {strides = array<i32>} : memref<16x24x128xf32, #tpu.memory_space<vmem>>, vector<4x12x128xf32>,
    %c0_205 = arith.constant 0 : index
    %c0_206 = arith.constant 0 : index
    %c0_207 = arith.constant 0 : index
    %180 = vector.load %arg15[%c0_205, %c0_206, %c0_207] : memref<16x24x128xf32, #tpu.memory_space<vmem>>, vector<16x24x128xf32>
    %181 = vector.shape_cast %180 : vector<16x24x128xf32> to vector<384x128xf32>
    %c0_208 = arith.constant 0 : index
    %c0_209 = arith.constant 0 : index
    %182 = vector.load %arg7[%c0_208, %c0_209] : memref<1x128xf32, #tpu.memory_space<vmem>>, vector<1x128xf32>
    %183 = vector.broadcast %182 : vector<1x128xf32> to vector<384x128xf32>
    %184 = arith.addf %181, %183 : vector<384x128xf32>
    %cst_210 = arith.constant 0.000000e+00 : f32
    %185 = vector.broadcast %cst_210 : f32 to vector<384x128xf32>
    %186 = arith.maximumf %184, %185 : vector<384x128xf32>
    %c0_211 = arith.constant 0 : index
    %c0_212 = arith.constant 0 : index
    %187 = vector.load %arg16[%c0_211, %c0_212] : memref<384x128xf32, #tpu.memory_space<vmem>>, vector<384x128xf32>
    %c2_213 = arith.constant 2 : index
    %c0_214 = arith.constant 0 : index
    %c0_215 = arith.constant 0 : index
    %188 = vector.load %arg12[%c2_213, %c0_214, %c0_215] : memref<5x128x128xf32, #tpu.memory_space<vmem>>, vector<1x128x128xf32>
    %189 = vector.shape_cast %188 : vector<1x128x128xf32> to vector<128x128xf32>
    %cst_216 = arith.constant dense<0.000000e+00> : vector<384x128xf32>
    %190 = tpu.matmul %186, %189, %cst_216 {dimension_numbers = #tpu.dot_dimension_numbers<[1], [0], [0], [1], [0, 0, 1, 1], [], []>} : vector<384x128xf32>, vector<128x128xf32>, vector<384x128xf32> -> vector<384x128xf32>
    %191 = arith.addf %187, %190 : vector<384x128xf32>
    %c0_217 = arith.constant 0 : index
    %c0_218 = arith.constant 0 : index
    %192 = vector.load %arg16[%c0_217, %c0_218] : memref<384x128xf32, #tpu.memory_space<vmem>>, vector<384x128xf32>
    tpu.vector_store %arg16[%c0_217, %c0_218], %191 {strides = array<i32>} : memref<384x128xf32, #tpu.memory_space<vmem>>, vector<384x128xf32>,
    %c4_219 = arith.constant 4 : index
    %c0_220 = arith.constant 0 : index
    %c0_221 = arith.constant 0 : index
    %193 = vector.load %arg8[%c4_219, %c0_220, %c0_221] : memref<9x64x128xf32, #tpu.memory_space<vmem>>, vector<1x64x128xf32>
    %194 = vector.shape_cast %193 : vector<1x64x128xf32> to vector<64x128xf32>
    %cst_222 = arith.constant dense<0.000000e+00> : vector<384x128xf32>
    %195 = tpu.matmul %2, %194, %cst_222 {dimension_numbers = #tpu.dot_dimension_numbers<[1], [0], [0], [1], [0, 0, 1, 1], [], []>} : vector<384x64xf32>, vector<64x128xf32>, vector<384x128xf32> -> vector<384x128xf32>
    %196 = vector.shape_cast %195 : vector<384x128xf32> to vector<16x24x128xf32>
    %c0_223 = arith.constant 0 : index
    %c0_224 = arith.constant 0 : index
    %c0_225 = arith.constant 0 : index
    %197 = vector.load %arg15[%c0_223, %c0_224, %c0_225] : memref<16x24x128xf32, #tpu.memory_space<vmem>>, vector<16x24x128xf32>
    tpu.vector_store %arg15[%c0_223, %c0_224, %c0_225], %196 {strides = array<i32>} : memref<16x24x128xf32, #tpu.memory_space<vmem>>, vector<16x24x128xf32>,
    %c3_226 = arith.constant 3 : index
    %c0_227 = arith.constant 0 : index
    %c0_228 = arith.constant 0 : index
    %198 = vector.load %arg8[%c3_226, %c0_227, %c0_228] : memref<9x64x128xf32, #tpu.memory_space<vmem>>, vector<1x64x128xf32>
    %199 = vector.shape_cast %198 : vector<1x64x128xf32> to vector<64x128xf32>
    %cst_229 = arith.constant dense<0.000000e+00> : vector<384x128xf32>
    %200 = tpu.matmul %2, %199, %cst_229 {dimension_numbers = #tpu.dot_dimension_numbers<[1], [0], [0], [1], [0, 0, 1, 1], [], []>} : vector<384x64xf32>, vector<64x128xf32>, vector<384x128xf32> -> vector<384x128xf32>
    %201 = vector.shape_cast %200 : vector<384x128xf32> to vector<16x24x128xf32>
    %c0_230 = arith.constant 0 : index
    %c18 = arith.constant 18 : index
    %c0_231 = arith.constant 0 : index
    %202 = vector.load %arg15[%c0_230, %c18, %c0_231] : memref<16x24x128xf32, #tpu.memory_space<vmem>>, vector<16x6x128xf32>
    %203 = vector.extract_strided_slice %201 {offsets = [0, 0, 0], sizes = [16, 6, 128], strides = [1, 1, 1]} : vector<16x24x128xf32> to vector<16x6x128xf32>
    %204 = arith.addf %202, %203 : vector<16x6x128xf32>
    %c0_232 = arith.constant 0 : index
    %c18_233 = arith.constant 18 : index
    %c0_234 = arith.constant 0 : index
    %205 = vector.load %arg15[%c0_232, %c18_233, %c0_234] : memref<16x24x128xf32, #tpu.memory_space<vmem>>, vector<16x6x128xf32>
    tpu.vector_store %arg15[%c0_232, %c18_233, %c0_234], %204 {strides = array<i32>} : memref<16x24x128xf32, #tpu.memory_space<vmem>>, vector<16x6x128xf32>,
    %c5_235 = arith.constant 5 : index
    %c0_236 = arith.constant 0 : index
    %c0_237 = arith.constant 0 : index
    %206 = vector.load %arg8[%c5_235, %c0_236, %c0_237] : memref<9x64x128xf32, #tpu.memory_space<vmem>>, vector<1x64x128xf32>
    %207 = vector.shape_cast %206 : vector<1x64x128xf32> to vector<64x128xf32>
    %cst_238 = arith.constant dense<0.000000e+00> : vector<384x128xf32>
    %208 = tpu.matmul %2, %207, %cst_238 {dimension_numbers = #tpu.dot_dimension_numbers<[1], [0], [0], [1], [0, 0, 1, 1], [], []>} : vector<384x64xf32>, vector<64x128xf32>, vector<384x128xf32> -> vector<384x128xf32>
    %209 = vector.shape_cast %208 : vector<384x128xf32> to vector<16x24x128xf32>
    %c0_239 = arith.constant 0 : index
    %c0_240 = arith.constant 0 : index
    %c0_241 = arith.constant 0 : index
    %210 = vector.load %arg15[%c0_239, %c0_240, %c0_241] : memref<16x24x128xf32, #tpu.memory_space<vmem>>, vector<16x6x128xf32>
    %211 = vector.extract_strided_slice %209 {offsets = [0, 18, 0], sizes = [16, 6, 128], strides = [1, 1, 1]} : vector<16x24x128xf32> to vector<16x6x128xf32>
    %212 = arith.addf %210, %211 : vector<16x6x128xf32>
    %c0_242 = arith.constant 0 : index
    %c0_243 = arith.constant 0 : index
    %c0_244 = arith.constant 0 : index
    %213 = vector.load %arg15[%c0_242, %c0_243, %c0_244] : memref<16x24x128xf32, #tpu.memory_space<vmem>>, vector<16x6x128xf32>
    tpu.vector_store %arg15[%c0_242, %c0_243, %c0_244], %212 {strides = array<i32>} : memref<16x24x128xf32, #tpu.memory_space<vmem>>, vector<16x6x128xf32>,
    %c0_245 = arith.constant 0 : index
    %c0_246 = arith.constant 0 : index
    %c0_247 = arith.constant 0 : index
    %214 = vector.load %arg15[%c0_245, %c0_246, %c0_247] : memref<16x24x128xf32, #tpu.memory_space<vmem>>, vector<16x24x128xf32>
    %215 = vector.shape_cast %214 : vector<16x24x128xf32> to vector<384x128xf32>
    %c0_248 = arith.constant 0 : index
    %c0_249 = arith.constant 0 : index
    %216 = vector.load %arg9[%c0_248, %c0_249] : memref<1x128xf32, #tpu.memory_space<vmem>>, vector<1x128xf32>
    %217 = vector.broadcast %216 : vector<1x128xf32> to vector<384x128xf32>
    %218 = arith.addf %215, %217 : vector<384x128xf32>
    %cst_250 = arith.constant 0.000000e+00 : f32
    %219 = vector.broadcast %cst_250 : f32 to vector<384x128xf32>
    %220 = arith.maximumf %218, %219 : vector<384x128xf32>
    %c0_251 = arith.constant 0 : index
    %c0_252 = arith.constant 0 : index
    %221 = vector.load %arg16[%c0_251, %c0_252] : memref<384x128xf32, #tpu.memory_space<vmem>>, vector<384x128xf32>
    %c3_253 = arith.constant 3 : index
    %c0_254 = arith.constant 0 : index
    %c0_255 = arith.constant 0 : index
    %222 = vector.load %arg12[%c3_253, %c0_254, %c0_255] : memref<5x128x128xf32, #tpu.memory_space<vmem>>, vector<1x128x128xf32>
    %223 = vector.shape_cast %222 : vector<1x128x128xf32> to vector<128x128xf32>
    %cst_256 = arith.constant dense<0.000000e+00> : vector<384x128xf32>
    %224 = tpu.matmul %220, %223, %cst_256 {dimension_numbers = #tpu.dot_dimension_numbers<[1], [0], [0], [1], [0, 0, 1, 1], [], []>} : vector<384x128xf32>, vector<128x128xf32>, vector<384x128xf32> -> vector<384x128xf32>
    %225 = arith.addf %221, %224 : vector<384x128xf32>
    %c0_257 = arith.constant 0 : index
    %c0_258 = arith.constant 0 : index
    %226 = vector.load %arg16[%c0_257, %c0_258] : memref<384x128xf32, #tpu.memory_space<vmem>>, vector<384x128xf32>
    tpu.vector_store %arg16[%c0_257, %c0_258], %225 {strides = array<i32>} : memref<384x128xf32, #tpu.memory_space<vmem>>, vector<384x128xf32>,
    %c0_259 = arith.constant 0 : index
    %c0_260 = arith.constant 0 : index
    %227 = vector.load %arg16[%c0_259, %c0_260] : memref<384x128xf32, #tpu.memory_space<vmem>>, vector<384x128xf32>
    %c0_261 = arith.constant 0 : index
    %c0_262 = arith.constant 0 : index
    %228 = vector.load %arg13[%c0_261, %c0_262] : memref<1x128xf32, #tpu.memory_space<vmem>>, vector<1x128xf32>
    %229 = vector.broadcast %228 : vector<1x128xf32> to vector<384x128xf32>
    %230 = arith.addf %227, %229 : vector<384x128xf32>
    %cst_263 = arith.constant 0.000000e+00 : f32
    %231 = vector.broadcast %cst_263 : f32 to vector<384x128xf32>
    %232 = arith.maximumf %230, %231 : vector<384x128xf32>
    %233 = vector.shape_cast %232 : vector<384x128xf32> to vector<1x16x24x128xf32>
    %c0_264 = arith.constant 0 : index
    %c0_265 = arith.constant 0 : index
    %c0_266 = arith.constant 0 : index
    %c0_267 = arith.constant 0 : index
    %234 = vector.load %arg14[%c0_264, %c0_265, %c0_266, %c0_267] : memref<1x16x24x128xf32, #tpu.memory_space<vmem>>, vector<1x16x24x128xf32>
    tpu.vector_store %arg14[%c0_264, %c0_265, %c0_266, %c0_267], %233 {strides = array<i32>} : memref<1x16x24x128xf32, #tpu.memory_space<vmem>>, vector<1x16x24x128xf32>,
    return
  }
  func.func @transform_0(%arg0: i32) -> (i32, i32, i32, i32) {
    %c0_i32 = arith.constant 0 : i32
    %c0_i32_0 = arith.constant 0 : i32
    %c0_i32_1 = arith.constant 0 : i32
    %c0_i32_2 = arith.constant 0 : i32
    return %arg0, %c0_i32, %c0_i32_0, %c0_i32_1 : i32, i32, i32, i32
  }
  func.func @transform_1(%arg0: i32) -> (i32, i32) {
    %c0_i32 = arith.constant 0 : i32
    %c0_i32_0 = arith.constant 0 : i32
    %c0_i32_1 = arith.constant 0 : i32
    return %c0_i32, %c0_i32_0 : i32, i32
  }
  func.func @transform_2(%arg0: i32) -> (i32, i32) {
    %c0_i32 = arith.constant 0 : i32
    %c0_i32_0 = arith.constant 0 : i32
    %c0_i32_1 = arith.constant 0 : i32
    return %c0_i32, %c0_i32_0 : i32, i32
  }
  func.func @transform_3(%arg0: i32) -> (i32, i32, i32) {
    %c0_i32 = arith.constant 0 : i32
    %c0_i32_0 = arith.constant 0 : i32
    %c0_i32_1 = arith.constant 0 : i32
    %c0_i32_2 = arith.constant 0 : i32
    return %c0_i32, %c0_i32_0, %c0_i32_1 : i32, i32, i32
  }
  func.func @transform_4(%arg0: i32) -> (i32, i32) {
    %c0_i32 = arith.constant 0 : i32
    %c0_i32_0 = arith.constant 0 : i32
    %c0_i32_1 = arith.constant 0 : i32
    return %c0_i32, %c0_i32_0 : i32, i32
  }
  func.func @transform_5(%arg0: i32) -> (i32, i32, i32) {
    %c0_i32 = arith.constant 0 : i32
    %c0_i32_0 = arith.constant 0 : i32
    %c0_i32_1 = arith.constant 0 : i32
    %c0_i32_2 = arith.constant 0 : i32
    return %c0_i32, %c0_i32_0, %c0_i32_1 : i32, i32, i32
  }
  func.func @transform_6(%arg0: i32) -> (i32, i32) {
    %c0_i32 = arith.constant 0 : i32
    %c0_i32_0 = arith.constant 0 : i32
    %c0_i32_1 = arith.constant 0 : i32
    return %c0_i32, %c0_i32_0 : i32, i32
  }
  func.func @transform_7(%arg0: i32) -> (i32, i32, i32) {
    %c0_i32 = arith.constant 0 : i32
    %c0_i32_0 = arith.constant 0 : i32
    %c0_i32_1 = arith.constant 0 : i32
    %c0_i32_2 = arith.constant 0 : i32
    return %c0_i32, %c0_i32_0, %c0_i32_1 : i32, i32, i32
  }
  func.func @transform_8(%arg0: i32) -> (i32, i32) {
    %c0_i32 = arith.constant 0 : i32
    %c0_i32_0 = arith.constant 0 : i32
    %c0_i32_1 = arith.constant 0 : i32
    return %c0_i32, %c0_i32_0 : i32, i32
  }
  func.func @transform_9(%arg0: i32) -> (i32, i32) {
    %c0_i32 = arith.constant 0 : i32
    %c0_i32_0 = arith.constant 0 : i32
    %c0_i32_1 = arith.constant 0 : i32
    return %c0_i32, %c0_i32_0 : i32, i32
  }
  func.func @transform_10(%arg0: i32) -> (i32, i32) {
    %c0_i32 = arith.constant 0 : i32
    %c0_i32_0 = arith.constant 0 : i32
    %c0_i32_1 = arith.constant 0 : i32
    return %c0_i32, %c0_i32_0 : i32, i32
  }
  func.func @transform_11(%arg0: i32) -> (i32, i32, i32) {
    %c0_i32 = arith.constant 0 : i32
    %c0_i32_0 = arith.constant 0 : i32
    %c0_i32_1 = arith.constant 0 : i32
    %c0_i32_2 = arith.constant 0 : i32
    return %c0_i32, %c0_i32_0, %c0_i32_1 : i32, i32, i32
  }
  func.func @transform_12(%arg0: i32) -> (i32, i32) {
    %c0_i32 = arith.constant 0 : i32
    %c0_i32_0 = arith.constant 0 : i32
    %c0_i32_1 = arith.constant 0 : i32
    return %c0_i32, %c0_i32_0 : i32, i32
  }
  func.func @transform_13(%arg0: i32) -> (i32, i32, i32, i32) {
    %c0_i32 = arith.constant 0 : i32
    %c0_i32_0 = arith.constant 0 : i32
    %c0_i32_1 = arith.constant 0 : i32
    %c0_i32_2 = arith.constant 0 : i32
    return %arg0, %c0_i32, %c0_i32_0, %c0_i32_1 : i32, i32, i32, i32
  }
}

</mosaic_0001>

<bundles_post_ra>
// kernel: tpu_custom_call.1
= control target key start
LH: loop header
LB: loop body
LE: loop exit
PB: predicated region body
PF: predicated region fallthrough
CT: control target
= control target key end

     0   :  { %s23092_s0 = inlined_call_operand.hbm [shape: f32[2,16,24,64], index: 0, kind: input, shape index: {}]   ;;  %s23093_s1 = inlined_call_operand.hbm [shape: f32[64,128], index: 1, kind: input, shape index: {}]   ;;  %s23094_s2 = inlined_call_operand.vmem [shape: f32[1,128], index: 2, kind: input, shape index: {}]   ;;  %s23095_s3 = inlined_call_operand.hbm [shape: f32[9,64,128], index: 3, kind: input, shape index: {}]   ;;  %s23096_s4 = inlined_call_operand.vmem [shape: f32[1,128], index: 4, kind: input, shape index: {}]   ;;  %s23097_s5 = inlined_call_operand.hbm [shape: f32[9,64,128], index: 5, kind: input, shape index: {}]   ;;  %s23098_s6 = inlined_call_operand.vmem [shape: f32[1,128], index: 6, kind: input, shape index: {}]   ;;  %s23099_s7 = inlined_call_operand.hbm [shape: f32[9,64,128], index: 7, kind: input, shape index: {}]   ;;  %s23100_s8 = inlined_call_operand.vmem [shape: f32[1,128], index: 8, kind: input, shape index: {}]   ;;  %s23101_s9 = inlined_call_operand.hbm [shape: f32[64,128], index: 9, kind: input, shape index: {}]   ;;  %s23102_s10 = inlined_call_operand.vmem [shape: f32[1,128], index: 10, kind: input, shape index: {}]   ;;  %s23103_s11 = inlined_call_operand.hbm [shape: f32[5,128,128], index: 11, kind: input, shape index: {}]   ;;  %s23104_s12 = inlined_call_operand.vmem [shape: f32[1,128], index: 12, kind: input, shape index: {}]   ;;  %s23105_s13 = inlined_call_operand.hbm [shape: f32[2,16,24,128], index: 13, kind: output, shape index: {}]  }
   0x1   :  { %23175 = sst [smem:[#allocation95_spill]] %s23093_s1 }
   0x2   :  { %23176 = sst [smem:[#allocation96_spill]] %s23095_s3 }
   0x3   :  { %23177 = sst [smem:[#allocation97_spill]] %s23097_s5 }
   0x4   :  { %23178 = sst [smem:[#allocation98_spill]] %s23099_s7 }
   0x5   :  { %23179 = sst [smem:[#allocation99_spill]] %s23101_s9 }
   0x6   :  { %23180 = sst [smem:[#allocation100_spill]] %s23103_s11 }
   0x7   :  { %18 = vsyncpa [#allocation5], 0 }
   0x8   :  { %20 = vsyncpa [#allocation5 + $0x1], 0 }
   0x9   :  { %21 = vsyncpa [#allocation8], 0 }
   0xa   :  { %22 = vsyncpa [#allocation11], 0 }
   0xb   :  { %23 = vsyncpa [#allocation14], 0 }
   0xc   :  { %24 = vsyncpa [#allocation6], 0 }
   0xd   :  { %26 = vsyncpa [#allocation6 + $0x1], 0  ;;  %s17994_s25 = smov 0   ;;  %s17996_s26 = smov 0  }
   0xe   :  { %s17998_s27 = smov 0   ;;  %s18000_s28 = smov 0  }
   0xf LB: > { %s17910_s29 = smov [#allocation7]   ;;  %s18015_s14 = sadd.s32 4294967295, %s17908_s28   ;;  %s17908_s28 = sphi %s18000_s28, %s23519_s28   ;;  %s17904_s27 = sphi %s17998_s27, %s23518_s27   ;;  %s17900_s26 = sphi %s17996_s26, %s23517_s26   ;;  %s17896_s25 = sphi %s17994_s25, %s23516_s25  }
  0x10   : > { %s353_s30 = sshll.u32 %s17910_s29, 4  ;;  %p12148_p0 = scmp.ge.s32.totalorder %s17908_s28, 1  ;;  %s354_s30 = int_to_ptr.vmem [resolvable:$true] %s353_s30 }
  0x11   : > { %p23108_p1 = scmp.eq.s32.totalorder %s18015_s14, 0  ;;  %p341_p2 = scmp.lt.s32.totalorder %s17908_s28, 3 }
  0x12   : > { %s17911_s16 = smov [#allocation10]   ;;  %s17912_s19 = smov [#allocation13]  }
  0x13   : > { %p18020_p3 = pnand %p12148_p0, %p341_p2  ;;  %s385_s17 = sshll.u32 %s17911_s16, 4  ;;  %s18033_s17 = int_to_ptr.vmem [resolvable:$true] %s385_s17 }
  0x14   : > { %s417_s20 = sshll.u32 %s17912_s19, 4  ;;  %s17659_s22 = scalar_lea.vmem %s354_s30, 1024  ;;  %s18035_s20 = int_to_ptr.vmem [resolvable:$true] %s417_s20 }
  0x15   : > { %s23181_s15 = scalar_select %p18020_p3, 1, 0 }
  0x16   : > { %p17213_p5 = pneg %p18020_p3  ;;  %p17660_p8 = scmp.ne.s32.totalorder %s354_s30, %s17659_s22 }
  0x17   : > { %p17667_p11 = scmp.lt.s32.totalorder %s354_s30, %s354_s30  ;;  %p17668_p12 = scmp.lt.s32.totalorder %s17659_s22, %s17659_s22 }
  0x18   : > { %p18029_p6 = pnand %p17213_p5, %p23108_p1 }
  0x19   : > { %p17669_p13 = por %p17668_p12, %p17667_p11 }
  0x1a   : > { %p18039_p7 = pneg %p18029_p6 }
  0x1c   : > { %p17662_p9 = pnand %p17660_p8, %p18039_p7 }
  0x1e   : > { %p17663_p10 = pneg %p17662_p9 }
  0x20   : > { %p17670_p0 = pnand %p17669_p13, %p17663_p10 }
  0x22   : > { %17673 = shalt.err (!%p17670_p0)
}
  0x23   : > { %s23106_s23 = smov 128   ;;  %s23107_s24 = smov 8  }
  0x24   : > { %s23184_s1 = sld [smem:[#allocation95_spill]]  ;;  %s17685_s19 = scalar_lea.vmem %s18033_s17, 9216 }
  0x25   : > { %p17686_p2 = scmp.ne.s32.totalorder %s18033_s17, %s17685_s19  ;;  %p17693_p9 = scmp.lt.s32.totalorder %s18033_s17, %s18033_s17 }
  0x26   : > { %p17694_p10 = scmp.lt.s32.totalorder %s17685_s19, %s17685_s19 }
  0x27   : > { %p17688_p5 = pnand %p17686_p2, %p18039_p7 }
  0x28   : > { %p17695_p11 = por %p17694_p10, %p17693_p9 }
  0x29   : > { %p17689_p8 = pneg %p17688_p5 }
  0x2a   : > { %17216 = dma.hbm_to_vmem [thread:$0]  (!%p18029_p6), %s23184_s1, 1024, %s354_s30, [#allocation8], %s23106_s23, %s23106_s23, %s23107_s24  }
  0x2b   : > { %p17696_p12 = pnand %p17695_p11, %p17689_p8 }
  0x2d   : > { %17699 = shalt.err (!%p17696_p12)
}
  0x2e   : > { %s23185_s5 = sld [smem:[#allocation97_spill]]  ;;  %s17711_s30 = scalar_lea.vmem %s18035_s20, 1024 }
  0x2f   : > { %p17712_p13 = scmp.ne.s32.totalorder %s18035_s20, %s17711_s30  ;;  %p17719_p5 = scmp.lt.s32.totalorder %s18035_s20, %s18035_s20 }
  0x30   : > { %p17720_p8 = scmp.lt.s32.totalorder %s17711_s30, %s17711_s30 }
  0x31   : > { %p17714_p0 = pnand %p17712_p13, %p18039_p7 }
  0x32   : > { %p17721_p9 = por %p17720_p8, %p17719_p5 }
  0x33   : > { %p17715_p2 = pneg %p17714_p0 }
  0x34   : > { %17222 = dma.hbm_to_vmem [thread:$0]  (!%p18029_p6), %s23185_s5, 9216, %s18033_s17, [#allocation11], %s23106_s23, %s23106_s23, %s23107_s24  }
  0x35   : > { %p17722_p10 = pnand %p17721_p9, %p17715_p2 }
  0x37   : > { %17725 = shalt.err (!%p17722_p10)
}
  0x38   : > { %s23186_s9 = sld [smem:[#allocation99_spill]]  ;;  %s17915_s17 = smov [#allocation9]  }
  0x39   : > { %s369_s22 = sshll.u32 %s17915_s17, 4  ;;  %s17916_s29 = smov [#allocation12]   ;;  %s370_s22 = int_to_ptr.vmem [resolvable:$true] %s369_s22 }
  0x3a   : > { %s401_s1 = sshll.u32 %s17916_s29, 4  ;;  %s17737_s30 = scalar_lea.vmem %s370_s22, 9216  ;;  %s402_s1 = int_to_ptr.vmem [resolvable:$true] %s401_s1 }
  0x3b   : > { %p17738_p11 = scmp.ne.s32.totalorder %s370_s22, %s17737_s30  ;;  %p17745_p0 = scmp.lt.s32.totalorder %s370_s22, %s370_s22 }
  0x3c   : > { %p17746_p2 = scmp.lt.s32.totalorder %s17737_s30, %s17737_s30 }
  0x3d   : > { %p17740_p12 = pnand %p17738_p11, %p18039_p7 }
  0x3e   : > { %17228 = dma.hbm_to_vmem [thread:$0]  (!%p18029_p6), %s23186_s9, 1024, %s18035_s20, [#allocation14], %s23106_s23, %s23106_s23, %s23107_s24  }
  0x3f   : > { %p17741_p13 = pneg %p17740_p12  ;;  %p17747_p5 = por %p17746_p2, %p17745_p0 }
  0x41   : > { %p17748_p8 = pnand %p17747_p5, %p17741_p13 }
  0x43   : > { %17751 = shalt.err (!%p17748_p8)
}
  0x44   : > { %s23187_s3 = sld [smem:[#allocation96_spill]]  ;;  %s17763_s19 = scalar_lea.vmem %s402_s1, 9216 }
  0x45   : > { %p17764_p9 = scmp.ne.s32.totalorder %s402_s1, %s17763_s19  ;;  %p17771_p12 = scmp.lt.s32.totalorder %s402_s1, %s402_s1 }
  0x46   : > { %p17772_p0 = scmp.lt.s32.totalorder %s17763_s19, %s17763_s19 }
  0x47   : > { %p17766_p10 = pnand %p17764_p9, %p18039_p7 }
  0x48   : > { %p17773_p13 = por %p17772_p0, %p17771_p12 }
  0x49   : > { %p17767_p11 = pneg %p17766_p10 }
  0x4a   : > { %17219 = dma.hbm_to_vmem [thread:$0]  (!%p18029_p6), %s23187_s3, 9216, %s370_s22, [#allocation8], %s23106_s23, %s23106_s23, %s23107_s24  }
  0x4b   : > { %p17774_p2 = pnand %p17773_p13, %p17767_p11 }
  0x4d   : > { %17777 = shalt.err (!%p17774_p2)
}
  0x4e   : > { %s23188_s7 = sld [smem:[#allocation98_spill]]  ;;  %s17917_s22 = smov [#allocation15]  }
  0x4f   : > { %s433_s30 = sshll.u32 %s17917_s22, 4  ;;  %s434_s30 = int_to_ptr.vmem [resolvable:$true] %s433_s30 }
  0x50   : > { %s17789_s20 = scalar_lea.vmem %s434_s30, 10240  ;;  %p17797_p10 = scmp.lt.s32.totalorder %s434_s30, %s434_s30 }
  0x51   : > { %p17790_p5 = scmp.ne.s32.totalorder %s434_s30, %s17789_s20  ;;  %p17798_p11 = scmp.lt.s32.totalorder %s17789_s20, %s17789_s20 }
  0x53   : > { %p17792_p8 = pnand %p17790_p5, %p18039_p7  ;;  %p17799_p12 = por %p17798_p11, %p17797_p10 }
  0x54   : > { %17225 = dma.hbm_to_vmem [thread:$0]  (!%p18029_p6), %s23188_s7, 9216, %s402_s1, [#allocation11], %s23106_s23, %s23106_s23, %s23107_s24  }
  0x55   : > { %p17793_p9 = pneg %p17792_p8 }
  0x57   : > { %p17800_p0 = pnand %p17799_p12, %p17793_p9 }
  0x59   : > { %17803 = shalt.err (!%p17800_p0)
}
  0x5a   : > { %s23189_s11 = sld [smem:[#allocation100_spill]]  ;;  %s12147_s18 = sadd.s32 4294967294, %s17908_s28  }
  0x5b   : > { %s18115_s21 = sadd.s32 1, %s17908_s28   ;;  %s39_s17 = sadd.s32 1, %s17904_s27 }
  0x5c   : > { %s36_s19 = ssub.s32 %s17908_s28, %s18115_s21  ;;  %p46_p13 = scmp.ne.s32.totalorder %s17904_s27, %s17900_s26 }
  0x5d   : > { %p37_p7 = scmp.eq.s32.totalorder %s36_s19, 0  ;;  %p47_p2 = scmp.eq.s32.totalorder %s17908_s28, 0 }
  0x5e   : > { %p52_p5 = scmp.ne.s32.totalorder %s17900_s26, %s17896_s25  ;;  %p334_p10 = scmp.eq.s32.totalorder %s12147_s18, 1 }
  0x5f   : > { %s18126_s29 = scalar_select %p37_p7, %s17904_s27, %s39_s17  }
  0x60   : > { %17231 = dma.hbm_to_vmem [thread:$0]  (!%p18029_p6), %s23189_s11, 10240, %s434_s30, [#allocation14], %s23106_s23, %s23106_s23, %s23107_s24  }
  0x61   : > { %23190 = sst [smem:[#allocation22_spill]] %s18126_s29  ;;  %p48_p8 = por %p47_p2, %p46_p13 }
  0x62   : > { %p18130_p9 = por %p23108_p1, %p52_p5  ;;  %p328_p6 = scmp.eq.s32.totalorder %s18015_s14, 1 }
  0x63   : > { %p17246_p11 = scmp.lt.s32.totalorder %s17908_s28, 2  ;;  %s450_s30 = sand.u32 1, %s17904_s27  }
  0x64   : > { %s23191_s22 = scalar_select %p18130_p9, 1, 0 }
  0x65   : > { %p18137_p12 = por %p328_p6, %p46_p13  ;;  %p18141_p0 = por %p334_p10, %p52_p5 }
  0x66   : > { %s17181_s1 = smul.u32 384, %s450_s30  ;;  %p18146_p7 = pnand %p17246_p11, %p48_p8 }
  0x67   : > { %s23192_s20 = scalar_select %p18137_p12, 1, 0 }
  0x68   : > { %s23193_s16 = scalar_select %p18141_p0, 1, 0 }
  0x69   : > { %s17182_s19 = smul.u32 6144, %s17908_s28  ;;  %s454_s3 = scalar_lea.vmem [#allocation4], %s17181_s1 }
  0x6a   : > { %s461_s5 = sshll.u32 %s454_s3, 4  ;;  %s18157_s7 = scalar_lea.sflag [#allocation5], %s450_s30  ;;  %s18155_s5 = int_to_ptr.vmem [resolvable:$true] %s461_s5 }
  0x6b   : > { %s18153_s18 = scalar_lea.hbm %s23092_s0, %s17182_s19  ;;  %p17806_p2 = pneg %p18146_p7 }
  0x6c   : > { %s17804_s9 = scalar_lea.hbm %s18153_s18, 6144  ;;  %s17809_s24 = scalar_lea.hbm %s23092_s0, 12288 }
  0x6d   : > { %p17805_p13 = scmp.ne.s32.totalorder %s18153_s18, %s17804_s9  ;;  %p17810_p6 = scmp.lt.s32.totalorder %s18153_s18, %s23092_s0 }
  0x6e   : > { %p17811_p10 = scmp.lt.s32.totalorder %s17809_s24, %s17804_s9 }
  0x6f   : > { %p17807_p5 = pnand %p17806_p2, %p17805_p13 }
  0x70   : > { %p17812_p11 = por %p17811_p10, %p17810_p6 }
  0x71   : > { %p17808_p8 = pneg %p17807_p5 }
  0x73   : > { %p17813_p4 = pnand %p17812_p11, %p17808_p8 }
  0x75   : > { %17816 = shalt.err (!%p17813_p4)
}
  0x76   : > { %s17817_s3 = scalar_lea.vmem %s18155_s5, 6144  ;;  %s17918_s30 = smov [#allocation4]  }
  0x77   : > { %p17818_p1 = scmp.ne.s32.totalorder %s18155_s5, %s17817_s3  ;;  %s17822_s1 = sshll.u32 %s17918_s30, 4  ;;  %s17823_s1 = int_to_ptr.vmem [resolvable:$false] %s17822_s1 }
  0x78   : > { %s17824_s11 = scalar_lea.vmem %s17823_s1, 12288  ;;  %p17825_p5 = scmp.lt.s32.totalorder %s18155_s5, %s17823_s1 }
  0x79   : > { %p17820_p0 = pnand %p17818_p1, %p17806_p2  ;;  %p17826_p12 = scmp.lt.s32.totalorder %s17824_s11, %s17817_s3 }
  0x7b   : > { %p17821_p13 = pneg %p17820_p0  ;;  %p17827_p9 = por %p17826_p12, %p17825_p5 }
  0x7d   : > { %p17828_p3 = pnand %p17827_p9, %p17821_p13 }
  0x7f   : > { %17831 = shalt.err (!%p17828_p3)
}
  0x80   : > { %s23195_s9 = smov 8   ;;  %s23196_s29 = smov 128  }
  0x81   : > { %17235 = dma.hbm_to_vmem [thread:$0]  (!%p18146_p7), %s18153_s18, 6144, %s18155_s5, %s18157_s7, %s23196_s29, %s23196_s29, %s23195_s9  }
  0x82   : > { %p23197_p1 = scmp.ne.s32.totalorder %s23181_s15, 0 }
  0x84   : > { %473 = sbr.rel (%p23197_p1) target bundleno = 2398 (0x95e), region = 72 }
  0x89   : > { %s18184_s23 = sand.u32 1, %s17900_s26   ;;  %p23198_p3 = scmp.ne.s32.totalorder %s23191_s22, 0 }
  0x8a   : > { %s17183_s24 = smul.u32 384, %s18184_s23  ;;  %s476_s19 = scalar_lea.sflag [#allocation5], %s18184_s23 }
  0x8c   : > { %s18190_s17 = scalar_lea.vmem [#allocation4], %s17183_s24 }
  0x8d   : > { %17875 = dma.done.wait (%p23198_p3), %s476_s19, 6144  }
  0x8e   : > { %17877 = vsyncadd (%p23198_p3), %s476_s19, 4294961152  ;;  %p23199_p4 = scmp.eq.s32.totalorder %s18015_s14, 0 }
  0x90   : > { %17879 = dma.done.wait (%p23199_p4), [#allocation8], 10240   ;;  %p23200_p9 = pmov %p23199_p4 }
  0x91   : > { %p23201_p12 = pmov %p23199_p4 }
  0x92   : > { %17881 = vsyncadd (%p23200_p9), [#allocation8], 4294957056 }
  0x93   : > { %17883 = dma.done.wait (%p23201_p12), [#allocation11], 18432   ;;  %p23202_p0 = pmov %p23199_p4 }
  0x95   : > { %17885 = vsyncadd (%p23202_p0), [#allocation11], 4294948864  ;;  %p23203_p7 = pmov %p23202_p0 }
  0x96   : > { %p23204_p2 = pmov %p23202_p0 }
  0x97   : > { %17887 = dma.done.wait (%p23203_p7), [#allocation14], 11264  }
  0x98   : > { %17889 = vsyncadd (%p23204_p2), [#allocation14], 4294956032  ;;  %v17919_v0 = vmov 0.0   ;;  %vm17920_vm0 = vmmov 0   ;;  %v788_v1 = vld [vmem:[#allocation7 + $0x38] sm:$0xff]  ;;  %v787_v2 = vld [vmem:[#allocation7 + $0x30] sm:$0xff] }
  0x99   : > { %14743 = vmatprep.subr.mxu0 %v17919_v0  ;;  %14759 = vmatprep.mubr.msk.f32.mxu0 %vm17920_vm0, %v17919_v0  ;;  %vm594_vm1 = vcmask 523264   ;;  %v786_v3 = vld [vmem:[#allocation7 + $0x28] sm:$0xff]  ;;  %v546_v4 = vld [vmem:[%s18190_s17] sm:$0xff]  ;;  %v548_v6 = vld [vmem:[%s18190_s17 + $0x10] sm:$0xff]  ;;  %vm3243_vm2 = vcmask 1041408   ;;  %vm7625_vm3 = vcmask 1043456  }
  0x9a   : > { %14762 = vmatprep.subr.mxu1 %v788_v1  ;;  %14778 = vmatprep.mubr.msk.f32.mxu1 %vm594_vm1, %v546_v4  ;;  %v547_v5 = vld [vmem:[%s18190_s17 + $0x8] sm:$0xff]  ;;  %v549_v7 = vld [vmem:[%s18190_s17 + $0x18] sm:$0xff]  ;;  %v595_v8 = vsel %vm594_vm1, %v546_v4, 0.0  ;;  %v785_v9 = vld [vmem:[#allocation7 + $0x20] sm:$0xff]  ;;  %v598_v11 = vsel %vm594_vm1, %v548_v6, 0.0  ;;  %p23512_p6 = scmp.ne.s32.totalorder %s23192_s20, 0 }
  0x9b   : > { %14763 = vmatpush3.msra.mxu1 %v788_v1  ;;  %v596_v10 = vsel %vm594_vm1, %v547_v5, 0.0  ;;  %v550_v12 = vld [vmem:[%s18190_s17 + $0x20] sm:$0xff]  ;;  %v784_v14 = vld [vmem:[#allocation7 + $0x18] sm:$0xff]  ;;  %v600_v15 = vsel %vm594_vm1, %v549_v7, 0.0  ;;  %v551_v16 = vld [vmem:[%s18190_s17 + $0x28] sm:$0xff]  ;;  %s17921_s3 = smov [#allocation16]  }
  0x9c   : > { %14764 = vmatprep.subr.mxu1 %v787_v2  ;;  %v597_v13 = vadd.f32 %v596_v10, %v595_v8  ;;  %v783_v18 = vld [vmem:[#allocation7 + $0x10] sm:$0xff]  ;;  %v602_v19 = vsel %vm594_vm1, %v550_v12, 0.0  ;;  %v782_v22 = vld [vmem:[#allocation7 + $0x8] sm:$0xff]  ;;  %v604_v23 = vsel %vm594_vm1, %v551_v16, 0.0  ;;  %v553_v24 = vld [vmem:[%s18190_s17 + $0x38] sm:$0xff]  ;;  %s17836_s30 = sshll.u32 %s17921_s3, 4  ;;  %s17837_s30 = int_to_ptr.vmem [resolvable:$false] %s17836_s30 }
  0x9d   : > { %14765 = vmatpush3.msra.mxu1 %v787_v2  ;;  %v552_v20 = vld [vmem:[%s18190_s17 + $0x30] sm:$0xff]  ;;  %v781_v26 = vld [vmem:[#allocation7] sm:$0xff]  ;;  %v608_v30 = vsel %vm594_vm1, %v553_v24, 0.0  ;;  %v555_v31 = vld [vmem:[%s18190_s17 + $0x48] sm:$0xff]  ;;  %s17838_s1 = scalar_lea.vmem %s17837_s30, 12288 }
  0x9e   : > { %14766 = vmatprep.subr.mxu1 %v786_v3  ;;  %v599_v17 = vadd.f32 %v598_v11, %v597_v13  ;;  %v606_v27 = vsel %vm594_vm1, %v552_v20, 0.0  ;;  %v554_v28 = vld [vmem:[%s18190_s17 + $0x40] sm:$0xff]  ;;  %v705_v33 = vld [vmem:[#allocation13 + $0x38] sm:$0xff]  ;;  %v704_v34 = vld [vmem:[#allocation13 + $0x30] sm:$0xff]  ;;  %v612_v39 = vsel %vm594_vm1, %v555_v31, 0.0 }
  0x9f   : > { %14767 = vmatpush3.msra.mxu1 %v786_v3  ;;  %v610_v35 = vsel %vm594_vm1, %v554_v28, 0.0  ;;  %v556_v36 = vld [vmem:[%s18190_s17 + $0x50] sm:$0xff]  ;;  %14744 = vmatpush3.msra.mxu0 %v705_v33  ;;  %v703_v38 = vld [vmem:[#allocation13 + $0x28] sm:$0xff]  ;;  %v557_v40 = vld [vmem:[%s18190_s17 + $0x58] sm:$0xff] }
  0xa0   : > { %14768 = vmatprep.subr.mxu1 %v785_v9  ;;  %v601_v21 = vadd.f32 %v600_v15, %v599_v17  ;;  %14745 = vmatprep.subr.mxu0 %v17919_v0  ;;  %v702_v42 = vld [vmem:[#allocation13 + $0x20] sm:$0xff]  ;;  %v614_v43 = vsel %vm594_vm1, %v556_v36, 0.0  ;;  %v701_v46 = vld [vmem:[#allocation13 + $0x18] sm:$0xff]  ;;  %v616_v47 = vsel %vm594_vm1, %v557_v40, 0.0  ;;  %v559_v48 = vld [vmem:[%s18190_s17 + $0x68] sm:$0xff] }
  0xa1   : > { %14769 = vmatpush3.msra.mxu1 %v785_v9  ;;  %14746 = vmatpush3.msra.mxu0 %v704_v34  ;;  %v558_v44 = vld [vmem:[%s18190_s17 + $0x60] sm:$0xff]  ;;  %v700_v50 = vld [vmem:[#allocation13 + $0x10] sm:$0xff]  ;;  %v699_v54 = vld [vmem:[#allocation13 + $0x8] sm:$0xff]  ;;  %v620_v55 = vsel %vm594_vm1, %v559_v48, 0.0 }
  0xa2   : > { %14770 = vmatprep.subr.mxu1 %v784_v14  ;;  %v603_v25 = vadd.f32 %v602_v19, %v601_v21  ;;  %14747 = vmatprep.subr.mxu0 %v17919_v0  ;;  %v618_v51 = vsel %vm594_vm1, %v558_v44, 0.0  ;;  %v560_v52 = vld [vmem:[%s18190_s17 + $0x70] sm:$0xff]  ;;  %v561_v56 = vld [vmem:[%s18190_s17 + $0x78] sm:$0xff]  ;;  %v698_v58 = vld [vmem:[#allocation13] sm:$0xff] }
  0xa3   : > { %14771 = vmatpush3.msra.mxu1 %v784_v14  ;;  %14748 = vmatpush3.msra.mxu0 %v703_v38  ;;  %v622_v59 = vsel %vm594_vm1, %v560_v52, 0.0  ;;  %v562_v60 = vld [vmem:[%s18190_s17 + $0x80] sm:$0xff]  ;;  %v18258_v62 = vld [vmem:[#allocation15 + $0x78] sm:$0xff]  ;;  %v624_v63 = vsel %vm594_vm1, %v561_v56, 0.0  ;;  %v563_v1 = vld [vmem:[%s18190_s17 + $0x88] sm:$0xff] }
  0xa4   : > { %14772 = vmatprep.subr.mxu1 %v783_v18  ;;  %v605_v29 = vadd.f32 %v604_v23, %v603_v25  ;;  %14749 = vmatprep.subr.mxu0 %v17919_v0  ;;  %v626_v3 = vsel %vm594_vm1, %v562_v60, 0.0  ;;  %v564_v4 = vld [vmem:[%s18190_s17 + $0x90] sm:$0xff]  ;;  %v566_v10 = vld [vmem:[%s18190_s17 + $0xa0] sm:$0xff]  ;;  %v567_v13 = vld [vmem:[%s18190_s17 + $0xa8] sm:$0xff] }
  0xa5   : > { %14773 = vmatpush3.msra.mxu1 %v783_v18  ;;  %14750 = vmatpush3.msra.mxu0 %v702_v42  ;;  %v630_v9 = vsel %vm594_vm1, %v564_v4, 0.0  ;;  %v634_v15 = vsel %vm594_vm1, %v566_v10, 0.0  ;;  %v636_v18 = vsel %vm594_vm1, %v567_v13, 0.0  ;;  %v569_v19 = vld [vmem:[%s18190_s17 + $0xb8] sm:$0xff]  ;;  %v571_v25 = vld [vmem:[%s18190_s17 + $0xc8] sm:$0xff]  ;;  %v574_v34 = vld [vmem:[%s18190_s17 + $0xe0] sm:$0xff] }
  0xa6   : > { %14774 = vmatprep.subr.mxu1 %v782_v22  ;;  %v607_v32 = vadd.f32 %v606_v27, %v605_v29  ;;  %14751 = vmatprep.subr.mxu0 %v17919_v0 }
  0xa7   : > { %14775 = vmatpush3.msra.mxu1 %v782_v22  ;;  %14752 = vmatpush3.msra.mxu0 %v701_v46  ;;  %v570_v22 = vld [vmem:[%s18190_s17 + $0xc0] sm:$0xff] }
  0xa8   : > { %14776 = vmatprep.subr.mxu1 %v781_v26  ;;  %v609_v37 = vadd.f32 %v608_v30, %v607_v32  ;;  %14753 = vmatprep.subr.mxu0 %v17919_v0  ;;  %v642_v27 = vsel %vm594_vm1, %v570_v22, 0.0  ;;  %v644_v30 = vsel %vm594_vm1, %v571_v25, 0.0  ;;  %v578_v46 = vld [vmem:[%s18190_s17 + $0x100] sm:$0xff] }
  0xa9   : > { %14777 = vmatpush3.msra.mxu1 %v781_v26  ;;  %14754 = vmatpush3.msra.mxu0 %v700_v50 }
  0xaa   : > { %14779 = vmatmul.mubr.msk.f32.vlgmr.msra.gmra.mxu1 %vm594_vm1, %v547_v5  ;;  %v611_v41 = vadd.f32 %v610_v35, %v609_v37  ;;  %14850 = vmatprep.subr.mxu1 %v17919_v0  ;;  %v575_v37 = vld [vmem:[%s18190_s17 + $0xe8] sm:$0xff] }
  0xab   : > { %14781 = vmatprep.mubr.msk.f32.mxu1 %vm594_vm1, %v548_v6  ;;  %14755 = vmatprep.subr.mxu0 %v17919_v0  ;;  %v628_v6 = vsel %vm594_vm1, %v563_v1, 0.0  ;;  %v652_v42 = vsel %vm594_vm1, %v575_v37, 0.0 }
  0xac   : > { %v613_v45 = vadd.f32 %v612_v39, %v611_v41  ;;  %14756 = vmatpush3.msra.mxu0 %v699_v54  ;;  %v650_v39 = vsel %vm594_vm1, %v574_v34, 0.0 }
  0xad   : > { %14757 = vmatprep.subr.mxu0 %v17919_v0 }
  0xae   : > { %14782 = vmatmul.mubr.msk.f32.gmra.mxu1 %vm594_vm1, %v549_v7  ;;  %v615_v49 = vadd.f32 %v614_v43, %v613_v45  ;;  %14758 = vmatpush3.msra.mxu0 %v698_v58  ;;  %v565_v7 = vld [vmem:[%s18190_s17 + $0x98] sm:$0xff]  ;;  %v582_v58 = vld [vmem:[%s18190_s17 + $0x120] sm:$0xff] }
  0xaf   : > { %14784 = vmatprep.mubr.msk.f32.mxu1 %vm594_vm1, %v550_v12  ;;  %14885 = vmatprep.subr.mxu0 %v18258_v62  ;;  %v632_v12 = vsel %vm594_vm1, %v565_v7, 0.0  ;;  %v577_v43 = vld [vmem:[%s18190_s17 + $0xf8] sm:$0xff] }
  0xb0   : > { %v617_v53 = vadd.f32 %v616_v47, %v615_v49  ;;  %v579_v49 = vld [vmem:[%s18190_s17 + $0x108] sm:$0xff] }
  0xb1   : > { %v660_v54 = vsel %vm594_vm1, %v579_v49, 0.0 }
  0xb2   : > { %14785 = vmatmul.mubr.msk.f32.gmra.mxu1 %vm594_vm1, %v551_v16  ;;  %v619_v57 = vadd.f32 %v618_v51, %v617_v53  ;;  %v568_v16 = vld [vmem:[%s18190_s17 + $0xb0] sm:$0xff]  ;;  %v658_v51 = vsel %vm594_vm1, %v578_v46, 0.0 }
  0xb3   : > { %14787 = vmatprep.mubr.msk.f32.mxu1 %vm594_vm1, %v552_v20  ;;  %v638_v21 = vsel %vm594_vm1, %v568_v16, 0.0 }
  0xb4   : > { %v621_v61 = vadd.f32 %v620_v55, %v619_v57  ;;  %v581_v55 = vld [vmem:[%s18190_s17 + $0x118] sm:$0xff] }
  0xb6   : > { %14788 = vmatmul.mubr.msk.f32.gmra.mxu1 %vm594_vm1, %v553_v24  ;;  %v623_v2 = vadd.f32 %v622_v59, %v621_v61  ;;  %v640_v24 = vsel %vm594_vm1, %v569_v19, 0.0  ;;  %v583_v61 = vld [vmem:[%s18190_s17 + $0x128] sm:$0xff] }
  0xb7   : > { %14790 = vmatprep.mubr.msk.f32.mxu1 %vm594_vm1, %v554_v28  ;;  %v572_v28 = vld [vmem:[%s18190_s17 + $0xd0] sm:$0xff] }
  0xb8   : > { %v625_v5 = vadd.f32 %v624_v63, %v623_v2  ;;  %v646_v33 = vsel %vm594_vm1, %v572_v28, 0.0  ;;  %v584_v2 = vld [vmem:[%s18190_s17 + $0x130] sm:$0xff] }
  0xba   : > { %14791 = vmatmul.mubr.msk.f32.gmra.mxu1 %vm594_vm1, %v555_v31  ;;  %v627_v8 = vadd.f32 %v626_v3, %v625_v5  ;;  %v573_v31 = vld [vmem:[%s18190_s17 + $0xd8] sm:$0xff] }
  0xbb   : > { %14793 = vmatprep.mubr.msk.f32.mxu1 %vm594_vm1, %v556_v36  ;;  %v648_v36 = vsel %vm594_vm1, %v573_v31, 0.0  ;;  %v585_v5 = vld [vmem:[%s18190_s17 + $0x138] sm:$0xff] }
  0xbc   : > { %v629_v11 = vadd.f32 %v628_v6, %v627_v8  ;;  %v586_v8 = vld [vmem:[%s18190_s17 + $0x140] sm:$0xff] }
  0xbe   : > { %14794 = vmatmul.mubr.msk.f32.gmra.mxu1 %vm594_vm1, %v557_v40  ;;  %v631_v14 = vadd.f32 %v630_v9, %v629_v11  ;;  %v576_v40 = vld [vmem:[%s18190_s17 + $0xf0] sm:$0xff]  ;;  %v587_v11 = vld [vmem:[%s18190_s17 + $0x148] sm:$0xff] }
  0xbf   : > { %14796 = vmatprep.mubr.msk.f32.mxu1 %vm594_vm1, %v558_v44  ;;  %v654_v45 = vsel %vm594_vm1, %v576_v40, 0.0 }
  0xc0   : > { %v633_v17 = vadd.f32 %v632_v12, %v631_v14  ;;  %v588_v14 = vld [vmem:[%s18190_s17 + $0x150] sm:$0xff] }
  0xc2   : > { %14797 = vmatmul.mubr.msk.f32.gmra.mxu1 %vm594_vm1, %v559_v48  ;;  %v635_v20 = vadd.f32 %v634_v15, %v633_v17  ;;  %v656_v48 = vsel %vm594_vm1, %v577_v43, 0.0  ;;  %v589_v17 = vld [vmem:[%s18190_s17 + $0x158] sm:$0xff] }
  0xc3   : > { %14799 = vmatprep.mubr.msk.f32.mxu1 %vm594_vm1, %v560_v52  ;;  %v580_v52 = vld [vmem:[%s18190_s17 + $0x110] sm:$0xff] }
  0xc4   : > { %v637_v23 = vadd.f32 %v636_v18, %v635_v20  ;;  %v662_v57 = vsel %vm594_vm1, %v580_v52, 0.0  ;;  %v18346_v20 = vld [vmem:[%s18190_s17 + $0x160] sm:$0xff] }
  0xc6   : > { %14800 = vmatmul.mubr.msk.f32.gmra.mxu1 %vm594_vm1, %v561_v56  ;;  %v639_v26 = vadd.f32 %v638_v21, %v637_v23  ;;  %v1325_v23 = vld [vmem:[#allocation15 + $0x278] sm:$0xff] }
  0xc7   : > { %14802 = vmatprep.mubr.msk.f32.mxu1 %vm594_vm1, %v562_v60  ;;  %v664_v60 = vsel %vm594_vm1, %v581_v55, 0.0  ;;  %14851 = vmatpush3.msra.mxu1 %v1325_v23 }
  0xc8   : > { %v641_v29 = vadd.f32 %v640_v24, %v639_v26  ;;  %v18351_v24 = vld [vmem:[%s18190_s17 + $0x168] sm:$0xff]  ;;  %v682_v26 = vsel %vm594_vm1, %v18346_v20, 0.0  ;;  %14852 = vmatprep.subr.mxu1 %v17919_v0 }
  0xca   : > { %14803 = vmatmul.mubr.msk.f32.gmra.mxu1 %vm594_vm1, %v563_v1  ;;  %v643_v32 = vadd.f32 %v642_v27, %v641_v29  ;;  %v666_v1 = vsel %vm594_vm1, %v582_v58, 0.0  ;;  %v18358_v27 = vld [vmem:[%s18190_s17 + $0x170] sm:$0xff]  ;;  %v684_v29 = vsel %vm594_vm1, %v18351_v24, 0.0 }
  0xcb   : > { %14805 = vmatprep.mubr.msk.f32.mxu1 %vm594_vm1, %v564_v4  ;;  %v668_v4 = vsel %vm594_vm1, %v583_v61, 0.0 }
  0xcc   : > { %v645_v35 = vadd.f32 %v644_v30, %v643_v32  ;;  %v18364_v30 = vld [vmem:[%s18190_s17 + $0x178] sm:$0xff]  ;;  %v686_v32 = vsel %vm594_vm1, %v18358_v27, 0.0 }
  0xce   : > { %14806 = vmatmul.mubr.msk.f32.gmra.mxu1 %vm594_vm1, %v565_v7  ;;  %v647_v38 = vadd.f32 %v646_v33, %v645_v35  ;;  %v670_v7 = vsel %vm594_vm1, %v584_v2, 0.0  ;;  %v1324_v33 = vld [vmem:[#allocation15 + $0x270] sm:$0xff]  ;;  %v688_v35 = vsel %vm594_vm1, %v18364_v30, 0.0 }
  0xcf   : > { %14808 = vmatprep.mubr.msk.f32.mxu1 %vm594_vm1, %v566_v10  ;;  %v672_v10 = vsel %vm594_vm1, %v585_v5, 0.0  ;;  %14853 = vmatpush3.msra.mxu1 %v1324_v33 }
  0xd0   : > { %v649_v41 = vadd.f32 %v648_v36, %v647_v38  ;;  %14854 = vmatprep.subr.mxu1 %v17919_v0  ;;  %v1323_v38 = vld [vmem:[#allocation15 + $0x268] sm:$0xff] }
  0xd1   : > { %14855 = vmatpush3.msra.mxu1 %v1323_v38 }
  0xd2   : > { %14809 = vmatmul.mubr.msk.f32.gmra.mxu1 %vm594_vm1, %v567_v13  ;;  %v651_v44 = vadd.f32 %v650_v39, %v649_v41  ;;  %v674_v13 = vsel %vm594_vm1, %v586_v8, 0.0  ;;  %14856 = vmatprep.subr.mxu1 %v17919_v0 }
  0xd3   : > { %14811 = vmatprep.mubr.msk.f32.mxu1 %vm594_vm1, %v568_v16  ;;  %v676_v16 = vsel %vm594_vm1, %v587_v11, 0.0 }
  0xd4   : > { %v653_v47 = vadd.f32 %v652_v42, %v651_v44  ;;  %v1322_v42 = vld [vmem:[#allocation15 + $0x260] sm:$0xff] }
  0xd5   : > { %14857 = vmatpush3.msra.mxu1 %v1322_v42 }
  0xd6   : > { %14812 = vmatmul.mubr.msk.f32.gmra.mxu1 %vm594_vm1, %v569_v19  ;;  %v655_v50 = vadd.f32 %v654_v45, %v653_v47  ;;  %v678_v19 = vsel %vm594_vm1, %v588_v14, 0.0  ;;  %14858 = vmatprep.subr.mxu1 %v17919_v0 }
  0xd7   : > { %14814 = vmatprep.mubr.msk.f32.mxu1 %vm594_vm1, %v570_v22  ;;  %v680_v22 = vsel %vm594_vm1, %v589_v17, 0.0 }
  0xd8   : > { %v657_v53 = vadd.f32 %v656_v48, %v655_v50  ;;  %v1307_v48 = vld [vmem:[#allocation15 + $0x70] sm:$0xff]  ;;  %v1305_v50 = vld [vmem:[#allocation15 + $0x60] sm:$0xff] }
  0xda   : > { %14815 = vmatmul.mubr.msk.f32.gmra.mxu1 %vm594_vm1, %v571_v25  ;;  %v659_v56 = vadd.f32 %v658_v51, %v657_v53  ;;  %v1320_v51 = vld [vmem:[#allocation15 + $0x250] sm:$0xff] }
  0xdb   : > { %14817 = vmatprep.mubr.msk.f32.mxu1 %vm594_vm1, %v572_v28  ;;  %v1303_v53 = vld [vmem:[#allocation15 + $0x50] sm:$0xff] }
  0xdc   : > { %v661_v59 = vadd.f32 %v660_v54, %v659_v56  ;;  %v1302_v54 = vld [vmem:[#allocation15 + $0x48] sm:$0xff]  ;;  %v1300_v56 = vld [vmem:[#allocation15 + $0x38] sm:$0xff] }
  0xde   : > { %14818 = vmatmul.mubr.msk.f32.gmra.mxu1 %vm594_vm1, %v573_v31  ;;  %v663_v63 = vadd.f32 %v662_v57, %v661_v59  ;;  %v1299_v57 = vld [vmem:[#allocation15 + $0x30] sm:$0xff]  ;;  %v1298_v59 = vld [vmem:[#allocation15 + $0x28] sm:$0xff] }
  0xdf   : > { %14820 = vmatprep.mubr.msk.f32.mxu1 %vm594_vm1, %v574_v34 }
  0xe0   : > { %v665_v3 = vadd.f32 %v664_v60, %v663_v63  ;;  %v1297_v60 = vld [vmem:[#allocation15 + $0x20] sm:$0xff]  ;;  %v1317_v63 = vld [vmem:[#allocation15 + $0x238] sm:$0xff] }
  0xe2   : > { %14821 = vmatmul.mubr.msk.f32.gmra.mxu1 %vm594_vm1, %v575_v37  ;;  %v667_v6 = vadd.f32 %v666_v1, %v665_v3  ;;  %v1295_v1 = vld [vmem:[#allocation15 + $0x10] sm:$0xff]  ;;  %v1293_v3 = vld [vmem:[#allocation15] sm:$0xff] }
  0xe3   : > { %14823 = vmatprep.mubr.msk.f32.mxu1 %vm594_vm1, %v576_v40 }
  0xe4   : > { %v669_v9 = vadd.f32 %v668_v4, %v667_v6  ;;  %v1316_v4 = vld [vmem:[#allocation15 + $0x230] sm:$0xff]  ;;  %v1314_v6 = vld [vmem:[#allocation15 + $0x220] sm:$0xff] }
  0xe6   : > { %14824 = vmatmul.mubr.msk.f32.gmra.mxu1 %vm594_vm1, %v577_v43  ;;  %v671_v12 = vadd.f32 %v670_v7, %v669_v9  ;;  %v1313_v7 = vld [vmem:[#allocation15 + $0x218] sm:$0xff]  ;;  %v1311_v9 = vld [vmem:[#allocation15 + $0x208] sm:$0xff] }
  0xe7   : > { %14826 = vmatprep.mubr.msk.f32.mxu1 %vm594_vm1, %v578_v46  ;;  %v1321_v46 = vld [vmem:[#allocation15 + $0x258] sm:$0xff] }
  0xe8   : > { %v673_v15 = vadd.f32 %v672_v10, %v671_v12  ;;  %14859 = vmatpush3.msra.mxu1 %v1321_v46  ;;  %v2122_v10 = vld [vmem:[#allocation9 + $0x38] sm:$0xff] }
  0xe9   : > { %14860 = vmatprep.subr.mxu1 %v17919_v0  ;;  %v18401_v12 = vld [vmem:[#allocation9 + $0x138] sm:$0xff] }
  0xea   : > { %14827 = vmatmul.mubr.msk.f32.gmra.mxu1 %vm594_vm1, %v579_v49  ;;  %v675_v18 = vadd.f32 %v674_v13, %v673_v15  ;;  %v1306_v49 = vld [vmem:[#allocation15 + $0x68] sm:$0xff]  ;;  %v18407_v13 = vld [vmem:[%s23094_s2] ss:$0 sm:$0xff] }
  0xeb   : > { %14829 = vmatprep.mubr.msk.f32.mxu1 %vm594_vm1, %v580_v52  ;;  %14861 = vmatpush3.msra.mxu1 %v1320_v51  ;;  %v1304_v52 = vld [vmem:[#allocation15 + $0x58] sm:$0xff]  ;;  %v2115_v51 = vld [vmem:[#allocation9] sm:$0xff] }
  0xec   : > { %v677_v21 = vadd.f32 %v676_v16, %v675_v18  ;;  %14862 = vmatprep.subr.mxu1 %v17919_v0 }
  0xee   : > { %14830 = vmatmul.mubr.msk.f32.gmra.mxu1 %vm594_vm1, %v581_v55  ;;  %v679_v25 = vadd.f32 %v678_v19, %v677_v21  ;;  %v1319_v55 = vld [vmem:[#allocation15 + $0x248] sm:$0xff] }
  0xef   : > { %14832 = vmatprep.mubr.msk.f32.mxu1 %vm594_vm1, %v582_v58  ;;  %14863 = vmatpush3.msra.mxu1 %v1319_v55  ;;  %v1318_v58 = vld [vmem:[#allocation15 + $0x240] sm:$0xff] }
  0xf0   : > { %v681_v28 = vadd.f32 %v680_v22, %v679_v25  ;;  %14864 = vmatprep.subr.mxu1 %v17919_v0  ;;  %v2121_v25 = vld [vmem:[#allocation9 + $0x30] sm:$0xff] }
  0xf1   : > { %14865 = vmatpush3.msra.mxu1 %v1318_v58 }
  0xf2   : > { %14833 = vmatmul.mubr.msk.f32.gmra.mxu1 %vm594_vm1, %v583_v61  ;;  %v683_v31 = vadd.f32 %v682_v26, %v681_v28  ;;  %14866 = vmatprep.subr.mxu1 %v17919_v0  ;;  %v1296_v61 = vld [vmem:[#allocation15 + $0x18] sm:$0xff] }
  0xf3   : > { %14835 = vmatprep.mubr.msk.f32.mxu1 %vm594_vm1, %v584_v2  ;;  %14867 = vmatpush3.msra.mxu1 %v1317_v63  ;;  %v1294_v2 = vld [vmem:[#allocation15 + $0x8] sm:$0xff] }
  0xf4   : > { %v685_v34 = vadd.f32 %v684_v29, %v683_v31  ;;  %14868 = vmatprep.subr.mxu1 %v17919_v0 }
  0xf5   : > { %14869 = vmatpush3.msra.mxu1 %v1316_v4 }
  0xf6   : > { %14836 = vmatmul.mubr.msk.f32.gmra.mxu1 %vm594_vm1, %v585_v5  ;;  %v687_v36 = vadd.f32 %v686_v32, %v685_v34  ;;  %14870 = vmatprep.subr.mxu1 %v17919_v0  ;;  %v1315_v5 = vld [vmem:[#allocation15 + $0x228] sm:$0xff] }
  0xf7   : > { %14838 = vmatprep.mubr.msk.f32.mxu1 %vm594_vm1, %v586_v8  ;;  %14871 = vmatpush3.msra.mxu1 %v1315_v5  ;;  %v1312_v8 = vld [vmem:[#allocation15 + $0x210] sm:$0xff]  ;;  %v2120_v32 = vld [vmem:[#allocation9 + $0x28] sm:$0xff] }
  0xf8   : > { %v689_v37 = vadd.f32 %v688_v35, %v687_v36  ;;  %14872 = vmatprep.subr.mxu1 %v17919_v0  ;;  %v2119_v35 = vld [vmem:[#allocation9 + $0x20] sm:$0xff] }
  0xf9   : > { %14873 = vmatpush3.msra.mxu1 %v1314_v6 }
  0xfa   : > { %14839 = vmatmul.mubr.msk.f32.gmra.mxu1 %vm594_vm1, %v587_v11  ;;  %v690_v39 = vrot.slane %v689_v37, 4  ;;  %14874 = vmatprep.subr.mxu1 %v17919_v0  ;;  %v1310_v11 = vld [vmem:[#allocation15 + $0x200] sm:$0xff] }
  0xfb   : > { %14841 = vmatprep.mubr.msk.f32.mxu1 %vm594_vm1, %v588_v14  ;;  %14875 = vmatpush3.msra.mxu1 %v1313_v7 }
  0xfc   : > { %v691_v40 = vadd.f32 %v690_v39, %v689_v37  ;;  %14876 = vmatprep.subr.mxu1 %v17919_v0 }
  0xfd   : > { %14877 = vmatpush3.msra.mxu1 %v1312_v8 }
  0xfe   : > { %14842 = vmatmul.mubr.msk.f32.gmra.mxu1 %vm594_vm1, %v589_v17  ;;  %v692_v41 = vrot.slane %v691_v40, 2  ;;  %14878 = vmatprep.subr.mxu1 %v17919_v0 }
  0xff   : > { %14844 = vmatprep.mubr.msk.f32.mxu1 %vm594_vm1, %v18346_v20  ;;  %14879 = vmatpush3.msra.mxu1 %v1311_v9 }
 0x100   : > { %v693_v43 = vadd.f32 %v692_v41, %v691_v40  ;;  %14880 = vmatprep.subr.mxu1 %v17919_v0  ;;  %v2118_v40 = vld [vmem:[#allocation9 + $0x18] sm:$0xff] }
 0x101   : > { %14881 = vmatpush3.msra.mxu1 %v1310_v11 }
 0x102   : > { %14845 = vmatmul.mubr.msk.f32.gmra.mxu1 %vm594_vm1, %v18351_v24  ;;  %v694_v44 = vrot.slane %v693_v43, 1  ;;  %14989 = vmatprep.subr.mxu1 %v18401_v12 }
 0x103   : > { %14847 = vmatprep.mubr.msk.f32.mxu1 %vm594_vm1, %v18358_v27 }
 0x104   : > { %v695_v45 = vadd.f32 %v694_v44, %v693_v43  ;;  %v2117_v43 = vld [vmem:[#allocation9 + $0x10] sm:$0xff] }
 0x106   : > { %14848 = vmatmul.mubr.msk.f32.gmra.mxu1 %vm594_vm1, %v18364_v30  ;;  %v697_v47 = vmul.f32 0.0026041667, %v695_v45 }
 0x107   : > { %14882 = vmatprep.mubr.msk.f32.mxu1 %vm17920_vm0, %v17919_v0 }
 0x108   : > { %14760 = vmatmul.mubr.msk.f32.vlgmr.msra.gmra.mxu0 %vm594_vm1, %v697_v47 }
 0x109   : > { %14886 = vmatpush3.msra.mxu0 %v18258_v62  ;;  %v1301_v62 = vld [vmem:[#allocation15 + $0x40] sm:$0xff] }
 0x10a   : > { %14887 = vmatprep.subr.mxu0 %v1307_v48 }
 0x10b   : > { %14888 = vmatpush3.msra.mxu0 %v1307_v48  ;;  %v2116_v48 = vld [vmem:[#allocation9 + $0x8] sm:$0xff] }
 0x10c   : > { %14889 = vmatprep.subr.mxu0 %v1306_v49 }
 0x10d   : > { %14890 = vmatpush3.msra.mxu0 %v1306_v49 }
 0x10e   : > { %14891 = vmatprep.subr.mxu0 %v1305_v50 }
 0x10f   : > { %14892 = vmatpush3.msra.mxu0 %v1305_v50 }
 0x110   : > { %14893 = vmatprep.subr.mxu0 %v1304_v52 }
 0x111   : > { %14894 = vmatpush3.msra.mxu0 %v1304_v52 }
 0x112   : > { %14895 = vmatprep.subr.mxu0 %v1303_v53 }
 0x113   : > { %14896 = vmatpush3.msra.mxu0 %v1303_v53 }
 0x114   : > { %14897 = vmatprep.subr.mxu0 %v1302_v54 }
 0x115   : > { %14898 = vmatpush3.msra.mxu0 %v1302_v54 }
 0x116   : > { %14899 = vmatprep.subr.mxu0 %v1301_v62 }
 0x117   : > { %14900 = vmatpush3.msra.mxu0 %v1301_v62 }
 0x118   : > { %14901 = vmatprep.subr.mxu0 %v1300_v56 }
 0x119   : > { %14902 = vmatpush3.msra.mxu0 %v1300_v56 }
 0x11a   : > { %14903 = vmatprep.subr.mxu0 %v1299_v57 }
 0x11b   : > { %14904 = vmatpush3.msra.mxu0 %v1299_v57 }
 0x11c   : > { %14905 = vmatprep.subr.mxu0 %v1298_v59 }
 0x11d   : > { %14906 = vmatpush3.msra.mxu0 %v1298_v59 }
 0x11e   : > { %14907 = vmatprep.subr.mxu0 %v1297_v60 }
 0x11f   : > { %14908 = vmatpush3.msra.mxu0 %v1297_v60 }
 0x120   : > { %14909 = vmatprep.subr.mxu0 %v1296_v61 }
 0x121   : > { %14910 = vmatpush3.msra.mxu0 %v1296_v61 }
 0x122   : > { %14911 = vmatprep.subr.mxu0 %v1295_v1 }
 0x123   : > { %14912 = vmatpush3.msra.mxu0 %v1295_v1 }
 0x124   : > { %14913 = vmatprep.subr.mxu0 %v1294_v2 }
 0x125   : > { %14914 = vmatpush3.msra.mxu0 %v1294_v2 }
 0x126   : > { %14915 = vmatprep.subr.mxu0 %v1293_v3 }
 0x127   : > { %14916 = vmatpush3.msra.mxu0 %v1293_v3 }
 0x128   : > { %15077 = vmatprep.subr.mxu0 %v2122_v10 }
 0x16a   : > { %v14780_v14 = vpop.f32.mrf.mxu1 }
 0x16b   : > { %v1012_v15 = vadd.f32 %v14780_v14, %v18407_v13 }
 0x16c   : > { %v1006_v16 = vpop.f32.mrf.mxu1 }
 0x16d   : > { %v1007_v17 = vadd.f32 %v18407_v13, %v1006_v16  ;;  %v1246_v0 = vmax.f32 %v1012_v15, 0.0 }
 0x16e   : > { %v14783_v18 = vpop.f32.mrf.mxu1 }
 0x16f   : > { %v1245_v19 = vmax.f32 %v1007_v17, 0.0  ;;  %v1022_v21 = vadd.f32 %v14783_v18, %v18407_v13 }
 0x170   : > { %v1016_v22 = vpop.f32.mrf.mxu1 }
 0x171   : > { %v1017_v23 = vadd.f32 %v18407_v13, %v1016_v22  ;;  %14917 = vmatprep.mubr.f32.mxu0 %v1245_v19  ;;  %v1248_v26 = vmax.f32 %v1022_v21, 0.0 }
 0x172   : > { %v14786_v28 = vpop.f32.mrf.mxu1  ;;  %14918 = vmatmul.mubr.f32.vlgmr.msra.gmra.mxu0 %v1246_v0 }
 0x173   : > { %v1247_v29 = vmax.f32 %v1017_v23, 0.0  ;;  %v1032_v31 = vadd.f32 %v14786_v28, %v18407_v13  ;;  %15078 = vmatpush3.msra.mxu0 %v2122_v10 }
 0x174   : > { %v1026_v33 = vpop.f32.mrf.mxu1  ;;  %15079 = vmatprep.subr.mxu0 %v2121_v25 }
 0x175   : > { %v1027_v34 = vadd.f32 %v18407_v13, %v1026_v33  ;;  %14920 = vmatprep.mubr.f32.mxu0 %v1247_v29  ;;  %15080 = vmatpush3.msra.mxu0 %v2121_v25  ;;  %v1250_v36 = vmax.f32 %v1032_v31, 0.0 }
 0x176   : > { %v14789_v37 = vpop.f32.mrf.mxu1  ;;  %14921 = vmatmul.mubr.f32.gmra.mxu0 %v1248_v26  ;;  %15081 = vmatprep.subr.mxu0 %v2120_v32 }
 0x177   : > { %v1249_v38 = vmax.f32 %v1027_v34, 0.0  ;;  %v1042_v39 = vadd.f32 %v14789_v37, %v18407_v13  ;;  %15082 = vmatpush3.msra.mxu0 %v2120_v32 }
 0x178   : > { %v1036_v41 = vpop.f32.mrf.mxu1  ;;  %15083 = vmatprep.subr.mxu0 %v2119_v35 }
 0x179   : > { %v1037_v42 = vadd.f32 %v18407_v13, %v1036_v41  ;;  %14923 = vmatprep.mubr.f32.mxu0 %v1249_v38  ;;  %15084 = vmatpush3.msra.mxu0 %v2119_v35  ;;  %v1252_v44 = vmax.f32 %v1042_v39, 0.0 }
 0x17a   : > { %v14792_v45 = vpop.f32.mrf.mxu1  ;;  %14924 = vmatmul.mubr.f32.gmra.mxu0 %v1250_v36  ;;  %15085 = vmatprep.subr.mxu0 %v2118_v40 }
 0x17b   : > { %v1251_v46 = vmax.f32 %v1037_v42, 0.0  ;;  %v1052_v47 = vadd.f32 %v14792_v45, %v18407_v13  ;;  %15086 = vmatpush3.msra.mxu0 %v2118_v40 }
 0x17c   : > { %v1046_v49 = vpop.f32.mrf.mxu1  ;;  %15087 = vmatprep.subr.mxu0 %v2117_v43 }
 0x17d   : > { %v1047_v50 = vadd.f32 %v18407_v13, %v1046_v49  ;;  %14926 = vmatprep.mubr.f32.mxu0 %v1251_v46  ;;  %15088 = vmatpush3.msra.mxu0 %v2117_v43  ;;  %v1254_v52 = vmax.f32 %v1052_v47, 0.0 }
 0x17e   : > { %v14795_v53 = vpop.f32.mrf.mxu1  ;;  %14927 = vmatmul.mubr.f32.gmra.mxu0 %v1252_v44  ;;  %15089 = vmatprep.subr.mxu0 %v2116_v48 }
 0x17f   : > { %v1253_v54 = vmax.f32 %v1047_v50, 0.0  ;;  %v1062_v55 = vadd.f32 %v14795_v53, %v18407_v13  ;;  %15090 = vmatpush3.msra.mxu0 %v2116_v48 }
 0x180   : > { %v1056_v62 = vpop.f32.mrf.mxu1  ;;  %15091 = vmatprep.subr.mxu0 %v2115_v51 }
 0x181   : > { %v1057_v56 = vadd.f32 %v18407_v13, %v1056_v62  ;;  %14929 = vmatprep.mubr.f32.mxu0 %v1253_v54  ;;  %15092 = vmatpush3.msra.mxu0 %v2115_v51  ;;  %v1256_v57 = vmax.f32 %v1062_v55, 0.0 }
 0x182   : > { %v14798_v58 = vpop.f32.mrf.mxu1  ;;  %14930 = vmatmul.mubr.f32.gmra.mxu0 %v1254_v52 }
 0x183   : > { %v1255_v59 = vmax.f32 %v1057_v56, 0.0  ;;  %v1072_v60 = vadd.f32 %v14798_v58, %v18407_v13 }
 0x184   : > { %v1066_v61 = vpop.f32.mrf.mxu1 }
 0x185   : > { %v1067_v63 = vadd.f32 %v18407_v13, %v1066_v61  ;;  %14932 = vmatprep.mubr.f32.mxu0 %v1255_v59  ;;  %v1258_v1 = vmax.f32 %v1072_v60, 0.0 }
 0x186   : > { %v14801_v2 = vpop.f32.mrf.mxu1  ;;  %14933 = vmatmul.mubr.f32.gmra.mxu0 %v1256_v57  ;;  %v18440_v57 = vld [vmem:[#allocation9 + $0xb8] sm:$0xff] }
 0x187   : > { %v1257_v3 = vmax.f32 %v1067_v63, 0.0  ;;  %v1082_v4 = vadd.f32 %v14801_v2, %v18407_v13  ;;  %15253 = vmatprep.subr.mxu0 %v18440_v57 }
 0x188   : > { %v1076_v5 = vpop.f32.mrf.mxu1 }
 0x189   : > { %v1077_v6 = vadd.f32 %v18407_v13, %v1076_v5  ;;  %14935 = vmatprep.mubr.f32.mxu0 %v1257_v3  ;;  %v1260_v7 = vmax.f32 %v1082_v4, 0.0 }
 0x18a   : > { %v14804_v8 = vpop.f32.mrf.mxu1  ;;  %14936 = vmatmul.mubr.f32.gmra.mxu0 %v1258_v1 }
 0x18b   : > { %v1259_v9 = vmax.f32 %v1077_v6, 0.0  ;;  %v1092_v10 = vadd.f32 %v14804_v8, %v18407_v13 }
 0x18c   : > { %v1086_v11 = vpop.f32.mrf.mxu1 }
 0x18d   : > { %v1087_v14 = vadd.f32 %v18407_v13, %v1086_v11  ;;  %14938 = vmatprep.mubr.f32.mxu0 %v1259_v9  ;;  %v1262_v15 = vmax.f32 %v1092_v10, 0.0 }
 0x18e   : > { %v14807_v16 = vpop.f32.mrf.mxu1  ;;  %14939 = vmatmul.mubr.f32.gmra.mxu0 %v1260_v7 }
 0x18f   : > { %v1261_v17 = vmax.f32 %v1087_v14, 0.0  ;;  %v1102_v0 = vadd.f32 %v14807_v16, %v18407_v13 }
 0x190   : > { %v1096_v18 = vpop.f32.mrf.mxu1 }
 0x191   : > { %v1097_v19 = vadd.f32 %v18407_v13, %v1096_v18  ;;  %14941 = vmatprep.mubr.f32.mxu0 %v1261_v17  ;;  %v1264_v21 = vmax.f32 %v1102_v0, 0.0 }
 0x192   : > { %v14810_v22 = vpop.f32.mrf.mxu1  ;;  %14942 = vmatmul.mubr.f32.gmra.mxu0 %v1262_v15 }
 0x193   : > { %v1263_v23 = vmax.f32 %v1097_v19, 0.0  ;;  %v1112_v25 = vadd.f32 %v14810_v22, %v18407_v13 }
 0x194   : > { %v1106_v26 = vpop.f32.mrf.mxu1 }
 0x195   : > { %v1107_v28 = vadd.f32 %v18407_v13, %v1106_v26  ;;  %14944 = vmatprep.mubr.f32.mxu0 %v1263_v23  ;;  %v1266_v29 = vmax.f32 %v1112_v25, 0.0 }
 0x196   : > { %v14813_v31 = vpop.f32.mrf.mxu1  ;;  %14945 = vmatmul.mubr.f32.gmra.mxu0 %v1264_v21 }
 0x197   : > { %v1265_v32 = vmax.f32 %v1107_v28, 0.0  ;;  %v1122_v33 = vadd.f32 %v14813_v31, %v18407_v13 }
 0x198   : > { %v1116_v34 = vpop.f32.mrf.mxu1 }
 0x199   : > { %v1117_v35 = vadd.f32 %v18407_v13, %v1116_v34  ;;  %14947 = vmatprep.mubr.f32.mxu0 %v1265_v32  ;;  %v1268_v36 = vmax.f32 %v1122_v33, 0.0 }
 0x19a   : > { %v14816_v37 = vpop.f32.mrf.mxu1  ;;  %14948 = vmatmul.mubr.f32.gmra.mxu0 %v1266_v29 }
 0x19b   : > { %v1267_v38 = vmax.f32 %v1117_v35, 0.0  ;;  %v1132_v39 = vadd.f32 %v14816_v37, %v18407_v13 }
 0x19c   : > { %v1126_v40 = vpop.f32.mrf.mxu1 }
 0x19d   : > { %v1127_v41 = vadd.f32 %v18407_v13, %v1126_v40  ;;  %14950 = vmatprep.mubr.f32.mxu0 %v1267_v38  ;;  %v1270_v42 = vmax.f32 %v1132_v39, 0.0 }
 0x19e   : > { %v14819_v43 = vpop.f32.mrf.mxu1  ;;  %14951 = vmatmul.mubr.f32.gmra.mxu0 %v1268_v36 }
 0x19f   : > { %v1269_v44 = vmax.f32 %v1127_v41, 0.0  ;;  %v1142_v45 = vadd.f32 %v14819_v43, %v18407_v13 }
 0x1a0   : > { %v1136_v46 = vpop.f32.mrf.mxu1 }
 0x1a1   : > { %v1137_v47 = vadd.f32 %v18407_v13, %v1136_v46  ;;  %14953 = vmatprep.mubr.f32.mxu0 %v1269_v44  ;;  %v1272_v48 = vmax.f32 %v1142_v45, 0.0 }
 0x1a2   : > { %v14822_v49 = vpop.f32.mrf.mxu1  ;;  %14954 = vmatmul.mubr.f32.gmra.mxu0 %v1270_v42 }
 0x1a3   : > { %v1271_v50 = vmax.f32 %v1137_v47, 0.0  ;;  %v1152_v51 = vadd.f32 %v14822_v49, %v18407_v13  ;;  %v706_v49 = vld [vmem:[%s23102_s10] sm:$0x1] }
 0x1a4   : > { %v1146_v52 = vpop.f32.mrf.mxu1 }
 0x1a5   : > { %v1147_v53 = vadd.f32 %v18407_v13, %v1146_v52  ;;  %14956 = vmatprep.mubr.f32.mxu0 %v1271_v50  ;;  %v1274_v54 = vmax.f32 %v1152_v51, 0.0 }
 0x1a6   : > { %v14825_v55 = vpop.f32.mrf.mxu1  ;;  %14957 = vmatmul.mubr.f32.gmra.mxu0 %v1272_v48 }
 0x1a7   : > { %v1273_v62 = vmax.f32 %v1147_v53, 0.0  ;;  %v1162_v56 = vadd.f32 %v14825_v55, %v18407_v13 }
 0x1a8   : > { %v1156_v58 = vpop.f32.mrf.mxu1 }
 0x1a9   : > { %v1157_v59 = vadd.f32 %v18407_v13, %v1156_v58  ;;  %14959 = vmatprep.mubr.f32.mxu0 %v1273_v62  ;;  %v1276_v60 = vmax.f32 %v1162_v56, 0.0  ;;  %v1760_v58 = vld [vmem:[#allocation9 + $0x130] sm:$0xff] }
 0x1aa   : > { %v14828_v61 = vpop.f32.mrf.mxu1  ;;  %14960 = vmatmul.mubr.f32.gmra.mxu0 %v1274_v54 }
 0x1ab   : > { %v1275_v63 = vmax.f32 %v1157_v59, 0.0  ;;  %v1172_v1 = vadd.f32 %v14828_v61, %v18407_v13  ;;  %v18464_v59 = vld [vmem:[%s18190_s17] sm:$0xff]  ;;  %v18472_v61 = vld [vmem:[%s18190_s17 + $0x8] sm:$0xff] }
 0x1ac   : > { %v1166_v2 = vpop.f32.mrf.mxu1 }
 0x1ad   : > { %v1167_v3 = vadd.f32 %v18407_v13, %v1166_v2  ;;  %14962 = vmatprep.mubr.f32.mxu0 %v1275_v63  ;;  %v1278_v4 = vmax.f32 %v1172_v1, 0.0  ;;  %v2894_v63 = vld [vmem:[#allocation9 + $0xb0] sm:$0xff] }
 0x1ae   : > { %v14831_v5 = vpop.f32.mrf.mxu1  ;;  %14963 = vmatmul.mubr.f32.gmra.mxu0 %v1276_v60  ;;  %v1758_v60 = vld [vmem:[#allocation9 + $0x120] sm:$0xff]  ;;  %v18477_v1 = vld [vmem:[%s18190_s17 + $0x10] sm:$0xff] }
 0x1af   : > { %v1277_v6 = vmax.f32 %v1167_v3, 0.0  ;;  %v1182_v7 = vadd.f32 %v14831_v5, %v18407_v13  ;;  %v1756_v2 = vld [vmem:[#allocation9 + $0x110] sm:$0xff]  ;;  %v18483_v3 = vld [vmem:[%s18190_s17 + $0x18] sm:$0xff]  ;;  %v18488_v5 = vld [vmem:[%s18190_s17 + $0x20] sm:$0xff] }
 0x1b0   : > { %v1176_v8 = vpop.f32.mrf.mxu1 }
 0x1b1   : > { %v1177_v9 = vadd.f32 %v18407_v13, %v1176_v8  ;;  %14965 = vmatprep.mubr.f32.mxu0 %v1277_v6  ;;  %v1280_v10 = vmax.f32 %v1182_v7, 0.0  ;;  %v1754_v6 = vld [vmem:[#allocation9 + $0x100] sm:$0xff]  ;;  %v18493_v7 = vld [vmem:[%s18190_s17 + $0x28] sm:$0xff] }
 0x1b2   : > { %v14834_v11 = vpop.f32.mrf.mxu1  ;;  %14966 = vmatmul.mubr.f32.gmra.mxu0 %v1278_v4  ;;  %v2893_v4 = vld [vmem:[#allocation9 + $0xa8] sm:$0xff]  ;;  %v2892_v8 = vld [vmem:[#allocation9 + $0xa0] sm:$0xff] }
 0x1b3   : > { %v1279_v14 = vmax.f32 %v1177_v9, 0.0  ;;  %v1192_v15 = vadd.f32 %v14834_v11, %v18407_v13  ;;  %v18498_v9 = vld [vmem:[%s18190_s17 + $0x30] sm:$0xff] }
 0x1b4   : > { %v1186_v16 = vpop.f32.mrf.mxu1  ;;  %v2508_v11 = vld [vmem:[#allocation9 + $0x70] sm:$0xff] }
 0x1b5   : > { %v1187_v17 = vadd.f32 %v18407_v13, %v1186_v16  ;;  %14968 = vmatprep.mubr.f32.mxu0 %v1279_v14  ;;  %v1282_v0 = vmax.f32 %v1192_v15, 0.0  ;;  %v18503_v14 = vld [vmem:[%s18190_s17 + $0x38] sm:$0xff]  ;;  %v18512_v15 = vld [vmem:[%s18190_s17 + $0x40] sm:$0xff]  ;;  %v2507_v16 = vld [vmem:[#allocation9 + $0x68] sm:$0xff] }
 0x1b6   : > { %v14837_v18 = vpop.f32.mrf.mxu1  ;;  %14969 = vmatmul.mubr.f32.gmra.mxu0 %v1280_v10  ;;  %v2509_v10 = vld [vmem:[#allocation9 + $0x78] sm:$0xff] }
 0x1b7   : > { %v1281_v19 = vmax.f32 %v1187_v17, 0.0  ;;  %v1202_v21 = vadd.f32 %v14837_v18, %v18407_v13  ;;  %v18517_v17 = vld [vmem:[%s18190_s17 + $0x48] sm:$0xff]  ;;  %v2506_v18 = vld [vmem:[#allocation9 + $0x60] sm:$0xff] }
 0x1b8   : > { %v1196_v22 = vpop.f32.mrf.mxu1 }
 0x1b9   : > { %v1197_v23 = vadd.f32 %v18407_v13, %v1196_v22  ;;  %14971 = vmatprep.mubr.f32.mxu0 %v1281_v19  ;;  %v1284_v25 = vmax.f32 %v1202_v21, 0.0  ;;  %v18531_v19 = vld [vmem:[%s18190_s17 + $0x58] sm:$0xff] }
 0x1ba   : > { %v14840_v26 = vpop.f32.mrf.mxu1  ;;  %14972 = vmatmul.mubr.f32.gmra.mxu0 %v1282_v0  ;;  %v18524_v0 = vld [vmem:[%s18190_s17 + $0x50] sm:$0xff]  ;;  %v2505_v21 = vld [vmem:[#allocation9 + $0x58] sm:$0xff] }
 0x1bb   : > { %v1283_v28 = vmax.f32 %v1197_v23, 0.0  ;;  %v1212_v29 = vadd.f32 %v14840_v26, %v18407_v13  ;;  %v2891_v22 = vld [vmem:[#allocation9 + $0x98] sm:$0xff]  ;;  %v18538_v23 = vld [vmem:[%s18190_s17 + $0x60] sm:$0xff]  ;;  %v18545_v26 = vld [vmem:[%s18190_s17 + $0x68] sm:$0xff] }
 0x1bc   : > { %v1206_v31 = vpop.f32.mrf.mxu1 }
 0x1bd   : > { %v1207_v32 = vadd.f32 %v18407_v13, %v1206_v31  ;;  %14974 = vmatprep.mubr.f32.mxu0 %v1283_v28  ;;  %v1286_v33 = vmax.f32 %v1212_v29, 0.0  ;;  %v18552_v28 = vld [vmem:[%s18190_s17 + $0x70] sm:$0xff]  ;;  %v2503_v29 = vld [vmem:[#allocation9 + $0x48] sm:$0xff]  ;;  %v18559_v31 = vld [vmem:[%s18190_s17 + $0x78] sm:$0xff] }
 0x1be   : > { %v14843_v34 = vpop.f32.mrf.mxu1  ;;  %14975 = vmatmul.mubr.f32.gmra.mxu0 %v1284_v25  ;;  %v2504_v25 = vld [vmem:[#allocation9 + $0x50] sm:$0xff] }
 0x1bf   : > { %v1285_v35 = vmax.f32 %v1207_v32, 0.0  ;;  %v1222_v36 = vadd.f32 %v14843_v34, %v18407_v13  ;;  %v2502_v32 = vld [vmem:[#allocation9 + $0x40] sm:$0xff] }
 0x1c0   : > { %v1216_v37 = vpop.f32.mrf.mxu1  ;;  %v18566_v34 = vld [vmem:[%s18190_s17 + $0x80] sm:$0xff] }
 0x1c1   : > { %v1217_v38 = vadd.f32 %v18407_v13, %v1216_v37  ;;  %14977 = vmatprep.mubr.f32.mxu0 %v1285_v35  ;;  %v1288_v39 = vmax.f32 %v1222_v36, 0.0  ;;  %v18573_v35 = vld [vmem:[%s18190_s17 + $0x88] sm:$0xff]  ;;  %v18577_v37 = vld [vmem:[#allocation9 + $0xf8] sm:$0xff] }
 0x1c2   : > { %v14846_v40 = vpop.f32.mrf.mxu1  ;;  %14978 = vmatmul.mubr.f32.gmra.mxu0 %v1286_v33  ;;  %v2890_v33 = vld [vmem:[#allocation9 + $0x90] sm:$0xff]  ;;  %v2889_v36 = vld [vmem:[#allocation9 + $0x88] sm:$0xff] }
 0x1c3   : > { %v1287_v41 = vmax.f32 %v1217_v38, 0.0  ;;  %v1232_v42 = vadd.f32 %v14846_v40, %v18407_v13  ;;  %v18582_v38 = vld [vmem:[%s18190_s17 + $0x90] sm:$0xff]  ;;  %v2888_v40 = vld [vmem:[#allocation9 + $0x80] sm:$0xff] }
 0x1c4   : > { %v1226_v43 = vpop.f32.mrf.mxu1  ;;  %23205 = vst [vmem:[#allocation23_spill] sm:$0xff] %v18582_v38 }
 0x1c5   : > { %v1227_v44 = vadd.f32 %v18407_v13, %v1226_v43  ;;  %14980 = vmatprep.mubr.f32.mxu0 %v1287_v41  ;;  %v1290_v45 = vmax.f32 %v1232_v42, 0.0  ;;  %v18597_v41 = vld [vmem:[%s18190_s17 + $0xa0] sm:$0xff]  ;;  %v18604_v42 = vld [vmem:[%s18190_s17 + $0xa8] sm:$0xff]  ;;  %v18611_v43 = vld [vmem:[%s18190_s17 + $0xb0] sm:$0xff] }
 0x1c6   : > { %v14849_v46 = vpop.f32.mrf.mxu1  ;;  %14981 = vmatmul.mubr.f32.gmra.mxu0 %v1288_v39  ;;  %v18590_v39 = vld [vmem:[%s18190_s17 + $0x98] sm:$0xff]  ;;  %23207 = vst [vmem:[#allocation25_spill] sm:$0xff] %v18597_v41  ;;  %23208 = vst [vmem:[#allocation26_spill] sm:$0xff] %v18604_v42 }
 0x1c7   : > { %v1289_v47 = vmax.f32 %v1227_v44, 0.0  ;;  %v1242_v48 = vadd.f32 %v14849_v46, %v18407_v13  ;;  %23206 = vst [vmem:[#allocation24_spill] sm:$0xff] %v18590_v39  ;;  %23209 = vst [vmem:[#allocation27_spill] sm:$0xff] %v18611_v43  ;;  %v18618_v44 = vld [vmem:[%s18190_s17 + $0xb8] sm:$0xff]  ;;  %v18632_v46 = vld [vmem:[%s18190_s17 + $0xc8] sm:$0xff] }
 0x1c8   : > { %v1236_v50 = vpop.f32.mrf.mxu1  ;;  %v776_v53 = vpop.f32.mrf.mxu0  ;;  %23210 = vst [vmem:[#allocation28_spill] sm:$0xff] %v18618_v44  ;;  %23212 = vst [vmem:[#allocation30_spill] sm:$0xff] %v18632_v46 }
 0x1c9   : > { %v1237_v51 = vadd.f32 %v18407_v13, %v1236_v50  ;;  %14983 = vmatprep.mubr.f32.mxu0 %v1289_v47  ;;  %v1292_v52 = vmax.f32 %v1242_v48, 0.0  ;;  %v777_v54 = vadd.f32 %v776_v53, %v706_v49  ;;  %v1759_v13 = vld [vmem:[#allocation9 + $0x128] sm:$0xff]  ;;  %v18639_v47 = vld [vmem:[%s18190_s17 + $0xd0] sm:$0xff]  ;;  %v18646_v48 = vld [vmem:[%s18190_s17 + $0xd8] sm:$0xff] }
 0x1ca   : > { %14984 = vmatmul.mubr.f32.gmra.mxu0 %v1290_v45  ;;  %v14761_v62 = vpop.f32.mrf.mxu0  ;;  %v18625_v45 = vld [vmem:[%s18190_s17 + $0xc0] sm:$0xff]  ;;  %23213 = vst [vmem:[#allocation31_spill] sm:$0xff] %v18639_v47  ;;  %23214 = vst [vmem:[#allocation32_spill] sm:$0xff] %v18646_v48  ;;  %v18660_v50 = vld [vmem:[%s18190_s17 + $0xe8] sm:$0xff] }
 0x1cb   : > { %v1291_v55 = vmax.f32 %v1237_v51, 0.0  ;;  %v780_v56 = vmax.f32 %v777_v54, 0.0  ;;  %23211 = vst [vmem:[#allocation29_spill] sm:$0xff] %v18625_v45  ;;  %v18653_v49 = vld [vmem:[%s18190_s17 + $0xe0] sm:$0xff]  ;;  %23216 = vst [vmem:[#allocation34_spill] sm:$0xff] %v18660_v50  ;;  %v18667_v51 = vld [vmem:[%s18190_s17 + $0xf0] sm:$0xff] }
 0x1cc   : > { %23215 = vst [vmem:[#allocation33_spill] sm:$0xff] %v18653_v49  ;;  %23217 = vst [vmem:[#allocation35_spill] sm:$0xff] %v18667_v51  ;;  %v18681_v53 = vld [vmem:[%s18190_s17 + $0x100] sm:$0xff]  ;;  %v18688_v54 = vld [vmem:[%s18190_s17 + $0x108] sm:$0xff] }
 0x1cd   : > { %14986 = vmatprep.mubr.f32.mxu0 %v1291_v55  ;;  %14883 = vmatmul.mubr.f32.vlgmr.msra.gmra.mxu1 %v780_v56  ;;  %23219 = vst [vmem:[#allocation37_spill] sm:$0xff] %v18681_v53  ;;  %23220 = vst [vmem:[#allocation38_spill] sm:$0xff] %v18688_v54  ;;  %v18695_v55 = vld [vmem:[%s18190_s17 + $0x110] sm:$0xff]  ;;  %v18702_v62 = vld [vmem:[%s18190_s17 + $0x118] sm:$0xff] }
 0x1ce   : > { %14987 = vmatmul.mubr.f32.gmra.mxu0 %v1292_v52  ;;  %14990 = vmatpush3.msra.mxu1 %v18401_v12  ;;  %v1757_v12 = vld [vmem:[#allocation9 + $0x118] sm:$0xff]  ;;  %23221 = vst [vmem:[#allocation39_spill] sm:$0xff] %v18695_v55  ;;  %23222 = vst [vmem:[#allocation40_spill] sm:$0xff] %v18702_v62  ;;  %v18709_v56 = vld [vmem:[%s18190_s17 + $0x120] sm:$0xff] }
 0x1cf   : > { %15093 = vmatprep.mubr.msk.f32.mxu0 %vm594_vm1, %v18464_v59  ;;  %15005 = vmatprep.mubr.msk.f32.mxu1 %vm594_vm1, %v18464_v59  ;;  %v18674_v52 = vld [vmem:[%s18190_s17 + $0xf8] sm:$0xff]  ;;  %23223 = vst [vmem:[#allocation41_spill] sm:$0xff] %v18709_v56 }
 0x1d0   : > { %14991 = vmatprep.subr.mxu1 %v1760_v58  ;;  %23218 = vst [vmem:[#allocation36_spill] sm:$0xff] %v18674_v52 }
 0x1d1   : > { %14992 = vmatpush3.msra.mxu1 %v1760_v58  ;;  %v3850_v58 = vld [vmem:[#allocation9 + $0x178] sm:$0xff] }
 0x1d2   : > { %15094 = vmatmul.mubr.msk.f32.vlgmr.msra.gmra.mxu0 %vm594_vm1, %v18472_v61  ;;  %14993 = vmatprep.subr.mxu1 %v1759_v13 }
 0x1d3   : > { %15096 = vmatprep.mubr.msk.f32.mxu0 %vm594_vm1, %v18477_v1  ;;  %14994 = vmatpush3.msra.mxu1 %v1759_v13  ;;  %v18716_v13 = vld [vmem:[%s18190_s17 + $0x128] sm:$0xff] }
 0x1d4   : > { %15254 = vmatpush3.msra.mxu0 %v18440_v57  ;;  %14995 = vmatprep.subr.mxu1 %v1758_v60  ;;  %v1755_v57 = vld [vmem:[#allocation9 + $0x108] sm:$0xff]  ;;  %23224 = vst [vmem:[#allocation42_spill] sm:$0xff] %v18716_v13 }
 0x1d5   : > { %15255 = vmatprep.subr.mxu0 %v2894_v63  ;;  %14996 = vmatpush3.msra.mxu1 %v1758_v60  ;;  %v18723_v60 = vld [vmem:[%s18190_s17 + $0x130] sm:$0xff] }
 0x1d6   : > { %15097 = vmatmul.mubr.msk.f32.gmra.mxu0 %vm594_vm1, %v18483_v3  ;;  %14997 = vmatprep.subr.mxu1 %v1757_v12  ;;  %23225 = vst [vmem:[#allocation43_spill] sm:$0xff] %v18723_v60 }
 0x1d7   : > { %15099 = vmatprep.mubr.msk.f32.mxu0 %vm594_vm1, %v18488_v5  ;;  %14998 = vmatpush3.msra.mxu1 %v1757_v12  ;;  %v18737_v12 = vld [vmem:[%s18190_s17 + $0x140] sm:$0xff] }
 0x1d8   : > { %15256 = vmatpush3.msra.mxu0 %v2894_v63  ;;  %14999 = vmatprep.subr.mxu1 %v1756_v2  ;;  %v18730_v63 = vld [vmem:[%s18190_s17 + $0x138] sm:$0xff]  ;;  %23227 = vst [vmem:[#allocation45_spill] sm:$0xff] %v18737_v12 }
 0x1d9   : > { %15257 = vmatprep.subr.mxu0 %v2893_v4  ;;  %15000 = vmatpush3.msra.mxu1 %v1756_v2  ;;  %23226 = vst [vmem:[#allocation44_spill] sm:$0xff] %v18730_v63  ;;  %v18744_v2 = vld [vmem:[%s18190_s17 + $0x148] sm:$0xff] }
 0x1da   : > { %15100 = vmatmul.mubr.msk.f32.gmra.mxu0 %vm594_vm1, %v18493_v7  ;;  %15001 = vmatprep.subr.mxu1 %v1755_v57 }
 0x1db   : > { %15102 = vmatprep.mubr.msk.f32.mxu0 %vm594_vm1, %v18498_v9  ;;  %15002 = vmatpush3.msra.mxu1 %v1755_v57  ;;  %v18758_v57 = vld [vmem:[%s18190_s17 + $0x158] sm:$0xff] }
 0x1dc   : > { %15258 = vmatpush3.msra.mxu0 %v2893_v4  ;;  %15003 = vmatprep.subr.mxu1 %v1754_v6  ;;  %v18751_v4 = vld [vmem:[%s18190_s17 + $0x150] sm:$0xff] }
 0x1dd   : > { %15259 = vmatprep.subr.mxu0 %v2892_v8  ;;  %15004 = vmatpush3.msra.mxu1 %v1754_v6 }
 0x1de   : > { %15103 = vmatmul.mubr.msk.f32.gmra.mxu0 %vm594_vm1, %v18503_v14  ;;  %15006 = vmatmul.mubr.msk.f32.vlgmr.msra.gmra.mxu1 %vm594_vm1, %v18472_v61 }
 0x1df   : > { %15165 = vmatprep.subr.mxu1 %v2509_v10  ;;  %15008 = vmatprep.mubr.msk.f32.mxu1 %vm594_vm1, %v18477_v1 }
 0x1e0   : > { %15166 = vmatpush3.msra.mxu1 %v2509_v10  ;;  %15105 = vmatprep.mubr.msk.f32.mxu0 %vm594_vm1, %v18512_v15  ;;  %v18804_v10 = vld [vmem:[%s18190_s17 + $0x168] sm:$0xff] }
 0x1e1   : > { %15167 = vmatprep.subr.mxu1 %v2508_v11  ;;  %15260 = vmatpush3.msra.mxu0 %v2892_v8  ;;  %v3848_v8 = vld [vmem:[#allocation9 + $0x168] sm:$0xff] }
 0x1e2   : > { %15168 = vmatpush3.msra.mxu1 %v2508_v11  ;;  %15106 = vmatmul.mubr.msk.f32.gmra.mxu0 %vm594_vm1, %v18517_v17  ;;  %v18811_v11 = vld [vmem:[%s18190_s17 + $0x170] sm:$0xff] }
 0x1e3   : > { %15009 = vmatmul.mubr.msk.f32.gmra.mxu1 %vm594_vm1, %v18483_v3  ;;  %15108 = vmatprep.mubr.msk.f32.mxu0 %vm594_vm1, %v18524_v0 }
 0x1e4   : > { %15011 = vmatprep.mubr.msk.f32.mxu1 %vm594_vm1, %v18488_v5  ;;  %15169 = vmatprep.subr.mxu1 %v2507_v16 }
 0x1e5   : > { %15170 = vmatpush3.msra.mxu1 %v2507_v16  ;;  %15261 = vmatprep.subr.mxu0 %v2891_v22 }
 0x1e6   : > { %15109 = vmatmul.mubr.msk.f32.gmra.mxu0 %vm594_vm1, %v18531_v19  ;;  %15171 = vmatprep.subr.mxu1 %v2506_v18 }
 0x1e7   : > { %15012 = vmatmul.mubr.msk.f32.gmra.mxu1 %vm594_vm1, %v18493_v7  ;;  %15111 = vmatprep.mubr.msk.f32.mxu0 %vm594_vm1, %v18538_v23 }
 0x1e8   : > { %15014 = vmatprep.mubr.msk.f32.mxu1 %vm594_vm1, %v18498_v9  ;;  %15172 = vmatpush3.msra.mxu1 %v2506_v18 }
 0x1e9   : > { %15173 = vmatprep.subr.mxu1 %v2505_v21  ;;  %15262 = vmatpush3.msra.mxu0 %v2891_v22  ;;  %v18822_v22 = vld [vmem:[%s18190_s17 + $0x178] sm:$0xff] }
 0x1ea   : > { %15112 = vmatmul.mubr.msk.f32.gmra.mxu0 %vm594_vm1, %v18545_v26  ;;  %15174 = vmatpush3.msra.mxu1 %v2505_v21  ;;  %v3847_v21 = vld [vmem:[#allocation9 + $0x160] sm:$0xff] }
 0x1eb   : > { %15015 = vmatmul.mubr.msk.f32.gmra.mxu1 %vm594_vm1, %v18503_v14  ;;  %15114 = vmatprep.mubr.msk.f32.mxu0 %vm594_vm1, %v18552_v28 }
 0x1ec   : > { %15017 = vmatprep.mubr.msk.f32.mxu1 %vm594_vm1, %v18512_v15  ;;  %15175 = vmatprep.subr.mxu1 %v2504_v25 }
 0x1ed   : > { %15176 = vmatpush3.msra.mxu1 %v2504_v25  ;;  %15263 = vmatprep.subr.mxu0 %v2890_v33 }
 0x1ee   : > { %15115 = vmatmul.mubr.msk.f32.gmra.mxu0 %vm594_vm1, %v18559_v31  ;;  %15177 = vmatprep.subr.mxu1 %v2503_v29 }
 0x1ef   : > { %15018 = vmatmul.mubr.msk.f32.gmra.mxu1 %vm594_vm1, %v18517_v17  ;;  %15117 = vmatprep.mubr.msk.f32.mxu0 %vm594_vm1, %v18566_v34 }
 0x1f0   : > { %15020 = vmatprep.mubr.msk.f32.mxu1 %vm594_vm1, %v18524_v0  ;;  %15178 = vmatpush3.msra.mxu1 %v2503_v29 }
 0x1f1   : > { %15179 = vmatprep.subr.mxu1 %v2502_v32  ;;  %15264 = vmatpush3.msra.mxu0 %v2890_v33 }
 0x1f2   : > { %15118 = vmatmul.mubr.msk.f32.gmra.mxu0 %vm594_vm1, %v18573_v35  ;;  %15180 = vmatpush3.msra.mxu1 %v2502_v32  ;;  %v3391_v32 = vld [vmem:[#allocation9 + $0xf0] sm:$0xff] }
 0x1f3   : > { %15021 = vmatmul.mubr.msk.f32.gmra.mxu1 %vm594_vm1, %v18531_v19  ;;  %15120 = vmatprep.mubr.msk.f32.mxu0 %vm594_vm1, %v18582_v38 }
 0x1f4   : > { %15023 = vmatprep.mubr.msk.f32.mxu1 %vm594_vm1, %v18538_v23  ;;  %15265 = vmatprep.subr.mxu0 %v2889_v36 }
 0x1f5   : > { %15341 = vmatprep.subr.mxu1 %v18577_v37  ;;  %15266 = vmatpush3.msra.mxu0 %v2889_v36  ;;  %v3390_v36 = vld [vmem:[#allocation9 + $0xe8] sm:$0xff] }
 0x1f6   : > { %15121 = vmatmul.mubr.msk.f32.gmra.mxu0 %vm594_vm1, %v18590_v39  ;;  %15267 = vmatprep.subr.mxu0 %v2888_v40 }
 0x1f7   : > { %15024 = vmatmul.mubr.msk.f32.gmra.mxu1 %vm594_vm1, %v18545_v26  ;;  %15123 = vmatprep.mubr.msk.f32.mxu0 %vm594_vm1, %v18597_v41 }
 0x1f8   : > { %15026 = vmatprep.mubr.msk.f32.mxu1 %vm594_vm1, %v18552_v28  ;;  %15268 = vmatpush3.msra.mxu0 %v2888_v40 }
 0x1f9   : > { %15429 = vmatprep.subr.mxu0 %v3850_v58 }
 0x1fa   : > { %15124 = vmatmul.mubr.msk.f32.gmra.mxu0 %vm594_vm1, %v18604_v42 }
 0x1fb   : > { %15027 = vmatmul.mubr.msk.f32.gmra.mxu1 %vm594_vm1, %v18559_v31  ;;  %15126 = vmatprep.mubr.msk.f32.mxu0 %vm594_vm1, %v18611_v43 }
 0x1fc   : > { %15029 = vmatprep.mubr.msk.f32.mxu1 %vm594_vm1, %v18566_v34 }
 0x1fe   : > { %15127 = vmatmul.mubr.msk.f32.gmra.mxu0 %vm594_vm1, %v18618_v44 }
 0x1ff   : > { %15030 = vmatmul.mubr.msk.f32.gmra.mxu1 %vm594_vm1, %v18573_v35  ;;  %15129 = vmatprep.mubr.msk.f32.mxu0 %vm594_vm1, %v18625_v45 }
 0x200   : > { %15032 = vmatprep.mubr.msk.f32.mxu1 %vm594_vm1, %v18582_v38 }
 0x202   : > { %15130 = vmatmul.mubr.msk.f32.gmra.mxu0 %vm594_vm1, %v18632_v46 }
 0x203   : > { %15033 = vmatmul.mubr.msk.f32.gmra.mxu1 %vm594_vm1, %v18590_v39  ;;  %15132 = vmatprep.mubr.msk.f32.mxu0 %vm594_vm1, %v18639_v47 }
 0x204   : > { %15035 = vmatprep.mubr.msk.f32.mxu1 %vm594_vm1, %v18597_v41 }
 0x206   : > { %15133 = vmatmul.mubr.msk.f32.gmra.mxu0 %vm594_vm1, %v18646_v48 }
 0x207   : > { %15036 = vmatmul.mubr.msk.f32.gmra.mxu1 %vm594_vm1, %v18604_v42  ;;  %15135 = vmatprep.mubr.msk.f32.mxu0 %vm594_vm1, %v18653_v49 }
 0x208   : > { %15038 = vmatprep.mubr.msk.f32.mxu1 %vm594_vm1, %v18611_v43 }
 0x20a   : > { %15136 = vmatmul.mubr.msk.f32.gmra.mxu0 %vm594_vm1, %v18660_v50 }
 0x20b   : > { %15039 = vmatmul.mubr.msk.f32.gmra.mxu1 %vm594_vm1, %v18618_v44  ;;  %15138 = vmatprep.mubr.msk.f32.mxu0 %vm594_vm1, %v18667_v51 }
 0x20c   : > { %15041 = vmatprep.mubr.msk.f32.mxu1 %vm594_vm1, %v18625_v45 }
 0x20e   : > { %15139 = vmatmul.mubr.msk.f32.gmra.mxu0 %vm594_vm1, %v18674_v52 }
 0x20f   : > { %15042 = vmatmul.mubr.msk.f32.gmra.mxu1 %vm594_vm1, %v18632_v46  ;;  %15141 = vmatprep.mubr.msk.f32.mxu0 %vm594_vm1, %v18681_v53 }
 0x210   : > { %15044 = vmatprep.mubr.msk.f32.mxu1 %vm594_vm1, %v18639_v47 }
 0x212   : > { %15142 = vmatmul.mubr.msk.f32.gmra.mxu0 %vm594_vm1, %v18688_v54 }
 0x213   : > { %15045 = vmatmul.mubr.msk.f32.gmra.mxu1 %vm594_vm1, %v18646_v48  ;;  %15144 = vmatprep.mubr.msk.f32.mxu0 %vm594_vm1, %v18695_v55 }
 0x214   : > { %15047 = vmatprep.mubr.msk.f32.mxu1 %vm594_vm1, %v18653_v49 }
 0x216   : > { %15145 = vmatmul.mubr.msk.f32.gmra.mxu0 %vm594_vm1, %v18702_v62 }
 0x217   : > { %15048 = vmatmul.mubr.msk.f32.gmra.mxu1 %vm594_vm1, %v18660_v50  ;;  %15147 = vmatprep.mubr.msk.f32.mxu0 %vm594_vm1, %v18709_v56 }
 0x218   : > { %15050 = vmatprep.mubr.msk.f32.mxu1 %vm594_vm1, %v18667_v51 }
 0x21a   : > { %15148 = vmatmul.mubr.msk.f32.gmra.mxu0 %vm594_vm1, %v18716_v13 }
 0x21b   : > { %15051 = vmatmul.mubr.msk.f32.gmra.mxu1 %vm594_vm1, %v18674_v52  ;;  %15150 = vmatprep.mubr.msk.f32.mxu0 %vm594_vm1, %v18723_v60 }
 0x21c   : > { %15053 = vmatprep.mubr.msk.f32.mxu1 %vm594_vm1, %v18681_v53 }
 0x21e   : > { %15151 = vmatmul.mubr.msk.f32.gmra.mxu0 %vm594_vm1, %v18730_v63 }
 0x21f   : > { %15054 = vmatmul.mubr.msk.f32.gmra.mxu1 %vm594_vm1, %v18688_v54  ;;  %15153 = vmatprep.mubr.msk.f32.mxu0 %vm594_vm1, %v18737_v12 }
 0x220   : > { %15056 = vmatprep.mubr.msk.f32.mxu1 %vm594_vm1, %v18695_v55 }
 0x222   : > { %15154 = vmatmul.mubr.msk.f32.gmra.mxu0 %vm594_vm1, %v18744_v2 }
 0x223   : > { %15057 = vmatmul.mubr.msk.f32.gmra.mxu1 %vm594_vm1, %v18702_v62  ;;  %15156 = vmatprep.mubr.msk.f32.mxu0 %vm594_vm1, %v18751_v4 }
 0x224   : > { %15059 = vmatprep.mubr.msk.f32.mxu1 %vm594_vm1, %v18709_v56 }
 0x226   : > { %15157 = vmatmul.mubr.msk.f32.gmra.mxu0 %vm594_vm1, %v18758_v57 }
 0x227   : > { %15060 = vmatmul.mubr.msk.f32.gmra.mxu1 %vm594_vm1, %v18716_v13  ;;  %15159 = vmatprep.mubr.msk.f32.mxu0 %vm594_vm1, %v18346_v20 }
 0x228   : > { %15062 = vmatprep.mubr.msk.f32.mxu1 %vm594_vm1, %v18723_v60 }
 0x22a   : > { %15160 = vmatmul.mubr.msk.f32.gmra.mxu0 %vm594_vm1, %v18351_v24  ;;  %v3849_v24 = vld [vmem:[#allocation9 + $0x170] sm:$0xff] }
 0x22b   : > { %15063 = vmatmul.mubr.msk.f32.gmra.mxu1 %vm594_vm1, %v18730_v63  ;;  %15162 = vmatprep.mubr.msk.f32.mxu0 %vm594_vm1, %v18358_v27  ;;  %v18793_v27 = vld [vmem:[%s18190_s17 + $0x160] sm:$0xff] }
 0x22c   : > { %15065 = vmatprep.mubr.msk.f32.mxu1 %vm594_vm1, %v18737_v12 }
 0x22e   : > { %15163 = vmatmul.mubr.msk.f32.gmra.mxu0 %vm594_vm1, %v18364_v30 }
 0x22f   : > { %15066 = vmatmul.mubr.msk.f32.gmra.mxu1 %vm594_vm1, %v18744_v2  ;;  %15269 = vmatprep.mubr.msk.f32.mxu0 %vm594_vm1, %v18464_v59 }
 0x230   : > { %15068 = vmatprep.mubr.msk.f32.mxu1 %vm594_vm1, %v18751_v4 }
 0x232   : > { %v18784_v20 = vpop.f32.mrf.mxu0  ;;  %15270 = vmatmul.mubr.msk.f32.vlgmr.msra.gmra.mxu0 %vm594_vm1, %v18472_v61 }
 0x233   : > { %23228 = vst [vmem:[#allocation46_spill] sm:$0xff] %v18784_v20  ;;  %15069 = vmatmul.mubr.msk.f32.gmra.mxu1 %vm594_vm1, %v18758_v57  ;;  %15272 = vmatprep.mubr.msk.f32.mxu0 %vm594_vm1, %v18477_v1 }
 0x234   : > { %15071 = vmatprep.mubr.msk.f32.mxu1 %vm594_vm1, %v18793_v27  ;;  %v18797_v30 = vpop.f32.mrf.mxu0  ;;  %15430 = vmatpush3.msra.mxu0 %v3850_v58  ;;  %v3846_v58 = vld [vmem:[#allocation9 + $0x158] sm:$0xff] }
 0x235   : > { %23229 = vst [vmem:[#allocation47_spill] sm:$0xff] %v18797_v30  ;;  %15431 = vmatprep.subr.mxu0 %v3849_v24 }
 0x236   : > { %v18799_v6 = vpop.f32.mrf.mxu0  ;;  %15273 = vmatmul.mubr.msk.f32.gmra.mxu0 %vm594_vm1, %v18483_v3 }
 0x237   : > { %23230 = vst [vmem:[#allocation48_spill] sm:$0xff] %v18799_v6  ;;  %15072 = vmatmul.mubr.msk.f32.gmra.mxu1 %vm594_vm1, %v18804_v10  ;;  %15275 = vmatprep.mubr.msk.f32.mxu0 %vm594_vm1, %v18488_v5 }
 0x238   : > { %15074 = vmatprep.mubr.msk.f32.mxu1 %vm594_vm1, %v18811_v11  ;;  %v18815_v16 = vpop.f32.mrf.mxu0  ;;  %15432 = vmatpush3.msra.mxu0 %v3849_v24 }
 0x239   : > { %23231 = vst [vmem:[#allocation49_spill] sm:$0xff] %v18815_v16  ;;  %15433 = vmatprep.subr.mxu0 %v3848_v8 }
 0x23a   : > { %v18817_v18 = vpop.f32.mrf.mxu0  ;;  %15276 = vmatmul.mubr.msk.f32.gmra.mxu0 %vm594_vm1, %v18493_v7 }
 0x23b   : > { %23232 = vst [vmem:[#allocation50_spill] sm:$0xff] %v18817_v18  ;;  %15075 = vmatmul.mubr.msk.f32.gmra.mxu1 %vm594_vm1, %v18822_v22  ;;  %15278 = vmatprep.mubr.msk.f32.mxu0 %vm594_vm1, %v18498_v9 }
 0x23c   : > { %15181 = vmatprep.mubr.msk.f32.mxu1 %vm594_vm1, %v18464_v59  ;;  %v18830_v25 = vpop.f32.mrf.mxu0  ;;  %15434 = vmatpush3.msra.mxu0 %v3848_v8 }
 0x23d   : > { %23233 = vst [vmem:[#allocation51_spill] sm:$0xff] %v18830_v25  ;;  %15435 = vmatprep.subr.mxu0 %v3847_v21 }
 0x23e   : > { %v18832_v29 = vpop.f32.mrf.mxu0  ;;  %15279 = vmatmul.mubr.msk.f32.gmra.mxu0 %vm594_vm1, %v18503_v14 }
 0x23f   : > { %23234 = vst [vmem:[#allocation52_spill] sm:$0xff] %v18832_v29  ;;  %15182 = vmatmul.mubr.msk.f32.vlgmr.msra.gmra.mxu1 %vm594_vm1, %v18472_v61  ;;  %15281 = vmatprep.mubr.msk.f32.mxu0 %vm594_vm1, %v18512_v15 }
 0x240   : > { %15342 = vmatpush3.msra.mxu1 %v18577_v37  ;;  %15184 = vmatprep.mubr.msk.f32.mxu1 %vm594_vm1, %v18477_v1  ;;  %v18843_v33 = vpop.f32.mrf.mxu0  ;;  %v3389_v37 = vld [vmem:[#allocation9 + $0xe0] sm:$0xff] }
 0x241   : > { %23235 = vst [vmem:[#allocation53_spill] sm:$0xff] %v18843_v33  ;;  %15343 = vmatprep.subr.mxu1 %v3391_v32  ;;  %15436 = vmatpush3.msra.mxu0 %v3847_v21  ;;  %v3388_v21 = vld [vmem:[#allocation9 + $0xd8] sm:$0xff] }
 0x242   : > { %v18845_v40 = vpop.f32.mrf.mxu0  ;;  %15344 = vmatpush3.msra.mxu1 %v3391_v32  ;;  %15282 = vmatmul.mubr.msk.f32.gmra.mxu0 %vm594_vm1, %v18517_v17 }
 0x243   : > { %23236 = vst [vmem:[#allocation54_spill] sm:$0xff] %v18845_v40  ;;  %15185 = vmatmul.mubr.msk.f32.gmra.mxu1 %vm594_vm1, %v18483_v3  ;;  %15284 = vmatprep.mubr.msk.f32.mxu0 %vm594_vm1, %v18524_v0  ;;  %v3386_v40 = vld [vmem:[#allocation9 + $0xc8] sm:$0xff] }
 0x244   : > { %15187 = vmatprep.mubr.msk.f32.mxu1 %vm594_vm1, %v18488_v5  ;;  %v18855_v24 = vpop.f32.mrf.mxu0  ;;  %15345 = vmatprep.subr.mxu1 %v3390_v36 }
 0x245   : > { %23237 = vst [vmem:[#allocation55_spill] sm:$0xff] %v18855_v24  ;;  %15346 = vmatpush3.msra.mxu1 %v3390_v36  ;;  %15437 = vmatprep.subr.mxu0 %v3846_v58  ;;  %v3387_v36 = vld [vmem:[#allocation9 + $0xd0] sm:$0xff] }
 0x246   : > { %v18857_v8 = vpop.f32.mrf.mxu0  ;;  %15285 = vmatmul.mubr.msk.f32.gmra.mxu0 %vm594_vm1, %v18531_v19  ;;  %15347 = vmatprep.subr.mxu1 %v3389_v37  ;;  %v3845_v24 = vld [vmem:[#allocation9 + $0x150] sm:$0xff] }
 0x247   : > { %23238 = vst [vmem:[#allocation56_spill] sm:$0xff] %v18857_v8  ;;  %15188 = vmatmul.mubr.msk.f32.gmra.mxu1 %vm594_vm1, %v18493_v7  ;;  %15287 = vmatprep.mubr.msk.f32.mxu0 %vm594_vm1, %v18538_v23 }
 0x248   : > { %15190 = vmatprep.mubr.msk.f32.mxu1 %vm594_vm1, %v18498_v9  ;;  %v18867_v32 = vpop.f32.mrf.mxu0  ;;  %15348 = vmatpush3.msra.mxu1 %v3389_v37 }
 0x249   : > { %23239 = vst [vmem:[#allocation57_spill] sm:$0xff] %v18867_v32  ;;  %15349 = vmatprep.subr.mxu1 %v3388_v21  ;;  %15438 = vmatpush3.msra.mxu0 %v3846_v58  ;;  %v3843_v32 = vld [vmem:[#allocation9 + $0x140] sm:$0xff] }
 0x24a   : > { %v18869_v8 = vpop.f32.mrf.mxu0  ;;  %15288 = vmatmul.mubr.msk.f32.gmra.mxu0 %vm594_vm1, %v18545_v26  ;;  %15350 = vmatpush3.msra.mxu1 %v3388_v21  ;;  %v3385_v21 = vld [vmem:[#allocation9 + $0xc0] sm:$0xff] }
 0x24b   : > { %23240 = vst [vmem:[#allocation58_spill] sm:$0xff] %v18869_v8  ;;  %15191 = vmatmul.mubr.msk.f32.gmra.mxu1 %vm594_vm1, %v18503_v14  ;;  %15290 = vmatprep.mubr.msk.f32.mxu0 %vm594_vm1, %v18552_v28  ;;  %v18897_v8 = vld [vmem:[#allocation9 + $0x1b8] sm:$0xff] }
 0x24c   : > { %15193 = vmatprep.mubr.msk.f32.mxu1 %vm594_vm1, %v18512_v15  ;;  %v18879_v37 = vpop.f32.mrf.mxu0  ;;  %15351 = vmatprep.subr.mxu1 %v3387_v36 }
 0x24d   : > { %23241 = vst [vmem:[#allocation59_spill] sm:$0xff] %v18879_v37  ;;  %15352 = vmatpush3.msra.mxu1 %v3387_v36  ;;  %15439 = vmatprep.subr.mxu0 %v3845_v24  ;;  %v3844_v36 = vld [vmem:[#allocation9 + $0x148] sm:$0xff] }
 0x24e   : > { %v18881_v58 = vpop.f32.mrf.mxu0  ;;  %15291 = vmatmul.mubr.msk.f32.gmra.mxu0 %vm594_vm1, %v18559_v31  ;;  %15353 = vmatprep.subr.mxu1 %v3386_v40 }
 0x24f   : > { %23242 = vst [vmem:[#allocation60_spill] sm:$0xff] %v18881_v58  ;;  %15194 = vmatmul.mubr.msk.f32.gmra.mxu1 %vm594_vm1, %v18517_v17  ;;  %15293 = vmatprep.mubr.msk.f32.mxu0 %vm594_vm1, %v18566_v34 }
 0x250   : > { %15196 = vmatprep.mubr.msk.f32.mxu1 %vm594_vm1, %v18524_v0  ;;  %v18891_v37 = vpop.f32.mrf.mxu0  ;;  %15354 = vmatpush3.msra.mxu1 %v3386_v40 }
 0x251   : > { %23243 = vst [vmem:[#allocation61_spill] sm:$0xff] %v18891_v37  ;;  %15355 = vmatprep.subr.mxu1 %v3385_v21  ;;  %15440 = vmatpush3.msra.mxu0 %v3845_v24 }
 0x252   : > { %v18893_v58 = vpop.f32.mrf.mxu0  ;;  %15294 = vmatmul.mubr.msk.f32.gmra.mxu0 %vm594_vm1, %v18573_v35  ;;  %15356 = vmatpush3.msra.mxu1 %v3385_v21 }
 0x253   : > { %23244 = vst [vmem:[#allocation62_spill] sm:$0xff] %v18893_v58  ;;  %15197 = vmatmul.mubr.msk.f32.gmra.mxu1 %vm594_vm1, %v18531_v19  ;;  %15296 = vmatprep.mubr.msk.f32.mxu0 %vm594_vm1, %v18582_v38 }
 0x254   : > { %15199 = vmatprep.mubr.msk.f32.mxu1 %vm594_vm1, %v18538_v23  ;;  %v18905_v40 = vpop.f32.mrf.mxu0  ;;  %15441 = vmatprep.subr.mxu0 %v3844_v36 }
 0x255   : > { %15442 = vmatpush3.msra.mxu0 %v3844_v36  ;;  %15517 = vmatprep.subr.mxu1 %v18897_v8 }
 0x256   : > { %v18908_v24 = vpop.f32.mrf.mxu0  ;;  %15297 = vmatmul.mubr.msk.f32.gmra.mxu0 %vm594_vm1, %v18590_v39  ;;  %15443 = vmatprep.subr.mxu0 %v3843_v32 }
 0x257   : > { %15200 = vmatmul.mubr.msk.f32.gmra.mxu1 %vm594_vm1, %v18545_v26  ;;  %15299 = vmatprep.mubr.msk.f32.mxu0 %vm594_vm1, %v18597_v41 }
 0x258   : > { %15202 = vmatprep.mubr.msk.f32.mxu1 %vm594_vm1, %v18552_v28  ;;  %v18918_v21 = vpop.f32.mrf.mxu0  ;;  %15444 = vmatpush3.msra.mxu0 %v3843_v32 }
 0x25a   : > { %v18920_v36 = vpop.f32.mrf.mxu0  ;;  %15300 = vmatmul.mubr.msk.f32.gmra.mxu0 %vm594_vm1, %v18604_v42 }
 0x25b   : > { %15203 = vmatmul.mubr.msk.f32.gmra.mxu1 %vm594_vm1, %v18559_v31  ;;  %15302 = vmatprep.mubr.msk.f32.mxu0 %vm594_vm1, %v18611_v43 }
 0x25c   : > { %15205 = vmatprep.mubr.msk.f32.mxu1 %vm594_vm1, %v18566_v34  ;;  %v18930_v58 = vpop.f32.mrf.mxu0 }
 0x25e   : > { %v18932_v37 = vpop.f32.mrf.mxu0  ;;  %15303 = vmatmul.mubr.msk.f32.gmra.mxu0 %vm594_vm1, %v18618_v44 }
 0x25f   : > { %15206 = vmatmul.mubr.msk.f32.gmra.mxu1 %vm594_vm1, %v18573_v35  ;;  %15305 = vmatprep.mubr.msk.f32.mxu0 %vm594_vm1, %v18625_v45 }
 0x260   : > { %15208 = vmatprep.mubr.msk.f32.mxu1 %vm594_vm1, %v18582_v38  ;;  %v18942_v32 = vpop.f32.mrf.mxu0 }
 0x262   : > { %v18944_v33 = vpop.f32.mrf.mxu0  ;;  %15306 = vmatmul.mubr.msk.f32.gmra.mxu0 %vm594_vm1, %v18632_v46 }
 0x263   : > { %15209 = vmatmul.mubr.msk.f32.gmra.mxu1 %vm594_vm1, %v18590_v39  ;;  %15308 = vmatprep.mubr.msk.f32.mxu0 %vm594_vm1, %v18639_v47 }
 0x264   : > { %15211 = vmatprep.mubr.msk.f32.mxu1 %vm594_vm1, %v18597_v41  ;;  %v18954_v29 = vpop.f32.mrf.mxu0 }
 0x266   : > { %v18956_v25 = vpop.f32.mrf.mxu0  ;;  %15309 = vmatmul.mubr.msk.f32.gmra.mxu0 %vm594_vm1, %v18646_v48 }
 0x267   : > { %15212 = vmatmul.mubr.msk.f32.gmra.mxu1 %vm594_vm1, %v18604_v42  ;;  %15311 = vmatprep.mubr.msk.f32.mxu0 %vm594_vm1, %v18653_v49 }
 0x268   : > { %15214 = vmatprep.mubr.msk.f32.mxu1 %vm594_vm1, %v18611_v43  ;;  %v18966_v18 = vpop.f32.mrf.mxu0  ;;  %v1396_v43 = vlaneseq }
 0x26a   : > { %v18968_v16 = vpop.f32.mrf.mxu0  ;;  %15312 = vmatmul.mubr.msk.f32.gmra.mxu0 %vm594_vm1, %v18660_v50  ;;  %v1397_v42 = vshrl.u32 %v1396_v43, 7 }
 0x26b   : > { %15215 = vmatmul.mubr.msk.f32.gmra.mxu1 %vm594_vm1, %v18618_v44  ;;  %15314 = vmatprep.mubr.msk.f32.mxu0 %vm594_vm1, %v18667_v51 }
 0x26c   : > { %15217 = vmatprep.mubr.msk.f32.mxu1 %vm594_vm1, %v18625_v45  ;;  %v18978_v6 = vpop.f32.mrf.mxu0  ;;  %v1398_v41 = vsub.s32 0, %v1397_v42 }
 0x26e   : > { %v18980_v30 = vpop.f32.mrf.mxu0  ;;  %15315 = vmatmul.mubr.msk.f32.gmra.mxu0 %vm594_vm1, %v18674_v52 }
 0x26f   : > { %15218 = vmatmul.mubr.msk.f32.gmra.mxu1 %vm594_vm1, %v18632_v46  ;;  %15317 = vmatprep.mubr.msk.f32.mxu0 %vm594_vm1, %v18681_v53 }
 0x270   : > { %15220 = vmatprep.mubr.msk.f32.mxu1 %vm594_vm1, %v18639_v47  ;;  %v18990_v20 = vpop.f32.mrf.mxu0 }
 0x272   : > { %v18992_v44 = vpop.f32.mrf.mxu0  ;;  %15318 = vmatmul.mubr.msk.f32.gmra.mxu0 %vm594_vm1, %v18688_v54 }
 0x273   : > { %15221 = vmatmul.mubr.msk.f32.gmra.mxu1 %vm594_vm1, %v18646_v48  ;;  %15320 = vmatprep.mubr.msk.f32.mxu0 %vm594_vm1, %v18695_v55 }
 0x274   : > { %15223 = vmatprep.mubr.msk.f32.mxu1 %vm594_vm1, %v18653_v49  ;;  %v19002_v46 = vpop.f32.mrf.mxu0 }
 0x276   : > { %v19004_v45 = vpop.f32.mrf.mxu0  ;;  %15321 = vmatmul.mubr.msk.f32.gmra.mxu0 %vm594_vm1, %v18702_v62 }
 0x277   : > { %15224 = vmatmul.mubr.msk.f32.gmra.mxu1 %vm594_vm1, %v18660_v50  ;;  %15323 = vmatprep.mubr.msk.f32.mxu0 %vm594_vm1, %v18709_v56 }
 0x278   : > { %15226 = vmatprep.mubr.msk.f32.mxu1 %vm594_vm1, %v18667_v51  ;;  %v19014_v48 = vpop.f32.mrf.mxu0 }
 0x27a   : > { %v19016_v47 = vpop.f32.mrf.mxu0  ;;  %15324 = vmatmul.mubr.msk.f32.gmra.mxu0 %vm594_vm1, %v18716_v13 }
 0x27b   : > { %15227 = vmatmul.mubr.msk.f32.gmra.mxu1 %vm594_vm1, %v18674_v52  ;;  %15326 = vmatprep.mubr.msk.f32.mxu0 %vm594_vm1, %v18723_v60 }
 0x27c   : > { %15229 = vmatprep.mubr.msk.f32.mxu1 %vm594_vm1, %v18681_v53  ;;  %v19026_v50 = vpop.f32.mrf.mxu0  ;;  %v19044_v53 = vld [vmem:[#allocation9 + $0x1f8] sm:$0xff] }
 0x27d   : > { %15605 = vmatprep.subr.mxu0 %v19044_v53 }
 0x27e   : > { %v19028_v49 = vpop.f32.mrf.mxu0  ;;  %15327 = vmatmul.mubr.msk.f32.gmra.mxu0 %vm594_vm1, %v18730_v63 }
 0x27f   : > { %15230 = vmatmul.mubr.msk.f32.gmra.mxu1 %vm594_vm1, %v18688_v54  ;;  %15329 = vmatprep.mubr.msk.f32.mxu0 %vm594_vm1, %v18737_v12 }
 0x280   : > { %15232 = vmatprep.mubr.msk.f32.mxu1 %vm594_vm1, %v18695_v55  ;;  %v19038_v52 = vpop.f32.mrf.mxu0 }
 0x282   : > { %v19040_v51 = vpop.f32.mrf.mxu0  ;;  %15330 = vmatmul.mubr.msk.f32.gmra.mxu0 %vm594_vm1, %v18744_v2 }
 0x283   : > { %15233 = vmatmul.mubr.msk.f32.gmra.mxu1 %vm594_vm1, %v18702_v62  ;;  %15332 = vmatprep.mubr.msk.f32.mxu0 %vm594_vm1, %v18751_v4 }
 0x284   : > { %15235 = vmatprep.mubr.msk.f32.mxu1 %vm594_vm1, %v18709_v56  ;;  %v19052_v54 = vpop.f32.mrf.mxu0 }
 0x286   : > { %v19055_v55 = vpop.f32.mrf.mxu0  ;;  %15333 = vmatmul.mubr.msk.f32.gmra.mxu0 %vm594_vm1, %v18758_v57 }
 0x287   : > { %15236 = vmatmul.mubr.msk.f32.gmra.mxu1 %vm594_vm1, %v18716_v13  ;;  %15335 = vmatprep.mubr.msk.f32.mxu0 %vm594_vm1, %v18793_v27 }
 0x288   : > { %15238 = vmatprep.mubr.msk.f32.mxu1 %vm594_vm1, %v18723_v60  ;;  %v1676_v56 = vpop.f32.mrf.mxu0 }
 0x28a   : > { %v14985_v62 = vpop.f32.mrf.mxu0  ;;  %15336 = vmatmul.mubr.msk.f32.gmra.mxu0 %vm594_vm1, %v18804_v10 }
 0x28b   : > { %15239 = vmatmul.mubr.msk.f32.gmra.mxu1 %vm594_vm1, %v18730_v63  ;;  %15338 = vmatprep.mubr.msk.f32.mxu0 %vm594_vm1, %v18811_v11 }
 0x28c   : > { %15241 = vmatprep.mubr.msk.f32.mxu1 %vm594_vm1, %v18737_v12  ;;  %v1686_v13 = vpop.f32.mrf.mxu0 }
 0x28d   : > { %v1392_v43 = vpop.f32.mrf.mxu1 }
 0x28e   : > { %v14988_v39 = vpop.f32.mrf.mxu0  ;;  %15339 = vmatmul.mubr.msk.f32.gmra.mxu0 %vm594_vm1, %v18822_v22  ;;  %v19081_v38 = vrot.slane %v1392_v43, %v1398_v41 }
 0x28f   : > { %15242 = vmatmul.mubr.msk.f32.gmra.mxu1 %vm594_vm1, %v18744_v2  ;;  %15445 = vmatprep.mubr.msk.f32.mxu0 %vm594_vm1, %v18464_v59  ;;  %v14884_v60 = vpop.f32.mrf.mxu1 }
 0x290   : > { %15244 = vmatprep.mubr.msk.f32.mxu1 %vm594_vm1, %v18751_v4  ;;  %v1696_v63 = vpop.f32.mrf.mxu0  ;;  %23245 = vst [vmem:[#allocation63_spill] sm:$0xff] %v19081_v38  ;;  %v19097_v41 = vadd.f32 %v18905_v40, %v19081_v38  ;;  %v19101_v60 = vadd.f32 %v18918_v21, %v19081_v38  ;;  %v19105_v2 = vadd.f32 %v18908_v24, %v19081_v38 }
 0x291   : > { %v19117_v40 = vadd.f32 %v18920_v36, %v19081_v38  ;;  %v19121_v21 = vadd.f32 %v18942_v32, %v19081_v38  ;;  %v19125_v24 = vadd.f32 %v18932_v37, %v19081_v38  ;;  %v19131_v43 = vadd.f32 %v18954_v29, %v19081_v38 }
 0x292   : > { %v19083_v12 = vpop.f32.mrf.mxu0  ;;  %15446 = vmatmul.mubr.msk.f32.vlgmr.msra.gmra.mxu0 %vm594_vm1, %v18472_v61  ;;  %23246 = vst [vmem:[#allocation64_spill] sm:$0xff] %v19097_v41  ;;  %23247 = vst [vmem:[#allocation65_spill] sm:$0xff] %v19101_v60  ;;  %v19139_v36 = vadd.f32 %v18966_v18, %v19081_v38  ;;  %v19143_v32 = vadd.f32 %v18956_v25, %v19081_v38  ;;  %v19151_v29 = vadd.f32 %v18978_v6, %v19081_v38 }
 0x293   : > { %15245 = vmatmul.mubr.msk.f32.gmra.mxu1 %vm594_vm1, %v18758_v57  ;;  %15448 = vmatprep.mubr.msk.f32.mxu0 %vm594_vm1, %v18477_v1  ;;  %23248 = vst [vmem:[#allocation66_spill] sm:$0xff] %v19105_v2  ;;  %v19113_v57 = vadd.f32 %v18930_v58, %v19081_v38  ;;  %23250 = vst [vmem:[#allocation68_spill] sm:$0xff] %v19117_v40  ;;  %v19135_v58 = vadd.f32 %v18944_v33, %v19081_v38  ;;  %v19776_v2 = vld [vmem:[%s18190_s17 + $0xa8] sm:$0xff] }
 0x294   : > { %15247 = vmatprep.mubr.msk.f32.mxu1 %vm594_vm1, %v18793_v27  ;;  %v19091_v42 = vpop.f32.mrf.mxu0  ;;  %23251 = vst [vmem:[#allocation69_spill] sm:$0xff] %v19121_v21  ;;  %23252 = vst [vmem:[#allocation70_spill] sm:$0xff] %v19125_v24  ;;  %v19155_v33 = vadd.f32 %v18968_v16, %v19081_v38  ;;  %v19159_v18 = vadd.f32 %v18990_v20, %v19081_v38  ;;  %v19163_v25 = vadd.f32 %v18980_v30, %v19081_v38  ;;  %v19754_v24 = vld [vmem:[%s18190_s17 + $0x98] sm:$0xff] }
 0x295   : > { %23249 = vst [vmem:[#allocation67_spill] sm:$0xff] %v19113_v57  ;;  %23253 = vst [vmem:[#allocation71_spill] sm:$0xff] %v19131_v43  ;;  %v19173_v6 = vadd.f32 %v18992_v44, %v19081_v38  ;;  %v19177_v16 = vadd.f32 %v19014_v48, %v19081_v38  ;;  %v19181_v20 = vadd.f32 %v19004_v45, %v19081_v38  ;;  %15606 = vmatpush3.msra.mxu0 %v19044_v53 }
 0x296   : > { %v19107_v4 = vpop.f32.mrf.mxu0  ;;  %15449 = vmatmul.mubr.msk.f32.gmra.mxu0 %vm594_vm1, %v18483_v3  ;;  %23254 = vst [vmem:[#allocation72_spill] sm:$0xff] %v19135_v58  ;;  %23255 = vst [vmem:[#allocation73_spill] sm:$0xff] %v19139_v36  ;;  %v19193_v44 = vadd.f32 %v19016_v47, %v19081_v38  ;;  %v19197_v48 = vadd.f32 %v19038_v52, %v19081_v38  ;;  %v19201_v45 = vadd.f32 %v19028_v49, %v19081_v38 }
 0x297   : > { %15248 = vmatmul.mubr.msk.f32.gmra.mxu1 %vm594_vm1, %v18804_v10  ;;  %23256 = vst [vmem:[#allocation74_spill] sm:$0xff] %v19143_v32  ;;  %23257 = vst [vmem:[#allocation75_spill] sm:$0xff] %v19151_v29  ;;  %15451 = vmatprep.mubr.msk.f32.mxu0 %vm594_vm1, %v18488_v5  ;;  %v19207_v37 = vadd.f32 %v19052_v54, %v19081_v38  ;;  %v19214_v47 = vadd.f32 %v1676_v56, %v19081_v38 }
 0x298   : > { %15250 = vmatprep.mubr.msk.f32.mxu1 %vm594_vm1, %v18811_v11  ;;  %v19147_v10 = vpop.f32.mrf.mxu0  ;;  %23258 = vst [vmem:[#allocation76_spill] sm:$0xff] %v19155_v33  ;;  %23259 = vst [vmem:[#allocation77_spill] sm:$0xff] %v19159_v18  ;;  %v19169_v11 = vadd.f32 %v19002_v46, %v19081_v38  ;;  %v19189_v46 = vadd.f32 %v19026_v50, %v19081_v38  ;;  %v19211_v50 = vadd.f32 %v19040_v51, %v19081_v38  ;;  %v23292_v18 = vld [vmem:[#allocation38_spill] sm:$0xff]  ;;  %v5253_v33 = vld [vmem:[#allocation9 + $0x220] sm:$0xff] }
 0x299   : > { %23260 = vst [vmem:[#allocation78_spill] sm:$0xff] %v19163_v25  ;;  %23262 = vst [vmem:[#allocation80_spill] sm:$0xff] %v19173_v6  ;;  %v19218_v52 = vadd.f32 %v19055_v55, %v19081_v38  ;;  %v19228_v54 = vadd.f32 %v1686_v13, %v19081_v38  ;;  %v19231_v51 = vadd.f32 %v14988_v39, %v19081_v38  ;;  %v4483_v55 = vld [vmem:[#allocation9 + $0x1b0] sm:$0xff]  ;;  %v4482_v13 = vld [vmem:[#allocation9 + $0x1a8] sm:$0xff] }
 0x29a   : > { %23261 = vst [vmem:[#allocation79_spill] sm:$0xff] %v19169_v11  ;;  %23263 = vst [vmem:[#allocation81_spill] sm:$0xff] %v19177_v16  ;;  %v19183_v30 = vpop.f32.mrf.mxu0  ;;  %15452 = vmatmul.mubr.msk.f32.gmra.mxu0 %vm594_vm1, %v18493_v7  ;;  %v19234_v56 = vadd.f32 %v1696_v63, %v19081_v38 }
 0x29b   : > { %23264 = vst [vmem:[#allocation82_spill] sm:$0xff] %v19181_v20  ;;  %23265 = vst [vmem:[#allocation83_spill] sm:$0xff] %v19189_v46  ;;  %15251 = vmatmul.mubr.msk.f32.gmra.mxu1 %vm594_vm1, %v18822_v22  ;;  %v19225_v22 = vadd.f32 %v14985_v62, %v19081_v38  ;;  %15454 = vmatprep.mubr.msk.f32.mxu0 %vm594_vm1, %v18498_v9  ;;  %v23290_v20 = vld [vmem:[#allocation36_spill] sm:$0xff] }
 0x29c   : > { %23266 = vst [vmem:[#allocation84_spill] sm:$0xff] %v19193_v44  ;;  %23267 = vst [vmem:[#allocation85_spill] sm:$0xff] %v19197_v48  ;;  %15357 = vmatprep.mubr.msk.f32.mxu1 %vm594_vm1, %v18464_v59  ;;  %v19222_v49 = vpop.f32.mrf.mxu0  ;;  %v19826_v38 = vld [vmem:[%s18190_s17 + $0xc8] sm:$0xff] }
 0x29d   : > { %23268 = vst [vmem:[#allocation86_spill] sm:$0xff] %v19201_v45  ;;  %23269 = vst [vmem:[#allocation87_spill] sm:$0xff] %v19207_v37  ;;  %v4863_v37 = vld [vmem:[#allocation9 + $0x1c0] sm:$0xff] }
 0x29e   : > { %23270 = vst [vmem:[#allocation88_spill] sm:$0xff] %v19211_v50  ;;  %23271 = vst [vmem:[#allocation89_spill] sm:$0xff] %v19214_v47  ;;  %v19238_v47 = vpop.f32.mrf.mxu0  ;;  %15455 = vmatmul.mubr.msk.f32.gmra.mxu0 %vm594_vm1, %v18503_v14  ;;  %v15007_v59 = vpop.f32.mrf.mxu1  ;;  %v23284_v50 = vld [vmem:[#allocation30_spill] sm:$0xff] }
 0x29f   : > { %23272 = vst [vmem:[#allocation90_spill] sm:$0xff] %v19218_v52  ;;  %23273 = vst [vmem:[#allocation91_spill] sm:$0xff] %v19225_v22  ;;  %15358 = vmatmul.mubr.msk.f32.vlgmr.msra.gmra.mxu1 %vm594_vm1, %v18472_v61  ;;  %15457 = vmatprep.mubr.msk.f32.mxu0 %vm594_vm1, %v18512_v15  ;;  %v4869_v61 = vld [vmem:[#allocation9 + $0x1f0] sm:$0xff]  ;;  %v4864_v22 = vld [vmem:[#allocation9 + $0x1c8] sm:$0xff] }
 0x2a0   : > { %23274 = vst [vmem:[#allocation92_spill] sm:$0xff] %v19228_v54  ;;  %23275 = vst [vmem:[#allocation93_spill] sm:$0xff] %v19231_v51  ;;  %15518 = vmatpush3.msra.mxu1 %v18897_v8  ;;  %15360 = vmatprep.mubr.msk.f32.mxu1 %vm594_vm1, %v18477_v1  ;;  %v19249_v39 = vpop.f32.mrf.mxu0  ;;  %v1828_v62 = vpop.f32.mrf.mxu1  ;;  %v4481_v1 = vld [vmem:[#allocation9 + $0x1a0] sm:$0xff]  ;;  %v23280_v54 = vld [vmem:[#allocation26_spill] sm:$0xff] }
 0x2a1   : > { %23276 = vst [vmem:[#allocation94_spill] sm:$0xff] %v19234_v56  ;;  %2068 = vst [vmem:[#allocation2 + $0x8] sm:$0xff] %v15007_v59  ;;  %15519 = vmatprep.subr.mxu1 %v4483_v55  ;;  %15607 = vmatprep.subr.mxu0 %v4869_v61  ;;  %v23282_v52 = vld [vmem:[#allocation28_spill] sm:$0xff] }
 0x2a2   : > { %2067 = vst [vmem:[#allocation2] sm:$0xff] %v1828_v62  ;;  %15520 = vmatpush3.msra.mxu1 %v4483_v55  ;;  %v19252_v63 = vpop.f32.mrf.mxu0  ;;  %15458 = vmatmul.mubr.msk.f32.gmra.mxu0 %vm594_vm1, %v18517_v17  ;;  %23308 = vst [vmem:[#allocation26_spill] sm:$0xff] %v19776_v2 }
 0x2a3   : > { %v15010_v59 = vpop.f32.mrf.mxu1  ;;  %15361 = vmatmul.mubr.msk.f32.gmra.mxu1 %vm594_vm1, %v18483_v3  ;;  %15460 = vmatprep.mubr.msk.f32.mxu0 %vm594_vm1, %v18524_v0  ;;  %v4480_v3 = vld [vmem:[#allocation9 + $0x198] sm:$0xff]  ;;  %23311 = vst [vmem:[#allocation28_spill] sm:$0xff] %v19826_v38 }
 0x2a4   : > { %2070 = vst [vmem:[#allocation2 + $0x18] sm:$0xff] %v15010_v59  ;;  %15363 = vmatprep.mubr.msk.f32.mxu1 %vm594_vm1, %v18488_v5  ;;  %v19262_v53 = vpop.f32.mrf.mxu0  ;;  %15521 = vmatprep.subr.mxu1 %v4482_v13  ;;  %v4479_v59 = vld [vmem:[#allocation9 + $0x190] sm:$0xff] }
 0x2a5   : > { %v1838_v8 = vpop.f32.mrf.mxu1  ;;  %15522 = vmatpush3.msra.mxu1 %v4482_v13  ;;  %15608 = vmatpush3.msra.mxu0 %v4869_v61 }
 0x2a6   : > { %2069 = vst [vmem:[#allocation2 + $0x10] sm:$0xff] %v1838_v8  ;;  %v19264_v55 = vpop.f32.mrf.mxu0  ;;  %15461 = vmatmul.mubr.msk.f32.gmra.mxu0 %vm594_vm1, %v18531_v19  ;;  %15523 = vmatprep.subr.mxu1 %v4481_v1 }
 0x2a7   : > { %v15013_v62 = vpop.f32.mrf.mxu1  ;;  %15364 = vmatmul.mubr.msk.f32.gmra.mxu1 %vm594_vm1, %v18493_v7  ;;  %15463 = vmatprep.mubr.msk.f32.mxu0 %vm594_vm1, %v18538_v23  ;;  %v4868_v7 = vld [vmem:[#allocation9 + $0x1e8] sm:$0xff] }
 0x2a8   : > { %2072 = vst [vmem:[#allocation2 + $0x28] sm:$0xff] %v15013_v62  ;;  %15366 = vmatprep.mubr.msk.f32.mxu1 %vm594_vm1, %v18498_v9  ;;  %v19274_v5 = vpop.f32.mrf.mxu0  ;;  %15524 = vmatpush3.msra.mxu1 %v4481_v1  ;;  %v4478_v9 = vld [vmem:[#allocation9 + $0x188] sm:$0xff] }
 0x2a9   : > { %v1848_v13 = vpop.f32.mrf.mxu1  ;;  %15525 = vmatprep.subr.mxu1 %v4480_v3  ;;  %15609 = vmatprep.subr.mxu0 %v4868_v7 }
 0x2aa   : > { %2071 = vst [vmem:[#allocation2 + $0x20] sm:$0xff] %v1848_v13  ;;  %v19276_v8 = vpop.f32.mrf.mxu0  ;;  %15464 = vmatmul.mubr.msk.f32.gmra.mxu0 %vm594_vm1, %v18545_v26  ;;  %15526 = vmatpush3.msra.mxu1 %v4480_v3  ;;  %v4867_v13 = vld [vmem:[#allocation9 + $0x1e0] sm:$0xff] }
 0x2ab   : > { %v15016_v56 = vpop.f32.mrf.mxu1  ;;  %15367 = vmatmul.mubr.msk.f32.gmra.mxu1 %vm594_vm1, %v18503_v14  ;;  %15466 = vmatprep.mubr.msk.f32.mxu0 %vm594_vm1, %v18552_v28  ;;  %v4477_v14 = vld [vmem:[#allocation9 + $0x180] sm:$0xff] }
 0x2ac   : > { %2074 = vst [vmem:[#allocation2 + $0x38] sm:$0xff] %v15016_v56  ;;  %15369 = vmatprep.mubr.msk.f32.mxu1 %vm594_vm1, %v18512_v15  ;;  %v19286_v61 = vpop.f32.mrf.mxu0  ;;  %15527 = vmatprep.subr.mxu1 %v4479_v59 }
 0x2ad   : > { %v1858_v1 = vpop.f32.mrf.mxu1  ;;  %15528 = vmatpush3.msra.mxu1 %v4479_v59  ;;  %15610 = vmatpush3.msra.mxu0 %v4868_v7 }
 0x2ae   : > { %2073 = vst [vmem:[#allocation2 + $0x30] sm:$0xff] %v1858_v1  ;;  %v19288_v3 = vpop.f32.mrf.mxu0  ;;  %15467 = vmatmul.mubr.msk.f32.gmra.mxu0 %vm594_vm1, %v18559_v31  ;;  %15529 = vmatprep.subr.mxu1 %v4478_v9 }
 0x2af   : > { %v15019_v62 = vpop.f32.mrf.mxu1  ;;  %15370 = vmatmul.mubr.msk.f32.gmra.mxu1 %vm594_vm1, %v18517_v17  ;;  %15469 = vmatprep.mubr.msk.f32.mxu0 %vm594_vm1, %v18566_v34  ;;  %v19304_v17 = vld [vmem:[#allocation9 + $0x238] sm:$0xff] }
 0x2b0   : > { %2076 = vst [vmem:[#allocation2 + $0x48] sm:$0xff] %v15019_v62  ;;  %15372 = vmatprep.mubr.msk.f32.mxu1 %vm594_vm1, %v18524_v0  ;;  %v19298_v15 = vpop.f32.mrf.mxu0  ;;  %15530 = vmatpush3.msra.mxu1 %v4478_v9  ;;  %v23277_v0 = vld [vmem:[#allocation23_spill] sm:$0xff]  ;;  %v4866_v9 = vld [vmem:[#allocation9 + $0x1d8] sm:$0xff] }
 0x2b1   : > { %v1868_v56 = vpop.f32.mrf.mxu1  ;;  %15531 = vmatprep.subr.mxu1 %v4477_v14  ;;  %15611 = vmatprep.subr.mxu0 %v4867_v13 }
 0x2b2   : > { %2075 = vst [vmem:[#allocation2 + $0x40] sm:$0xff] %v1868_v56  ;;  %v19300_v59 = vpop.f32.mrf.mxu0  ;;  %15470 = vmatmul.mubr.msk.f32.gmra.mxu0 %vm594_vm1, %v18573_v35  ;;  %15532 = vmatpush3.msra.mxu1 %v4477_v14  ;;  %v23278_v56 = vld [vmem:[#allocation24_spill] sm:$0xff] }
 0x2b3   : > { %v15022_v1 = vpop.f32.mrf.mxu1  ;;  %15373 = vmatmul.mubr.msk.f32.gmra.mxu1 %vm594_vm1, %v18531_v19  ;;  %15472 = vmatprep.mubr.msk.f32.mxu0 %vm594_vm1, %v23277_v0  ;;  %v4865_v19 = vld [vmem:[#allocation9 + $0x1d0] sm:$0xff]  ;;  %23305 = vst [vmem:[#allocation24_spill] sm:$0xff] %v19754_v24 }
 0x2b4   : > { %2078 = vst [vmem:[#allocation2 + $0x58] sm:$0xff] %v15022_v1  ;;  %15375 = vmatprep.mubr.msk.f32.mxu1 %vm594_vm1, %v18538_v23  ;;  %v19312_v7 = vpop.f32.mrf.mxu0  ;;  %15693 = vmatprep.subr.mxu1 %v19304_v17  ;;  %v23279_v23 = vld [vmem:[#allocation25_spill] sm:$0xff] }
 0x2b5   : > { %v1878_v62 = vpop.f32.mrf.mxu1  ;;  %15612 = vmatpush3.msra.mxu0 %v4867_v13 }
 0x2b6   : > { %2077 = vst [vmem:[#allocation2 + $0x50] sm:$0xff] %v1878_v62  ;;  %v19315_v14 = vpop.f32.mrf.mxu0  ;;  %15473 = vmatmul.mubr.msk.f32.gmra.mxu0 %vm594_vm1, %v23278_v56  ;;  %15613 = vmatprep.subr.mxu0 %v4866_v9 }
 0x2b7   : > { %v15025_v51 = vpop.f32.mrf.mxu1  ;;  %15376 = vmatmul.mubr.msk.f32.gmra.mxu1 %vm594_vm1, %v18545_v26  ;;  %15475 = vmatprep.mubr.msk.f32.mxu0 %vm594_vm1, %v23279_v23 }
 0x2b8   : > { %2080 = vst [vmem:[#allocation2 + $0x68] sm:$0xff] %v15025_v51  ;;  %15378 = vmatprep.mubr.msk.f32.mxu1 %vm594_vm1, %v18552_v28  ;;  %v19325_v13 = vpop.f32.mrf.mxu0  ;;  %15614 = vmatpush3.msra.mxu0 %v4866_v9  ;;  %v23281_v51 = vld [vmem:[#allocation27_spill] sm:$0xff] }
 0x2b9   : > { %v1888_v1 = vpop.f32.mrf.mxu1  ;;  %15615 = vmatprep.subr.mxu0 %v4865_v19 }
 0x2ba   : > { %2079 = vst [vmem:[#allocation2 + $0x60] sm:$0xff] %v1888_v1  ;;  %v19327_v62 = vpop.f32.mrf.mxu0  ;;  %15476 = vmatmul.mubr.msk.f32.gmra.mxu0 %vm594_vm1, %v23280_v54 }
 0x2bb   : > { %v15028_v26 = vpop.f32.mrf.mxu1  ;;  %15379 = vmatmul.mubr.msk.f32.gmra.mxu1 %vm594_vm1, %v18559_v31  ;;  %15478 = vmatprep.mubr.msk.f32.mxu0 %vm594_vm1, %v23281_v51 }
 0x2bc   : > { %2082 = vst [vmem:[#allocation2 + $0x78] sm:$0xff] %v15028_v26  ;;  %15381 = vmatprep.mubr.msk.f32.mxu1 %vm594_vm1, %v18566_v34  ;;  %v19337_v28 = vpop.f32.mrf.mxu0  ;;  %15616 = vmatpush3.msra.mxu0 %v4865_v19  ;;  %v23283_v26 = vld [vmem:[#allocation29_spill] sm:$0xff] }
 0x2bd   : > { %v1898_v9 = vpop.f32.mrf.mxu1  ;;  %15617 = vmatprep.subr.mxu0 %v4864_v22 }
 0x2be   : > { %2081 = vst [vmem:[#allocation2 + $0x70] sm:$0xff] %v1898_v9  ;;  %v19339_v1 = vpop.f32.mrf.mxu0  ;;  %15479 = vmatmul.mubr.msk.f32.gmra.mxu0 %vm594_vm1, %v23282_v52 }
 0x2bf   : > { %v15031_v31 = vpop.f32.mrf.mxu1  ;;  %15382 = vmatmul.mubr.msk.f32.gmra.mxu1 %vm594_vm1, %v18573_v35  ;;  %15481 = vmatprep.mubr.msk.f32.mxu0 %vm594_vm1, %v23283_v26  ;;  %v23285_v35 = vld [vmem:[#allocation31_spill] sm:$0xff] }
 0x2c0   : > { %2084 = vst [vmem:[#allocation2 + $0x88] sm:$0xff] %v15031_v31  ;;  %15384 = vmatprep.mubr.msk.f32.mxu1 %vm594_vm1, %v23277_v0  ;;  %v19349_v34 = vpop.f32.mrf.mxu0  ;;  %15618 = vmatpush3.msra.mxu0 %v4864_v22 }
 0x2c1   : > { %v1908_v19 = vpop.f32.mrf.mxu1  ;;  %15619 = vmatprep.subr.mxu0 %v4863_v37 }
 0x2c2   : > { %2083 = vst [vmem:[#allocation2 + $0x80] sm:$0xff] %v1908_v19  ;;  %v19351_v9 = vpop.f32.mrf.mxu0  ;;  %15482 = vmatmul.mubr.msk.f32.gmra.mxu0 %vm594_vm1, %v23284_v50  ;;  %v23286_v19 = vld [vmem:[#allocation32_spill] sm:$0xff] }
 0x2c3   : > { %v15034_v48 = vpop.f32.mrf.mxu1  ;;  %15385 = vmatmul.mubr.msk.f32.gmra.mxu1 %vm594_vm1, %v23278_v56  ;;  %15484 = vmatprep.mubr.msk.f32.mxu0 %vm594_vm1, %v23285_v35  ;;  %v23287_v56 = vld [vmem:[#allocation33_spill] sm:$0xff] }
 0x2c4   : > { %2086 = vst [vmem:[#allocation2 + $0x98] sm:$0xff] %v15034_v48  ;;  %15387 = vmatprep.mubr.msk.f32.mxu1 %vm594_vm1, %v23279_v23  ;;  %v19361_v22 = vpop.f32.mrf.mxu0  ;;  %15620 = vmatpush3.msra.mxu0 %v4863_v37 }
 0x2c5   : > { %v1918_v0 = vpop.f32.mrf.mxu1 }
 0x2c6   : > { %2085 = vst [vmem:[#allocation2 + $0x90] sm:$0xff] %v1918_v0  ;;  %v19363_v31 = vpop.f32.mrf.mxu0  ;;  %15485 = vmatmul.mubr.msk.f32.gmra.mxu0 %vm594_vm1, %v23286_v19  ;;  %v23288_v0 = vld [vmem:[#allocation34_spill] sm:$0xff] }
 0x2c7   : > { %v15037_v45 = vpop.f32.mrf.mxu1  ;;  %15388 = vmatmul.mubr.msk.f32.gmra.mxu1 %vm594_vm1, %v23280_v54  ;;  %15487 = vmatprep.mubr.msk.f32.mxu0 %vm594_vm1, %v23287_v56  ;;  %v23289_v54 = vld [vmem:[#allocation35_spill] sm:$0xff] }
 0x2c8   : > { %2088 = vst [vmem:[#allocation2 + $0xa8] sm:$0xff] %v15037_v45  ;;  %15390 = vmatprep.mubr.msk.f32.mxu1 %vm594_vm1, %v23281_v51  ;;  %v19373_v48 = vpop.f32.mrf.mxu0 }
 0x2c9   : > { %v1928_v37 = vpop.f32.mrf.mxu1 }
 0x2ca   : > { %2087 = vst [vmem:[#allocation2 + $0xa0] sm:$0xff] %v1928_v37  ;;  %v19375_v23 = vpop.f32.mrf.mxu0  ;;  %15488 = vmatmul.mubr.msk.f32.gmra.mxu0 %vm594_vm1, %v23288_v0 }
 0x2cb   : > { %v15040_v46 = vpop.f32.mrf.mxu1  ;;  %15391 = vmatmul.mubr.msk.f32.gmra.mxu1 %vm594_vm1, %v23282_v52  ;;  %15490 = vmatprep.mubr.msk.f32.mxu0 %vm594_vm1, %v23289_v54  ;;  %v23291_v52 = vld [vmem:[#allocation37_spill] sm:$0xff] }
 0x2cc   : > { %2090 = vst [vmem:[#allocation2 + $0xb8] sm:$0xff] %v15040_v46  ;;  %15393 = vmatprep.mubr.msk.f32.mxu1 %vm594_vm1, %v23283_v26  ;;  %v19385_v45 = vpop.f32.mrf.mxu0 }
 0x2cd   : > { %v2411_v51 = vld [vmem:[#allocation2 + $0x96] sm:$0xff]  ;;  %v1938_v37 = vpop.f32.mrf.mxu1 }
 0x2ce   : > { %v2441_v44 = vadd.f32 %v2411_v51, %v19091_v42  ;;  %2089 = vst [vmem:[#allocation2 + $0xb0] sm:$0xff] %v1938_v37  ;;  %v15140_v16 = vpop.f32.mrf.mxu0  ;;  %15491 = vmatmul.mubr.msk.f32.gmra.mxu0 %vm594_vm1, %v23290_v20 }
 0x2cf   : > { %v15043_v11 = vpop.f32.mrf.mxu1  ;;  %15394 = vmatmul.mubr.msk.f32.gmra.mxu1 %vm594_vm1, %v23284_v50  ;;  %15493 = vmatprep.mubr.msk.f32.mxu0 %vm594_vm1, %v23291_v52 }
 0x2d0   : > { %2471 = vst [vmem:[#allocation2 + $0x96] sm:$0xff] %v2441_v44  ;;  %2092 = vst [vmem:[#allocation2 + $0xc8] sm:$0xff] %v15043_v11  ;;  %15396 = vmatprep.mubr.msk.f32.mxu1 %vm594_vm1, %v23285_v35  ;;  %v2339_v46 = vpop.f32.mrf.mxu0  ;;  %v23293_v11 = vld [vmem:[#allocation39_spill] sm:$0xff] }
 0x2d1   : > { %v2412_v26 = vld [vmem:[#allocation2 + $0x9e] sm:$0xff]  ;;  %v2413_v42 = vld [vmem:[#allocation2 + $0xa6] sm:$0x3]  ;;  %v1948_v51 = vpop.f32.mrf.mxu1 }
 0x2d2   : > { %v2442_v16 = vadd.f32 %v19083_v12, %v2412_v26  ;;  %v2443_v37 = vadd.f32 %v2413_v42, %v19147_v10  ;;  %2091 = vst [vmem:[#allocation2 + $0xc0] sm:$0xff] %v1948_v51  ;;  %v15143_v6 = vpop.f32.mrf.mxu0  ;;  %15494 = vmatmul.mubr.msk.f32.gmra.mxu0 %vm594_vm1, %v23292_v18  ;;  %v23294_v26 = vld [vmem:[#allocation40_spill] sm:$0xff] }
 0x2d3   : > { %v2416_v50 = vld [vmem:[#allocation2 + $0xbe] sm:$0x3]  ;;  %v15046_v25 = vpop.f32.mrf.mxu1  ;;  %15397 = vmatmul.mubr.msk.f32.gmra.mxu1 %vm594_vm1, %v23286_v19  ;;  %15496 = vmatprep.mubr.msk.f32.mxu0 %vm594_vm1, %v23293_v11 }
 0x2d4   : > { %2472 = vst [vmem:[#allocation2 + $0x9e] sm:$0xff] %v2442_v16  ;;  %2473 = vst [vmem:[#allocation2 + $0xa6] sm:$0x3] %v2443_v37  ;;  %v2446_v44 = vadd.f32 %v19183_v30, %v2416_v50  ;;  %15399 = vmatprep.mubr.msk.f32.mxu1 %vm594_vm1, %v23287_v56  ;;  %v2347_v12 = vpop.f32.mrf.mxu0  ;;  %v23296_v16 = vld [vmem:[#allocation42_spill] sm:$0xff]  ;;  %v23297_v37 = vld [vmem:[#allocation43_spill] sm:$0xff] }
 0x2d5   : > { %2094 = vst [vmem:[#allocation2 + $0xd8] sm:$0xff] %v15046_v25  ;;  %v2414_v10 = vld [vmem:[#allocation2 + $0xae] sm:$0xff]  ;;  %v2415_v6 = vld [vmem:[#allocation2 + $0xb6] sm:$0xff]  ;;  %v1958_v18 = vpop.f32.mrf.mxu1 }
 0x2d6   : > { %2476 = vst [vmem:[#allocation2 + $0xbe] sm:$0x3] %v2446_v44  ;;  %v2444_v35 = vadd.f32 %v19107_v4, %v2414_v10  ;;  %v2445_v19 = vadd.f32 %v2415_v6, %v19222_v49  ;;  %2093 = vst [vmem:[#allocation2 + $0xd0] sm:$0xff] %v1958_v18  ;;  %v15146_v46 = vpop.f32.mrf.mxu0  ;;  %15497 = vmatmul.mubr.msk.f32.gmra.mxu0 %vm594_vm1, %v23294_v26  ;;  %v23295_v25 = vld [vmem:[#allocation41_spill] sm:$0xff]  ;;  %v23298_v10 = vld [vmem:[#allocation44_spill] sm:$0xff] }
 0x2d7   : > { %v15049_v42 = vpop.f32.mrf.mxu1  ;;  %15400 = vmatmul.mubr.msk.f32.gmra.mxu1 %vm594_vm1, %v23288_v0  ;;  %15499 = vmatprep.mubr.msk.f32.mxu0 %vm594_vm1, %v23295_v25 }
 0x2d8   : > { %2474 = vst [vmem:[#allocation2 + $0xae] sm:$0xff] %v2444_v35  ;;  %2475 = vst [vmem:[#allocation2 + $0xb6] sm:$0xff] %v2445_v19  ;;  %15402 = vmatprep.mubr.msk.f32.mxu1 %vm594_vm1, %v23289_v54  ;;  %v2355_v4 = vpop.f32.mrf.mxu0  ;;  %v19431_v35 = vld [vmem:[%s18190_s17 + $0x108] sm:$0xff] }
 0x2d9   : > { %2096 = vst [vmem:[#allocation2 + $0xe8] sm:$0xff] %v15049_v42  ;;  %v2417_v30 = vld [vmem:[#allocation2 + $0xc6] sm:$0xff]  ;;  %v1968_v49 = vpop.f32.mrf.mxu1 }
 0x2da   : > { %v2447_v56 = vadd.f32 %v2417_v30, %v19249_v39  ;;  %2095 = vst [vmem:[#allocation2 + $0xe0] sm:$0xff] %v1968_v49  ;;  %v15149_v51 = vpop.f32.mrf.mxu0  ;;  %15500 = vmatmul.mubr.msk.f32.gmra.mxu0 %vm594_vm1, %v23296_v16  ;;  %v19446_v30 = vld [vmem:[%s18190_s17 + $0x148] sm:$0xff] }
 0x2db   : > { %v15052_v0 = vpop.f32.mrf.mxu1  ;;  %15403 = vmatmul.mubr.msk.f32.gmra.mxu1 %vm594_vm1, %v23290_v20  ;;  %15502 = vmatprep.mubr.msk.f32.mxu0 %vm594_vm1, %v23297_v37  ;;  %v19456_v51 = vld [vmem:[%s18190_s17 + $0x150] sm:$0xff] }
 0x2dc   : > { %2477 = vst [vmem:[#allocation2 + $0xc6] sm:$0xff] %v2447_v56  ;;  %2098 = vst [vmem:[#allocation2 + $0xf8] sm:$0xff] %v15052_v0  ;;  %15405 = vmatprep.mubr.msk.f32.mxu1 %vm594_vm1, %v23291_v52  ;;  %v2363_v54 = vpop.f32.mrf.mxu0  ;;  %v23299_v52 = vld [vmem:[#allocation45_spill] sm:$0xff]  ;;  %v19451_v56 = vld [vmem:[%s18190_s17 + $0x118] sm:$0xff] }
 0x2dd   : > { %v2418_v39 = vld [vmem:[#allocation2 + $0xce] sm:$0xff]  ;;  %v2419_v50 = vld [vmem:[#allocation2 + $0xd6] sm:$0x3]  ;;  %v1978_v11 = vpop.f32.mrf.mxu1 }
 0x2de   : > { %v2448_v44 = vadd.f32 %v19238_v47, %v2418_v39  ;;  %v2449_v12 = vadd.f32 %v2419_v50, %v19262_v53  ;;  %2097 = vst [vmem:[#allocation2 + $0xf0] sm:$0xff] %v1978_v11  ;;  %v15152_v20 = vpop.f32.mrf.mxu0  ;;  %15503 = vmatmul.mubr.msk.f32.gmra.mxu0 %vm594_vm1, %v23298_v10  ;;  %v19439_v53 = vld [vmem:[%s18190_s17 + $0x110] sm:$0xff]  ;;  %v19467_v39 = vld [vmem:[%s18190_s17 + $0x158] sm:$0xff]  ;;  %v19472_v11 = vld [vmem:[%s18190_s17 + $0x128] sm:$0xff] }
 0x2df   : > { %v15055_v18 = vpop.f32.mrf.mxu1  ;;  %15406 = vmatmul.mubr.msk.f32.gmra.mxu1 %vm594_vm1, %v19431_v35  ;;  %15505 = vmatprep.mubr.msk.f32.mxu0 %vm594_vm1, %v23299_v52  ;;  %v19486_v52 = vld [vmem:[%s18190_s17 + $0x168] sm:$0xff] }
 0x2e0   : > { %v2422_v6 = vld [vmem:[#allocation2 + $0xee] sm:$0x3]  ;;  %2478 = vst [vmem:[#allocation2 + $0xce] sm:$0xff] %v2448_v44  ;;  %2479 = vst [vmem:[#allocation2 + $0xd6] sm:$0x3] %v2449_v12  ;;  %15408 = vmatprep.mubr.msk.f32.mxu1 %vm594_vm1, %v19439_v53  ;;  %v2371_v19 = vpop.f32.mrf.mxu0 }
 0x2e1   : > { %v2452_v47 = vadd.f32 %v19264_v55, %v2422_v6  ;;  %2100 = vst [vmem:[#allocation2 + $0x108] sm:$0xff] %v15055_v18  ;;  %v2420_v46 = vld [vmem:[#allocation2 + $0xde] sm:$0xff]  ;;  %v2421_v26 = vld [vmem:[#allocation2 + $0xe6] sm:$0xff]  ;;  %v1988_v42 = vpop.f32.mrf.mxu1 }
 0x2e2   : > { %v2450_v25 = vadd.f32 %v19252_v63, %v2420_v46  ;;  %v2451_v4 = vadd.f32 %v2421_v26, %v19274_v5  ;;  %2099 = vst [vmem:[#allocation2 + $0x100] sm:$0xff] %v1988_v42  ;;  %v15155_v55 = vpop.f32.mrf.mxu0  ;;  %15506 = vmatmul.mubr.msk.f32.gmra.mxu0 %vm594_vm1, %v19446_v30  ;;  %v19461_v63 = vld [vmem:[%s18190_s17 + $0x120] sm:$0xff]  ;;  %v19491_v46 = vld [vmem:[%s18190_s17 + $0x138] sm:$0xff]  ;;  %v19496_v26 = vld [vmem:[%s18190_s17 + $0x170] sm:$0xff] }
 0x2e3   : > { %2482 = vst [vmem:[#allocation2 + $0xee] sm:$0x3] %v2452_v47  ;;  %v15058_v49 = vpop.f32.mrf.mxu1  ;;  %15409 = vmatmul.mubr.msk.f32.gmra.mxu1 %vm594_vm1, %v19451_v56  ;;  %15508 = vmatprep.mubr.msk.f32.mxu0 %vm594_vm1, %v19456_v51  ;;  %v2800_v43 = vld [vmem:[#allocation2 + $0xa8] sm:$0xff] }
 0x2e4   : > { %2480 = vst [vmem:[#allocation2 + $0xde] sm:$0xff] %v2450_v25  ;;  %2481 = vst [vmem:[#allocation2 + $0xe6] sm:$0xff] %v2451_v4  ;;  %15411 = vmatprep.mubr.msk.f32.mxu1 %vm594_vm1, %v19461_v63  ;;  %v2379_v5 = vpop.f32.mrf.mxu0 }
 0x2e5   : > { %2102 = vst [vmem:[#allocation2 + $0x118] sm:$0xff] %v15058_v49  ;;  %v2423_v16 = vld [vmem:[#allocation2 + $0xf6] sm:$0xff]  ;;  %v1998_v0 = vpop.f32.mrf.mxu1 }
 0x2e6   : > { %v2453_v37 = vadd.f32 %v2423_v16, %v19286_v61  ;;  %2101 = vst [vmem:[#allocation2 + $0x110] sm:$0xff] %v1998_v0  ;;  %v15158_v54 = vpop.f32.mrf.mxu0  ;;  %15509 = vmatmul.mubr.msk.f32.gmra.mxu0 %vm594_vm1, %v19467_v39  ;;  %v19479_v61 = vld [vmem:[%s18190_s17 + $0x130] sm:$0xff]  ;;  %v19509_v0 = vld [vmem:[%s18190_s17 + $0x178] sm:$0xff] }
 0x2e7   : > { %v15061_v50 = vpop.f32.mrf.mxu1  ;;  %15412 = vmatmul.mubr.msk.f32.gmra.mxu1 %vm594_vm1, %v19472_v11  ;;  %15511 = vmatprep.mubr.msk.f32.mxu0 %vm594_vm1, %v18793_v27 }
 0x2e8   : > { %2483 = vst [vmem:[#allocation2 + $0xf6] sm:$0xff] %v2453_v37  ;;  %2104 = vst [vmem:[#allocation2 + $0x128] sm:$0xff] %v15061_v50  ;;  %15414 = vmatprep.mubr.msk.f32.mxu1 %vm594_vm1, %v19479_v61  ;;  %v2387_v44 = vpop.f32.mrf.mxu0  ;;  %v19516_v37 = vld [vmem:[%s18190_s17] sm:$0xff] }
 0x2e9   : > { %v2424_v12 = vld [vmem:[#allocation2 + $0xfe] sm:$0xff]  ;;  %v2425_v20 = vld [vmem:[#allocation2 + $0x106] sm:$0x3]  ;;  %v2008_v10 = vpop.f32.mrf.mxu1 }
 0x2ea   : > { %v2454_v6 = vadd.f32 %v19276_v8, %v2424_v12  ;;  %v2455_v18 = vadd.f32 %v2425_v20, %v19298_v15  ;;  %2103 = vst [vmem:[#allocation2 + $0x120] sm:$0xff] %v2008_v10  ;;  %v15161_v27 = vpop.f32.mrf.mxu0  ;;  %15512 = vmatmul.mubr.msk.f32.gmra.mxu0 %vm594_vm1, %v19486_v52  ;;  %v19502_v15 = vld [vmem:[%s18190_s17 + $0x140] sm:$0xff]  ;;  %v19526_v12 = vld [vmem:[%s18190_s17 + $0x8] sm:$0xff]  ;;  %v19533_v10 = vld [vmem:[%s18190_s17 + $0x10] sm:$0xff] }
 0x2eb   : > { %v15064_v19 = vpop.f32.mrf.mxu1  ;;  %15415 = vmatmul.mubr.msk.f32.gmra.mxu1 %vm594_vm1, %v19491_v46  ;;  %15514 = vmatprep.mubr.msk.f32.mxu0 %vm594_vm1, %v19496_v26 }
 0x2ec   : > { %v2428_v47 = vld [vmem:[#allocation2 + $0x11e] sm:$0x3]  ;;  %2484 = vst [vmem:[#allocation2 + $0xfe] sm:$0xff] %v2454_v6  ;;  %2485 = vst [vmem:[#allocation2 + $0x106] sm:$0x3] %v2455_v18  ;;  %15417 = vmatprep.mubr.msk.f32.mxu1 %vm594_vm1, %v19502_v15  ;;  %v2395_v42 = vpop.f32.mrf.mxu0 }
 0x2ed   : > { %v2458_v8 = vadd.f32 %v19300_v59, %v2428_v47  ;;  %2106 = vst [vmem:[#allocation2 + $0x138] sm:$0xff] %v15064_v19  ;;  %v2426_v25 = vld [vmem:[#allocation2 + $0x10e] sm:$0xff]  ;;  %v2427_v4 = vld [vmem:[#allocation2 + $0x116] sm:$0xff]  ;;  %v2018_v55 = vpop.f32.mrf.mxu1 }
 0x2ee   : > { %v2456_v49 = vadd.f32 %v19288_v3, %v2426_v25  ;;  %v2457_v5 = vadd.f32 %v2427_v4, %v19312_v7  ;;  %2105 = vst [vmem:[#allocation2 + $0x130] sm:$0xff] %v2018_v55  ;;  %v15164_v16 = vpop.f32.mrf.mxu0  ;;  %15515 = vmatmul.mubr.msk.f32.gmra.mxu0 %vm594_vm1, %v19509_v0  ;;  %v19549_v25 = vld [vmem:[%s18190_s17 + $0x18] sm:$0xff] }
 0x2ef   : > { %2488 = vst [vmem:[#allocation2 + $0x11e] sm:$0x3] %v2458_v8  ;;  %v15067_v59 = vpop.f32.mrf.mxu1  ;;  %15418 = vmatmul.mubr.msk.f32.gmra.mxu1 %vm594_vm1, %v19446_v30  ;;  %15621 = vmatprep.mubr.msk.f32.mxu0 %vm594_vm1, %v19516_v37 }
 0x2f0   : > { %2486 = vst [vmem:[#allocation2 + $0x10e] sm:$0xff] %v2456_v49  ;;  %2487 = vst [vmem:[#allocation2 + $0x116] sm:$0xff] %v2457_v5  ;;  %15420 = vmatprep.mubr.msk.f32.mxu1 %vm594_vm1, %v19456_v51  ;;  %v2403_v3 = vpop.f32.mrf.mxu0  ;;  %v19556_v49 = vld [vmem:[%s18190_s17 + $0x20] sm:$0xff] }
 0x2f1   : > { %2108 = vst [vmem:[#allocation2 + $0x148] sm:$0xff] %v15067_v59  ;;  %v2429_v7 = vld [vmem:[#allocation2 + $0x126] sm:$0xff]  ;;  %v2028_v54 = vpop.f32.mrf.mxu1 }
 0x2f2   : > { %v2459_v50 = vadd.f32 %v2429_v7, %v19325_v13  ;;  %2107 = vst [vmem:[#allocation2 + $0x140] sm:$0xff] %v2028_v54  ;;  %v19523_v44 = vpop.f32.mrf.mxu0  ;;  %15622 = vmatmul.mubr.msk.f32.vlgmr.msra.gmra.mxu0 %vm594_vm1, %v19526_v12  ;;  %v19538_v13 = vld [vmem:[%s18190_s17 + $0x160] sm:$0xff] }
 0x2f3   : > { %v15070_v20 = vpop.f32.mrf.mxu1  ;;  %15421 = vmatmul.mubr.msk.f32.gmra.mxu1 %vm594_vm1, %v19467_v39  ;;  %15624 = vmatprep.mubr.msk.f32.mxu0 %vm594_vm1, %v19533_v10  ;;  %v2811_v40 = vld [vmem:[#allocation2 + $0x100] sm:$0xff] }
 0x2f4   : > { %2489 = vst [vmem:[#allocation2 + $0x126] sm:$0xff] %v2459_v50  ;;  %2110 = vst [vmem:[#allocation2 + $0x158] sm:$0xff] %v15070_v20  ;;  %15423 = vmatprep.mubr.msk.f32.mxu1 %vm594_vm1, %v19538_v13  ;;  %v19542_v6 = vpop.f32.mrf.mxu0  ;;  %v19570_v50 = vld [vmem:[%s18190_s17 + $0x28] sm:$0xff]  ;;  %v3245_v20 = vrot.slane %v19523_v44, 6 }
 0x2f5   : > { %v2430_v18 = vld [vmem:[#allocation2 + $0x12e] sm:$0xff]  ;;  %v2431_v27 = vld [vmem:[#allocation2 + $0x136] sm:$0x3]  ;;  %v2038_v47 = vpop.f32.mrf.mxu1 }
 0x2f6   : > { %v2460_v19 = vadd.f32 %v19315_v14, %v2430_v18  ;;  %v2461_v8 = vadd.f32 %v2431_v27, %v19337_v28  ;;  %2109 = vst [vmem:[#allocation2 + $0x150] sm:$0xff] %v2038_v47  ;;  %v19546_v42 = vpop.f32.mrf.mxu0  ;;  %15625 = vmatmul.mubr.msk.f32.gmra.mxu0 %vm594_vm1, %v19549_v25  ;;  %v3244_v47 = vrot.slane %v19542_v6, 6 }
 0x2f7   : > { %v15073_v55 = vpop.f32.mrf.mxu1  ;;  %15424 = vmatmul.mubr.msk.f32.gmra.mxu1 %vm594_vm1, %v19486_v52  ;;  %15627 = vmatprep.mubr.msk.f32.mxu0 %vm594_vm1, %v19556_v49 }
 0x2f8   : > { %v2434_v4 = vld [vmem:[#allocation2 + $0x14e] sm:$0x3]  ;;  %2490 = vst [vmem:[#allocation2 + $0x12e] sm:$0xff] %v2460_v19  ;;  %2491 = vst [vmem:[#allocation2 + $0x136] sm:$0x3] %v2461_v8  ;;  %15426 = vmatprep.mubr.msk.f32.mxu1 %vm594_vm1, %v19496_v26  ;;  %v19563_v28 = vpop.f32.mrf.mxu0  ;;  %v5255_v8 = vld [vmem:[#allocation9 + $0x230] sm:$0xff]  ;;  %v3246_v6 = vsel %vm3243_vm2, %v3244_v47, %v3245_v20 }
 0x2f9   : > { %v2464_v14 = vadd.f32 %v19339_v1, %v2434_v4  ;;  %2112 = vst [vmem:[#allocation2 + $0x168] sm:$0xff] %v15073_v55  ;;  %v2432_v5 = vld [vmem:[#allocation2 + $0x13e] sm:$0xff]  ;;  %v2433_v16 = vld [vmem:[#allocation2 + $0x146] sm:$0xff]  ;;  %v2048_v59 = vpop.f32.mrf.mxu1  ;;  %v23150_v18 = vrot.slane %v19563_v28, 6 }
 0x2fa   : > { %v2462_v3 = vadd.f32 %v19327_v62, %v2432_v5  ;;  %v2463_v7 = vadd.f32 %v2433_v16, %v19349_v34  ;;  %2111 = vst [vmem:[#allocation2 + $0x160] sm:$0xff] %v2048_v59  ;;  %v19567_v54 = vpop.f32.mrf.mxu0  ;;  %15628 = vmatmul.mubr.msk.f32.gmra.mxu0 %vm594_vm1, %v19570_v50  ;;  %v19579_v62 = vld [vmem:[%s18190_s17 + $0x30] sm:$0xff]  ;;  %v19592_v55 = vld [vmem:[%s18190_s17 + $0x38] sm:$0xff]  ;;  %v3249_v16 = vrot.slane %v19546_v42, 6  ;;  %v19604_v59 = vld [vmem:[%s18190_s17 + $0x40] sm:$0xff] }
 0x2fb   : > { %2494 = vst [vmem:[#allocation2 + $0x14e] sm:$0x3] %v2464_v14  ;;  %v15076_v1 = vpop.f32.mrf.mxu1  ;;  %15427 = vmatmul.mubr.msk.f32.gmra.mxu1 %vm594_vm1, %v19509_v0  ;;  %15630 = vmatprep.mubr.msk.f32.mxu0 %vm594_vm1, %v19579_v62  ;;  %v2798_v5 = vld [vmem:[#allocation2 + $0x98] sm:$0xff]  ;;  %v5254_v42 = vld [vmem:[#allocation9 + $0x228] sm:$0xff] }
 0x2fc   : > { %2492 = vst [vmem:[#allocation2 + $0x13e] sm:$0xff] %v2462_v3  ;;  %2493 = vst [vmem:[#allocation2 + $0x146] sm:$0xff] %v2463_v7  ;;  %15533 = vmatprep.mubr.msk.f32.mxu1 %vm594_vm1, %v19516_v37  ;;  %v19585_v34 = vpop.f32.mrf.mxu0 }
 0x2fd   : > { %2114 = vst [vmem:[#allocation2 + $0x178] sm:$0xff] %v15076_v1  ;;  %v2435_v27 = vld [vmem:[#allocation2 + $0x156] sm:$0xff]  ;;  %v2058_v44 = vpop.f32.mrf.mxu1  ;;  %v23300_v58 = vrot.slane %v19585_v34, 6 }
 0x2fe   : > { %v2465_v19 = vadd.f32 %v2435_v27, %v19361_v22  ;;  %2113 = vst [vmem:[#allocation2 + $0x170] sm:$0xff] %v2058_v44  ;;  %v19589_v4 = vpop.f32.mrf.mxu0  ;;  %15631 = vmatmul.mubr.msk.f32.gmra.mxu0 %vm594_vm1, %v19592_v55  ;;  %v3248_v22 = vsel %vm3243_vm2, %v3245_v20, %v23150_v18  ;;  %v2797_v18 = vld [vmem:[#allocation2 + $0x90] sm:$0xff] }
 0x2ff   : > { %v15183_v14 = vpop.f32.mrf.mxu1  ;;  %15534 = vmatmul.mubr.msk.f32.vlgmr.msra.gmra.mxu1 %vm594_vm1, %v19526_v12  ;;  %15633 = vmatprep.mubr.msk.f32.mxu0 %vm594_vm1, %v19604_v59  ;;  %v3251_v20 = vsel %vm3243_vm2, %v3249_v16, %v23300_v58  ;;  %v2799_v58 = vld [vmem:[#allocation2 + $0xa0] sm:$0xff]  ;;  %v23152_v16 = vrot.slane %v19567_v54, 6 }
 0x300   : > { %2495 = vst [vmem:[#allocation2 + $0x156] sm:$0xff] %v2465_v19  ;;  %v2828_v3 = vadd.f32 %v15183_v14, %v2798_v5  ;;  %15694 = vmatpush3.msra.mxu1 %v19304_v17  ;;  %15536 = vmatprep.mubr.msk.f32.mxu1 %vm594_vm1, %v19533_v10  ;;  %v19611_v7 = vpop.f32.mrf.mxu0 }
 0x301   : > { %v2436_v1 = vld [vmem:[#allocation2 + $0x15e] sm:$0xff]  ;;  %v2437_v27 = vld [vmem:[#allocation2 + $0x166] sm:$0x3]  ;;  %v2576_v44 = vpop.f32.mrf.mxu1  ;;  %15695 = vmatprep.subr.mxu1 %v5255_v8 }
 0x302   : > { %v2466_v29 = vadd.f32 %v19351_v9, %v2436_v1  ;;  %v2467_v19 = vadd.f32 %v2437_v27, %v19373_v48  ;;  %v2827_v14 = vadd.f32 %v2797_v18, %v2576_v44  ;;  %v3325_v5 = vadd.f32 %v3248_v22, %v2828_v3  ;;  %15696 = vmatpush3.msra.mxu1 %v5255_v8  ;;  %v19616_v17 = vpop.f32.mrf.mxu0  ;;  %v5252_v1 = vld [vmem:[#allocation9 + $0x218] sm:$0xff] }
 0x303   : > { %v15186_v32 = vpop.f32.mrf.mxu1  ;;  %15537 = vmatmul.mubr.msk.f32.gmra.mxu1 %vm594_vm1, %v19549_v25  ;;  %15697 = vmatprep.subr.mxu1 %v5254_v42  ;;  %v2802_v44 = vld [vmem:[#allocation2 + $0xb8] sm:$0xff] }
 0x304   : > { %v2440_v36 = vld [vmem:[#allocation2 + $0x17e] sm:$0x3]  ;;  %2496 = vst [vmem:[#allocation2 + $0x15e] sm:$0xff] %v2466_v29  ;;  %2497 = vst [vmem:[#allocation2 + $0x166] sm:$0x3] %v2467_v19  ;;  %v3324_v48 = vadd.f32 %v3246_v6, %v2827_v14  ;;  %v2830_v18 = vadd.f32 %v15186_v32, %v2800_v43  ;;  %15539 = vmatprep.mubr.msk.f32.mxu1 %vm594_vm1, %v19556_v49  ;;  %v19626_v47 = vpop.f32.mrf.mxu0  ;;  %15698 = vmatpush3.msra.mxu1 %v5254_v42  ;;  %v19630_v29 = vld [vmem:[%s18190_s17 + $0x48] sm:$0xff] }
 0x305   : > { %v2470_v9 = vadd.f32 %v19375_v23, %v2440_v36  ;;  %3355 = vst [vmem:[#allocation2 + $0x98] sm:$0xff] %v3325_v5  ;;  %v2438_v8 = vld [vmem:[#allocation2 + $0x16e] sm:$0xff]  ;;  %v2439_v22 = vld [vmem:[#allocation2 + $0x176] sm:$0xff]  ;;  %v2586_v3 = vpop.f32.mrf.mxu1  ;;  %15634 = vmatmul.mubr.msk.f32.gmra.mxu0 %vm594_vm1, %v19630_v29  ;;  %15699 = vmatprep.subr.mxu1 %v5253_v33 }
 0x306   : > { %v2468_v43 = vadd.f32 %v19363_v31, %v2438_v8  ;;  %v2469_v36 = vadd.f32 %v2439_v22, %v19385_v45  ;;  %3354 = vst [vmem:[#allocation2 + $0x90] sm:$0xff] %v3324_v48  ;;  %v2829_v32 = vadd.f32 %v2799_v58, %v2586_v3  ;;  %v3327_v23 = vadd.f32 %v3251_v20, %v2830_v18  ;;  %v19636_v6 = vpop.f32.mrf.mxu0  ;;  %v19639_v42 = vld [vmem:[%s18190_s17 + $0x50] sm:$0xff]  ;;  %v19658_v8 = vld [vmem:[%s18190_s17 + $0x58] sm:$0xff]  ;;  %v19665_v3 = vld [vmem:[%s18190_s17 + $0x60] sm:$0xff] }
 0x307   : > { %2500 = vst [vmem:[#allocation2 + $0x17e] sm:$0x3] %v2470_v9  ;;  %15636 = vmatprep.mubr.msk.f32.mxu0 %vm594_vm1, %v19639_v42  ;;  %v15189_v27 = vpop.f32.mrf.mxu1  ;;  %15540 = vmatmul.mubr.msk.f32.gmra.mxu1 %vm594_vm1, %v19570_v50  ;;  %v3255_v31 = vrot.slane %v19589_v4, 6  ;;  %v23151_v45 = vrot.slane %v19626_v47, 6  ;;  %v5251_v5 = vld [vmem:[#allocation9 + $0x210] sm:$0xff]  ;;  %v23301_v4 = vrot.slane %v19585_v34, 6 }
 0x308   : > { %2498 = vst [vmem:[#allocation2 + $0x16e] sm:$0xff] %v2468_v43  ;;  %2499 = vst [vmem:[#allocation2 + $0x176] sm:$0xff] %v2469_v36  ;;  %v2832_v19 = vadd.f32 %v15189_v27, %v2802_v44  ;;  %15542 = vmatprep.mubr.msk.f32.mxu1 %vm594_vm1, %v19579_v62  ;;  %v19649_v14 = vpop.f32.mrf.mxu0  ;;  %15700 = vmatpush3.msra.mxu1 %v5253_v33  ;;  %v2801_v9 = vld [vmem:[#allocation2 + $0xb0] sm:$0xff]  ;;  %v3254_v18 = vrot.slane %v19611_v7, 6  ;;  %v5250_v34 = vld [vmem:[#allocation9 + $0x208] sm:$0xff]  ;;  %v3259_v43 = vrot.slane %v19616_v17, 6 }
 0x309   : > { %2859 = vst [vmem:[#allocation2 + $0xa0] sm:$0xff] %v2829_v32  ;;  %3357 = vst [vmem:[#allocation2 + $0xa8] sm:$0xff] %v3327_v23  ;;  %v2596_v20 = vpop.f32.mrf.mxu1  ;;  %v3253_v48 = vsel %vm3243_vm2, %v23301_v4, %v23152_v16  ;;  %15637 = vmatmul.mubr.msk.f32.gmra.mxu0 %vm594_vm1, %v19658_v8  ;;  %15701 = vmatprep.subr.mxu1 %v5252_v1  ;;  %v2804_v7 = vld [vmem:[#allocation2 + $0xc8] sm:$0xff]  ;;  %v3258_v36 = vsel %vm3243_vm2, %v3255_v31, %v23151_v45  ;;  %v3260_v32 = vrot.slane %v19649_v14, 6  ;;  %v5249_v44 = vld [vmem:[#allocation9 + $0x200] sm:$0xff] }
 0x30a   : > { %2862 = vst [vmem:[#allocation2 + $0xb8] sm:$0xff] %v2832_v19  ;;  %v2831_v22 = vadd.f32 %v2801_v9, %v2596_v20  ;;  %v19662_v33 = vpop.f32.mrf.mxu0  ;;  %15639 = vmatprep.mubr.msk.f32.mxu0 %vm594_vm1, %v19665_v3  ;;  %15702 = vmatpush3.msra.mxu1 %v5252_v1  ;;  %v2803_v20 = vld [vmem:[#allocation2 + $0xc0] sm:$0xff]  ;;  %v3256_v17 = vsel %vm3243_vm2, %v3254_v18, %v3255_v31  ;;  %v19682_v9 = vld [vmem:[%s18190_s17 + $0x68] sm:$0xff]  ;;  %v2806_v31 = vld [vmem:[#allocation2 + $0xd8] sm:$0xff]  ;;  %v23153_v16 = vrot.slane %v19636_v6, 6 }
 0x30b   : > { %v15192_v58 = vpop.f32.mrf.mxu1  ;;  %15543 = vmatmul.mubr.msk.f32.gmra.mxu1 %vm594_vm1, %v19592_v55  ;;  %15703 = vmatprep.subr.mxu1 %v5251_v5  ;;  %v3261_v18 = vsel %vm3243_vm2, %v3259_v43, %v3260_v32  ;;  %v2805_v45 = vld [vmem:[#allocation2 + $0xd0] sm:$0xff]  ;;  %v19704_v43 = vld [vmem:[%s18190_s17 + $0x78] sm:$0xff] }
 0x30c   : > { %v3328_v23 = vadd.f32 %v3253_v48, %v2831_v22  ;;  %v2834_v27 = vadd.f32 %v15192_v58, %v2804_v7  ;;  %15545 = vmatprep.mubr.msk.f32.mxu1 %vm594_vm1, %v19604_v59  ;;  %v19678_v1 = vpop.f32.mrf.mxu0  ;;  %15704 = vmatpush3.msra.mxu1 %v5251_v5  ;;  %v19689_v22 = vld [vmem:[%s18190_s17 + $0x70] sm:$0xff]  ;;  %v23302_v7 = vrot.slane %v19563_v28, 6  ;;  %v23303_v28 = vrot.slane %v19567_v54, 6 }
 0x30d   : > { %v2606_v19 = vpop.f32.mrf.mxu1  ;;  %15640 = vmatmul.mubr.msk.f32.gmra.mxu0 %vm594_vm1, %v19682_v9  ;;  %15705 = vmatprep.subr.mxu1 %v5250_v34 }
 0x30e   : > { %3358 = vst [vmem:[#allocation2 + $0xb0] sm:$0xff] %v3328_v23  ;;  %v2833_v14 = vadd.f32 %v2803_v20, %v2606_v19  ;;  %v3331_v4 = vadd.f32 %v3258_v36, %v2834_v27  ;;  %v19686_v48 = vpop.f32.mrf.mxu0  ;;  %15642 = vmatprep.mubr.msk.f32.mxu0 %vm594_vm1, %v19689_v22  ;;  %15706 = vmatpush3.msra.mxu1 %v5250_v34 }
 0x30f   : > { %v15195_v58 = vpop.f32.mrf.mxu1  ;;  %15546 = vmatmul.mubr.msk.f32.gmra.mxu1 %vm594_vm1, %v19630_v29  ;;  %15707 = vmatprep.subr.mxu1 %v5249_v44 }
 0x310   : > { %v3185_v5 = vld [vmem:[#allocation2 + $0xa0] sm:$0x3]  ;;  %v3330_v23 = vadd.f32 %v3256_v17, %v2833_v14  ;;  %v2836_v27 = vadd.f32 %v15195_v58, %v2806_v31  ;;  %3361 = vst [vmem:[#allocation2 + $0xc8] sm:$0xff] %v3331_v4  ;;  %15548 = vmatprep.mubr.msk.f32.mxu1 %vm594_vm1, %v19639_v42  ;;  %v19700_v34 = vpop.f32.mrf.mxu0  ;;  %15708 = vmatpush3.msra.mxu1 %v5249_v44  ;;  %v2808_v31 = vld [vmem:[#allocation2 + $0xe8] sm:$0xff] }
 0x311   : > { %v3326_v36 = vadd.f32 %v23302_v7, %v3185_v5  ;;  %v3188_v19 = vld [vmem:[#allocation2 + $0xb8] sm:$0x3]  ;;  %v2616_v20 = vpop.f32.mrf.mxu1  ;;  %15643 = vmatmul.mubr.msk.f32.gmra.mxu0 %vm594_vm1, %v19704_v43  ;;  %v19713_v44 = vld [vmem:[%s18190_s17 + $0x80] sm:$0xff]  ;;  %v3265_v7 = vrot.slane %v19662_v33, 6  ;;  %v23154_v54 = vrot.slane %v19700_v34, 6  ;;  %v3264_v33 = vrot.slane %v19678_v1, 6 }
 0x312   : > { %v3329_v17 = vadd.f32 %v23303_v28, %v3188_v19  ;;  %3360 = vst [vmem:[#allocation2 + $0xc0] sm:$0xff] %v3330_v23  ;;  %v2835_v14 = vadd.f32 %v2805_v45, %v2616_v20  ;;  %v3333_v4 = vadd.f32 %v3261_v18, %v2836_v27  ;;  %v19710_v5 = vpop.f32.mrf.mxu0  ;;  %15645 = vmatprep.mubr.msk.f32.mxu0 %vm594_vm1, %v19713_v44  ;;  %v2807_v23 = vld [vmem:[#allocation2 + $0xe0] sm:$0xff]  ;;  %v19730_v19 = vld [vmem:[%s18190_s17 + $0x88] sm:$0xff] }
 0x313   : > { %3356 = vst [vmem:[#allocation2 + $0xa0] sm:$0x3] %v3326_v36  ;;  %v15198_v58 = vpop.f32.mrf.mxu1  ;;  %15549 = vmatmul.mubr.msk.f32.gmra.mxu1 %vm594_vm1, %v19658_v8  ;;  %v3263_v27 = vsel %vm3243_vm2, %v3260_v32, %v23153_v16  ;;  %v3269_v32 = vrot.slane %v19686_v48, 6  ;;  %v3268_v1 = vsel %vm3243_vm2, %v3265_v7, %v23154_v54  ;;  %v2809_v16 = vld [vmem:[#allocation2 + $0xf0] sm:$0xff]  ;;  %v3266_v21 = vsel %vm3243_vm2, %v3264_v33, %v3265_v7 }
 0x314   : > { %3359 = vst [vmem:[#allocation2 + $0xb8] sm:$0x3] %v3329_v17  ;;  %2865 = vst [vmem:[#allocation2 + $0xd0] sm:$0xff] %v2835_v14  ;;  %v2838_v45 = vadd.f32 %v15198_v58, %v2808_v31  ;;  %15551 = vmatprep.mubr.msk.f32.mxu1 %vm594_vm1, %v19665_v3  ;;  %v19723_v18 = vpop.f32.mrf.mxu0  ;;  %v19737_v17 = vld [vmem:[%s18190_s17 + $0x90] sm:$0xff]  ;;  %v23307_v33 = vrot.slane %v19626_v47, 6  ;;  %v23155_v60 = vrot.slane %v19710_v5, 6 }
 0x315   : > { %3363 = vst [vmem:[#allocation2 + $0xd8] sm:$0xff] %v3333_v4  ;;  %v2626_v36 = vpop.f32.mrf.mxu1  ;;  %15646 = vmatmul.mubr.msk.f32.gmra.mxu0 %vm594_vm1, %v19730_v19  ;;  %23304 = vst [vmem:[#allocation23_spill] sm:$0xff] %v19737_v17  ;;  %v2810_v4 = vld [vmem:[#allocation2 + $0xf8] sm:$0xff]  ;;  %v3270_v58 = vrot.slane %v19723_v18, 6 }
 0x316   : > { %2868 = vst [vmem:[#allocation2 + $0xe8] sm:$0xff] %v2838_v45  ;;  %v2837_v20 = vadd.f32 %v2807_v23, %v2626_v36  ;;  %v19734_v28 = vpop.f32.mrf.mxu0  ;;  %15648 = vmatprep.mubr.msk.f32.mxu0 %vm594_vm1, %v19737_v17 }
 0x317   : > { %v15201_v14 = vpop.f32.mrf.mxu1  ;;  %15552 = vmatmul.mubr.msk.f32.gmra.mxu1 %vm594_vm1, %v19682_v9  ;;  %v3271_v7 = vsel %vm3243_vm2, %v3269_v32, %v3270_v58 }
 0x318   : > { %v3334_v31 = vadd.f32 %v3263_v27, %v2837_v20  ;;  %v2840_v45 = vadd.f32 %v15201_v14, %v2810_v4  ;;  %15554 = vmatprep.mubr.msk.f32.mxu1 %vm594_vm1, %v19689_v22  ;;  %v19750_v36 = vpop.f32.mrf.mxu0  ;;  %v19761_v27 = vld [vmem:[%s18190_s17 + $0xa0] sm:$0xff]  ;;  %v2812_v4 = vld [vmem:[#allocation2 + $0x108] sm:$0xff] }
 0x319   : > { %v2636_v23 = vpop.f32.mrf.mxu1  ;;  %15649 = vmatmul.mubr.msk.f32.gmra.mxu0 %vm594_vm1, %v19754_v24  ;;  %23306 = vst [vmem:[#allocation25_spill] sm:$0xff] %v19761_v27 }
 0x31a   : > { %3364 = vst [vmem:[#allocation2 + $0xe0] sm:$0xff] %v3334_v31  ;;  %v2839_v48 = vadd.f32 %v2809_v16, %v2636_v23  ;;  %v3337_v54 = vadd.f32 %v3268_v1, %v2840_v45  ;;  %v19758_v18 = vpop.f32.mrf.mxu0  ;;  %15651 = vmatprep.mubr.msk.f32.mxu0 %vm594_vm1, %v19761_v27 }
 0x31b   : > { %v3191_v20 = vld [vmem:[#allocation2 + $0xd0] sm:$0x3]  ;;  %v15204_v14 = vpop.f32.mrf.mxu1  ;;  %15555 = vmatmul.mubr.msk.f32.gmra.mxu1 %vm594_vm1, %v19704_v43 }
 0x31c   : > { %v3332_v16 = vadd.f32 %v23307_v33, %v3191_v20  ;;  %v3336_v1 = vadd.f32 %v3266_v21, %v2839_v48  ;;  %v2842_v31 = vadd.f32 %v15204_v14, %v2812_v4  ;;  %3367 = vst [vmem:[#allocation2 + $0xf8] sm:$0xff] %v3337_v54  ;;  %15557 = vmatprep.mubr.msk.f32.mxu1 %vm594_vm1, %v19713_v44  ;;  %v19772_v45 = vpop.f32.mrf.mxu0  ;;  %v23309_v21 = vrot.slane %v19636_v6, 6  ;;  %v19785_v20 = vld [vmem:[%s18190_s17 + $0xb0] sm:$0xff]  ;;  %v2814_v4 = vld [vmem:[#allocation2 + $0x118] sm:$0xff] }
 0x31d   : > { %v3194_v23 = vld [vmem:[#allocation2 + $0xe8] sm:$0x3]  ;;  %v2646_v57 = vpop.f32.mrf.mxu1  ;;  %15652 = vmatmul.mubr.msk.f32.gmra.mxu0 %vm594_vm1, %v19776_v2  ;;  %v3275_v33 = vrot.slane %v19734_v28, 6  ;;  %v23158_v6 = vrot.slane %v19772_v45, 6  ;;  %v3274_v28 = vrot.slane %v19750_v36, 6 }
 0x31e   : > { %3362 = vst [vmem:[#allocation2 + $0xd0] sm:$0x3] %v3332_v16  ;;  %v3335_v47 = vadd.f32 %v23309_v21, %v3194_v23  ;;  %3366 = vst [vmem:[#allocation2 + $0xf0] sm:$0xff] %v3336_v1  ;;  %v2841_v54 = vadd.f32 %v2811_v40, %v2646_v57  ;;  %v3339_v32 = vadd.f32 %v3271_v7, %v2842_v31  ;;  %v19782_v48 = vpop.f32.mrf.mxu0  ;;  %15654 = vmatprep.mubr.msk.f32.mxu0 %vm594_vm1, %v19785_v20  ;;  %v2813_v16 = vld [vmem:[#allocation2 + $0x110] sm:$0xff]  ;;  %v19802_v31 = vld [vmem:[%s18190_s17 + $0xb8] sm:$0xff] }
 0x31f   : > { %v15207_v14 = vpop.f32.mrf.mxu1  ;;  %15558 = vmatmul.mubr.msk.f32.gmra.mxu1 %vm594_vm1, %v19730_v19  ;;  %v3273_v1 = vsel %vm3243_vm2, %v3270_v58, %v23155_v60  ;;  %v3279_v58 = vrot.slane %v19758_v18, 6  ;;  %v3278_v36 = vsel %vm3243_vm2, %v3275_v33, %v23158_v6  ;;  %v2815_v60 = vld [vmem:[#allocation2 + $0x120] sm:$0xff]  ;;  %v3276_v41 = vsel %vm3243_vm2, %v3274_v28, %v3275_v33 }
 0x320   : > { %3365 = vst [vmem:[#allocation2 + $0xe8] sm:$0x3] %v3335_v47  ;;  %2871 = vst [vmem:[#allocation2 + $0x100] sm:$0xff] %v2841_v54  ;;  %v2844_v57 = vadd.f32 %v15207_v14, %v2814_v4  ;;  %15560 = vmatprep.mubr.msk.f32.mxu1 %vm594_vm1, %v19737_v17  ;;  %v19795_v40 = vpop.f32.mrf.mxu0  ;;  %v19809_v47 = vld [vmem:[%s18190_s17 + $0xc0] sm:$0xff]  ;;  %v23312_v28 = vrot.slane %v19700_v34, 6  ;;  %v23163_v17 = vrot.slane %v19782_v48, 6 }
 0x321   : > { %3369 = vst [vmem:[#allocation2 + $0x108] sm:$0xff] %v3339_v32  ;;  %v2656_v7 = vpop.f32.mrf.mxu1  ;;  %15655 = vmatmul.mubr.msk.f32.gmra.mxu0 %vm594_vm1, %v19802_v31  ;;  %23310 = vst [vmem:[#allocation27_spill] sm:$0xff] %v19809_v47  ;;  %v2816_v32 = vld [vmem:[#allocation2 + $0x128] sm:$0xff]  ;;  %v3280_v14 = vrot.slane %v19795_v40, 6 }
 0x322   : > { %2874 = vst [vmem:[#allocation2 + $0x118] sm:$0xff] %v2844_v57  ;;  %v2843_v23 = vadd.f32 %v2813_v16, %v2656_v7  ;;  %v19806_v21 = vpop.f32.mrf.mxu0  ;;  %15657 = vmatprep.mubr.msk.f32.mxu0 %vm594_vm1, %v19809_v47 }
 0x323   : > { %v15210_v54 = vpop.f32.mrf.mxu1  ;;  %15561 = vmatmul.mubr.msk.f32.gmra.mxu1 %vm594_vm1, %v19754_v24  ;;  %v3281_v33 = vsel %vm3243_vm2, %v3279_v58, %v3280_v14  ;;  %v2817_v24 = vld [vmem:[#allocation2 + $0x130] sm:$0xff] }
 0x324   : > { %v3340_v4 = vadd.f32 %v3273_v1, %v2843_v23  ;;  %v2846_v57 = vadd.f32 %v15210_v54, %v2816_v32  ;;  %15563 = vmatprep.mubr.msk.f32.mxu1 %vm594_vm1, %v19761_v27  ;;  %v19822_v7 = vpop.f32.mrf.mxu0  ;;  %v19833_v1 = vld [vmem:[%s18190_s17 + $0xd0] sm:$0xff]  ;;  %v2818_v32 = vld [vmem:[#allocation2 + $0x138] sm:$0xff] }
 0x325   : > { %v2666_v16 = vpop.f32.mrf.mxu1  ;;  %15658 = vmatmul.mubr.msk.f32.gmra.mxu0 %vm594_vm1, %v19826_v38 }
 0x326   : > { %3370 = vst [vmem:[#allocation2 + $0x110] sm:$0xff] %v3340_v4  ;;  %v2845_v18 = vadd.f32 %v2815_v60, %v2666_v16  ;;  %v3343_v6 = vadd.f32 %v3278_v36, %v2846_v57  ;;  %v19830_v40 = vpop.f32.mrf.mxu0  ;;  %15660 = vmatprep.mubr.msk.f32.mxu0 %vm594_vm1, %v19833_v1 }
 0x327   : > { %v3197_v23 = vld [vmem:[#allocation2 + $0x100] sm:$0x3]  ;;  %v15213_v54 = vpop.f32.mrf.mxu1  ;;  %15564 = vmatmul.mubr.msk.f32.gmra.mxu1 %vm594_vm1, %v19776_v2  ;;  %v19848_v2 = vld [vmem:[%s18190_s17 + $0xd8] sm:$0xff] }
 0x328   : > { %v3338_v60 = vadd.f32 %v23312_v28, %v3197_v23  ;;  %v3342_v36 = vadd.f32 %v3276_v41, %v2845_v18  ;;  %v2848_v4 = vadd.f32 %v15213_v54, %v2818_v32  ;;  %3373 = vst [vmem:[#allocation2 + $0x128] sm:$0xff] %v3343_v6  ;;  %15566 = vmatprep.mubr.msk.f32.mxu1 %vm594_vm1, %v19785_v20  ;;  %v19844_v57 = vpop.f32.mrf.mxu0  ;;  %v23313_v41 = vrot.slane %v19710_v5, 6  ;;  %v19857_v23 = vld [vmem:[%s18190_s17 + $0xe0] sm:$0xff]  ;;  %v2820_v32 = vld [vmem:[#allocation2 + $0x148] sm:$0xff] }
 0x329   : > { %v3200_v16 = vld [vmem:[#allocation2 + $0x118] sm:$0x3]  ;;  %v2676_v27 = vpop.f32.mrf.mxu1  ;;  %15661 = vmatmul.mubr.msk.f32.gmra.mxu0 %vm594_vm1, %v19848_v2  ;;  %v3285_v28 = vrot.slane %v19806_v21, 6  ;;  %v23165_v5 = vrot.slane %v19844_v57, 6  ;;  %v3284_v21 = vrot.slane %v19822_v7, 6 }
 0x32a   : > { %3368 = vst [vmem:[#allocation2 + $0x100] sm:$0x3] %v3338_v60  ;;  %v3341_v34 = vadd.f32 %v23313_v41, %v3200_v16  ;;  %3372 = vst [vmem:[#allocation2 + $0x120] sm:$0xff] %v3342_v36  ;;  %v2847_v6 = vadd.f32 %v2817_v24, %v2676_v27  ;;  %v3345_v58 = vadd.f32 %v3281_v33, %v2848_v4  ;;  %v19854_v18 = vpop.f32.mrf.mxu0  ;;  %15663 = vmatprep.mubr.msk.f32.mxu0 %vm594_vm1, %v19857_v23  ;;  %v2819_v60 = vld [vmem:[#allocation2 + $0x140] sm:$0xff]  ;;  %v19874_v4 = vld [vmem:[%s18190_s17 + $0xe8] sm:$0xff] }
 0x32b   : > { %v15216_v54 = vpop.f32.mrf.mxu1  ;;  %15567 = vmatmul.mubr.msk.f32.gmra.mxu1 %vm594_vm1, %v19802_v31  ;;  %v3283_v36 = vsel %vm3243_vm2, %v3280_v14, %v23163_v17  ;;  %v3289_v14 = vrot.slane %v19830_v40, 6  ;;  %v3288_v7 = vsel %vm3243_vm2, %v3285_v28, %v23165_v5  ;;  %v3286_v17 = vsel %vm3243_vm2, %v3284_v21, %v3285_v28 }
 0x32c   : > { %3371 = vst [vmem:[#allocation2 + $0x118] sm:$0x3] %v3341_v34  ;;  %2877 = vst [vmem:[#allocation2 + $0x130] sm:$0xff] %v2847_v6  ;;  %v2850_v24 = vadd.f32 %v15216_v54, %v2820_v32  ;;  %15569 = vmatprep.mubr.msk.f32.mxu1 %vm594_vm1, %v19809_v47  ;;  %v19867_v27 = vpop.f32.mrf.mxu0  ;;  %v19879_v34 = vld [vmem:[%s18190_s17 + $0xf0] sm:$0xff]  ;;  %v23314_v21 = vrot.slane %v19772_v45, 6 }
 0x32d   : > { %3375 = vst [vmem:[#allocation2 + $0x138] sm:$0xff] %v3345_v58  ;;  %v2686_v33 = vpop.f32.mrf.mxu1  ;;  %15664 = vmatmul.mubr.msk.f32.gmra.mxu0 %vm594_vm1, %v19874_v4  ;;  %v2822_v58 = vld [vmem:[#allocation2 + $0x158] sm:$0xff]  ;;  %v3290_v54 = vrot.slane %v19867_v27, 6  ;;  %v19899_v27 = vld [vmem:[%s18190_s17 + $0x100] sm:$0xff] }
 0x32e   : > { %2880 = vst [vmem:[#allocation2 + $0x148] sm:$0xff] %v2850_v24  ;;  %v2849_v16 = vadd.f32 %v2819_v60, %v2686_v33  ;;  %v15316_v41 = vpop.f32.mrf.mxu0  ;;  %15666 = vmatprep.mubr.msk.f32.mxu0 %vm594_vm1, %v19879_v34 }
 0x32f   : > { %v15219_v6 = vpop.f32.mrf.mxu1  ;;  %15570 = vmatmul.mubr.msk.f32.gmra.mxu1 %vm594_vm1, %v19826_v38  ;;  %v2821_v41 = vld [vmem:[#allocation2 + $0x150] sm:$0xff]  ;;  %v19894_v38 = vld [vmem:[%s18190_s17 + $0xf8] sm:$0xff]  ;;  %v3291_v28 = vsel %vm3243_vm2, %v3289_v14, %v3290_v54  ;;  %v23315_v14 = vrot.slane %v19782_v48, 6 }
 0x330   : > { %v3346_v32 = vadd.f32 %v3283_v36, %v2849_v16  ;;  %v2852_v24 = vadd.f32 %v15219_v6, %v2822_v58  ;;  %15572 = vmatprep.mubr.msk.f32.mxu1 %vm594_vm1, %v19833_v1  ;;  %v3112_v33 = vpop.f32.mrf.mxu0  ;;  %v2824_v6 = vld [vmem:[#allocation2 + $0x168] sm:$0xff] }
 0x331   : > { %v2696_v60 = vpop.f32.mrf.mxu1  ;;  %15667 = vmatmul.mubr.msk.f32.gmra.mxu0 %vm594_vm1, %v19894_v38 }
 0x332   : > { %3376 = vst [vmem:[#allocation2 + $0x140] sm:$0xff] %v3346_v32  ;;  %v2851_v40 = vadd.f32 %v2821_v41, %v2696_v60  ;;  %v3349_v5 = vadd.f32 %v3288_v7, %v2852_v24  ;;  %v15319_v47 = vpop.f32.mrf.mxu0  ;;  %15669 = vmatprep.mubr.msk.f32.mxu0 %vm594_vm1, %v19899_v27  ;;  %v2823_v60 = vld [vmem:[#allocation2 + $0x160] sm:$0xff]  ;;  %v3292_v41 = vrot.slane %v19854_v18, 6 }
 0x333   : > { %v3203_v36 = vld [vmem:[#allocation2 + $0x130] sm:$0x3]  ;;  %v15222_v16 = vpop.f32.mrf.mxu1  ;;  %15573 = vmatmul.mubr.msk.f32.gmra.mxu1 %vm594_vm1, %v19848_v2 }
 0x334   : > { %v3344_v58 = vadd.f32 %v23314_v21, %v3203_v36  ;;  %v3348_v32 = vadd.f32 %v3286_v17, %v2851_v40  ;;  %v2854_v33 = vadd.f32 %v15222_v16, %v2824_v6  ;;  %3379 = vst [vmem:[#allocation2 + $0x158] sm:$0xff] %v3349_v5  ;;  %15575 = vmatprep.mubr.msk.f32.mxu1 %vm594_vm1, %v19857_v23  ;;  %v3120_v47 = vpop.f32.mrf.mxu0  ;;  %v19917_v36 = vld [vmem:[#allocation10 + $0x138] sm:$0xff]  ;;  %v2825_v21 = vld [vmem:[#allocation2 + $0x170] sm:$0xff] }
 0x335   : > { %v3206_v7 = vld [vmem:[#allocation2 + $0x148] sm:$0x3]  ;;  %v2706_v24 = vpop.f32.mrf.mxu1  ;;  %15670 = vmatmul.mubr.msk.f32.gmra.mxu0 %vm594_vm1, %v19431_v35  ;;  %v2826_v6 = vld [vmem:[#allocation2 + $0x178] sm:$0xff]  ;;  %15885 = vmatprep.subr.mxu1 %v19917_v36 }
 0x336   : > { %3374 = vst [vmem:[#allocation2 + $0x130] sm:$0x3] %v3344_v58  ;;  %v3347_v45 = vadd.f32 %v23315_v14, %v3206_v7  ;;  %3378 = vst [vmem:[#allocation2 + $0x150] sm:$0xff] %v3348_v32  ;;  %v2853_v17 = vadd.f32 %v2823_v60, %v2706_v24  ;;  %v3351_v40 = vadd.f32 %v3291_v28, %v2854_v33  ;;  %v15322_v5 = vpop.f32.mrf.mxu0  ;;  %15672 = vmatprep.mubr.msk.f32.mxu0 %vm594_vm1, %v19439_v53 }
 0x337   : > { %v15225_v16 = vpop.f32.mrf.mxu1  ;;  %15576 = vmatmul.mubr.msk.f32.gmra.mxu1 %vm594_vm1, %v19874_v4  ;;  %v3293_v58 = vsel %vm3243_vm2, %v3290_v54, %v3292_v41 }
 0x338   : > { %3377 = vst [vmem:[#allocation2 + $0x148] sm:$0x3] %v3347_v45  ;;  %2883 = vst [vmem:[#allocation2 + $0x160] sm:$0xff] %v2853_v17  ;;  %v2856_v48 = vadd.f32 %v15225_v16, %v2826_v6  ;;  %15578 = vmatprep.mubr.msk.f32.mxu1 %vm594_vm1, %v19879_v34  ;;  %v3128_v18 = vpop.f32.mrf.mxu0  ;;  %v23316_v17 = vrot.slane %v19844_v57, 6 }
 0x339   : > { %3381 = vst [vmem:[#allocation2 + $0x168] sm:$0xff] %v3351_v40  ;;  %v2716_v28 = vpop.f32.mrf.mxu1  ;;  %15673 = vmatmul.mubr.msk.f32.gmra.mxu0 %vm594_vm1, %v19451_v56 }
 0x33a   : > { %2886 = vst [vmem:[#allocation2 + $0x178] sm:$0xff] %v2856_v48  ;;  %v2855_v32 = vadd.f32 %v2825_v21, %v2716_v28  ;;  %v15325_v33 = vpop.f32.mrf.mxu0  ;;  %15675 = vmatprep.mubr.msk.f32.mxu0 %vm594_vm1, %v19461_v63 }
 0x33b   : > { %v15228_v47 = vpop.f32.mrf.mxu1  ;;  %15579 = vmatmul.mubr.msk.f32.gmra.mxu1 %vm594_vm1, %v19894_v38 }
 0x33c   : > { %v3352_v7 = vadd.f32 %v3293_v58, %v2855_v32  ;;  %15581 = vmatprep.mubr.msk.f32.mxu1 %vm594_vm1, %v19899_v27  ;;  %v3136_v24 = vpop.f32.mrf.mxu0 }
 0x33d   : > { %v2726_v60 = vpop.f32.mrf.mxu1  ;;  %15676 = vmatmul.mubr.msk.f32.gmra.mxu0 %vm594_vm1, %v19472_v11 }
 0x33e   : > { %3382 = vst [vmem:[#allocation2 + $0x170] sm:$0xff] %v3352_v7  ;;  %v15328_v54 = vpop.f32.mrf.mxu0  ;;  %15678 = vmatprep.mubr.msk.f32.mxu0 %vm594_vm1, %v19479_v61 }
 0x33f   : > { %v3209_v14 = vld [vmem:[#allocation2 + $0x160] sm:$0x3]  ;;  %v15231_v45 = vpop.f32.mrf.mxu1  ;;  %15582 = vmatmul.mubr.msk.f32.gmra.mxu1 %vm594_vm1, %v19431_v35 }
 0x340   : > { %v3350_v40 = vadd.f32 %v23316_v17, %v3209_v14  ;;  %15584 = vmatprep.mubr.msk.f32.mxu1 %vm594_vm1, %v19439_v53  ;;  %v3144_v5 = vpop.f32.mrf.mxu0 }
 0x341   : > { %v3212_v16 = vld [vmem:[#allocation2 + $0x178] sm:$0x3]  ;;  %v2734_v6 = vpop.f32.mrf.mxu1  ;;  %15679 = vmatmul.mubr.msk.f32.gmra.mxu0 %vm594_vm1, %v19491_v46 }
 0x342   : > { %3380 = vst [vmem:[#allocation2 + $0x160] sm:$0x3] %v3350_v40  ;;  %v3353_v48 = vadd.f32 %v3292_v41, %v3212_v16  ;;  %v15331_v18 = vpop.f32.mrf.mxu0  ;;  %15681 = vmatprep.mubr.msk.f32.mxu0 %vm594_vm1, %v19502_v15 }
 0x343   : > { %v15234_v28 = vpop.f32.mrf.mxu1  ;;  %15585 = vmatmul.mubr.msk.f32.gmra.mxu1 %vm594_vm1, %v19451_v56 }
 0x344   : > { %3383 = vst [vmem:[#allocation2 + $0x178] sm:$0x3] %v3353_v48  ;;  %15587 = vmatprep.mubr.msk.f32.mxu1 %vm594_vm1, %v19461_v63  ;;  %v3152_v35 = vpop.f32.mrf.mxu0  ;;  %v3698_v48 = vld [vmem:[#allocation2 + $0x6] sm:$0xff] }
 0x345   : > { %v2742_v53 = vpop.f32.mrf.mxu1  ;;  %15682 = vmatmul.mubr.msk.f32.gmra.mxu0 %vm594_vm1, %v19446_v30  ;;  %v6366_v35 = vld [vmem:[#allocation10 + $0x120] sm:$0xff] }
 0x346   : > { %v15334_v57 = vpop.f32.mrf.mxu0  ;;  %15684 = vmatprep.mubr.msk.f32.mxu0 %vm594_vm1, %v19456_v51 }
 0x347   : > { %v15237_v41 = vpop.f32.mrf.mxu1  ;;  %15588 = vmatmul.mubr.msk.f32.gmra.mxu1 %vm594_vm1, %v19472_v11  ;;  %v6365_v57 = vld [vmem:[#allocation10 + $0x118] sm:$0xff] }
 0x348   : > { %15590 = vmatprep.mubr.msk.f32.mxu1 %vm594_vm1, %v19479_v61  ;;  %v3160_v56 = vpop.f32.mrf.mxu0 }
 0x349   : > { %v2750_v21 = vpop.f32.mrf.mxu1  ;;  %15685 = vmatmul.mubr.msk.f32.gmra.mxu0 %vm594_vm1, %v19467_v39 }
 0x34a   : > { %v15337_v63 = vpop.f32.mrf.mxu0  ;;  %15687 = vmatprep.mubr.msk.f32.mxu0 %vm594_vm1, %v19538_v13 }
 0x34b   : > { %v15240_v58 = vpop.f32.mrf.mxu1  ;;  %15591 = vmatmul.mubr.msk.f32.gmra.mxu1 %vm594_vm1, %v19491_v46  ;;  %v3700_v63 = vld [vmem:[#allocation2 + $0x16] sm:$0x3] }
 0x34c   : > { %15593 = vmatprep.mubr.msk.f32.mxu1 %vm594_vm1, %v19502_v15  ;;  %v3168_v11 = vpop.f32.mrf.mxu0 }
 0x34d   : > { %v2758_v32 = vpop.f32.mrf.mxu1  ;;  %15688 = vmatmul.mubr.msk.f32.gmra.mxu0 %vm594_vm1, %v19486_v52 }
 0x34e   : > { %v15340_v61 = vpop.f32.mrf.mxu0  ;;  %15690 = vmatprep.mubr.msk.f32.mxu0 %vm594_vm1, %v19496_v26  ;;  %v6364_v32 = vld [vmem:[#allocation10 + $0x110] sm:$0xff] }
 0x34f   : > { %v15243_v33 = vpop.f32.mrf.mxu1  ;;  %15594 = vmatmul.mubr.msk.f32.gmra.mxu1 %vm594_vm1, %v19446_v30 }
 0x350   : > { %15596 = vmatprep.mubr.msk.f32.mxu1 %vm594_vm1, %v19456_v51  ;;  %v3176_v46 = vpop.f32.mrf.mxu0  ;;  %v3703_v33 = vld [vmem:[#allocation2 + $0x2e] sm:$0x3] }
 0x351   : > { %v2766_v47 = vpop.f32.mrf.mxu1  ;;  %15691 = vmatmul.mubr.msk.f32.gmra.mxu0 %vm594_vm1, %v19509_v0 }
 0x352   : > { %v19977_v15 = vpop.f32.mrf.mxu0 }
 0x353   : > { %v15246_v7 = vpop.f32.mrf.mxu1  ;;  %15597 = vmatmul.mubr.msk.f32.gmra.mxu1 %vm594_vm1, %v19467_v39  ;;  %v4253_v41 = vrot.slane %v19977_v15, 6 }
 0x354   : > { %15599 = vmatprep.mubr.msk.f32.mxu1 %vm594_vm1, %v19538_v13  ;;  %v19983_v24 = vpop.f32.mrf.mxu0  ;;  %v6363_v7 = vld [vmem:[#allocation10 + $0x108] sm:$0xff] }
 0x355   : > { %v2774_v30 = vpop.f32.mrf.mxu1  ;;  %v4252_v56 = vrot.slane %v19983_v24, 6 }
 0x356   : > { %v19985_v60 = vpop.f32.mrf.mxu0 }
 0x357   : > { %v15249_v51 = vpop.f32.mrf.mxu1  ;;  %15600 = vmatmul.mubr.msk.f32.gmra.mxu1 %vm594_vm1, %v19486_v52  ;;  %v6368_v52 = vld [vmem:[#allocation10 + $0x130] sm:$0xff]  ;;  %v4254_v24 = vsel %vm3243_vm2, %v4252_v56, %v4253_v41 }
 0x358   : > { %15602 = vmatprep.mubr.msk.f32.mxu1 %vm594_vm1, %v19496_v26  ;;  %v19991_v54 = vpop.f32.mrf.mxu0  ;;  %v3699_v26 = vld [vmem:[#allocation2 + $0xe] sm:$0xff] }
 0x359   : > { %v2782_v14 = vpop.f32.mrf.mxu1  ;;  %v4255_v58 = vrot.slane %v19991_v54, 6  ;;  %v3702_v54 = vld [vmem:[#allocation2 + $0x26] sm:$0xff]  ;;  %v3707_v56 = vld [vmem:[#allocation2 + $0x4e] sm:$0xff] }
 0x35a   : > { %v19993_v45 = vpop.f32.mrf.mxu0 }
 0x35b   : > { %v15252_v39 = vpop.f32.mrf.mxu1  ;;  %15603 = vmatmul.mubr.msk.f32.gmra.mxu1 %vm594_vm1, %v19509_v0  ;;  %v6367_v0 = vld [vmem:[#allocation10 + $0x128] sm:$0xff] }
 0x35c   : > { %15709 = vmatprep.mubr.msk.f32.mxu1 %vm594_vm1, %v19516_v37  ;;  %v19999_v13 = vpop.f32.mrf.mxu0 }
 0x35d   : > { %v2790_v17 = vpop.f32.mrf.mxu1  ;;  %v4258_v46 = vrot.slane %v19999_v13, 6  ;;  %v6362_v13 = vld [vmem:[#allocation10 + $0x100] sm:$0xff] }
 0x35e   : > { %v20001_v40 = vpop.f32.mrf.mxu0 }
 0x35f   : > { %v15359_v5 = vpop.f32.mrf.mxu1  ;;  %15710 = vmatmul.mubr.msk.f32.vlgmr.msra.gmra.mxu1 %vm594_vm1, %v19526_v12  ;;  %v3701_v12 = vld [vmem:[#allocation2 + $0x1e] sm:$0xff] }
 0x360   : > { %v3747_v16 = vadd.f32 %v15359_v5, %v3699_v26  ;;  %15712 = vmatprep.mubr.msk.f32.mxu1 %vm594_vm1, %v19533_v10  ;;  %v20007_v6 = vpop.f32.mrf.mxu0  ;;  %15886 = vmatpush3.msra.mxu1 %v19917_v36  ;;  %v3705_v26 = vld [vmem:[#allocation2 + $0x3e] sm:$0xff] }
 0x361   : > { %v3459_v37 = vpop.f32.mrf.mxu1  ;;  %15887 = vmatprep.subr.mxu1 %v6368_v52 }
 0x362   : > { %3795 = vst [vmem:[#allocation2 + $0xe] sm:$0xff] %v3747_v16  ;;  %v3746_v18 = vadd.f32 %v3698_v48, %v3459_v37  ;;  %v20010_v28 = vpop.f32.mrf.mxu0  ;;  %15888 = vmatpush3.msra.mxu1 %v6368_v52 }
 0x363   : > { %v15362_v53 = vpop.f32.mrf.mxu1  ;;  %15713 = vmatmul.mubr.msk.f32.gmra.mxu1 %vm594_vm1, %v19549_v25  ;;  %15889 = vmatprep.subr.mxu1 %v6367_v0 }
 0x364   : > { %3794 = vst [vmem:[#allocation2 + $0x6] sm:$0xff] %v3746_v18  ;;  %v3749_v10 = vadd.f32 %v15362_v53, %v3701_v12  ;;  %15715 = vmatprep.mubr.msk.f32.mxu1 %vm594_vm1, %v19556_v49  ;;  %v20016_v36 = vpop.f32.mrf.mxu0  ;;  %15890 = vmatpush3.msra.mxu1 %v6367_v0  ;;  %v4257_v49 = vrot.slane %v19985_v60, 6  ;;  %v4256_v60 = vsel %vm3243_vm2, %v4253_v41, %v4255_v58  ;;  %v4260_v18 = vrot.slane %v19993_v45, 6  ;;  %v3704_v12 = vld [vmem:[#allocation2 + $0x36] sm:$0xff] }
 0x365   : > { %v3469_v21 = vpop.f32.mrf.mxu1  ;;  %15891 = vmatprep.subr.mxu1 %v6366_v35 }
 0x366   : > { %3797 = vst [vmem:[#allocation2 + $0x1e] sm:$0xff] %v3749_v10  ;;  %v3748_v25 = vadd.f32 %v3700_v63, %v3469_v21  ;;  %v20021_v11 = vpop.f32.mrf.mxu0  ;;  %15892 = vmatpush3.msra.mxu1 %v6366_v35  ;;  %v4259_v52 = vsel %vm3243_vm2, %v4257_v49, %v4258_v46  ;;  %v4261_v21 = vsel %vm3243_vm2, %v4258_v46, %v4260_v18  ;;  %v4263_v63 = vrot.slane %v20001_v40, 6 }
 0x367   : > { %v15365_v61 = vpop.f32.mrf.mxu1  ;;  %15716 = vmatmul.mubr.msk.f32.gmra.mxu1 %vm594_vm1, %v19570_v50  ;;  %15893 = vmatprep.subr.mxu1 %v6365_v57  ;;  %v4265_v49 = vrot.slane %v20016_v36, 6 }
 0x368   : > { %3796 = vst [vmem:[#allocation2 + $0x16] sm:$0x3] %v3748_v25  ;;  %v3751_v47 = vadd.f32 %v15365_v61, %v3703_v33  ;;  %15718 = vmatprep.mubr.msk.f32.mxu1 %vm594_vm1, %v19579_v62  ;;  %v20029_v15 = vpop.f32.mrf.mxu0  ;;  %15894 = vmatpush3.msra.mxu1 %v6365_v57  ;;  %v3709_v61 = vld [vmem:[#allocation2 + $0x5e] sm:$0x3] }
 0x369   : > { %v4158_v30 = vld [vmem:[#allocation2 + $0x10] sm:$0x3]  ;;  %v3479_v51 = vpop.f32.mrf.mxu1  ;;  %15895 = vmatprep.subr.mxu1 %v6364_v32  ;;  %v4268_v40 = vrot.slane %v20029_v15, 6 }
 0x36a   : > { %v4382_v50 = vadd.f32 %v4255_v58, %v4158_v30  ;;  %3799 = vst [vmem:[#allocation2 + $0x2e] sm:$0x3] %v3751_v47  ;;  %v3750_v14 = vadd.f32 %v3702_v54, %v3479_v51  ;;  %v20033_v39 = vpop.f32.mrf.mxu0  ;;  %15896 = vmatpush3.msra.mxu1 %v6364_v32  ;;  %v4262_v58 = vrot.slane %v20007_v6, 6  ;;  %v3706_v32 = vld [vmem:[#allocation2 + $0x46] sm:$0x3] }
 0x36b   : > { %v4156_v62 = vld [vmem:[#allocation2] sm:$0xff]  ;;  %v4157_v17 = vld [vmem:[#allocation2 + $0x8] sm:$0xff]  ;;  %v15368_v5 = vpop.f32.mrf.mxu1  ;;  %15719 = vmatmul.mubr.msk.f32.gmra.mxu1 %vm594_vm1, %v19592_v55  ;;  %15897 = vmatprep.subr.mxu1 %v6363_v7 }
 0x36c   : > { %v4380_v16 = vadd.f32 %v4254_v24, %v4156_v62  ;;  %v4381_v0 = vadd.f32 %v4256_v60, %v4157_v17  ;;  %4430 = vst [vmem:[#allocation2 + $0x10] sm:$0x3] %v4382_v50  ;;  %3798 = vst [vmem:[#allocation2 + $0x26] sm:$0xff] %v3750_v14  ;;  %v3753_v37 = vadd.f32 %v15368_v5, %v3705_v26  ;;  %15721 = vmatprep.mubr.msk.f32.mxu1 %vm594_vm1, %v19604_v59  ;;  %v20040_v48 = vpop.f32.mrf.mxu0  ;;  %v3708_v50 = vld [vmem:[#allocation2 + $0x56] sm:$0xff] }
 0x36d   : > { %15898 = vmatpush3.msra.mxu1 %v6363_v7  ;;  %v4159_v35 = vld [vmem:[#allocation2 + $0x18] sm:$0xff]  ;;  %v3489_v53 = vpop.f32.mrf.mxu1  ;;  %v4264_v60 = vsel %vm3243_vm2, %v4262_v58, %v4263_v63  ;;  %v3712_v58 = vld [vmem:[#allocation2 + $0x76] sm:$0x3] }
 0x36e   : > { %15899 = vmatprep.subr.mxu1 %v6362_v13  ;;  %4428 = vst [vmem:[#allocation2] sm:$0xff] %v4380_v16  ;;  %4429 = vst [vmem:[#allocation2 + $0x8] sm:$0xff] %v4381_v0  ;;  %v4383_v55 = vadd.f32 %v4259_v52, %v4159_v35  ;;  %v3752_v10 = vadd.f32 %v3704_v12, %v3489_v53  ;;  %v20043_v57 = vpop.f32.mrf.mxu0  ;;  %v3711_v52 = vld [vmem:[#allocation2 + $0x6e] sm:$0xff]  ;;  %v3710_v53 = vld [vmem:[#allocation2 + $0x66] sm:$0xff] }
 0x36f   : > { %3801 = vst [vmem:[#allocation2 + $0x3e] sm:$0xff] %v3753_v37  ;;  %15900 = vmatpush3.msra.mxu1 %v6362_v13  ;;  %v15371_v41 = vpop.f32.mrf.mxu1  ;;  %v4270_v37 = vrot.slane %v20021_v11, 6 }
 0x370   : > { %15722 = vmatmul.mubr.msk.f32.gmra.mxu1 %vm594_vm1, %v19630_v29  ;;  %4431 = vst [vmem:[#allocation2 + $0x18] sm:$0xff] %v4383_v55  ;;  %3800 = vst [vmem:[#allocation2 + $0x36] sm:$0xff] %v3752_v10  ;;  %v3755_v59 = vadd.f32 %v15371_v41, %v3707_v56  ;;  %v20049_v45 = vpop.f32.mrf.mxu0  ;;  %v3713_v41 = vld [vmem:[#allocation2 + $0x7e] sm:$0xff] }
 0x371   : > { %15724 = vmatprep.mubr.msk.f32.mxu1 %vm594_vm1, %v19639_v42  ;;  %v3499_v25 = vpop.f32.mrf.mxu1  ;;  %v4267_v42 = vrot.slane %v20010_v28, 6  ;;  %v4266_v28 = vsel %vm3243_vm2, %v4263_v63, %v4265_v49  ;;  %v4271_v56 = vsel %vm3243_vm2, %v4268_v40, %v4270_v37 }
 0x372   : > { %3803 = vst [vmem:[#allocation2 + $0x4e] sm:$0xff] %v3755_v59  ;;  %v3754_v29 = vadd.f32 %v3706_v32, %v3499_v25  ;;  %v20055_v33 = vpop.f32.mrf.mxu0  ;;  %v4273_v59 = vrot.slane %v20033_v39, 6  ;;  %v4275_v25 = vrot.slane %v20049_v45, 6  ;;  %v3715_v32 = vld [vmem:[#allocation2 + $0x8e] sm:$0x3] }
 0x373   : > { %v4161_v47 = vld [vmem:[#allocation2 + $0x28] sm:$0x3]  ;;  %v4160_v7 = vld [vmem:[#allocation2 + $0x20] sm:$0xff]  ;;  %v15374_v24 = vpop.f32.mrf.mxu1 }
 0x374   : > { %15725 = vmatmul.mubr.msk.f32.gmra.mxu1 %vm594_vm1, %v19658_v8  ;;  %v4385_v6 = vadd.f32 %v4260_v18, %v4161_v47  ;;  %v4384_v46 = vadd.f32 %v4261_v21, %v4160_v7  ;;  %3802 = vst [vmem:[#allocation2 + $0x46] sm:$0x3] %v3754_v29  ;;  %v3757_v30 = vadd.f32 %v15374_v24, %v3709_v61  ;;  %v20063_v36 = vpop.f32.mrf.mxu0  ;;  %v4272_v21 = vrot.slane %v20040_v48, 6  ;;  %v5959_v29 = vld [vmem:[#allocation15 + $0xf8] sm:$0xff]  ;;  %v23317_v24 = vld [vmem:[#allocation23_spill] sm:$0xff] }
 0x375   : > { %15727 = vmatprep.mubr.msk.f32.mxu1 %vm594_vm1, %v19665_v3  ;;  %v3509_v54 = vpop.f32.mrf.mxu1  ;;  %v4269_v3 = vsel %vm3243_vm2, %v4267_v42, %v4268_v40  ;;  %v4277_v47 = vrot.slane %v20043_v57, 6  ;;  %v4278_v39 = vrot.slane %v20063_v36, 6  ;;  %15781 = vmatprep.subr.mxu0 %v5959_v29 }
 0x376   : > { %v4164_v51 = vld [vmem:[#allocation2 + $0x40] sm:$0x3]  ;;  %4433 = vst [vmem:[#allocation2 + $0x28] sm:$0x3] %v4385_v6  ;;  %4432 = vst [vmem:[#allocation2 + $0x20] sm:$0xff] %v4384_v46  ;;  %v3756_v15 = vadd.f32 %v3708_v50, %v3509_v54  ;;  %v20067_v14 = vpop.f32.mrf.mxu0  ;;  %15782 = vmatpush3.msra.mxu0 %v5959_v29  ;;  %v4274_v6 = vsel %vm3243_vm2, %v4272_v21, %v4273_v59  ;;  %v4276_v46 = vsel %vm3243_vm2, %v4273_v59, %v4275_v25 }
 0x377   : > { %v4388_v8 = vadd.f32 %v4265_v49, %v4164_v51  ;;  %3805 = vst [vmem:[#allocation2 + $0x5e] sm:$0x3] %v3757_v30  ;;  %v4162_v13 = vld [vmem:[#allocation2 + $0x30] sm:$0xff]  ;;  %v4163_v62 = vld [vmem:[#allocation2 + $0x38] sm:$0xff]  ;;  %v15377_v17 = vpop.f32.mrf.mxu1  ;;  %v4279_v50 = vsel %vm3243_vm2, %v4277_v47, %v4278_v39  ;;  %v4283_v21 = vrot.slane %v20067_v14, 6 }
 0x378   : > { %15728 = vmatmul.mubr.msk.f32.gmra.mxu1 %vm594_vm1, %v19682_v9  ;;  %v4386_v5 = vadd.f32 %v4264_v60, %v4162_v13  ;;  %v4387_v26 = vadd.f32 %v4266_v28, %v4163_v62  ;;  %3804 = vst [vmem:[#allocation2 + $0x56] sm:$0xff] %v3756_v15  ;;  %v3759_v16 = vadd.f32 %v15377_v17, %v3711_v52  ;;  %v20074_v0 = vpop.f32.mrf.mxu0  ;;  %v3717_v15 = vld [vmem:[#allocation2 + $0x9e] sm:$0xff]  ;;  %v23318_v13 = vld [vmem:[#allocation24_spill] sm:$0xff]  ;;  %v23319_v52 = vld [vmem:[#allocation25_spill] sm:$0xff] }
 0x379   : > { %4436 = vst [vmem:[#allocation2 + $0x40] sm:$0x3] %v4388_v8  ;;  %15730 = vmatprep.mubr.msk.f32.mxu1 %vm594_vm1, %v19689_v22  ;;  %v4165_v18 = vld [vmem:[#allocation2 + $0x48] sm:$0xff]  ;;  %v3519_v35 = vpop.f32.mrf.mxu1  ;;  %v3721_v29 = vld [vmem:[#allocation2 + $0xbe] sm:$0x3] }
 0x37a   : > { %4434 = vst [vmem:[#allocation2 + $0x30] sm:$0xff] %v4386_v5  ;;  %4435 = vst [vmem:[#allocation2 + $0x38] sm:$0xff] %v4387_v26  ;;  %v4389_v12 = vadd.f32 %v4269_v3, %v4165_v18  ;;  %v3758_v9 = vadd.f32 %v3710_v53, %v3519_v35  ;;  %v20077_v55 = vpop.f32.mrf.mxu0  ;;  %v4280_v26 = vrot.slane %v20055_v33, 6  ;;  %v3716_v18 = vld [vmem:[#allocation2 + $0x96] sm:$0xff] }
 0x37b   : > { %3807 = vst [vmem:[#allocation2 + $0x6e] sm:$0xff] %v3759_v16  ;;  %v15380_v10 = vpop.f32.mrf.mxu1 }
 0x37c   : > { %15731 = vmatmul.mubr.msk.f32.gmra.mxu1 %vm594_vm1, %v19704_v43  ;;  %4437 = vst [vmem:[#allocation2 + $0x48] sm:$0xff] %v4389_v12  ;;  %3806 = vst [vmem:[#allocation2 + $0x66] sm:$0xff] %v3758_v9  ;;  %v3761_v22 = vadd.f32 %v15380_v10, %v3713_v41  ;;  %v20083_v11 = vpop.f32.mrf.mxu0  ;;  %v5958_v9 = vld [vmem:[#allocation15 + $0xf0] sm:$0xff]  ;;  %v4281_v59 = vsel %vm3243_vm2, %v4278_v39, %v4280_v26 }
 0x37d   : > { %15733 = vmatprep.mubr.msk.f32.mxu1 %vm594_vm1, %v19713_v44  ;;  %v3529_v63 = vpop.f32.mrf.mxu1  ;;  %v3719_v41 = vld [vmem:[#allocation2 + $0xae] sm:$0xff]  ;;  %15783 = vmatprep.subr.mxu0 %v5958_v9 }
 0x37e   : > { %3809 = vst [vmem:[#allocation2 + $0x7e] sm:$0xff] %v3761_v22  ;;  %v3760_v43 = vadd.f32 %v3712_v58, %v3529_v63  ;;  %v20089_v49 = vpop.f32.mrf.mxu0  ;;  %v23320_v22 = vld [vmem:[#allocation26_spill] sm:$0xff]  ;;  %15784 = vmatpush3.msra.mxu0 %v5958_v9  ;;  %v4282_v63 = vrot.slane %v20074_v0, 6 }
 0x37f   : > { %v4167_v61 = vld [vmem:[#allocation2 + $0x58] sm:$0x3]  ;;  %v4166_v44 = vld [vmem:[#allocation2 + $0x50] sm:$0xff]  ;;  %v15383_v7 = vpop.f32.mrf.mxu1 }
 0x380   : > { %15734 = vmatmul.mubr.msk.f32.gmra.mxu1 %vm594_vm1, %v19730_v19  ;;  %v4391_v48 = vadd.f32 %v4270_v37, %v4167_v61  ;;  %v4390_v42 = vadd.f32 %v4271_v56, %v4166_v44  ;;  %3808 = vst [vmem:[#allocation2 + $0x76] sm:$0x3] %v3760_v43  ;;  %v3763_v45 = vadd.f32 %v15383_v7, %v3715_v32  ;;  %v20097_v40 = vpop.f32.mrf.mxu0  ;;  %v3714_v19 = vld [vmem:[#allocation2 + $0x86] sm:$0xff]  ;;  %v4285_v43 = vrot.slane %v20083_v11, 6 }
 0x381   : > { %15736 = vmatprep.mubr.msk.f32.mxu1 %vm594_vm1, %v23317_v24  ;;  %v3539_v30 = vpop.f32.mrf.mxu1  ;;  %v5957_v44 = vld [vmem:[#allocation15 + $0xe8] sm:$0xff]  ;;  %v4287_v7 = vrot.slane %v20077_v55, 6  ;;  %v4288_v14 = vrot.slane %v20097_v40, 6  ;;  %v4284_v24 = vsel %vm3243_vm2, %v4282_v63, %v4283_v21 }
 0x382   : > { %v4170_v57 = vld [vmem:[#allocation2 + $0x70] sm:$0x3]  ;;  %4439 = vst [vmem:[#allocation2 + $0x58] sm:$0x3] %v4391_v48  ;;  %4438 = vst [vmem:[#allocation2 + $0x50] sm:$0xff] %v4390_v42  ;;  %v3762_v60 = vadd.f32 %v3714_v19, %v3539_v30  ;;  %v20101_v51 = vpop.f32.mrf.mxu0  ;;  %15785 = vmatprep.subr.mxu0 %v5957_v44  ;;  %v23321_v42 = vld [vmem:[#allocation27_spill] sm:$0xff] }
 0x383   : > { %v4394_v36 = vadd.f32 %v4275_v25, %v4170_v57  ;;  %3811 = vst [vmem:[#allocation2 + $0x8e] sm:$0x3] %v3763_v45  ;;  %v4168_v28 = vld [vmem:[#allocation2 + $0x60] sm:$0xff]  ;;  %v4169_v54 = vld [vmem:[#allocation2 + $0x68] sm:$0xff]  ;;  %v15386_v8 = vpop.f32.mrf.mxu1  ;;  %15786 = vmatpush3.msra.mxu0 %v5957_v44 }
 0x384   : > { %15737 = vmatmul.mubr.msk.f32.gmra.mxu1 %vm594_vm1, %v23318_v13  ;;  %v4392_v62 = vadd.f32 %v4274_v6, %v4168_v28  ;;  %v4393_v3 = vadd.f32 %v4276_v46, %v4169_v54  ;;  %3810 = vst [vmem:[#allocation2 + $0x86] sm:$0xff] %v3762_v60  ;;  %v3765_v17 = vadd.f32 %v15386_v8, %v3717_v15  ;;  %v20108_v5 = vpop.f32.mrf.mxu0  ;;  %v3718_v25 = vld [vmem:[#allocation2 + $0xa6] sm:$0x3]  ;;  %v3723_v54 = vld [vmem:[#allocation2 + $0xce] sm:$0xff] }
 0x385   : > { %4442 = vst [vmem:[#allocation2 + $0x70] sm:$0x3] %v4394_v36  ;;  %15739 = vmatprep.mubr.msk.f32.mxu1 %vm594_vm1, %v23319_v52  ;;  %v4171_v16 = vld [vmem:[#allocation2 + $0x78] sm:$0xff]  ;;  %v3549_v37 = vpop.f32.mrf.mxu1  ;;  %v4286_v6 = vsel %vm3243_vm2, %v4283_v21, %v4285_v43  ;;  %v4289_v60 = vsel %vm3243_vm2, %v4287_v7, %v4288_v14  ;;  %v3724_v21 = vld [vmem:[#allocation2 + $0xd6] sm:$0x3] }
 0x386   : > { %4440 = vst [vmem:[#allocation2 + $0x60] sm:$0xff] %v4392_v62  ;;  %4441 = vst [vmem:[#allocation2 + $0x68] sm:$0xff] %v4393_v3  ;;  %v4395_v35 = vadd.f32 %v4279_v50, %v4171_v16  ;;  %v3764_v53 = vadd.f32 %v3716_v18, %v3549_v37  ;;  %v20111_v12 = vpop.f32.mrf.mxu0  ;;  %v23322_v50 = vld [vmem:[#allocation28_spill] sm:$0xff]  ;;  %v4290_v3 = vrot.slane %v20089_v49, 6 }
 0x387   : > { %3813 = vst [vmem:[#allocation2 + $0x9e] sm:$0xff] %v3765_v17  ;;  %v15389_v10 = vpop.f32.mrf.mxu1 }
 0x388   : > { %15740 = vmatmul.mubr.msk.f32.gmra.mxu1 %vm594_vm1, %v23320_v22  ;;  %4443 = vst [vmem:[#allocation2 + $0x78] sm:$0xff] %v4395_v35  ;;  %3812 = vst [vmem:[#allocation2 + $0x96] sm:$0xff] %v3764_v53  ;;  %v3767_v33 = vadd.f32 %v15389_v10, %v3719_v41  ;;  %v20117_v56 = vpop.f32.mrf.mxu0  ;;  %v5956_v35 = vld [vmem:[#allocation15 + $0xe0] sm:$0xff]  ;;  %v20147_v53 = vld [vmem:[#allocation10 + $0x78] sm:$0xff]  ;;  %v4291_v41 = vsel %vm3243_vm2, %v4288_v14, %v4290_v3  ;;  %v4293_v22 = vrot.slane %v20101_v51, 6 }
 0x389   : > { %15742 = vmatprep.mubr.msk.f32.mxu1 %vm594_vm1, %v19785_v20  ;;  %v3559_v58 = vpop.f32.mrf.mxu1  ;;  %v3725_v10 = vld [vmem:[#allocation2 + $0xde] sm:$0xff]  ;;  %15787 = vmatprep.subr.mxu0 %v5956_v35 }
 0x38a   : > { %3815 = vst [vmem:[#allocation2 + $0xae] sm:$0xff] %v3767_v33  ;;  %v3766_v32 = vadd.f32 %v3718_v25, %v3559_v58  ;;  %v20123_v61 = vpop.f32.mrf.mxu0  ;;  %15788 = vmatpush3.msra.mxu0 %v5956_v35  ;;  %v4292_v33 = vrot.slane %v20108_v5, 6  ;;  %16061 = vmatprep.subr.mxu1 %v20147_v53  ;;  %v3727_v58 = vld [vmem:[#allocation2 + $0xee] sm:$0x3]  ;;  %v3730_v35 = vld [vmem:[#allocation2 + $0x106] sm:$0x3] }
 0x38b   : > { %v4173_v20 = vld [vmem:[#allocation2 + $0x88] sm:$0x3]  ;;  %v4172_v47 = vld [vmem:[#allocation2 + $0x80] sm:$0xff]  ;;  %v15392_v48 = vpop.f32.mrf.mxu1 }
 0x38c   : > { %15743 = vmatmul.mubr.msk.f32.gmra.mxu1 %vm594_vm1, %v19802_v31  ;;  %v4397_v0 = vadd.f32 %v4280_v26, %v4173_v20  ;;  %v4396_v39 = vadd.f32 %v4281_v59, %v4172_v47  ;;  %3814 = vst [vmem:[#allocation2 + $0xa6] sm:$0x3] %v3766_v32  ;;  %v3769_v11 = vadd.f32 %v15392_v48, %v3721_v29  ;;  %v20131_v45 = vpop.f32.mrf.mxu0  ;;  %v3720_v31 = vld [vmem:[#allocation2 + $0xb6] sm:$0xff]  ;;  %v3722_v26 = vld [vmem:[#allocation2 + $0xc6] sm:$0xff]  ;;  %v4297_v29 = vrot.slane %v20111_v12, 6 }
 0x38d   : > { %15745 = vmatprep.mubr.msk.f32.mxu1 %vm594_vm1, %v23321_v42  ;;  %v3569_v57 = vpop.f32.mrf.mxu1  ;;  %v4298_v51 = vrot.slane %v20131_v45, 6  ;;  %v4294_v7 = vsel %vm3243_vm2, %v4292_v33, %v4293_v22 }
 0x38e   : > { %v4176_v55 = vld [vmem:[#allocation2 + $0xa0] sm:$0x3]  ;;  %4445 = vst [vmem:[#allocation2 + $0x88] sm:$0x3] %v4397_v0  ;;  %4444 = vst [vmem:[#allocation2 + $0x80] sm:$0xff] %v4396_v39  ;;  %v3768_v46 = vadd.f32 %v3720_v31, %v3569_v57  ;;  %v20135_v30 = vpop.f32.mrf.mxu0 }
 0x38f   : > { %v4400_v40 = vadd.f32 %v4285_v43, %v4176_v55  ;;  %3817 = vst [vmem:[#allocation2 + $0xbe] sm:$0x3] %v3769_v11  ;;  %v4174_v19 = vld [vmem:[#allocation2 + $0x90] sm:$0xff]  ;;  %v4175_v36 = vld [vmem:[#allocation2 + $0x98] sm:$0xff]  ;;  %v15395_v28 = vpop.f32.mrf.mxu1 }
 0x390   : > { %15746 = vmatmul.mubr.msk.f32.gmra.mxu1 %vm594_vm1, %v23322_v50  ;;  %v4398_v8 = vadd.f32 %v4284_v24, %v4174_v19  ;;  %v4399_v15 = vadd.f32 %v4286_v6, %v4175_v36  ;;  %3816 = vst [vmem:[#allocation2 + $0xb6] sm:$0xff] %v3768_v46  ;;  %v3771_v13 = vadd.f32 %v15395_v28, %v3723_v54  ;;  %v20142_v62 = vpop.f32.mrf.mxu0  ;;  %v3729_v55 = vld [vmem:[#allocation2 + $0xfe] sm:$0xff]  ;;  %v4300_v46 = vrot.slane %v20123_v61, 6  ;;  %v5954_v50 = vld [vmem:[#allocation15 + $0xd0] sm:$0xff] }
 0x391   : > { %4448 = vst [vmem:[#allocation2 + $0xa0] sm:$0x3] %v4400_v40  ;;  %15748 = vmatprep.mubr.msk.f32.mxu1 %vm594_vm1, %v19833_v1  ;;  %v4177_v17 = vld [vmem:[#allocation2 + $0xa8] sm:$0xff]  ;;  %v3579_v52 = vpop.f32.mrf.mxu1  ;;  %v20190_v61 = vld [vmem:[%s18190_s17 + $0x110] sm:$0xff] }
 0x392   : > { %4446 = vst [vmem:[#allocation2 + $0x90] sm:$0xff] %v4398_v8  ;;  %4447 = vst [vmem:[#allocation2 + $0x98] sm:$0xff] %v4399_v15  ;;  %v4401_v16 = vadd.f32 %v4289_v60, %v4177_v17  ;;  %v3770_v37 = vadd.f32 %v3722_v26, %v3579_v52  ;;  %v20145_v18 = vpop.f32.mrf.mxu0  ;;  %v3728_v60 = vld [vmem:[#allocation2 + $0xf6] sm:$0xff]  ;;  %v3731_v15 = vld [vmem:[#allocation2 + $0x10e] sm:$0xff]  ;;  %v4301_v52 = vsel %vm3243_vm2, %v4298_v51, %v4300_v46  ;;  %v4303_v26 = vrot.slane %v20135_v30, 6 }
 0x393   : > { %3819 = vst [vmem:[#allocation2 + $0xce] sm:$0xff] %v3771_v13  ;;  %v15398_v9 = vpop.f32.mrf.mxu1  ;;  %v20185_v13 = vld [vmem:[%s18190_s17 + $0x108] sm:$0xff]  ;;  %v20204_v30 = vld [vmem:[%s18190_s17 + $0x118] sm:$0xff] }
 0x394   : > { %15749 = vmatmul.mubr.msk.f32.gmra.mxu1 %vm594_vm1, %v19848_v2  ;;  %4449 = vst [vmem:[#allocation2 + $0xa8] sm:$0xff] %v4401_v16  ;;  %3818 = vst [vmem:[#allocation2 + $0xc6] sm:$0xff] %v3770_v37  ;;  %v3773_v1 = vadd.f32 %v15398_v9, %v3725_v10  ;;  %v20153_v49 = vpop.f32.mrf.mxu0  ;;  %v4295_v2 = vrot.slane %v20117_v56, 6  ;;  %v5953_v17 = vld [vmem:[#allocation15 + $0xc8] sm:$0xff]  ;;  %v4302_v16 = vrot.slane %v20142_v62, 6 }
 0x395   : > { %15751 = vmatprep.mubr.msk.f32.mxu1 %vm594_vm1, %v19857_v23  ;;  %v3589_v59 = vpop.f32.mrf.mxu1  ;;  %v5955_v23 = vld [vmem:[#allocation15 + $0xd8] sm:$0xff]  ;;  %v4305_v9 = vrot.slane %v20153_v49, 6 }
 0x396   : > { %3821 = vst [vmem:[#allocation2 + $0xde] sm:$0xff] %v3773_v1  ;;  %v3772_v63 = vadd.f32 %v3724_v21, %v3589_v59  ;;  %v20160_v25 = vpop.f32.mrf.mxu0  ;;  %15789 = vmatprep.subr.mxu0 %v5955_v23  ;;  %v4296_v48 = vsel %vm3243_vm2, %v4293_v22, %v4295_v2  ;;  %v3733_v1 = vld [vmem:[#allocation2 + $0x11e] sm:$0x3]  ;;  %v4307_v59 = vrot.slane %v20145_v18, 6  ;;  %v4304_v18 = vsel %vm3243_vm2, %v4302_v16, %v4303_v26 }
 0x397   : > { %v4179_v43 = vld [vmem:[#allocation2 + $0xb8] sm:$0x3]  ;;  %v4178_v32 = vld [vmem:[#allocation2 + $0xb0] sm:$0xff]  ;;  %v15401_v44 = vpop.f32.mrf.mxu1  ;;  %15790 = vmatpush3.msra.mxu0 %v5955_v23 }
 0x398   : > { %15752 = vmatmul.mubr.msk.f32.gmra.mxu1 %vm594_vm1, %v19874_v4  ;;  %v4403_v5 = vadd.f32 %v4290_v3, %v4179_v43  ;;  %v4402_v56 = vadd.f32 %v4291_v41, %v4178_v32  ;;  %3820 = vst [vmem:[#allocation2 + $0xd6] sm:$0x3] %v3772_v63  ;;  %v3775_v20 = vadd.f32 %v15401_v44, %v3727_v58  ;;  %v20168_v47 = vpop.f32.mrf.mxu0  ;;  %v3726_v4 = vld [vmem:[#allocation2 + $0xe6] sm:$0xff]  ;;  %v3732_v44 = vld [vmem:[#allocation2 + $0x116] sm:$0xff] }
 0x399   : > { %15754 = vmatprep.mubr.msk.f32.mxu1 %vm594_vm1, %v19879_v34  ;;  %v3599_v14 = vpop.f32.mrf.mxu1  ;;  %v4299_v34 = vsel %vm3243_vm2, %v4297_v29, %v4298_v51  ;;  %15791 = vmatprep.subr.mxu0 %v5954_v50  ;;  %v4308_v62 = vrot.slane %v20168_v47, 6  ;;  %v20210_v58 = vld [vmem:[%s18190_s17 + $0x120] sm:$0xff]  ;;  %v4306_v32 = vsel %vm3243_vm2, %v4303_v26, %v4305_v9  ;;  %v3736_v26 = vld [vmem:[#allocation2 + $0x136] sm:$0x3] }
 0x39a   : > { %v4182_v12 = vld [vmem:[#allocation2 + $0xd0] sm:$0x3]  ;;  %4451 = vst [vmem:[#allocation2 + $0xb8] sm:$0x3] %v4403_v5  ;;  %4450 = vst [vmem:[#allocation2 + $0xb0] sm:$0xff] %v4402_v56  ;;  %v3774_v39 = vadd.f32 %v3726_v4, %v3599_v14  ;;  %v20172_v11 = vpop.f32.mrf.mxu0  ;;  %15792 = vmatpush3.msra.mxu0 %v5954_v50  ;;  %v20222_v14 = vld [vmem:[%s18190_s17 + $0x128] sm:$0xff] }
 0x39b   : > { %v4406_v0 = vadd.f32 %v4295_v2, %v4182_v12  ;;  %3823 = vst [vmem:[#allocation2 + $0xee] sm:$0x3] %v3775_v20  ;;  %v4180_v42 = vld [vmem:[#allocation2 + $0xc0] sm:$0xff]  ;;  %v4181_v45 = vld [vmem:[#allocation2 + $0xc8] sm:$0xff]  ;;  %v15404_v24 = vpop.f32.mrf.mxu1  ;;  %15793 = vmatprep.subr.mxu0 %v5953_v17 }
 0x39c   : > { %15755 = vmatmul.mubr.msk.f32.gmra.mxu1 %vm594_vm1, %v19894_v38  ;;  %v4404_v6 = vadd.f32 %v4294_v7, %v4180_v42  ;;  %v4405_v57 = vadd.f32 %v4296_v48, %v4181_v45  ;;  %3822 = vst [vmem:[#allocation2 + $0xe6] sm:$0xff] %v3774_v39  ;;  %v3777_v31 = vadd.f32 %v15404_v24, %v3729_v55  ;;  %v20179_v40 = vpop.f32.mrf.mxu0  ;;  %v3735_v48 = vld [vmem:[#allocation2 + $0x12e] sm:$0xff]  ;;  %v20242_v50 = vld [vmem:[%s18190_s17 + $0x140] sm:$0xff] }
 0x39d   : > { %4454 = vst [vmem:[#allocation2 + $0xd0] sm:$0x3] %v4406_v0  ;;  %15757 = vmatprep.mubr.msk.f32.mxu1 %vm594_vm1, %v19899_v27  ;;  %v4183_v19 = vld [vmem:[#allocation2 + $0xd8] sm:$0xff]  ;;  %v3609_v36 = vpop.f32.mrf.mxu1  ;;  %15794 = vmatpush3.msra.mxu0 %v5953_v17  ;;  %v4309_v7 = vsel %vm3243_vm2, %v4307_v59, %v4308_v62  ;;  %v20227_v42 = vld [vmem:[%s18190_s17 + $0x130] sm:$0xff]  ;;  %v4312_v17 = vrot.slane %v20179_v40, 6 }
 0x39e   : > { %4452 = vst [vmem:[#allocation2 + $0xc0] sm:$0xff] %v4404_v6  ;;  %4453 = vst [vmem:[#allocation2 + $0xc8] sm:$0xff] %v4405_v57  ;;  %v4407_v38 = vadd.f32 %v4299_v34, %v4183_v19  ;;  %v3776_v28 = vadd.f32 %v3728_v60, %v3609_v36  ;;  %v20182_v54 = vpop.f32.mrf.mxu0  ;;  %v4310_v34 = vrot.slane %v20160_v25, 6  ;;  %v3734_v6 = vld [vmem:[#allocation2 + $0x126] sm:$0xff]  ;;  %v3737_v60 = vld [vmem:[#allocation2 + $0x13e] sm:$0xff] }
 0x39f   : > { %3825 = vst [vmem:[#allocation2 + $0xfe] sm:$0xff] %v3777_v31  ;;  %v15407_v8 = vpop.f32.mrf.mxu1  ;;  %v5952_v19 = vld [vmem:[#allocation15 + $0xc0] sm:$0xff]  ;;  %v5951_v25 = vld [vmem:[#allocation15 + $0xb8] sm:$0xff] }
 0x3a0   : > { %15758 = vmatmul.mubr.msk.f32.gmra.mxu1 %vm594_vm1, %v20185_v13  ;;  %4455 = vst [vmem:[#allocation2 + $0xd8] sm:$0xff] %v4407_v38  ;;  %3824 = vst [vmem:[#allocation2 + $0xf6] sm:$0xff] %v3776_v28  ;;  %v3779_v27 = vadd.f32 %v15407_v8, %v3731_v15  ;;  %v20194_v3 = vpop.f32.mrf.mxu0  ;;  %v20237_v38 = vld [vmem:[%s18190_s17 + $0x138] sm:$0xff]  ;;  %15795 = vmatprep.subr.mxu0 %v5952_v19  ;;  %v4311_v15 = vsel %vm3243_vm2, %v4308_v62, %v4310_v34  ;;  %v20262_v62 = vld [vmem:[%s18190_s17 + $0x150] sm:$0xff] }
 0x3a1   : > { %15760 = vmatprep.mubr.msk.f32.mxu1 %vm594_vm1, %v20190_v61  ;;  %v3619_v37 = vpop.f32.mrf.mxu1  ;;  %15796 = vmatpush3.msra.mxu0 %v5952_v19  ;;  %v4315_v16 = vrot.slane %v20194_v3, 6 }
 0x3a2   : > { %3827 = vst [vmem:[#allocation2 + $0x10e] sm:$0xff] %v3779_v27  ;;  %v3778_v10 = vadd.f32 %v3730_v35, %v3619_v37  ;;  %v20200_v41 = vpop.f32.mrf.mxu0  ;;  %v4313_v27 = vrot.slane %v20172_v11, 6  ;;  %15797 = vmatprep.subr.mxu0 %v5951_v25  ;;  %v3739_v35 = vld [vmem:[#allocation2 + $0x14e] sm:$0x3] }
 0x3a3   : > { %v4185_v22 = vld [vmem:[#allocation2 + $0xe8] sm:$0x3]  ;;  %v4184_v33 = vld [vmem:[#allocation2 + $0xe0] sm:$0xff]  ;;  %v15410_v21 = vpop.f32.mrf.mxu1  ;;  %15798 = vmatpush3.msra.mxu0 %v5951_v25  ;;  %v3743_v25 = vld [vmem:[#allocation2 + $0x16e] sm:$0xff] }
 0x3a4   : > { %15761 = vmatmul.mubr.msk.f32.gmra.mxu1 %vm594_vm1, %v20204_v30  ;;  %v4409_v49 = vadd.f32 %v4300_v46, %v4185_v22  ;;  %v4408_v2 = vadd.f32 %v4301_v52, %v4184_v33  ;;  %3826 = vst [vmem:[#allocation2 + $0x106] sm:$0x3] %v3778_v10  ;;  %v3781_v63 = vadd.f32 %v15410_v21, %v3733_v1  ;;  %v20214_v23 = vpop.f32.mrf.mxu0  ;;  %v4317_v22 = vrot.slane %v20182_v54, 6  ;;  %v20256_v11 = vld [vmem:[%s18190_s17 + $0x148] sm:$0xff] }
 0x3a5   : > { %15763 = vmatprep.mubr.msk.f32.mxu1 %vm594_vm1, %v20210_v58  ;;  %v3629_v29 = vpop.f32.mrf.mxu1  ;;  %v4318_v40 = vrot.slane %v20214_v23, 6  ;;  %v4314_v54 = vsel %vm3243_vm2, %v4312_v17, %v4313_v27  ;;  %v5950_v23 = vld [vmem:[#allocation15 + $0xb0] sm:$0xff] }
 0x3a6   : > { %v4188_v43 = vld [vmem:[#allocation2 + $0x100] sm:$0x3]  ;;  %4457 = vst [vmem:[#allocation2 + $0xe8] sm:$0x3] %v4409_v49  ;;  %4456 = vst [vmem:[#allocation2 + $0xe0] sm:$0xff] %v4408_v2  ;;  %v3780_v5 = vadd.f32 %v3732_v44, %v3629_v29  ;;  %v20218_v56 = vpop.f32.mrf.mxu0  ;;  %15799 = vmatprep.subr.mxu0 %v5950_v23 }
 0x3a7   : > { %v4412_v51 = vadd.f32 %v4305_v9, %v4188_v43  ;;  %3829 = vst [vmem:[#allocation2 + $0x11e] sm:$0x3] %v3781_v63  ;;  %v4186_v20 = vld [vmem:[#allocation2 + $0xf0] sm:$0xff]  ;;  %v4187_v47 = vld [vmem:[#allocation2 + $0xf8] sm:$0xff]  ;;  %v15413_v12 = vpop.f32.mrf.mxu1  ;;  %v4316_v63 = vsel %vm3243_vm2, %v4313_v27, %v4315_v16  ;;  %v3738_v43 = vld [vmem:[#allocation2 + $0x146] sm:$0xff]  ;;  %15800 = vmatpush3.msra.mxu0 %v5950_v23 }
 0x3a8   : > { %15764 = vmatmul.mubr.msk.f32.gmra.mxu1 %vm594_vm1, %v20222_v14  ;;  %v4410_v4 = vadd.f32 %v4304_v18, %v4186_v20  ;;  %v4411_v0 = vadd.f32 %v4306_v32, %v4187_v47  ;;  %3828 = vst [vmem:[#allocation2 + $0x116] sm:$0xff] %v3780_v5  ;;  %v3783_v39 = vadd.f32 %v15413_v12, %v3735_v48  ;;  %v20231_v45 = vpop.f32.mrf.mxu0  ;;  %v20272_v12 = vld [vmem:[%s18190_s17 + $0x158] sm:$0xff]  ;;  %v20288_v27 = vld [vmem:[%s18190_s17 + $0x170] sm:$0xff] }
 0x3a9   : > { %4460 = vst [vmem:[#allocation2 + $0x100] sm:$0x3] %v4412_v51  ;;  %15766 = vmatprep.mubr.msk.f32.mxu1 %vm594_vm1, %v20227_v42  ;;  %v4189_v24 = vld [vmem:[#allocation2 + $0x108] sm:$0xff]  ;;  %v3639_v55 = vpop.f32.mrf.mxu1  ;;  %v4319_v20 = vsel %vm3243_vm2, %v4317_v22, %v4318_v40  ;;  %v3745_v22 = vld [vmem:[#allocation2 + $0x17e] sm:$0x3] }
 0x3aa   : > { %4458 = vst [vmem:[#allocation2 + $0xf0] sm:$0xff] %v4410_v4  ;;  %4459 = vst [vmem:[#allocation2 + $0xf8] sm:$0xff] %v4411_v0  ;;  %v4413_v57 = vadd.f32 %v4309_v7, %v4189_v24  ;;  %v3782_v31 = vadd.f32 %v3734_v6, %v3639_v55  ;;  %v20234_v46 = vpop.f32.mrf.mxu0  ;;  %v3741_v7 = vld [vmem:[#allocation2 + $0x15e] sm:$0xff]  ;;  %v4320_v24 = vrot.slane %v20200_v41, 6 }
 0x3ab   : > { %3831 = vst [vmem:[#allocation2 + $0x12e] sm:$0xff] %v3783_v39  ;;  %v15416_v36 = vpop.f32.mrf.mxu1  ;;  %v20277_v39 = vld [vmem:[%s18190_s17 + $0x160] sm:$0xff] }
 0x3ac   : > { %15767 = vmatmul.mubr.msk.f32.gmra.mxu1 %vm594_vm1, %v20237_v38  ;;  %4461 = vst [vmem:[#allocation2 + $0x108] sm:$0xff] %v4413_v57  ;;  %3830 = vst [vmem:[#allocation2 + $0x126] sm:$0xff] %v3782_v31  ;;  %v3785_v28 = vadd.f32 %v15416_v36, %v3737_v60  ;;  %v20246_v8 = vpop.f32.mrf.mxu0  ;;  %v3740_v57 = vld [vmem:[#allocation2 + $0x156] sm:$0xff] }
 0x3ad   : > { %15769 = vmatprep.mubr.msk.f32.mxu1 %vm594_vm1, %v20242_v50  ;;  %v3649_v52 = vpop.f32.mrf.mxu1 }
 0x3ae   : > { %3833 = vst [vmem:[#allocation2 + $0x13e] sm:$0xff] %v3785_v28  ;;  %v3784_v37 = vadd.f32 %v3736_v26, %v3649_v52  ;;  %v20252_v9 = vpop.f32.mrf.mxu0  ;;  %v20283_v28 = vld [vmem:[%s18190_s17 + $0x168] sm:$0xff]  ;;  %v4321_v52 = vsel %vm3243_vm2, %v4318_v40, %v4320_v24  ;;  %v4323_v26 = vrot.slane %v20218_v56, 6  ;;  %v20298_v40 = vld [vmem:[%s18190_s17 + $0x178] sm:$0xff] }
 0x3af   : > { %v4191_v10 = vld [vmem:[#allocation2 + $0x118] sm:$0x3]  ;;  %v4190_v1 = vld [vmem:[#allocation2 + $0x110] sm:$0xff]  ;;  %v15419_v33 = vpop.f32.mrf.mxu1 }
 0x3b0   : > { %15770 = vmatmul.mubr.msk.f32.gmra.mxu1 %vm594_vm1, %v20256_v11  ;;  %v4415_v3 = vadd.f32 %v4310_v34, %v4191_v10  ;;  %v4414_v59 = vadd.f32 %v4311_v15, %v4190_v1  ;;  %3832 = vst [vmem:[#allocation2 + $0x136] sm:$0x3] %v3784_v37  ;;  %v3787_v21 = vadd.f32 %v15419_v33, %v3739_v35  ;;  %v20266_v49 = vpop.f32.mrf.mxu0  ;;  %v5949_v15 = vld [vmem:[#allocation15 + $0xa8] sm:$0xff]  ;;  %v3742_v35 = vld [vmem:[#allocation2 + $0x166] sm:$0x3]  ;;  %v4325_v10 = vrot.slane %v20246_v8, 6 }
 0x3b1   : > { %15772 = vmatprep.mubr.msk.f32.mxu1 %vm594_vm1, %v20262_v62  ;;  %v3659_v18 = vpop.f32.mrf.mxu1  ;;  %15801 = vmatprep.subr.mxu0 %v5949_v15  ;;  %v4328_v56 = vrot.slane %v20266_v49, 6 }
 0x3b2   : > { %v4194_v2 = vld [vmem:[#allocation2 + $0x130] sm:$0x3]  ;;  %4463 = vst [vmem:[#allocation2 + $0x118] sm:$0x3] %v4415_v3  ;;  %4462 = vst [vmem:[#allocation2 + $0x110] sm:$0xff] %v4414_v59  ;;  %v3786_v29 = vadd.f32 %v3738_v43, %v3659_v18  ;;  %v15623_v44 = vpop.f32.mrf.mxu0  ;;  %15802 = vmatpush3.msra.mxu0 %v5949_v15  ;;  %v4326_v23 = vsel %vm3243_vm2, %v4323_v26, %v4325_v10 }
 0x3b3   : > { %v4418_v32 = vadd.f32 %v4315_v16, %v4194_v2  ;;  %3835 = vst [vmem:[#allocation2 + $0x14e] sm:$0x3] %v3787_v21  ;;  %v4192_v51 = vld [vmem:[#allocation2 + $0x120] sm:$0xff]  ;;  %v4193_v5 = vld [vmem:[#allocation2 + $0x128] sm:$0xff]  ;;  %v15422_v47 = vpop.f32.mrf.mxu1  ;;  %v4322_v16 = vrot.slane %v20231_v45, 6  ;;  %v4327_v21 = vrot.slane %v20234_v46, 6 }
 0x3b4   : > { %15773 = vmatmul.mubr.msk.f32.gmra.mxu1 %vm594_vm1, %v20272_v12  ;;  %v4416_v48 = vadd.f32 %v4314_v54, %v4192_v51  ;;  %v4417_v4 = vadd.f32 %v4316_v63, %v4193_v5  ;;  %3834 = vst [vmem:[#allocation2 + $0x146] sm:$0xff] %v3786_v29  ;;  %v3789_v0 = vadd.f32 %v15422_v47, %v3741_v7  ;;  %v4937_v34 = vpop.f32.mrf.mxu0  ;;  %v20304_v63 = vld [vmem:[%s18190_s17] sm:$0xff]  ;;  %v3744_v29 = vld [vmem:[#allocation2 + $0x176] sm:$0xff] }
 0x3b5   : > { %4466 = vst [vmem:[#allocation2 + $0x130] sm:$0x3] %v4418_v32  ;;  %15775 = vmatprep.mubr.msk.f32.mxu1 %vm594_vm1, %v20277_v39  ;;  %v4195_v55 = vld [vmem:[#allocation2 + $0x138] sm:$0xff]  ;;  %v3669_v6 = vpop.f32.mrf.mxu1  ;;  %v4324_v46 = vsel %vm3243_vm2, %v4322_v16, %v4323_v26  ;;  %v5948_v44 = vld [vmem:[#allocation15 + $0xa0] sm:$0xff] }
 0x3b6   : > { %4464 = vst [vmem:[#allocation2 + $0x120] sm:$0xff] %v4416_v48  ;;  %4465 = vst [vmem:[#allocation2 + $0x128] sm:$0xff] %v4417_v4  ;;  %v4419_v31 = vadd.f32 %v4319_v20, %v4195_v55  ;;  %v3788_v19 = vadd.f32 %v3740_v57, %v3669_v6  ;;  %v15626_v36 = vpop.f32.mrf.mxu0  ;;  %v7028_v20 = vld [vmem:[#allocation10 + $0x70] sm:$0xff]  ;;  %15803 = vmatprep.subr.mxu0 %v5948_v44  ;;  %v4329_v48 = vsel %vm3243_vm2, %v4327_v21, %v4328_v56  ;;  %v7027_v57 = vld [vmem:[#allocation10 + $0x68] sm:$0xff] }
 0x3b7   : > { %3837 = vst [vmem:[#allocation2 + $0x15e] sm:$0xff] %v3789_v0  ;;  %v15425_v60 = vpop.f32.mrf.mxu1  ;;  %v20312_v0 = vld [vmem:[%s18190_s17 + $0x8] sm:$0xff]  ;;  %15804 = vmatpush3.msra.mxu0 %v5948_v44  ;;  %v20317_v55 = vld [vmem:[%s18190_s17 + $0x10] sm:$0xff] }
 0x3b8   : > { %15776 = vmatmul.mubr.msk.f32.gmra.mxu1 %vm594_vm1, %v20283_v28  ;;  %4467 = vst [vmem:[#allocation2 + $0x138] sm:$0xff] %v4419_v31  ;;  %3836 = vst [vmem:[#allocation2 + $0x156] sm:$0xff] %v3788_v19  ;;  %v3791_v41 = vadd.f32 %v15425_v60, %v3743_v25  ;;  %v4945_v17 = vpop.f32.mrf.mxu0  ;;  %v4330_v31 = vrot.slane %v20252_v9, 6  ;;  %v7026_v25 = vld [vmem:[#allocation10 + $0x60] sm:$0xff]  ;;  %v7025_v9 = vld [vmem:[#allocation10 + $0x58] sm:$0xff] }
 0x3b9   : > { %15778 = vmatprep.mubr.msk.f32.mxu1 %vm594_vm1, %v20288_v27  ;;  %v3679_v37 = vpop.f32.mrf.mxu1  ;;  %v5947_v17 = vld [vmem:[#allocation15 + $0x98] sm:$0xff]  ;;  %v20340_v21 = vld [vmem:[%s18190_s17 + $0x30] sm:$0xff] }
 0x3ba   : > { %3839 = vst [vmem:[#allocation2 + $0x16e] sm:$0xff] %v3791_v41  ;;  %v3790_v1 = vadd.f32 %v3742_v35, %v3679_v37  ;;  %v15629_v33 = vpop.f32.mrf.mxu0  ;;  %v20324_v41 = vld [vmem:[%s18190_s17 + $0x18] sm:$0xff]  ;;  %15805 = vmatprep.subr.mxu0 %v5947_v17  ;;  %v7024_v37 = vld [vmem:[#allocation10 + $0x50] sm:$0xff] }
 0x3bb   : > { %v4197_v3 = vld [vmem:[#allocation2 + $0x148] sm:$0x3]  ;;  %v4196_v59 = vld [vmem:[#allocation2 + $0x140] sm:$0xff]  ;;  %v15428_v54 = vpop.f32.mrf.mxu1  ;;  %15806 = vmatpush3.msra.mxu0 %v5947_v17 }
 0x3bc   : > { %15779 = vmatmul.mubr.msk.f32.gmra.mxu1 %vm594_vm1, %v20298_v40  ;;  %v4421_v45 = vadd.f32 %v4320_v24, %v4197_v3  ;;  %v4420_v8 = vadd.f32 %v4321_v52, %v4196_v59  ;;  %3838 = vst [vmem:[#allocation2 + $0x166] sm:$0x3] %v3790_v1  ;;  %v3793_v2 = vadd.f32 %v15428_v54, %v3745_v22  ;;  %v4953_v18 = vpop.f32.mrf.mxu0  ;;  %v20335_v22 = vld [vmem:[%s18190_s17 + $0x28] sm:$0xff] }
 0x3bd   : > { %15901 = vmatprep.mubr.msk.f32.mxu1 %vm594_vm1, %v20304_v63  ;;  %v3689_v32 = vpop.f32.mrf.mxu1  ;;  %v4331_v52 = vsel %vm3243_vm2, %v4328_v56, %v4330_v31  ;;  %v7023_v54 = vld [vmem:[#allocation10 + $0x48] sm:$0xff]  ;;  %v20345_v18 = vld [vmem:[%s18190_s17 + $0x38] sm:$0xff] }
 0x3be   : > { %v4200_v43 = vld [vmem:[#allocation2 + $0x160] sm:$0x3]  ;;  %4469 = vst [vmem:[#allocation2 + $0x148] sm:$0x3] %v4421_v45  ;;  %4468 = vst [vmem:[#allocation2 + $0x140] sm:$0xff] %v4420_v8  ;;  %v3792_v51 = vadd.f32 %v3744_v29, %v3689_v32  ;;  %v15632_v5 = vpop.f32.mrf.mxu0  ;;  %v5946_v29 = vld [vmem:[#allocation15 + $0x90] sm:$0xff] }
 0x3bf   : > { %v4424_v49 = vadd.f32 %v4325_v10, %v4200_v43  ;;  %3841 = vst [vmem:[#allocation2 + $0x17e] sm:$0x3] %v3793_v2  ;;  %v4198_v47 = vld [vmem:[#allocation2 + $0x150] sm:$0xff]  ;;  %v4199_v7 = vld [vmem:[#allocation2 + $0x158] sm:$0xff]  ;;  %v15535_v4 = vpop.f32.mrf.mxu1  ;;  %v7022_v8 = vld [vmem:[#allocation10 + $0x40] sm:$0xff]  ;;  %15807 = vmatprep.subr.mxu0 %v5946_v29 }
 0x3c0   : > { %15902 = vmatmul.mubr.msk.f32.vlgmr.msra.gmra.mxu1 %vm594_vm1, %v20312_v0  ;;  %v4422_v34 = vadd.f32 %v4324_v46, %v4198_v47  ;;  %v4423_v24 = vadd.f32 %v4326_v23, %v4199_v7  ;;  %3840 = vst [vmem:[#allocation2 + $0x176] sm:$0xff] %v3792_v51  ;;  %v4961_v6 = vpop.f32.mrf.mxu0  ;;  %v20350_v43 = vld [vmem:[%s18190_s17 + $0x40] sm:$0xff]  ;;  %v20360_v5 = vld [vmem:[%s18190_s17 + $0x50] sm:$0xff]  ;;  %15808 = vmatpush3.msra.mxu0 %v5946_v29  ;;  %v5945_v7 = vld [vmem:[#allocation15 + $0x88] sm:$0xff] }
 0x3c1   : > { %4472 = vst [vmem:[#allocation2 + $0x160] sm:$0x3] %v4424_v49  ;;  %15904 = vmatprep.mubr.msk.f32.mxu1 %vm594_vm1, %v20317_v55  ;;  %16062 = vmatpush3.msra.mxu1 %v20147_v53  ;;  %v4201_v19 = vld [vmem:[#allocation2 + $0x168] sm:$0xff]  ;;  %v4551_v36 = vpop.f32.mrf.mxu1  ;;  %v20329_v53 = vld [vmem:[%s18190_s17 + $0x20] sm:$0xff]  ;;  %v20365_v4 = vld [vmem:[%s18190_s17 + $0x58] sm:$0xff] }
 0x3c2   : > { %16063 = vmatprep.subr.mxu1 %v7028_v20  ;;  %4470 = vst [vmem:[#allocation2 + $0x150] sm:$0xff] %v4422_v34  ;;  %4471 = vst [vmem:[#allocation2 + $0x158] sm:$0xff] %v4423_v24  ;;  %v4425_v60 = vadd.f32 %v4329_v48, %v4201_v19  ;;  %v20355_v49 = vld [vmem:[%s18190_s17 + $0x48] sm:$0xff]  ;;  %15809 = vmatprep.subr.mxu0 %v5945_v7  ;;  %v20370_v24 = vld [vmem:[%s18190_s17 + $0x60] sm:$0xff] }
 0x3c3   : > { %16064 = vmatpush3.msra.mxu1 %v7028_v20  ;;  %v15538_v15 = vpop.f32.mrf.mxu1  ;;  %15810 = vmatpush3.msra.mxu0 %v5945_v7  ;;  %v20375_v19 = vld [vmem:[%s18190_s17 + $0x68] sm:$0xff]  ;;  %v4775_v7 = vld [vmem:[#allocation2 + $0x1e] sm:$0xff] }
 0x3c4   : > { %15905 = vmatmul.mubr.msk.f32.gmra.mxu1 %vm594_vm1, %v20324_v41  ;;  %16065 = vmatprep.subr.mxu1 %v7027_v57  ;;  %4473 = vst [vmem:[#allocation2 + $0x168] sm:$0xff] %v4425_v60  ;;  %v20380_v60 = vld [vmem:[%s18190_s17 + $0x70] sm:$0xff] }
 0x3c5   : > { %15907 = vmatprep.mubr.msk.f32.mxu1 %vm594_vm1, %v20329_v53  ;;  %16066 = vmatpush3.msra.mxu1 %v7027_v57  ;;  %v4559_v26 = vpop.f32.mrf.mxu1  ;;  %v15635_v16 = vpop.f32.mrf.mxu0 }
 0x3c6   : > { %16067 = vmatprep.subr.mxu1 %v7026_v25  ;;  %v20394_v16 = vld [vmem:[%s18190_s17 + $0x80] sm:$0xff] }
 0x3c7   : > { %16068 = vmatpush3.msra.mxu1 %v7026_v25  ;;  %v4203_v35 = vld [vmem:[#allocation2 + $0x178] sm:$0x3]  ;;  %v4202_v10 = vld [vmem:[#allocation2 + $0x170] sm:$0xff]  ;;  %v15541_v1 = vpop.f32.mrf.mxu1  ;;  %v4969_v33 = vpop.f32.mrf.mxu0 }
 0x3c8   : > { %15908 = vmatmul.mubr.msk.f32.gmra.mxu1 %vm594_vm1, %v20335_v22  ;;  %16069 = vmatprep.subr.mxu1 %v7025_v9  ;;  %v4427_v3 = vadd.f32 %v4330_v31, %v4203_v35  ;;  %v4426_v59 = vadd.f32 %v4331_v52, %v4202_v10  ;;  %v20387_v52 = vld [vmem:[%s18190_s17 + $0x78] sm:$0xff]  ;;  %v20404_v33 = vld [vmem:[%s18190_s17 + $0x88] sm:$0xff] }
 0x3c9   : > { %15910 = vmatprep.mubr.msk.f32.mxu1 %vm594_vm1, %v20340_v21  ;;  %16070 = vmatpush3.msra.mxu1 %v7025_v9  ;;  %v4567_v56 = vpop.f32.mrf.mxu1  ;;  %v15638_v45 = vpop.f32.mrf.mxu0  ;;  %v5944_v9 = vld [vmem:[#allocation15 + $0x80] sm:$0xff]  ;;  %v20400_v10 = vld [vmem:[#allocation10 + $0x38] sm:$0xff] }
 0x3ca   : > { %16071 = vmatprep.subr.mxu1 %v7024_v37  ;;  %4475 = vst [vmem:[#allocation2 + $0x178] sm:$0x3] %v4427_v3  ;;  %4474 = vst [vmem:[#allocation2 + $0x170] sm:$0xff] %v4426_v59  ;;  %15811 = vmatprep.subr.mxu0 %v5944_v9  ;;  %v20411_v59 = vld [vmem:[%s18190_s17 + $0x90] sm:$0xff] }
 0x3cb   : > { %16072 = vmatpush3.msra.mxu1 %v7024_v37  ;;  %v15544_v2 = vpop.f32.mrf.mxu1  ;;  %v4977_v46 = vpop.f32.mrf.mxu0  ;;  %15812 = vmatpush3.msra.mxu0 %v5944_v9  ;;  %23323 = vst [vmem:[#allocation29_spill] sm:$0xff] %v20400_v10 }
 0x3cc   : > { %15911 = vmatmul.mubr.msk.f32.gmra.mxu1 %vm594_vm1, %v20345_v18  ;;  %16073 = vmatprep.subr.mxu1 %v7023_v54  ;;  %v20418_v2 = vld [vmem:[%s18190_s17 + $0x98] sm:$0xff] }
 0x3cd   : > { %15913 = vmatprep.mubr.msk.f32.mxu1 %vm594_vm1, %v20350_v43  ;;  %16074 = vmatpush3.msra.mxu1 %v7023_v54  ;;  %v4575_v23 = vpop.f32.mrf.mxu1  ;;  %v15641_v32 = vpop.f32.mrf.mxu0 }
 0x3ce   : > { %16075 = vmatprep.subr.mxu1 %v7022_v8  ;;  %15973 = vmatprep.subr.mxu0 %v20400_v10  ;;  %v20425_v32 = vld [vmem:[%s18190_s17 + $0xa0] sm:$0xff]  ;;  %v20474_v10 = vld [vmem:[%s18190_s17 + $0xd8] sm:$0xff] }
 0x3cf   : > { %16076 = vmatpush3.msra.mxu1 %v7022_v8  ;;  %v15547_v44 = vpop.f32.mrf.mxu1  ;;  %v4985_v51 = vpop.f32.mrf.mxu0  ;;  %v4773_v8 = vld [vmem:[#allocation2 + $0xe] sm:$0xff]  ;;  %23330 = vst [vmem:[#allocation36_spill] sm:$0xff] %v20474_v10 }
 0x3d0   : > { %15914 = vmatmul.mubr.msk.f32.gmra.mxu1 %vm594_vm1, %v20355_v49  ;;  %v4772_v44 = vld [vmem:[#allocation2 + $0x6] sm:$0xff] }
 0x3d1   : > { %15916 = vmatprep.mubr.msk.f32.mxu1 %vm594_vm1, %v20360_v5  ;;  %v4583_v20 = vpop.f32.mrf.mxu1  ;;  %v15644_v47 = vpop.f32.mrf.mxu0 }
 0x3d3   : > { %v15550_v48 = vpop.f32.mrf.mxu1  ;;  %v4993_v34 = vpop.f32.mrf.mxu0 }
 0x3d4   : > { %15917 = vmatmul.mubr.msk.f32.gmra.mxu1 %vm594_vm1, %v20365_v4  ;;  %v20432_v48 = vld [vmem:[%s18190_s17 + $0xa8] sm:$0xff] }
 0x3d5   : > { %15919 = vmatprep.mubr.msk.f32.mxu1 %vm594_vm1, %v20370_v24  ;;  %v4591_v6 = vpop.f32.mrf.mxu1  ;;  %v15647_v57 = vpop.f32.mrf.mxu0 }
 0x3d6   : > { %v20439_v57 = vld [vmem:[%s18190_s17 + $0xb0] sm:$0xff] }
 0x3d7   : > { %v15553_v31 = vpop.f32.mrf.mxu1  ;;  %v5001_v36 = vpop.f32.mrf.mxu0 }
 0x3d8   : > { %15920 = vmatmul.mubr.msk.f32.gmra.mxu1 %vm594_vm1, %v20375_v19  ;;  %v4774_v36 = vld [vmem:[#allocation2 + $0x16] sm:$0x3] }
 0x3d9   : > { %15922 = vmatprep.mubr.msk.f32.mxu1 %vm594_vm1, %v20380_v60  ;;  %v4599_v25 = vpop.f32.mrf.mxu1  ;;  %v20384_v15 = vpop.f32.mrf.mxu0 }
 0x3db   : > { %v15556_v17 = vpop.f32.mrf.mxu1  ;;  %v20391_v26 = vpop.f32.mrf.mxu0 }
 0x3dc   : > { %15923 = vmatmul.mubr.msk.f32.gmra.mxu1 %vm594_vm1, %v20387_v52 }
 0x3dd   : > { %15925 = vmatprep.mubr.msk.f32.mxu1 %vm594_vm1, %v20394_v16  ;;  %v4607_v37 = vpop.f32.mrf.mxu1  ;;  %v20398_v35 = vpop.f32.mrf.mxu0 }
 0x3de   : > { %v4777_v37 = vld [vmem:[#allocation2 + $0x2e] sm:$0x3] }
 0x3df   : > { %v15559_v1 = vpop.f32.mrf.mxu1  ;;  %v20408_v3 = vpop.f32.mrf.mxu0 }
 0x3e0   : > { %15926 = vmatmul.mubr.msk.f32.gmra.mxu1 %vm594_vm1, %v20404_v33  ;;  %v20446_v1 = vld [vmem:[%s18190_s17 + $0xb8] sm:$0xff] }
 0x3e1   : > { %15928 = vmatprep.mubr.msk.f32.mxu1 %vm594_vm1, %v20411_v59  ;;  %v4615_v54 = vpop.f32.mrf.mxu1  ;;  %v20415_v56 = vpop.f32.mrf.mxu0 }
 0x3e3   : > { %v15562_v45 = vpop.f32.mrf.mxu1  ;;  %v20422_v46 = vpop.f32.mrf.mxu0 }
 0x3e4   : > { %15929 = vmatmul.mubr.msk.f32.gmra.mxu1 %vm594_vm1, %v20418_v2  ;;  %v4803_v23 = vadd.f32 %v15562_v45, %v4773_v8  ;;  %v20453_v8 = vld [vmem:[%s18190_s17 + $0xc0] sm:$0xff] }
 0x3e5   : > { %15931 = vmatprep.mubr.msk.f32.mxu1 %vm594_vm1, %v20425_v32  ;;  %v4623_v29 = vpop.f32.mrf.mxu1  ;;  %v20429_v51 = vpop.f32.mrf.mxu0 }
 0x3e6   : > { %23324 = vst [vmem:[#allocation30_spill] sm:$0xff] %v20429_v51  ;;  %4833 = vst [vmem:[#allocation2 + $0xe] sm:$0xff] %v4803_v23  ;;  %v4802_v20 = vadd.f32 %v4772_v44, %v4623_v29  ;;  %v4776_v29 = vld [vmem:[#allocation2 + $0x26] sm:$0xff] }
 0x3e7   : > { %v15565_v47 = vpop.f32.mrf.mxu1  ;;  %v20436_v34 = vpop.f32.mrf.mxu0 }
 0x3e8   : > { %15932 = vmatmul.mubr.msk.f32.gmra.mxu1 %vm594_vm1, %v20432_v48  ;;  %23325 = vst [vmem:[#allocation31_spill] sm:$0xff] %v20436_v34  ;;  %4832 = vst [vmem:[#allocation2 + $0x6] sm:$0xff] %v4802_v20  ;;  %v4805_v6 = vadd.f32 %v15565_v47, %v4775_v7  ;;  %v4779_v7 = vld [vmem:[#allocation2 + $0x3e] sm:$0xff]  ;;  %v20500_v34 = vld [vmem:[%s18190_s17 + $0xf0] sm:$0xff] }
 0x3e9   : > { %15934 = vmatprep.mubr.msk.f32.mxu1 %vm594_vm1, %v20439_v57  ;;  %v4633_v31 = vpop.f32.mrf.mxu1  ;;  %v20443_v25 = vpop.f32.mrf.mxu0  ;;  %23335 = vst [vmem:[#allocation41_spill] sm:$0xff] %v20500_v34 }
 0x3ea   : > { %23326 = vst [vmem:[#allocation32_spill] sm:$0xff] %v20443_v25  ;;  %4835 = vst [vmem:[#allocation2 + $0x1e] sm:$0xff] %v4805_v6  ;;  %v4804_v9 = vadd.f32 %v4774_v36, %v4633_v31  ;;  %v20460_v6 = vld [vmem:[%s18190_s17 + $0xc8] sm:$0xff] }
 0x3eb   : > { %v15568_v17 = vpop.f32.mrf.mxu1  ;;  %v20450_v54 = vpop.f32.mrf.mxu0  ;;  %v4781_v25 = vld [vmem:[#allocation2 + $0x4e] sm:$0xff] }
 0x3ec   : > { %15935 = vmatmul.mubr.msk.f32.gmra.mxu1 %vm594_vm1, %v20446_v1  ;;  %4834 = vst [vmem:[#allocation2 + $0x16] sm:$0x3] %v4804_v9  ;;  %v4807_v45 = vadd.f32 %v15568_v17, %v4777_v37  ;;  %v20467_v9 = vld [vmem:[%s18190_s17 + $0xd0] sm:$0xff] }
 0x3ed   : > { %15937 = vmatprep.mubr.msk.f32.mxu1 %vm594_vm1, %v20453_v8  ;;  %v4643_v23 = vpop.f32.mrf.mxu1  ;;  %v20457_v44 = vpop.f32.mrf.mxu0  ;;  %23328 = vst [vmem:[#allocation34_spill] sm:$0xff] %v20467_v9  ;;  %v4778_v37 = vld [vmem:[#allocation2 + $0x36] sm:$0xff] }
 0x3ee   : > { %4837 = vst [vmem:[#allocation2 + $0x2e] sm:$0x3] %v4807_v45  ;;  %v4806_v20 = vadd.f32 %v4776_v29, %v4643_v23 }
 0x3ef   : > { %v15571_v47 = vpop.f32.mrf.mxu1  ;;  %v20464_v31 = vpop.f32.mrf.mxu0 }
 0x3f0   : > { %15938 = vmatmul.mubr.msk.f32.gmra.mxu1 %vm594_vm1, %v20460_v6  ;;  %23327 = vst [vmem:[#allocation33_spill] sm:$0xff] %v20464_v31  ;;  %4836 = vst [vmem:[#allocation2 + $0x26] sm:$0xff] %v4806_v20  ;;  %v4809_v36 = vadd.f32 %v15571_v47, %v4779_v7  ;;  %v20482_v31 = vld [vmem:[%s18190_s17 + $0xe0] sm:$0xff] }
 0x3f1   : > { %15940 = vmatprep.mubr.msk.f32.mxu1 %vm594_vm1, %v20467_v9  ;;  %v4653_v17 = vpop.f32.mrf.mxu1  ;;  %v20471_v45 = vpop.f32.mrf.mxu0  ;;  %23332 = vst [vmem:[#allocation38_spill] sm:$0xff] %v20482_v31  ;;  %v20507_v9 = vld [vmem:[%s18190_s17 + $0xf8] sm:$0xff] }
 0x3f2   : > { %23329 = vst [vmem:[#allocation35_spill] sm:$0xff] %v20471_v45  ;;  %4839 = vst [vmem:[#allocation2 + $0x3e] sm:$0xff] %v4809_v36  ;;  %v4808_v23 = vadd.f32 %v4778_v37, %v4653_v17  ;;  %v20486_v36 = vld [vmem:[#allocation10 + $0xf8] sm:$0xff]  ;;  %v4780_v37 = vld [vmem:[#allocation2 + $0x46] sm:$0x3] }
 0x3f3   : > { %v15574_v29 = vpop.f32.mrf.mxu1  ;;  %v5160_v51 = vld [vmem:[#allocation2 + $0x10] sm:$0xff]  ;;  %v20478_v20 = vpop.f32.mrf.mxu0  ;;  %16237 = vmatprep.subr.mxu1 %v20486_v36 }
 0x3f4   : > { %15941 = vmatmul.mubr.msk.f32.gmra.mxu1 %vm594_vm1, %v20474_v10  ;;  %23331 = vst [vmem:[#allocation37_spill] sm:$0xff] %v20478_v20  ;;  %4838 = vst [vmem:[#allocation2 + $0x36] sm:$0xff] %v4808_v23  ;;  %v4811_v47 = vadd.f32 %v15574_v29, %v4781_v25  ;;  %v5190_v7 = vadd.f32 %v5160_v51, %v20408_v3  ;;  %v4783_v3 = vld [vmem:[#allocation2 + $0x5e] sm:$0x3]  ;;  %v20492_v51 = vld [vmem:[%s18190_s17 + $0xe8] sm:$0xff] }
 0x3f5   : > { %15943 = vmatprep.mubr.msk.f32.mxu1 %vm594_vm1, %v20482_v31  ;;  %v4663_v17 = vpop.f32.mrf.mxu1  ;;  %v20488_v45 = vpop.f32.mrf.mxu0  ;;  %23334 = vst [vmem:[#allocation40_spill] sm:$0xff] %v20492_v51  ;;  %v4785_v10 = vld [vmem:[#allocation2 + $0x6e] sm:$0xff] }
 0x3f6   : > { %23333 = vst [vmem:[#allocation39_spill] sm:$0xff] %v20488_v45  ;;  %4841 = vst [vmem:[#allocation2 + $0x4e] sm:$0xff] %v4811_v47  ;;  %v4810_v23 = vadd.f32 %v4780_v37, %v4663_v17 }
 0x3f7   : > { %5220 = vst [vmem:[#allocation2 + $0x10] sm:$0xff] %v5190_v7  ;;  %v5163_v25 = vld [vmem:[#allocation2 + $0x28] sm:$0xff]  ;;  %v15577_v29 = vpop.f32.mrf.mxu1  ;;  %v20496_v20 = vpop.f32.mrf.mxu0  ;;  %v4782_v7 = vld [vmem:[#allocation2 + $0x56] sm:$0xff] }
 0x3f8   : > { %15944 = vmatmul.mubr.msk.f32.gmra.mxu1 %vm594_vm1, %v20492_v51  ;;  %4840 = vst [vmem:[#allocation2 + $0x46] sm:$0x3] %v4810_v23  ;;  %v5193_v31 = vadd.f32 %v20415_v56, %v5163_v25  ;;  %v4813_v45 = vadd.f32 %v15577_v29, %v4783_v3  ;;  %v20514_v25 = vld [vmem:[%s18190_s17 + $0x100] sm:$0xff] }
 0x3f9   : > { %15946 = vmatprep.mubr.msk.f32.mxu1 %vm594_vm1, %v20500_v34  ;;  %v4673_v47 = vpop.f32.mrf.mxu1  ;;  %v20504_v17 = vpop.f32.mrf.mxu0  ;;  %23337 = vst [vmem:[#allocation43_spill] sm:$0xff] %v20514_v25 }
 0x3fa   : > { %5223 = vst [vmem:[#allocation2 + $0x28] sm:$0xff] %v5193_v31  ;;  %4843 = vst [vmem:[#allocation2 + $0x5e] sm:$0x3] %v4813_v45  ;;  %v4812_v37 = vadd.f32 %v4782_v7, %v4673_v47  ;;  %v4784_v31 = vld [vmem:[#allocation2 + $0x66] sm:$0xff]  ;;  %v4787_v7 = vld [vmem:[#allocation2 + $0x7e] sm:$0xff] }
 0x3fb   : > { %v15580_v51 = vpop.f32.mrf.mxu1  ;;  %v20511_v56 = vpop.f32.mrf.mxu0 }
 0x3fc   : > { %15947 = vmatmul.mubr.msk.f32.gmra.mxu1 %vm594_vm1, %v20507_v9  ;;  %23336 = vst [vmem:[#allocation42_spill] sm:$0xff] %v20511_v56  ;;  %4842 = vst [vmem:[#allocation2 + $0x56] sm:$0xff] %v4812_v37  ;;  %v4815_v23 = vadd.f32 %v15580_v51, %v4785_v10  ;;  %v4786_v56 = vld [vmem:[#allocation2 + $0x76] sm:$0x3] }
 0x3fd   : > { %15949 = vmatprep.mubr.msk.f32.mxu1 %vm594_vm1, %v20514_v25  ;;  %v4683_v29 = vpop.f32.mrf.mxu1  ;;  %v20518_v45 = vpop.f32.mrf.mxu0 }
 0x3fe   : > { %23338 = vst [vmem:[#allocation44_spill] sm:$0xff] %v20518_v45  ;;  %4845 = vst [vmem:[#allocation2 + $0x6e] sm:$0xff] %v4815_v23  ;;  %v4814_v3 = vadd.f32 %v4784_v31, %v4683_v29  ;;  %v4789_v45 = vld [vmem:[#allocation2 + $0x8e] sm:$0x3] }
 0x3ff   : > { %v15583_v47 = vpop.f32.mrf.mxu1  ;;  %v5166_v34 = vld [vmem:[#allocation2 + $0x40] sm:$0xff]  ;;  %v20525_v25 = vpop.f32.mrf.mxu0 }
 0x400   : > { %15950 = vmatmul.mubr.msk.f32.gmra.mxu1 %vm594_vm1, %v20185_v13  ;;  %4844 = vst [vmem:[#allocation2 + $0x66] sm:$0xff] %v4814_v3  ;;  %v4817_v37 = vadd.f32 %v15583_v47, %v4787_v7  ;;  %v5196_v10 = vadd.f32 %v5166_v34, %v20450_v54  ;;  %v4788_v54 = vld [vmem:[#allocation2 + $0x86] sm:$0xff]  ;;  %v4791_v7 = vld [vmem:[#allocation2 + $0x9e] sm:$0xff] }
 0x401   : > { %15952 = vmatprep.mubr.msk.f32.mxu1 %vm594_vm1, %v20190_v61  ;;  %v4693_v51 = vpop.f32.mrf.mxu1  ;;  %v20532_v3 = vpop.f32.mrf.mxu0 }
 0x402   : > { %4847 = vst [vmem:[#allocation2 + $0x7e] sm:$0xff] %v4817_v37  ;;  %5226 = vst [vmem:[#allocation2 + $0x40] sm:$0xff] %v5196_v10  ;;  %v4816_v23 = vadd.f32 %v4786_v56, %v4693_v51  ;;  %v4793_v51 = vld [vmem:[#allocation2 + $0xae] sm:$0xff] }
 0x403   : > { %v5169_v29 = vld [vmem:[#allocation2 + $0x58] sm:$0xff]  ;;  %v15586_v31 = vpop.f32.mrf.mxu1 }
 0x404   : > { %15953 = vmatmul.mubr.msk.f32.gmra.mxu1 %vm594_vm1, %v20204_v30  ;;  %4846 = vst [vmem:[#allocation2 + $0x76] sm:$0x3] %v4816_v23  ;;  %v5199_v13 = vadd.f32 %v20457_v44, %v5169_v29  ;;  %v4819_v34 = vadd.f32 %v15586_v31, %v4789_v45  ;;  %v4790_v45 = vld [vmem:[#allocation2 + $0x96] sm:$0xff] }
 0x405   : > { %15955 = vmatprep.mubr.msk.f32.mxu1 %vm594_vm1, %v20210_v58  ;;  %v4703_v61 = vpop.f32.mrf.mxu1  ;;  %v5109_v58 = vpop.f32.mrf.mxu0 }
 0x406   : > { %5229 = vst [vmem:[#allocation2 + $0x58] sm:$0xff] %v5199_v13  ;;  %4849 = vst [vmem:[#allocation2 + $0x8e] sm:$0x3] %v4819_v34  ;;  %v4818_v56 = vadd.f32 %v4788_v54, %v4703_v61 }
 0x407   : > { %v15589_v47 = vpop.f32.mrf.mxu1  ;;  %v15683_v13 = vpop.f32.mrf.mxu0 }
 0x408   : > { %15956 = vmatmul.mubr.msk.f32.gmra.mxu1 %vm594_vm1, %v20222_v14  ;;  %4848 = vst [vmem:[#allocation2 + $0x86] sm:$0xff] %v4818_v56  ;;  %v4821_v30 = vadd.f32 %v15589_v47, %v4791_v7  ;;  %v4795_v56 = vld [vmem:[#allocation2 + $0xbe] sm:$0x3] }
 0x409   : > { %15958 = vmatprep.mubr.msk.f32.mxu1 %vm594_vm1, %v20227_v42  ;;  %v4713_v44 = vpop.f32.mrf.mxu1  ;;  %v4792_v42 = vld [vmem:[#allocation2 + $0xa6] sm:$0x3]  ;;  %v20548_v7 = vpop.f32.mrf.mxu0 }
 0x40a   : > { %4851 = vst [vmem:[#allocation2 + $0x9e] sm:$0xff] %v4821_v30  ;;  %v4820_v37 = vadd.f32 %v4790_v45, %v4713_v44  ;;  %v4797_v45 = vld [vmem:[#allocation2 + $0xce] sm:$0xff] }
 0x40b   : > { %v15592_v10 = vpop.f32.mrf.mxu1  ;;  %v5172_v23 = vld [vmem:[#allocation2 + $0x70] sm:$0xff] }
 0x40c   : > { %15959 = vmatmul.mubr.msk.f32.gmra.mxu1 %vm594_vm1, %v20237_v38  ;;  %4850 = vst [vmem:[#allocation2 + $0x96] sm:$0xff] %v4820_v37  ;;  %v4823_v29 = vadd.f32 %v15592_v10, %v4793_v51  ;;  %v5202_v14 = vadd.f32 %v5172_v23, %v20496_v20  ;;  %v4794_v20 = vld [vmem:[#allocation2 + $0xb6] sm:$0xff]  ;;  %v4796_v37 = vld [vmem:[#allocation2 + $0xc6] sm:$0xff]  ;;  %v4799_v23 = vld [vmem:[#allocation2 + $0xde] sm:$0xff] }
 0x40d   : > { %15961 = vmatprep.mubr.msk.f32.mxu1 %vm594_vm1, %v20242_v50  ;;  %v4723_v31 = vpop.f32.mrf.mxu1 }
 0x40e   : > { %4853 = vst [vmem:[#allocation2 + $0xae] sm:$0xff] %v4823_v29  ;;  %5232 = vst [vmem:[#allocation2 + $0x70] sm:$0xff] %v5202_v14  ;;  %v4822_v34 = vadd.f32 %v4792_v42, %v4723_v31 }
 0x40f   : > { %v5175_v61 = vld [vmem:[#allocation2 + $0x88] sm:$0xff]  ;;  %v15595_v54 = vpop.f32.mrf.mxu1 }
 0x410   : > { %15962 = vmatmul.mubr.msk.f32.gmra.mxu1 %vm594_vm1, %v20256_v11  ;;  %4852 = vst [vmem:[#allocation2 + $0xa6] sm:$0x3] %v4822_v34  ;;  %v5205_v38 = vadd.f32 %v20504_v17, %v5175_v61  ;;  %v4825_v47 = vadd.f32 %v15595_v54, %v4795_v56  ;;  %v4801_v56 = vld [vmem:[#allocation2 + $0xee] sm:$0x3] }
 0x411   : > { %15964 = vmatprep.mubr.msk.f32.mxu1 %vm594_vm1, %v20262_v62  ;;  %v4733_v50 = vpop.f32.mrf.mxu1  ;;  %v20554_v62 = vpop.f32.mrf.mxu0 }
 0x412   : > { %5235 = vst [vmem:[#allocation2 + $0x88] sm:$0xff] %v5205_v38  ;;  %4855 = vst [vmem:[#allocation2 + $0xbe] sm:$0x3] %v4825_v47  ;;  %v4824_v30 = vadd.f32 %v4794_v20, %v4733_v50  ;;  %v7669_v20 = vld [vmem:[#allocation10 + $0xf0] sm:$0xff] }
 0x413   : > { %v15598_v44 = vpop.f32.mrf.mxu1  ;;  %v20560_v42 = vpop.f32.mrf.mxu0 }
 0x414   : > { %15965 = vmatmul.mubr.msk.f32.gmra.mxu1 %vm594_vm1, %v20272_v12  ;;  %4854 = vst [vmem:[#allocation2 + $0xb6] sm:$0xff] %v4824_v30  ;;  %v4827_v11 = vadd.f32 %v15598_v44, %v4797_v45  ;;  %v7667_v44 = vld [vmem:[#allocation10 + $0xe0] sm:$0xff] }
 0x415   : > { %15967 = vmatprep.mubr.msk.f32.mxu1 %vm594_vm1, %v20277_v39  ;;  %v4743_v17 = vpop.f32.mrf.mxu1  ;;  %v4798_v39 = vld [vmem:[#allocation2 + $0xd6] sm:$0x3]  ;;  %v20566_v47 = vpop.f32.mrf.mxu0 }
 0x416   : > { %4857 = vst [vmem:[#allocation2 + $0xce] sm:$0xff] %v4827_v11  ;;  %v4826_v10 = vadd.f32 %v4796_v37, %v4743_v17 }
 0x417   : > { %v15601_v51 = vpop.f32.mrf.mxu1  ;;  %v5178_v29 = vld [vmem:[#allocation2 + $0xa0] sm:$0xff] }
 0x418   : > { %15968 = vmatmul.mubr.msk.f32.gmra.mxu1 %vm594_vm1, %v20283_v28  ;;  %4856 = vst [vmem:[#allocation2 + $0xc6] sm:$0xff] %v4826_v10  ;;  %v4829_v14 = vadd.f32 %v15601_v51, %v4799_v23  ;;  %v5208_v12 = vadd.f32 %v5178_v29, %v5109_v58  ;;  %v4800_v58 = vld [vmem:[#allocation2 + $0xe6] sm:$0xff] }
 0x419   : > { %15970 = vmatprep.mubr.msk.f32.mxu1 %vm594_vm1, %v20288_v27  ;;  %v4753_v31 = vpop.f32.mrf.mxu1  ;;  %v7663_v29 = vld [vmem:[#allocation10 + $0xc0] sm:$0xff] }
 0x41a   : > { %4859 = vst [vmem:[#allocation2 + $0xde] sm:$0xff] %v4829_v14  ;;  %5238 = vst [vmem:[#allocation2 + $0xa0] sm:$0xff] %v5208_v12  ;;  %v4828_v34 = vadd.f32 %v4798_v39, %v4753_v31 }
 0x41b   : > { %v5181_v61 = vld [vmem:[#allocation2 + $0xb8] sm:$0xff]  ;;  %v15604_v54 = vpop.f32.mrf.mxu1 }
 0x41c   : > { %15971 = vmatmul.mubr.msk.f32.gmra.mxu1 %vm594_vm1, %v20298_v40  ;;  %4858 = vst [vmem:[#allocation2 + $0xd6] sm:$0x3] %v4828_v34  ;;  %v5211_v28 = vadd.f32 %v15683_v13, %v5181_v61  ;;  %v4831_v38 = vadd.f32 %v15604_v54, %v4801_v56  ;;  %v7668_v40 = vld [vmem:[#allocation10 + $0xe8] sm:$0xff]  ;;  %v5139_v13 = vpop.f32.mrf.mxu0 }
 0x41d   : > { %16077 = vmatprep.mubr.msk.f32.mxu1 %vm594_vm1, %v20304_v63  ;;  %v4763_v27 = vpop.f32.mrf.mxu1 }
 0x41e   : > { %5241 = vst [vmem:[#allocation2 + $0xb8] sm:$0xff] %v5211_v28  ;;  %4861 = vst [vmem:[#allocation2 + $0xee] sm:$0x3] %v4831_v38  ;;  %v4830_v50 = vadd.f32 %v4800_v58, %v4763_v27  ;;  %v15692_v37 = vpop.f32.mrf.mxu0  ;;  %v5546_v38 = vld [vmem:[#allocation2 + $0x10] sm:$0x3]  ;;  %v5161_v58 = vld [vmem:[#allocation2 + $0x18] sm:$0xff] }
 0x41f   : > { %v15711_v30 = vpop.f32.mrf.mxu1 }
 0x420   : > { %16078 = vmatmul.mubr.msk.f32.vlgmr.msra.gmra.mxu1 %vm594_vm1, %v20312_v0  ;;  %4860 = vst [vmem:[#allocation2 + $0xe6] sm:$0xff] %v4830_v50  ;;  %v7666_v0 = vld [vmem:[#allocation10 + $0xd8] sm:$0xff]  ;;  %v5162_v30 = vld [vmem:[#allocation2 + $0x20] sm:$0xff] }
 0x421   : > { %16080 = vmatprep.mubr.msk.f32.mxu1 %vm594_vm1, %v20317_v55  ;;  %16238 = vmatpush3.msra.mxu1 %v20486_v36  ;;  %v5323_v63 = vpop.f32.mrf.mxu1  ;;  %v7665_v36 = vld [vmem:[#allocation10 + $0xd0] sm:$0xff] }
 0x422   : > { %16239 = vmatprep.subr.mxu1 %v7669_v20  ;;  %v5549_v63 = vld [vmem:[#allocation2 + $0x28] sm:$0x3] }
 0x423   : > { %16240 = vmatpush3.msra.mxu1 %v7669_v20  ;;  %v5184_v45 = vld [vmem:[#allocation2 + $0xd0] sm:$0xff]  ;;  %v15714_v11 = vpop.f32.mrf.mxu1 }
 0x424   : > { %16081 = vmatmul.mubr.msk.f32.gmra.mxu1 %vm594_vm1, %v20324_v41  ;;  %16241 = vmatprep.subr.mxu1 %v7668_v40  ;;  %v5214_v17 = vadd.f32 %v5184_v45, %v5139_v13 }
 0x425   : > { %16083 = vmatprep.mubr.msk.f32.mxu1 %vm594_vm1, %v20329_v53  ;;  %16242 = vmatpush3.msra.mxu1 %v7668_v40  ;;  %v5331_v55 = vpop.f32.mrf.mxu1  ;;  %v7664_v53 = vld [vmem:[#allocation10 + $0xc8] sm:$0xff] }
 0x426   : > { %16243 = vmatprep.subr.mxu1 %v7667_v44  ;;  %5244 = vst [vmem:[#allocation2 + $0xd0] sm:$0xff] %v5214_v17 }
 0x427   : > { %16244 = vmatpush3.msra.mxu1 %v7667_v44  ;;  %v5187_v10 = vld [vmem:[#allocation2 + $0xe8] sm:$0xff]  ;;  %v15717_v51 = vpop.f32.mrf.mxu1 }
 0x428   : > { %16084 = vmatmul.mubr.msk.f32.gmra.mxu1 %vm594_vm1, %v20335_v22  ;;  %16245 = vmatprep.subr.mxu1 %v7666_v0  ;;  %v5217_v41 = vadd.f32 %v15692_v37, %v5187_v10  ;;  %v23339_v37 = vld [vmem:[#allocation34_spill] sm:$0xff] }
 0x429   : > { %16086 = vmatprep.mubr.msk.f32.mxu1 %vm594_vm1, %v20340_v21  ;;  %16246 = vmatpush3.msra.mxu1 %v7666_v0  ;;  %v5339_v23 = vpop.f32.mrf.mxu1  ;;  %v20636_v10 = vld [vmem:[#allocation10 + $0x1b8] sm:$0xff] }
 0x42a   : > { %16247 = vmatprep.subr.mxu1 %v7665_v36  ;;  %5247 = vst [vmem:[#allocation2 + $0xe8] sm:$0xff] %v5217_v41 }
 0x42b   : > { %16248 = vmatpush3.msra.mxu1 %v7665_v36  ;;  %v15720_v14 = vpop.f32.mrf.mxu1 }
 0x42c   : > { %16087 = vmatmul.mubr.msk.f32.gmra.mxu1 %vm594_vm1, %v20345_v18  ;;  %16249 = vmatprep.subr.mxu1 %v7664_v53 }
 0x42d   : > { %16089 = vmatprep.mubr.msk.f32.mxu1 %vm594_vm1, %v20350_v43  ;;  %16250 = vmatpush3.msra.mxu1 %v7664_v53  ;;  %v5347_v22 = vpop.f32.mrf.mxu1 }
 0x42e   : > { %16251 = vmatprep.subr.mxu1 %v7663_v29  ;;  %v23340_v22 = vld [vmem:[#allocation36_spill] sm:$0xff] }
 0x42f   : > { %16252 = vmatpush3.msra.mxu1 %v7663_v29 }
 0x430   : > { %v15723_v21 = vpop.f32.mrf.mxu1  ;;  %16090 = vmatmul.mubr.msk.f32.gmra.mxu1 %vm594_vm1, %v20355_v49  ;;  %16413 = vmatprep.subr.mxu1 %v20636_v10 }
 0x431   : > { %16092 = vmatprep.mubr.msk.f32.mxu1 %vm594_vm1, %v20360_v5  ;;  %v5165_v21 = vld [vmem:[#allocation2 + $0x38] sm:$0xff] }
 0x432   : > { %v5355_v12 = vpop.f32.mrf.mxu1 }
 0x433   : > { %v23341_v12 = vld [vmem:[#allocation31_spill] sm:$0xff] }
 0x434   : > { %v15726_v31 = vpop.f32.mrf.mxu1  ;;  %16093 = vmatmul.mubr.msk.f32.gmra.mxu1 %vm594_vm1, %v20365_v4 }
 0x435   : > { %16095 = vmatprep.mubr.msk.f32.mxu1 %vm594_vm1, %v20370_v24 }
 0x436   : > { %v5363_v18 = vpop.f32.mrf.mxu1 }
 0x438   : > { %v15729_v43 = vpop.f32.mrf.mxu1  ;;  %16096 = vmatmul.mubr.msk.f32.gmra.mxu1 %vm594_vm1, %v20375_v19 }
 0x439   : > { %16098 = vmatprep.mubr.msk.f32.mxu1 %vm594_vm1, %v20380_v60  ;;  %v5158_v60 = vld [vmem:[#allocation2] sm:$0xff]  ;;  %v23342_v43 = vld [vmem:[#allocation38_spill] sm:$0xff] }
 0x43a   : > { %v5371_v49 = vpop.f32.mrf.mxu1  ;;  %v5188_v61 = vadd.f32 %v5158_v60, %v20391_v26 }
 0x43b   : > { %v23343_v49 = vld [vmem:[#allocation29_spill] sm:$0xff] }
 0x43c   : > { %v15732_v39 = vpop.f32.mrf.mxu1  ;;  %16099 = vmatmul.mubr.msk.f32.gmra.mxu1 %vm594_vm1, %v20387_v52 }
 0x43d   : > { %16101 = vmatprep.mubr.msk.f32.mxu1 %vm594_vm1, %v20394_v16  ;;  %v6728_v39 = vld [vmem:[#allocation10 + $0x28] sm:$0xff] }
 0x43e   : > { %v5379_v5 = vpop.f32.mrf.mxu1 }
 0x440   : > { %v15735_v4 = vpop.f32.mrf.mxu1  ;;  %16102 = vmatmul.mubr.msk.f32.gmra.mxu1 %vm594_vm1, %v20404_v33  ;;  %v5159_v33 = vld [vmem:[#allocation2 + $0x8] sm:$0xff] }
 0x441   : > { %16104 = vmatprep.mubr.msk.f32.mxu1 %vm594_vm1, %v20411_v59  ;;  %v5189_v26 = vadd.f32 %v20384_v15, %v5159_v33  ;;  %v5552_v33 = vld [vmem:[#allocation2 + $0x40] sm:$0x3] }
 0x442   : > { %v5387_v24 = vpop.f32.mrf.mxu1 }
 0x444   : > { %v15738_v19 = vpop.f32.mrf.mxu1  ;;  %16105 = vmatmul.mubr.msk.f32.gmra.mxu1 %vm594_vm1, %v20418_v2 }
 0x445   : > { %16107 = vmatprep.mubr.msk.f32.mxu1 %vm594_vm1, %v20425_v32  ;;  %v5605_v34 = vrot.slane %v15738_v19, 6  ;;  %v20618_v32 = vld [vmem:[%s23096_s4] ss:$0 sm:$0xff] }
 0x446   : > { %v5395_v52 = vpop.f32.mrf.mxu1 }
 0x447   : > { %v5604_v16 = vrot.slane %v5395_v52, 6 }
 0x448   : > { %v15741_v54 = vpop.f32.mrf.mxu1  ;;  %16108 = vmatmul.mubr.msk.f32.gmra.mxu1 %vm594_vm1, %v20432_v48 }
 0x449   : > { %v5606_v59 = vsel %vm3243_vm2, %v5604_v16, %v5605_v34  ;;  %16110 = vmatprep.mubr.msk.f32.mxu1 %vm594_vm1, %v20439_v57  ;;  %v5609_v44 = vrot.slane %v15741_v54, 6  ;;  %v6727_v16 = vld [vmem:[#allocation10 + $0x20] sm:$0xff] }
 0x44a   : > { %v5684_v2 = vadd.f32 %v5606_v59, %v5188_v61  ;;  %v5405_v56 = vpop.f32.mrf.mxu1  ;;  %v23344_v61 = vld [vmem:[#allocation30_spill] sm:$0xff] }
 0x44b   : > { %v5607_v28 = vrot.slane %v5405_v56, 6  ;;  %v5195_v54 = vadd.f32 %v23344_v61, %v5165_v21  ;;  %v6725_v21 = vld [vmem:[#allocation10 + $0x10] sm:$0xff] }
 0x44c   : > { %v15744_v27 = vpop.f32.mrf.mxu1  ;;  %16111 = vmatmul.mubr.msk.f32.gmra.mxu1 %vm594_vm1, %v20446_v1  ;;  %v5799_v48 = vadd.f32 %v20618_v32, %v5684_v2  ;;  %v5191_v1 = vadd.f32 %v20398_v35, %v5161_v58  ;;  %v5164_v35 = vld [vmem:[#allocation2 + $0x30] sm:$0xff]  ;;  %v23345_v2 = vld [vmem:[#allocation40_spill] sm:$0xff] }
 0x44d   : > { %v5608_v57 = vsel %vm3243_vm2, %v5605_v34, %v5607_v28  ;;  %v5686_v50 = vadd.f32 %v5607_v28, %v5546_v38  ;;  %v5612_v20 = vrot.slane %v15744_v27, 6  ;;  %16113 = vmatprep.mubr.msk.f32.mxu1 %vm594_vm1, %v20453_v8  ;;  %v5192_v8 = vadd.f32 %v5162_v30, %v20422_v46  ;;  %v6729_v46 = vld [vmem:[#allocation10 + $0x30] sm:$0xff]  ;;  %v5167_v28 = vld [vmem:[#allocation2 + $0x48] sm:$0xff]  ;;  %v5555_v30 = vld [vmem:[#allocation2 + $0x58] sm:$0x3] }
 0x44e   : > { %v5685_v40 = vadd.f32 %v5608_v57, %v5189_v26  ;;  %v5415_v13 = vpop.f32.mrf.mxu1  ;;  %v5847_v15 = vmax.f32 %v5799_v48, 0.0  ;;  %v5194_v31 = vadd.f32 %v5164_v35, %v23341_v12  ;;  %v23346_v48 = vld [vmem:[#allocation41_spill] sm:$0xff] }
 0x44f   : > { %5716 = vst [vmem:[#allocation2 + $0x10] sm:$0x3] %v5686_v50  ;;  %v5689_v45 = vadd.f32 %v5612_v20, %v5549_v63  ;;  %v5610_v11 = vrot.slane %v5415_v13, 6  ;;  %v5168_v57 = vld [vmem:[#allocation2 + $0x50] sm:$0xff] }
 0x450   : > { %v15747_v17 = vpop.f32.mrf.mxu1  ;;  %16114 = vmatmul.mubr.msk.f32.gmra.mxu1 %vm594_vm1, %v20460_v6  ;;  %15813 = vmatprep.mubr.f32.mxu0 %v5847_v15  ;;  %v5800_v0 = vadd.f32 %v20618_v32, %v5685_v40 }
 0x451   : > { %5719 = vst [vmem:[#allocation2 + $0x28] sm:$0x3] %v5689_v45  ;;  %v5611_v55 = vsel %vm3243_vm2, %v5609_v44, %v5610_v11  ;;  %v5613_v36 = vsel %vm3243_vm2, %v5610_v11, %v5612_v20  ;;  %16116 = vmatprep.mubr.msk.f32.mxu1 %vm594_vm1, %v23339_v37  ;;  %v5615_v23 = vrot.slane %v15747_v17, 6  ;;  %v23347_v17 = vld [vmem:[#allocation32_spill] sm:$0xff] }
 0x452   : > { %v5687_v51 = vadd.f32 %v5611_v55, %v5191_v1  ;;  %v5425_v41 = vpop.f32.mrf.mxu1  ;;  %v5848_v53 = vmax.f32 %v5800_v0, 0.0  ;;  %v5688_v6 = vadd.f32 %v5613_v36, %v5192_v8  ;;  %v6726_v1 = vld [vmem:[#allocation10 + $0x18] sm:$0xff]  ;;  %v5197_v0 = vadd.f32 %v23347_v17, %v5167_v28  ;;  %v23348_v55 = vld [vmem:[#allocation33_spill] sm:$0xff] }
 0x453   : > { %v5614_v29 = vrot.slane %v5425_v41, 6  ;;  %v5198_v36 = vadd.f32 %v5168_v57, %v23348_v55  ;;  %v5170_v41 = vld [vmem:[#allocation2 + $0x60] sm:$0xff]  ;;  %v20683_v28 = vld [vmem:[%s18190_s17 + $0x118] sm:$0xff] }
 0x454   : > { %v15750_v14 = vpop.f32.mrf.mxu1  ;;  %16117 = vmatmul.mubr.msk.f32.gmra.mxu1 %vm594_vm1, %v23340_v22  ;;  %15814 = vmatmul.mubr.f32.vlgmr.msra.gmra.mxu0 %v5848_v53  ;;  %v5802_v24 = vadd.f32 %v20618_v32, %v5687_v51  ;;  %v5803_v34 = vadd.f32 %v20618_v32, %v5688_v6  ;;  %v23349_v51 = vld [vmem:[#allocation43_spill] sm:$0xff] }
 0x455   : > { %v5616_v18 = vsel %vm3243_vm2, %v5614_v29, %v5615_v23  ;;  %16119 = vmatprep.mubr.msk.f32.mxu1 %vm594_vm1, %v23342_v43  ;;  %15974 = vmatpush3.msra.mxu0 %v23343_v49  ;;  %v5619_v50 = vrot.slane %v15750_v14, 6  ;;  %v23350_v43 = vld [vmem:[#allocation37_spill] sm:$0xff] }
 0x456   : > { %v5435_v5 = vpop.f32.mrf.mxu1  ;;  %v5746_v4 = vld [vmem:[#allocation2 + $0x10] sm:$0xff]  ;;  %15975 = vmatprep.subr.mxu0 %v6729_v46  ;;  %v5690_v19 = vadd.f32 %v5616_v18, %v5194_v31  ;;  %v5850_v63 = vmax.f32 %v5802_v24, 0.0  ;;  %v5851_v45 = vmax.f32 %v5803_v34, 0.0  ;;  %v20667_v31 = vld [vmem:[%s18190_s17 + $0x108] sm:$0xff]  ;;  %v5200_v49 = vadd.f32 %v5170_v41, %v23350_v43 }
 0x457   : > { %v5617_v60 = vrot.slane %v5435_v5, 6  ;;  %v5801_v52 = vadd.f32 %v20618_v32, %v5746_v4  ;;  %15976 = vmatpush3.msra.mxu0 %v6729_v46  ;;  %v5171_v18 = vld [vmem:[#allocation2 + $0x68] sm:$0xff]  ;;  %v20674_v5 = vld [vmem:[%s18190_s17 + $0x110] sm:$0xff] }
 0x458   : > { %v15753_v59 = vpop.f32.mrf.mxu1  ;;  %16120 = vmatmul.mubr.msk.f32.gmra.mxu1 %vm594_vm1, %v23345_v2  ;;  %v5749_v56 = vld [vmem:[#allocation2 + $0x28] sm:$0xff]  ;;  %15977 = vmatprep.subr.mxu0 %v6728_v39  ;;  %v5805_v11 = vadd.f32 %v20618_v32, %v5690_v19  ;;  %v5558_v2 = vld [vmem:[#allocation2 + $0x70] sm:$0x3] }
 0x459   : > { %v5618_v26 = vsel %vm3243_vm2, %v5615_v23, %v5617_v60  ;;  %v5692_v38 = vadd.f32 %v5617_v60, %v5552_v33  ;;  %v5622_v27 = vrot.slane %v15753_v59, 6  ;;  %16122 = vmatprep.mubr.msk.f32.mxu1 %vm594_vm1, %v23346_v48  ;;  %v5849_v58 = vmax.f32 %v5801_v52, 0.0  ;;  %15978 = vmatpush3.msra.mxu0 %v6728_v39  ;;  %v6724_v52 = vld [vmem:[#allocation10 + $0x8] sm:$0xff]  ;;  %v23351_v33 = vld [vmem:[#allocation35_spill] sm:$0xff] }
 0x45a   : > { %v5691_v20 = vadd.f32 %v5618_v26, %v5195_v54  ;;  %v5445_v40 = vpop.f32.mrf.mxu1  ;;  %v5804_v13 = vadd.f32 %v20618_v32, %v5749_v56  ;;  %15979 = vmatprep.subr.mxu0 %v6727_v16  ;;  %v5853_v22 = vmax.f32 %v5805_v11, 0.0  ;;  %v5201_v59 = vadd.f32 %v23351_v33, %v5171_v18 }
 0x45b   : > { %5722 = vst [vmem:[#allocation2 + $0x40] sm:$0x3] %v5692_v38  ;;  %v5695_v15 = vadd.f32 %v5622_v27, %v5555_v30  ;;  %v5620_v44 = vrot.slane %v5445_v40, 6  ;;  %15816 = vmatprep.mubr.f32.mxu0 %v5849_v58  ;;  %15980 = vmatpush3.msra.mxu0 %v6727_v16  ;;  %v6723_v38 = vld [vmem:[#allocation10] sm:$0xff] }
 0x45c   : > { %v15756_v8 = vpop.f32.mrf.mxu1  ;;  %16123 = vmatmul.mubr.msk.f32.gmra.mxu1 %vm594_vm1, %v20507_v9  ;;  %15817 = vmatmul.mubr.f32.gmra.mxu0 %v5850_v63  ;;  %v5852_v23 = vmax.f32 %v5804_v13, 0.0  ;;  %v5806_v9 = vadd.f32 %v20618_v32, %v5691_v20  ;;  %v5174_v30 = vld [vmem:[#allocation2 + $0x80] sm:$0xff]  ;;  %v5561_v13 = vld [vmem:[#allocation2 + $0x88] sm:$0x3] }
 0x45d   : > { %5725 = vst [vmem:[#allocation2 + $0x58] sm:$0x3] %v5695_v15  ;;  %v5621_v37 = vsel %vm3243_vm2, %v5619_v50, %v5620_v44  ;;  %v5623_v35 = vsel %vm3243_vm2, %v5620_v44, %v5622_v27  ;;  %16125 = vmatprep.mubr.msk.f32.mxu1 %vm594_vm1, %v23349_v51  ;;  %15819 = vmatprep.mubr.f32.mxu0 %v5851_v45  ;;  %v5625_v46 = vrot.slane %v15756_v8, 6  ;;  %v5173_v27 = vld [vmem:[#allocation2 + $0x78] sm:$0xff]  ;;  %v20689_v50 = vld [vmem:[%s18190_s17 + $0x120] sm:$0xff] }
 0x45e   : > { %v5693_v53 = vadd.f32 %v5621_v37, %v5197_v0  ;;  %v5455_v6 = vpop.f32.mrf.mxu1  ;;  %15981 = vmatprep.subr.mxu0 %v6726_v1  ;;  %v5694_v29 = vadd.f32 %v5623_v35, %v5198_v36  ;;  %v5854_v24 = vmax.f32 %v5806_v9, 0.0  ;;  %v23352_v8 = vld [vmem:[#allocation39_spill] sm:$0xff]  ;;  %v20697_v37 = vld [vmem:[%s18190_s17 + $0x128] sm:$0xff]  ;;  %v20701_v35 = vld [vmem:[#allocation10 + $0xb8] sm:$0xff] }
 0x45f   : > { %v5624_v14 = vrot.slane %v5455_v6, 6  ;;  %15982 = vmatpush3.msra.mxu0 %v6726_v1  ;;  %v5203_v55 = vadd.f32 %v23352_v8, %v5173_v27  ;;  %v23353_v51 = vld [vmem:[#allocation42_spill] sm:$0xff]  ;;  %v5176_v9 = vld [vmem:[#allocation2 + $0x90] sm:$0xff]  ;;  %v20730_v27 = vld [vmem:[%s18190_s17 + $0x148] sm:$0xff] }
 0x460   : > { %v15759_v12 = vpop.f32.mrf.mxu1  ;;  %16126 = vmatmul.mubr.msk.f32.gmra.mxu1 %vm594_vm1, %v20667_v31  ;;  %15820 = vmatmul.mubr.f32.gmra.mxu0 %v5852_v23  ;;  %v5808_v60 = vadd.f32 %v20618_v32, %v5693_v53  ;;  %v5809_v54 = vadd.f32 %v20618_v32, %v5694_v29  ;;  %v5204_v41 = vadd.f32 %v5174_v30, %v23353_v51  ;;  %v20707_v23 = vld [vmem:[%s18190_s17 + $0x130] sm:$0xff] }
 0x461   : > { %v5626_v39 = vsel %vm3243_vm2, %v5624_v14, %v5625_v46  ;;  %16128 = vmatprep.mubr.msk.f32.mxu1 %vm594_vm1, %v20674_v5  ;;  %15822 = vmatprep.mubr.f32.mxu0 %v5853_v22  ;;  %v5629_v40 = vrot.slane %v15759_v12, 6 }
 0x462   : > { %v5465_v4 = vpop.f32.mrf.mxu1  ;;  %v5752_v19 = vld [vmem:[#allocation2 + $0x40] sm:$0xff]  ;;  %15983 = vmatprep.subr.mxu0 %v6725_v21  ;;  %v5696_v34 = vadd.f32 %v5626_v39, %v5200_v49  ;;  %v5856_v44 = vmax.f32 %v5808_v60, 0.0  ;;  %v5857_v17 = vmax.f32 %v5809_v54, 0.0  ;;  %v20714_v39 = vld [vmem:[%s18190_s17 + $0x138] sm:$0xff] }
 0x463   : > { %v5627_v16 = vrot.slane %v5465_v4, 6  ;;  %v5807_v61 = vadd.f32 %v20618_v32, %v5752_v19  ;;  %15984 = vmatpush3.msra.mxu0 %v6725_v21  ;;  %v5177_v4 = vld [vmem:[#allocation2 + $0x98] sm:$0xff]  ;;  %v20721_v60 = vld [vmem:[%s18190_s17 + $0x140] sm:$0xff] }
 0x464   : > { %v15762_v56 = vpop.f32.mrf.mxu1  ;;  %16129 = vmatmul.mubr.msk.f32.gmra.mxu1 %vm594_vm1, %v20683_v28  ;;  %15823 = vmatmul.mubr.f32.gmra.mxu0 %v5854_v24  ;;  %v5755_v26 = vld [vmem:[#allocation2 + $0x58] sm:$0xff]  ;;  %v5811_v0 = vadd.f32 %v20618_v32, %v5696_v34  ;;  %v5206_v24 = vadd.f32 %v5176_v9, %v20525_v25 }
 0x465   : > { %v5628_v48 = vsel %vm3243_vm2, %v5625_v46, %v5627_v16  ;;  %v5698_v58 = vadd.f32 %v5627_v16, %v5558_v2  ;;  %v5632_v57 = vrot.slane %v15762_v56, 6  ;;  %16131 = vmatprep.mubr.msk.f32.mxu1 %vm594_vm1, %v20689_v50  ;;  %v5855_v20 = vmax.f32 %v5807_v61, 0.0  ;;  %15985 = vmatprep.subr.mxu0 %v6724_v52  ;;  %v23354_v2 = vld [vmem:[#allocation44_spill] sm:$0xff] }
 0x466   : > { %v5697_v63 = vadd.f32 %v5628_v48, %v5201_v59  ;;  %v5475_v15 = vpop.f32.mrf.mxu1  ;;  %v5810_v45 = vadd.f32 %v20618_v32, %v5755_v26  ;;  %15986 = vmatpush3.msra.mxu0 %v6724_v52  ;;  %v5859_v43 = vmax.f32 %v5811_v0, 0.0  ;;  %v5207_v56 = vadd.f32 %v23354_v2, %v5177_v4  ;;  %v5564_v26 = vld [vmem:[#allocation2 + $0xa0] sm:$0x3] }
 0x467   : > { %5728 = vst [vmem:[#allocation2 + $0x70] sm:$0x3] %v5698_v58  ;;  %v5701_v11 = vadd.f32 %v5632_v57, %v5561_v13  ;;  %v5630_v1 = vrot.slane %v5475_v15, 6  ;;  %15825 = vmatprep.mubr.f32.mxu0 %v5855_v20  ;;  %15987 = vmatprep.subr.mxu0 %v6723_v38  ;;  %v5179_v58 = vld [vmem:[#allocation2 + $0xa8] sm:$0xff]  ;;  %v5180_v13 = vld [vmem:[#allocation2 + $0xb0] sm:$0xff] }
 0x468   : > { %v15765_v36 = vpop.f32.mrf.mxu1  ;;  %16132 = vmatmul.mubr.msk.f32.gmra.mxu1 %vm594_vm1, %v20697_v37  ;;  %15826 = vmatmul.mubr.f32.gmra.mxu0 %v5856_v44  ;;  %v5858_v14 = vmax.f32 %v5810_v45, 0.0  ;;  %v5812_v22 = vadd.f32 %v20618_v32, %v5697_v63  ;;  %v5567_v45 = vld [vmem:[#allocation2 + $0xb8] sm:$0x3]  ;;  %v5209_v51 = vadd.f32 %v20532_v3, %v5179_v58  ;;  %v5182_v3 = vld [vmem:[#allocation2 + $0xc0] sm:$0xff] }
 0x469   : > { %5731 = vst [vmem:[#allocation2 + $0x88] sm:$0x3] %v5701_v11  ;;  %v5631_v53 = vsel %vm3243_vm2, %v5629_v40, %v5630_v1  ;;  %v5633_v6 = vsel %vm3243_vm2, %v5630_v1, %v5632_v57  ;;  %16134 = vmatprep.mubr.msk.f32.mxu1 %vm594_vm1, %v20707_v23  ;;  %15828 = vmatprep.mubr.f32.mxu0 %v5857_v17  ;;  %v5635_v12 = vrot.slane %v15765_v36, 6  ;;  %v20736_v40 = vld [vmem:[%s18190_s17 + $0x150] sm:$0xff]  ;;  %v20774_v58 = vld [vmem:[%s18190_s17 + $0x178] sm:$0xff] }
 0x46a   : > { %v5699_v29 = vadd.f32 %v5631_v53, %v5203_v55  ;;  %v5485_v46 = vpop.f32.mrf.mxu1  ;;  %15988 = vmatpush3.msra.mxu0 %v6723_v38  ;;  %v5700_v21 = vadd.f32 %v5633_v6, %v5204_v41  ;;  %v5860_v34 = vmax.f32 %v5812_v22, 0.0  ;;  %v20744_v53 = vld [vmem:[%s18190_s17 + $0x158] sm:$0xff]  ;;  %v5210_v6 = vadd.f32 %v5180_v13, %v20548_v7 }
 0x46b   : > { %v5634_v18 = vrot.slane %v5485_v46, 6  ;;  %16149 = vmatprep.subr.mxu0 %v20701_v35  ;;  %v20752_v46 = vld [vmem:[%s18190_s17 + $0x160] sm:$0xff] }
 0x46c   : > { %v15768_v49 = vpop.f32.mrf.mxu1  ;;  %16135 = vmatmul.mubr.msk.f32.gmra.mxu1 %vm594_vm1, %v20714_v39  ;;  %15829 = vmatmul.mubr.f32.gmra.mxu0 %v5858_v14  ;;  %v5814_v61 = vadd.f32 %v20618_v32, %v5699_v29  ;;  %v5815_v25 = vadd.f32 %v20618_v32, %v5700_v21 }
 0x46d   : > { %v5636_v19 = vsel %vm3243_vm2, %v5634_v18, %v5635_v12  ;;  %16137 = vmatprep.mubr.msk.f32.mxu1 %vm594_vm1, %v20721_v60  ;;  %15831 = vmatprep.mubr.f32.mxu0 %v5859_v43  ;;  %v5639_v15 = vrot.slane %v15768_v49, 6 }
 0x46e   : > { %v5495_v52 = vpop.f32.mrf.mxu1  ;;  %v5758_v16 = vld [vmem:[#allocation2 + $0x70] sm:$0xff]  ;;  %v5702_v54 = vadd.f32 %v5636_v19, %v5206_v24  ;;  %v5862_v1 = vmax.f32 %v5814_v61, 0.0  ;;  %v5863_v55 = vmax.f32 %v5815_v25, 0.0  ;;  %v20758_v24 = vld [vmem:[%s18190_s17 + $0x168] sm:$0xff] }
 0x46f   : > { %v5637_v33 = vrot.slane %v5495_v52, 6  ;;  %v5813_v59 = vadd.f32 %v20618_v32, %v5758_v16  ;;  %v5183_v19 = vld [vmem:[#allocation2 + $0xc8] sm:$0xff]  ;;  %v5212_v52 = vadd.f32 %v5182_v3, %v20560_v42  ;;  %v20765_v16 = vld [vmem:[%s18190_s17 + $0x170] sm:$0xff] }
 0x470   : > { %v15771_v38 = vpop.f32.mrf.mxu1  ;;  %16138 = vmatmul.mubr.msk.f32.gmra.mxu1 %vm594_vm1, %v20730_v27  ;;  %15832 = vmatmul.mubr.f32.gmra.mxu0 %v5860_v34  ;;  %v5761_v48 = vld [vmem:[#allocation2 + $0x88] sm:$0xff]  ;;  %v5817_v36 = vadd.f32 %v20618_v32, %v5702_v54 }
 0x471   : > { %v5638_v57 = vsel %vm3243_vm2, %v5635_v12, %v5637_v33  ;;  %v5704_v20 = vadd.f32 %v5637_v33, %v5564_v26  ;;  %v5642_v30 = vrot.slane %v15771_v38, 6  ;;  %16140 = vmatprep.mubr.msk.f32.mxu1 %vm594_vm1, %v20736_v40  ;;  %v5861_v63 = vmax.f32 %v5813_v59, 0.0  ;;  %v5570_v38 = vld [vmem:[#allocation2 + $0xd0] sm:$0x3]  ;;  %v20788_v3 = vld [vmem:[%s18190_s17 + $0x8] sm:$0xff] }
 0x472   : > { %v5703_v44 = vadd.f32 %v5638_v57, %v5207_v56  ;;  %v5505_v11 = vpop.f32.mrf.mxu1  ;;  %v5816_v17 = vadd.f32 %v20618_v32, %v5761_v48  ;;  %v5865_v49 = vmax.f32 %v5817_v36, 0.0  ;;  %v5213_v26 = vadd.f32 %v20554_v62, %v5183_v19 }
 0x473   : > { %5734 = vst [vmem:[#allocation2 + $0xa0] sm:$0x3] %v5704_v20  ;;  %v5707_v0 = vadd.f32 %v5642_v30, %v5567_v45  ;;  %v5640_v8 = vrot.slane %v5505_v11, 6  ;;  %15834 = vmatprep.mubr.f32.mxu0 %v5861_v63  ;;  %v5185_v20 = vld [vmem:[#allocation2 + $0xd8] sm:$0xff]  ;;  %v5186_v45 = vld [vmem:[#allocation2 + $0xe0] sm:$0xff] }
 0x474   : > { %v15774_v41 = vpop.f32.mrf.mxu1  ;;  %16141 = vmatmul.mubr.msk.f32.gmra.mxu1 %vm594_vm1, %v20744_v53  ;;  %15835 = vmatmul.mubr.f32.gmra.mxu0 %v5862_v1  ;;  %v5864_v21 = vmax.f32 %v5816_v17, 0.0  ;;  %v5818_v12 = vadd.f32 %v20618_v32, %v5703_v44  ;;  %v5149_v44 = vpop.f32.mrf.mxu0  ;;  %v5573_v17 = vld [vmem:[#allocation2 + $0xe8] sm:$0x3] }
 0x475   : > { %5737 = vst [vmem:[#allocation2 + $0xb8] sm:$0x3] %v5707_v0  ;;  %v5641_v9 = vsel %vm3243_vm2, %v5639_v15, %v5640_v8  ;;  %v5643_v29 = vsel %vm3243_vm2, %v5640_v8, %v5642_v30  ;;  %16143 = vmatprep.mubr.msk.f32.mxu1 %vm594_vm1, %v20752_v46  ;;  %15837 = vmatprep.mubr.f32.mxu0 %v5863_v55  ;;  %v5645_v18 = vrot.slane %v15774_v41, 6  ;;  %v20780_v15 = vld [vmem:[%s18190_s17] sm:$0xff] }
 0x476   : > { %v5705_v14 = vadd.f32 %v5641_v9, %v5209_v51  ;;  %v5515_v22 = vpop.f32.mrf.mxu1  ;;  %v5706_v7 = vadd.f32 %v5643_v29, %v5210_v6  ;;  %v5866_v54 = vmax.f32 %v5818_v12, 0.0  ;;  %v5215_v9 = vadd.f32 %v20566_v47, %v5185_v20  ;;  %v20820_v20 = vld [vmem:[%s18190_s17 + $0x30] sm:$0xff] }
 0x477   : > { %v5644_v43 = vrot.slane %v5515_v22, 6  ;;  %v5216_v22 = vadd.f32 %v5186_v45, %v5149_v44 }
 0x478   : > { %v15777_v4 = vpop.f32.mrf.mxu1  ;;  %16144 = vmatmul.mubr.msk.f32.gmra.mxu1 %vm594_vm1, %v20758_v24  ;;  %15838 = vmatmul.mubr.f32.gmra.mxu0 %v5864_v21  ;;  %v5820_v59 = vadd.f32 %v20618_v32, %v5705_v14  ;;  %v5821_v42 = vadd.f32 %v20618_v32, %v5706_v7  ;;  %v8569_v14 = vld [vmem:[#allocation10 + $0x1b0] sm:$0xff] }
 0x479   : > { %v5646_v34 = vsel %vm3243_vm2, %v5644_v43, %v5645_v18  ;;  %16146 = vmatprep.mubr.msk.f32.mxu1 %vm594_vm1, %v20765_v16  ;;  %15840 = vmatprep.mubr.f32.mxu0 %v5865_v49  ;;  %v5649_v11 = vrot.slane %v15777_v4, 6  ;;  %v20795_v7 = vld [vmem:[%s18190_s17 + $0x10] sm:$0xff] }
 0x47a   : > { %v5525_v61 = vpop.f32.mrf.mxu1  ;;  %v5764_v33 = vld [vmem:[#allocation2 + $0xa0] sm:$0xff]  ;;  %v5708_v25 = vadd.f32 %v5646_v34, %v5212_v52  ;;  %v5868_v8 = vmax.f32 %v5820_v59, 0.0  ;;  %v5869_v41 = vmax.f32 %v5821_v42, 0.0  ;;  %v20802_v34 = vld [vmem:[%s18190_s17 + $0x18] sm:$0xff] }
 0x47b   : > { %v5647_v2 = vrot.slane %v5525_v61, 6  ;;  %v5819_v56 = vadd.f32 %v20618_v32, %v5764_v33  ;;  %v8568_v61 = vld [vmem:[#allocation10 + $0x1a8] sm:$0xff]  ;;  %v8567_v42 = vld [vmem:[#allocation10 + $0x1a0] sm:$0xff] }
 0x47c   : > { %v15780_v48 = vpop.f32.mrf.mxu1  ;;  %16147 = vmatmul.mubr.msk.f32.gmra.mxu1 %vm594_vm1, %v20774_v58  ;;  %15841 = vmatmul.mubr.f32.gmra.mxu0 %v5866_v54  ;;  %v5767_v57 = vld [vmem:[#allocation2 + $0xb8] sm:$0xff]  ;;  %v5823_v6 = vadd.f32 %v20618_v32, %v5708_v25  ;;  %v20807_v54 = vld [vmem:[%s18190_s17 + $0x20] sm:$0xff] }
 0x47d   : > { %v5648_v30 = vsel %vm3243_vm2, %v5645_v18, %v5647_v2  ;;  %v5710_v63 = vadd.f32 %v5647_v2, %v5570_v38  ;;  %v5652_v13 = vrot.slane %v15780_v48, 6  ;;  %16253 = vmatprep.mubr.msk.f32.mxu1 %vm594_vm1, %v20780_v15  ;;  %v5867_v62 = vmax.f32 %v5819_v56, 0.0  ;;  %v20815_v38 = vld [vmem:[%s18190_s17 + $0x28] sm:$0xff] }
 0x47e   : > { %v5709_v1 = vadd.f32 %v5648_v30, %v5213_v26  ;;  %v5535_v0 = vpop.f32.mrf.mxu1  ;;  %v5822_v55 = vadd.f32 %v20618_v32, %v5767_v57  ;;  %v5871_v19 = vmax.f32 %v5823_v6, 0.0  ;;  %v5774_v57 = vld [vmem:[#allocation2 + $0xf0] sm:$0xff] }
 0x47f   : > { %5740 = vst [vmem:[#allocation2 + $0xd0] sm:$0x3] %v5710_v63  ;;  %v5713_v36 = vadd.f32 %v5652_v13, %v5573_v17  ;;  %v5650_v51 = vrot.slane %v5535_v0, 6  ;;  %15843 = vmatprep.mubr.f32.mxu0 %v5867_v62  ;;  %v5829_v45 = vadd.f32 %v20618_v32, %v5774_v57  ;;  %v20827_v0 = vld [vmem:[%s18190_s17 + $0x38] sm:$0xff]  ;;  %v5781_v57 = vld [vmem:[#allocation2 + $0x128] sm:$0xff] }
 0x480   : > { %v15903_v29 = vpop.f32.mrf.mxu1  ;;  %16254 = vmatmul.mubr.msk.f32.vlgmr.msra.gmra.mxu1 %vm594_vm1, %v20788_v3  ;;  %15844 = vmatmul.mubr.f32.gmra.mxu0 %v5868_v8  ;;  %v5870_v43 = vmax.f32 %v5822_v55, 0.0  ;;  %v5824_v49 = vadd.f32 %v20618_v32, %v5709_v1  ;;  %v8566_v1 = vld [vmem:[#allocation10 + $0x198] sm:$0xff]  ;;  %v5776_v8 = vld [vmem:[#allocation2 + $0x100] sm:$0xff] }
 0x481   : > { %5743 = vst [vmem:[#allocation2 + $0xe8] sm:$0x3] %v5713_v36  ;;  %v5651_v21 = vsel %vm3243_vm2, %v5649_v11, %v5650_v51  ;;  %v5653_v12 = vsel %vm3243_vm2, %v5650_v51, %v5652_v13  ;;  %6676 = vst [vmem:[#allocation2 + $0x8] sm:$0xff] %v15903_v29  ;;  %16256 = vmatprep.mubr.msk.f32.mxu1 %vm594_vm1, %v20795_v7  ;;  %15846 = vmatprep.mubr.f32.mxu0 %v5869_v41  ;;  %v5775_v11 = vld [vmem:[#allocation2 + $0xf8] sm:$0xff]  ;;  %v20832_v55 = vld [vmem:[%s18190_s17 + $0x40] sm:$0xff]  ;;  %v5877_v6 = vmax.f32 %v5829_v45, 0.0 }
 0x482   : > { %v5711_v47 = vadd.f32 %v5651_v21, %v5215_v9  ;;  %v6436_v18 = vpop.f32.mrf.mxu1  ;;  %16414 = vmatpush3.msra.mxu1 %v20636_v10  ;;  %v5712_v4 = vadd.f32 %v5653_v12, %v5216_v22  ;;  %v5872_v33 = vmax.f32 %v5824_v49, 0.0  ;;  %v5830_v41 = vadd.f32 %v20618_v32, %v5775_v11  ;;  %v5777_v29 = vld [vmem:[#allocation2 + $0x108] sm:$0xff]  ;;  %v5778_v12 = vld [vmem:[#allocation2 + $0x110] sm:$0xff] }
 0x483   : > { %6675 = vst [vmem:[#allocation2] sm:$0xff] %v6436_v18  ;;  %16415 = vmatprep.subr.mxu1 %v8569_v14  ;;  %v5831_v9 = vadd.f32 %v20618_v32, %v5776_v8  ;;  %v20839_v21 = vld [vmem:[%s18190_s17 + $0x48] sm:$0xff]  ;;  %v5832_v49 = vadd.f32 %v20618_v32, %v5777_v29 }
 0x484   : > { %v15906_v52 = vpop.f32.mrf.mxu1  ;;  %16257 = vmatmul.mubr.msk.f32.gmra.mxu1 %vm594_vm1, %v20802_v34  ;;  %15847 = vmatmul.mubr.f32.gmra.mxu0 %v5870_v43  ;;  %v5826_v25 = vadd.f32 %v20618_v32, %v5711_v47  ;;  %v5827_v56 = vadd.f32 %v20618_v32, %v5712_v4  ;;  %v20844_v47 = vld [vmem:[%s18190_s17 + $0x50] sm:$0xff]  ;;  %v5878_v43 = vmax.f32 %v5830_v41, 0.0  ;;  %v20875_v41 = vld [vmem:[%s18190_s17 + $0x78] sm:$0xff] }
 0x485   : > { %6678 = vst [vmem:[#allocation2 + $0x18] sm:$0xff] %v15906_v52  ;;  %16259 = vmatprep.mubr.msk.f32.mxu1 %vm594_vm1, %v20807_v54  ;;  %15849 = vmatprep.mubr.f32.mxu0 %v5871_v19  ;;  %v5879_v4 = vmax.f32 %v5831_v9, 0.0  ;;  %v5833_v19 = vadd.f32 %v20618_v32, %v5778_v12  ;;  %v5779_v52 = vld [vmem:[#allocation2 + $0x118] sm:$0xff]  ;;  %v20880_v9 = vld [vmem:[%s18190_s17 + $0x80] sm:$0xff] }
 0x486   : > { %v6446_v10 = vpop.f32.mrf.mxu1  ;;  %v5770_v59 = vld [vmem:[#allocation2 + $0xd0] sm:$0xff]  ;;  %16416 = vmatpush3.msra.mxu1 %v8569_v14  ;;  %v5874_v13 = vmax.f32 %v5826_v25, 0.0  ;;  %v5875_v44 = vmax.f32 %v5827_v56, 0.0  ;;  %v20856_v25 = vld [vmem:[%s18190_s17 + $0x60] sm:$0xff]  ;;  %v5880_v56 = vmax.f32 %v5832_v49, 0.0 }
 0x487   : > { %6677 = vst [vmem:[#allocation2 + $0x10] sm:$0xff] %v6446_v10  ;;  %v5825_v2 = vadd.f32 %v20618_v32, %v5770_v59  ;;  %16417 = vmatprep.subr.mxu1 %v8568_v61  ;;  %v8565_v14 = vld [vmem:[#allocation10 + $0x190] sm:$0xff]  ;;  %v5780_v59 = vld [vmem:[#allocation2 + $0x120] sm:$0xff] }
 0x488   : > { %v15909_v26 = vpop.f32.mrf.mxu1  ;;  %16260 = vmatmul.mubr.msk.f32.gmra.mxu1 %vm594_vm1, %v20815_v38  ;;  %15850 = vmatmul.mubr.f32.gmra.mxu0 %v5872_v33  ;;  %v5773_v48 = vld [vmem:[#allocation2 + $0xe8] sm:$0xff]  ;;  %v20851_v33 = vld [vmem:[%s18190_s17 + $0x58] sm:$0xff] }
 0x489   : > { %6680 = vst [vmem:[#allocation2 + $0x28] sm:$0xff] %v15909_v26  ;;  %16262 = vmatprep.mubr.msk.f32.mxu1 %vm594_vm1, %v20820_v20  ;;  %v5873_v30 = vmax.f32 %v5825_v2, 0.0  ;;  %16418 = vmatpush3.msra.mxu1 %v8568_v61  ;;  %v5828_v62 = vadd.f32 %v20618_v32, %v5773_v48  ;;  %v8564_v61 = vld [vmem:[#allocation10 + $0x188] sm:$0xff]  ;;  %v5881_v26 = vmax.f32 %v5833_v19, 0.0  ;;  %v5835_v48 = vadd.f32 %v20618_v32, %v5780_v59  ;;  %v5786_v19 = vld [vmem:[#allocation2 + $0x150] sm:$0xff] }
 0x48a   : > { %v6456_v63 = vpop.f32.mrf.mxu1  ;;  %16419 = vmatprep.subr.mxu1 %v8567_v42 }
 0x48b   : > { %6679 = vst [vmem:[#allocation2 + $0x20] sm:$0xff] %v6456_v63  ;;  %15852 = vmatprep.mubr.f32.mxu0 %v5873_v30  ;;  %16420 = vmatpush3.msra.mxu1 %v8567_v42  ;;  %v5876_v51 = vmax.f32 %v5828_v62, 0.0  ;;  %v5834_v42 = vadd.f32 %v20618_v32, %v5779_v52  ;;  %v8563_v30 = vld [vmem:[#allocation10 + $0x180] sm:$0xff]  ;;  %v5782_v62 = vld [vmem:[#allocation2 + $0x130] sm:$0xff] }
 0x48c   : > { %v15912_v17 = vpop.f32.mrf.mxu1  ;;  %16263 = vmatmul.mubr.msk.f32.gmra.mxu1 %vm594_vm1, %v20827_v0  ;;  %15853 = vmatmul.mubr.f32.gmra.mxu0 %v5874_v13  ;;  %v20863_v13 = vld [vmem:[%s18190_s17 + $0x68] sm:$0xff]  ;;  %v5837_v8 = vadd.f32 %v20618_v32, %v5782_v62  ;;  %v20892_v52 = vld [vmem:[%s18190_s17 + $0x90] sm:$0xff] }
 0x48d   : > { %6682 = vst [vmem:[#allocation2 + $0x38] sm:$0xff] %v15912_v17  ;;  %16265 = vmatprep.mubr.msk.f32.mxu1 %vm594_vm1, %v20832_v55  ;;  %15855 = vmatprep.mubr.f32.mxu0 %v5875_v44  ;;  %v20868_v44 = vld [vmem:[%s18190_s17 + $0x70] sm:$0xff]  ;;  %v5882_v11 = vmax.f32 %v5834_v42, 0.0  ;;  %v5883_v17 = vmax.f32 %v5835_v48, 0.0  ;;  %v5787_v42 = vld [vmem:[#allocation2 + $0x158] sm:$0xff] }
 0x48e   : > { %v6466_v36 = vpop.f32.mrf.mxu1  ;;  %16421 = vmatprep.subr.mxu1 %v8566_v1  ;;  %v5885_v12 = vmax.f32 %v5837_v8, 0.0  ;;  %v20899_v48 = vld [vmem:[%s18190_s17 + $0x98] sm:$0xff] }
 0x48f   : > { %6681 = vst [vmem:[#allocation2 + $0x30] sm:$0xff] %v6466_v36  ;;  %16422 = vmatpush3.msra.mxu1 %v8566_v1  ;;  %v5836_v1 = vadd.f32 %v20618_v32, %v5781_v57  ;;  %v5783_v36 = vld [vmem:[#allocation2 + $0x138] sm:$0xff]  ;;  %v5788_v57 = vld [vmem:[#allocation2 + $0x160] sm:$0xff] }
 0x490   : > { %v15915_v22 = vpop.f32.mrf.mxu1  ;;  %16266 = vmatmul.mubr.msk.f32.gmra.mxu1 %vm594_vm1, %v20839_v21  ;;  %15856 = vmatmul.mubr.f32.gmra.mxu0 %v5876_v51 }
 0x491   : > { %6684 = vst [vmem:[#allocation2 + $0x48] sm:$0xff] %v15915_v22  ;;  %16268 = vmatprep.mubr.msk.f32.mxu1 %vm594_vm1, %v20844_v47  ;;  %15858 = vmatprep.mubr.f32.mxu0 %v5877_v6  ;;  %v5784_v6 = vld [vmem:[#allocation2 + $0x140] sm:$0xff]  ;;  %v5838_v22 = vadd.f32 %v20618_v32, %v5783_v36  ;;  %v20911_v36 = vld [vmem:[%s18190_s17 + $0xa8] sm:$0xff] }
 0x492   : > { %v6476_v18 = vpop.f32.mrf.mxu1  ;;  %16423 = vmatprep.subr.mxu1 %v8565_v14 }
 0x493   : > { %6683 = vst [vmem:[#allocation2 + $0x40] sm:$0xff] %v6476_v18  ;;  %16424 = vmatpush3.msra.mxu1 %v8565_v14  ;;  %v5884_v14 = vmax.f32 %v5836_v1, 0.0  ;;  %v5839_v18 = vadd.f32 %v20618_v32, %v5784_v6  ;;  %v5843_v1 = vadd.f32 %v20618_v32, %v5788_v57  ;;  %v20916_v6 = vld [vmem:[%s18190_s17 + $0xb0] sm:$0xff] }
 0x494   : > { %v15918_v10 = vpop.f32.mrf.mxu1  ;;  %16269 = vmatmul.mubr.msk.f32.gmra.mxu1 %vm594_vm1, %v20851_v33  ;;  %15859 = vmatmul.mubr.f32.gmra.mxu0 %v5878_v43  ;;  %v5785_v43 = vld [vmem:[#allocation2 + $0x148] sm:$0xff]  ;;  %v20939_v57 = vld [vmem:[%s18190_s17 + $0xd0] sm:$0xff] }
 0x495   : > { %6686 = vst [vmem:[#allocation2 + $0x58] sm:$0xff] %v15918_v10  ;;  %16271 = vmatprep.mubr.msk.f32.mxu1 %vm594_vm1, %v20856_v25  ;;  %15861 = vmatprep.mubr.f32.mxu0 %v5879_v4  ;;  %v20887_v4 = vld [vmem:[%s18190_s17 + $0x88] sm:$0xff]  ;;  %v5886_v10 = vmax.f32 %v5838_v22, 0.0  ;;  %v5840_v59 = vadd.f32 %v20618_v32, %v5785_v43  ;;  %v5791_v43 = vld [vmem:[#allocation2 + $0x178] sm:$0xff] }
 0x496   : > { %v6486_v2 = vpop.f32.mrf.mxu1  ;;  %16425 = vmatprep.subr.mxu1 %v8564_v61 }
 0x497   : > { %6685 = vst [vmem:[#allocation2 + $0x50] sm:$0xff] %v6486_v2  ;;  %16426 = vmatpush3.msra.mxu1 %v8564_v61  ;;  %v5887_v2 = vmax.f32 %v5839_v18, 0.0  ;;  %v5888_v62 = vmax.f32 %v5840_v59, 0.0 }
 0x498   : > { %v15921_v63 = vpop.f32.mrf.mxu1  ;;  %16272 = vmatmul.mubr.msk.f32.gmra.mxu1 %vm594_vm1, %v20863_v13  ;;  %15862 = vmatmul.mubr.f32.gmra.mxu0 %v5880_v56  ;;  %v5841_v56 = vadd.f32 %v20618_v32, %v5786_v19  ;;  %v20923_v19 = vld [vmem:[%s18190_s17 + $0xb8] sm:$0xff] }
 0x499   : > { %6688 = vst [vmem:[#allocation2 + $0x68] sm:$0xff] %v15921_v63  ;;  %16274 = vmatprep.mubr.msk.f32.mxu1 %vm594_vm1, %v20868_v44  ;;  %15864 = vmatprep.mubr.f32.mxu0 %v5881_v26 }
 0x49a   : > { %v6496_v45 = vpop.f32.mrf.mxu1  ;;  %16427 = vmatprep.subr.mxu1 %v8563_v30 }
 0x49b   : > { %6687 = vst [vmem:[#allocation2 + $0x60] sm:$0xff] %v6496_v45  ;;  %16428 = vmatpush3.msra.mxu1 %v8563_v30  ;;  %v20904_v30 = vld [vmem:[%s18190_s17 + $0xa0] sm:$0xff]  ;;  %v5842_v45 = vadd.f32 %v20618_v32, %v5787_v42 }
 0x49c   : > { %v15924_v51 = vpop.f32.mrf.mxu1  ;;  %16275 = vmatmul.mubr.msk.f32.gmra.mxu1 %vm594_vm1, %v20875_v41  ;;  %15865 = vmatmul.mubr.f32.gmra.mxu0 %v5882_v11  ;;  %v5889_v11 = vmax.f32 %v5841_v56, 0.0 }
 0x49d   : > { %6690 = vst [vmem:[#allocation2 + $0x78] sm:$0xff] %v15924_v51  ;;  %16277 = vmatprep.mubr.msk.f32.mxu1 %vm594_vm1, %v20880_v9  ;;  %15867 = vmatprep.mubr.f32.mxu0 %v5883_v17  ;;  %v5789_v17 = vld [vmem:[#allocation2 + $0x168] sm:$0xff]  ;;  %v5790_v51 = vld [vmem:[#allocation2 + $0x170] sm:$0xff] }
 0x49e   : > { %v6506_v29 = vpop.f32.mrf.mxu1  ;;  %v5844_v22 = vadd.f32 %v20618_v32, %v5789_v17  ;;  %v5845_v18 = vadd.f32 %v20618_v32, %v5790_v51  ;;  %v7342_v17 = vld [vmem:[#allocation10 + $0xb0] sm:$0xff]  ;;  %v20956_v51 = vld [vmem:[%s18190_s17 + $0xe8] sm:$0xff] }
 0x49f   : > { %6689 = vst [vmem:[#allocation2 + $0x70] sm:$0xff] %v6506_v29 }
 0x4a0   : > { %v15927_v49 = vpop.f32.mrf.mxu1  ;;  %16278 = vmatmul.mubr.msk.f32.gmra.mxu1 %vm594_vm1, %v20887_v4  ;;  %15868 = vmatmul.mubr.f32.gmra.mxu0 %v5884_v14  ;;  %v5890_v14 = vmax.f32 %v5842_v45, 0.0  ;;  %v5892_v59 = vmax.f32 %v5844_v22, 0.0  ;;  %v5893_v56 = vmax.f32 %v5845_v18, 0.0  ;;  %v20944_v45 = vld [vmem:[%s18190_s17 + $0xd8] sm:$0xff]  ;;  %v7341_v22 = vld [vmem:[#allocation10 + $0xa8] sm:$0xff] }
 0x4a1   : > { %6692 = vst [vmem:[#allocation2 + $0x88] sm:$0xff] %v15927_v49  ;;  %16280 = vmatprep.mubr.msk.f32.mxu1 %vm594_vm1, %v20892_v52  ;;  %15870 = vmatprep.mubr.f32.mxu0 %v5885_v12  ;;  %v5891_v12 = vmax.f32 %v5843_v1, 0.0  ;;  %v20971_v18 = vld [vmem:[%s18190_s17 + $0xf8] sm:$0xff] }
 0x4a2   : > { %v6516_v61 = vpop.f32.mrf.mxu1 }
 0x4a3   : > { %6691 = vst [vmem:[#allocation2 + $0x80] sm:$0xff] %v6516_v61  ;;  %v20928_v61 = vld [vmem:[%s18190_s17 + $0xc0] sm:$0xff] }
 0x4a4   : > { %v15930_v26 = vpop.f32.mrf.mxu1  ;;  %16281 = vmatmul.mubr.msk.f32.gmra.mxu1 %vm594_vm1, %v20899_v48  ;;  %15871 = vmatmul.mubr.f32.gmra.mxu0 %v5886_v10 }
 0x4a5   : > { %6694 = vst [vmem:[#allocation2 + $0x98] sm:$0xff] %v15930_v26  ;;  %16283 = vmatprep.mubr.msk.f32.mxu1 %vm594_vm1, %v20904_v30  ;;  %15873 = vmatprep.mubr.f32.mxu0 %v5887_v2  ;;  %v5846_v2 = vadd.f32 %v20618_v32, %v5791_v43  ;;  %v20934_v26 = vld [vmem:[%s18190_s17 + $0xc8] sm:$0xff]  ;;  %v20978_v43 = vld [vmem:[%s18190_s17 + $0x100] sm:$0xff] }
 0x4a6   : > { %v6526_v63 = vpop.f32.mrf.mxu1 }
 0x4a7   : > { %6693 = vst [vmem:[#allocation2 + $0x90] sm:$0xff] %v6526_v63  ;;  %v5894_v32 = vmax.f32 %v5846_v2, 0.0  ;;  %v7339_v2 = vld [vmem:[#allocation10 + $0x98] sm:$0xff] }
 0x4a8   : > { %v15933_v8 = vpop.f32.mrf.mxu1  ;;  %16284 = vmatmul.mubr.msk.f32.gmra.mxu1 %vm594_vm1, %v20911_v36  ;;  %15874 = vmatmul.mubr.f32.gmra.mxu0 %v5888_v62 }
 0x4a9   : > { %6696 = vst [vmem:[#allocation2 + $0xa8] sm:$0xff] %v15933_v8  ;;  %16286 = vmatprep.mubr.msk.f32.mxu1 %vm594_vm1, %v20916_v6  ;;  %15876 = vmatprep.mubr.f32.mxu0 %v5889_v11  ;;  %v20949_v11 = vld [vmem:[%s18190_s17 + $0xe0] sm:$0xff] }
 0x4aa   : > { %v6536_v29 = vpop.f32.mrf.mxu1 }
 0x4ab   : > { %6695 = vst [vmem:[#allocation2 + $0xa0] sm:$0xff] %v6536_v29  ;;  %v20963_v29 = vld [vmem:[%s18190_s17 + $0xf0] sm:$0xff] }
 0x4ac   : > { %v15936_v49 = vpop.f32.mrf.mxu1  ;;  %16287 = vmatmul.mubr.msk.f32.gmra.mxu1 %vm594_vm1, %v20923_v19  ;;  %15877 = vmatmul.mubr.f32.gmra.mxu0 %v5890_v14 }
 0x4ad   : > { %6698 = vst [vmem:[#allocation2 + $0xb8] sm:$0xff] %v15936_v49  ;;  %16289 = vmatprep.mubr.msk.f32.mxu1 %vm594_vm1, %v20928_v61  ;;  %15879 = vmatprep.mubr.f32.mxu0 %v5891_v12  ;;  %v7340_v49 = vld [vmem:[#allocation10 + $0xa0] sm:$0xff] }
 0x4ae   : > { %v6546_v10 = vpop.f32.mrf.mxu1 }
 0x4af   : > { %6697 = vst [vmem:[#allocation2 + $0xb0] sm:$0xff] %v6546_v10 }
 0x4b0   : > { %v15939_v42 = vpop.f32.mrf.mxu1  ;;  %16290 = vmatmul.mubr.msk.f32.gmra.mxu1 %vm594_vm1, %v20934_v26  ;;  %15880 = vmatmul.mubr.f32.gmra.mxu0 %v5892_v59 }
 0x4b1   : > { %6700 = vst [vmem:[#allocation2 + $0xc8] sm:$0xff] %v15939_v42  ;;  %16292 = vmatprep.mubr.msk.f32.mxu1 %vm594_vm1, %v20939_v57  ;;  %15882 = vmatprep.mubr.f32.mxu0 %v5893_v56 }
 0x4b2   : > { %v6556_v63 = vpop.f32.mrf.mxu1 }
 0x4b3   : > { %6699 = vst [vmem:[#allocation2 + $0xc0] sm:$0xff] %v6556_v63 }
 0x4b4   : > { %v15942_v62 = vpop.f32.mrf.mxu1  ;;  %16293 = vmatmul.mubr.msk.f32.gmra.mxu1 %vm594_vm1, %v20944_v45  ;;  %15883 = vmatmul.mubr.f32.gmra.mxu0 %v5894_v32  ;;  %v7337_v32 = vld [vmem:[#allocation10 + $0x88] sm:$0xff] }
 0x4b5   : > { %6702 = vst [vmem:[#allocation2 + $0xd8] sm:$0xff] %v15942_v62  ;;  %16295 = vmatprep.mubr.msk.f32.mxu1 %vm594_vm1, %v20949_v11  ;;  %15989 = vmatprep.mubr.msk.f32.mxu0 %vm594_vm1, %v20780_v15 }
 0x4b6   : > { %v6566_v1 = vpop.f32.mrf.mxu1 }
 0x4b7   : > { %6701 = vst [vmem:[#allocation2 + $0xd0] sm:$0xff] %v6566_v1 }
 0x4b8   : > { %v15945_v8 = vpop.f32.mrf.mxu1  ;;  %16296 = vmatmul.mubr.msk.f32.gmra.mxu1 %vm594_vm1, %v20956_v51  ;;  %15990 = vmatmul.mubr.msk.f32.vlgmr.msra.gmra.mxu0 %vm594_vm1, %v20788_v3 }
 0x4b9   : > { %6704 = vst [vmem:[#allocation2 + $0xe8] sm:$0xff] %v15945_v8  ;;  %16298 = vmatprep.mubr.msk.f32.mxu1 %vm594_vm1, %v20963_v29  ;;  %16150 = vmatpush3.msra.mxu0 %v20701_v35 }
 0x4ba   : > { %v6576_v14 = vpop.f32.mrf.mxu1  ;;  %15992 = vmatprep.mubr.msk.f32.mxu0 %vm594_vm1, %v20795_v7  ;;  %16151 = vmatprep.subr.mxu0 %v7342_v17 }
 0x4bb   : > { %6703 = vst [vmem:[#allocation2 + $0xe0] sm:$0xff] %v6576_v14  ;;  %16152 = vmatpush3.msra.mxu0 %v7342_v17  ;;  %v7336_v17 = vld [vmem:[#allocation10 + $0x80] sm:$0xff] }
 0x4bc   : > { %v15948_v12 = vpop.f32.mrf.mxu1  ;;  %16299 = vmatmul.mubr.msk.f32.gmra.mxu1 %vm594_vm1, %v20971_v18  ;;  %15993 = vmatmul.mubr.msk.f32.gmra.mxu0 %vm594_vm1, %v20802_v34 }
 0x4bd   : > { %6706 = vst [vmem:[#allocation2 + $0xf8] sm:$0xff] %v15948_v12  ;;  %16301 = vmatprep.mubr.msk.f32.mxu1 %vm594_vm1, %v20978_v43  ;;  %15995 = vmatprep.mubr.msk.f32.mxu0 %vm594_vm1, %v20807_v54 }
 0x4be   : > { %v6586_v35 = vpop.f32.mrf.mxu1  ;;  %16153 = vmatprep.subr.mxu0 %v7341_v22 }
 0x4bf   : > { %6705 = vst [vmem:[#allocation2 + $0xf0] sm:$0xff] %v6586_v35  ;;  %16154 = vmatpush3.msra.mxu0 %v7341_v22  ;;  %v21024_v22 = vld [vmem:[#allocation10 + $0x178] sm:$0xff] }
 0x4c0   : > { %v15951_v10 = vpop.f32.mrf.mxu1  ;;  %16302 = vmatmul.mubr.msk.f32.gmra.mxu1 %vm594_vm1, %v20667_v31  ;;  %15996 = vmatmul.mubr.msk.f32.gmra.mxu0 %vm594_vm1, %v20815_v38 }
 0x4c1   : > { %6708 = vst [vmem:[#allocation2 + $0x108] sm:$0xff] %v15951_v10  ;;  %16304 = vmatprep.mubr.msk.f32.mxu1 %vm594_vm1, %v20674_v5  ;;  %15998 = vmatprep.mubr.msk.f32.mxu0 %vm594_vm1, %v20820_v20  ;;  %v7338_v5 = vld [vmem:[#allocation10 + $0x90] sm:$0xff] }
 0x4c2   : > { %v6596_v59 = vpop.f32.mrf.mxu1  ;;  %16155 = vmatprep.subr.mxu0 %v7340_v49 }
 0x4c3   : > { %6707 = vst [vmem:[#allocation2 + $0x100] sm:$0xff] %v6596_v59  ;;  %16156 = vmatpush3.msra.mxu0 %v7340_v49 }
 0x4c4   : > { %v15954_v56 = vpop.f32.mrf.mxu1  ;;  %16305 = vmatmul.mubr.msk.f32.gmra.mxu1 %vm594_vm1, %v20683_v28  ;;  %15999 = vmatmul.mubr.msk.f32.gmra.mxu0 %vm594_vm1, %v20827_v0 }
 0x4c5   : > { %6710 = vst [vmem:[#allocation2 + $0x118] sm:$0xff] %v15954_v56  ;;  %16307 = vmatprep.mubr.msk.f32.mxu1 %vm594_vm1, %v20689_v50  ;;  %16001 = vmatprep.mubr.msk.f32.mxu0 %vm594_vm1, %v20832_v55 }
 0x4c6   : > { %v6606_v31 = vpop.f32.mrf.mxu1  ;;  %16157 = vmatprep.subr.mxu0 %v7339_v2 }
 0x4c7   : > { %6709 = vst [vmem:[#allocation2 + $0x110] sm:$0xff] %v6606_v31  ;;  %16158 = vmatpush3.msra.mxu0 %v7339_v2 }
 0x4c8   : > { %v15957_v42 = vpop.f32.mrf.mxu1  ;;  %16308 = vmatmul.mubr.msk.f32.gmra.mxu1 %vm594_vm1, %v20697_v37  ;;  %16002 = vmatmul.mubr.msk.f32.gmra.mxu0 %vm594_vm1, %v20839_v21 }
 0x4c9   : > { %6712 = vst [vmem:[#allocation2 + $0x128] sm:$0xff] %v15957_v42  ;;  %16310 = vmatprep.mubr.msk.f32.mxu1 %vm594_vm1, %v20707_v23  ;;  %16004 = vmatprep.mubr.msk.f32.mxu0 %vm594_vm1, %v20844_v47 }
 0x4ca   : > { %v6616_v63 = vpop.f32.mrf.mxu1  ;;  %16159 = vmatprep.subr.mxu0 %v7338_v5 }
 0x4cb   : > { %16160 = vmatpush3.msra.mxu0 %v7338_v5 }
 0x4cc   : > { %v15960_v62 = vpop.f32.mrf.mxu1  ;;  %16311 = vmatmul.mubr.msk.f32.gmra.mxu1 %vm594_vm1, %v20714_v39  ;;  %16005 = vmatmul.mubr.msk.f32.gmra.mxu0 %vm594_vm1, %v20851_v33 }
 0x4cd   : > { %16313 = vmatprep.mubr.msk.f32.mxu1 %vm594_vm1, %v20721_v60  ;;  %16007 = vmatprep.mubr.msk.f32.mxu0 %vm594_vm1, %v20856_v25 }
 0x4ce   : > { %v6626_v1 = vpop.f32.mrf.mxu1  ;;  %16161 = vmatprep.subr.mxu0 %v7337_v32 }
 0x4cf   : > { %6713 = vst [vmem:[#allocation2 + $0x130] sm:$0xff] %v6626_v1  ;;  %16162 = vmatpush3.msra.mxu0 %v7337_v32 }
 0x4d0   : > { %v15963_v8 = vpop.f32.mrf.mxu1  ;;  %16314 = vmatmul.mubr.msk.f32.gmra.mxu1 %vm594_vm1, %v20730_v27  ;;  %16008 = vmatmul.mubr.msk.f32.gmra.mxu0 %vm594_vm1, %v20863_v13 }
 0x4d1   : > { %6716 = vst [vmem:[#allocation2 + $0x148] sm:$0xff] %v15963_v8  ;;  %16316 = vmatprep.mubr.msk.f32.mxu1 %vm594_vm1, %v20736_v40  ;;  %16010 = vmatprep.mubr.msk.f32.mxu0 %vm594_vm1, %v20868_v44 }
 0x4d2   : > { %v6636_v14 = vpop.f32.mrf.mxu1  ;;  %16163 = vmatprep.subr.mxu0 %v7336_v17 }
 0x4d3   : > { %6715 = vst [vmem:[#allocation2 + $0x140] sm:$0xff] %v6636_v14  ;;  %16164 = vmatpush3.msra.mxu0 %v7336_v17 }
 0x4d4   : > { %v15966_v12 = vpop.f32.mrf.mxu1  ;;  %16317 = vmatmul.mubr.msk.f32.gmra.mxu1 %vm594_vm1, %v20744_v53  ;;  %16011 = vmatmul.mubr.msk.f32.gmra.mxu0 %vm594_vm1, %v20875_v41 }
 0x4d5   : > { %6718 = vst [vmem:[#allocation2 + $0x158] sm:$0xff] %v15966_v12  ;;  %16319 = vmatprep.mubr.msk.f32.mxu1 %vm594_vm1, %v20752_v46  ;;  %16013 = vmatprep.mubr.msk.f32.mxu0 %vm594_vm1, %v20880_v9 }
 0x4d6   : > { %v6646_v35 = vpop.f32.mrf.mxu1  ;;  %16325 = vmatprep.subr.mxu0 %v21024_v22 }
 0x4d8   : > { %v15969_v49 = vpop.f32.mrf.mxu1  ;;  %16320 = vmatmul.mubr.msk.f32.gmra.mxu1 %vm594_vm1, %v20758_v24  ;;  %16014 = vmatmul.mubr.msk.f32.gmra.mxu0 %vm594_vm1, %v20887_v4 }
 0x4d9   : > { %16322 = vmatprep.mubr.msk.f32.mxu1 %vm594_vm1, %v20765_v16  ;;  %16016 = vmatprep.mubr.msk.f32.mxu0 %vm594_vm1, %v20892_v52 }
 0x4da   : > { %v6656_v10 = vpop.f32.mrf.mxu1 }
 0x4db   : > { %6719 = vst [vmem:[#allocation2 + $0x160] sm:$0xff] %v6656_v10 }
 0x4dc   : > { %v15972_v59 = vpop.f32.mrf.mxu1  ;;  %16323 = vmatmul.mubr.msk.f32.gmra.mxu1 %vm594_vm1, %v20774_v58  ;;  %16017 = vmatmul.mubr.msk.f32.gmra.mxu0 %vm594_vm1, %v20899_v48 }
 0x4dd   : > { %6722 = vst [vmem:[#allocation2 + $0x178] sm:$0xff] %v15972_v59  ;;  %16429 = vmatprep.mubr.msk.f32.mxu1 %vm594_vm1, %v20780_v15  ;;  %16019 = vmatprep.mubr.msk.f32.mxu0 %vm594_vm1, %v20904_v30 }
 0x4de   : > { %v6666_v2 = vpop.f32.mrf.mxu1 }
 0x4df   : > { %6721 = vst [vmem:[#allocation2 + $0x170] sm:$0xff] %v6666_v2 }
 0x4e0   : > { %v21051_v56 = vpop.f32.mrf.mxu1  ;;  %16430 = vmatmul.mubr.msk.f32.vlgmr.msra.gmra.mxu1 %vm594_vm1, %v20788_v3  ;;  %16020 = vmatmul.mubr.msk.f32.gmra.mxu0 %vm594_vm1, %v20911_v36 }
 0x4e1   : > { %16432 = vmatprep.mubr.msk.f32.mxu1 %vm594_vm1, %v20795_v7  ;;  %16022 = vmatprep.mubr.msk.f32.mxu0 %vm594_vm1, %v20916_v6 }
 0x4e2   : > { %v7096_v31 = vpop.f32.mrf.mxu1 }
 0x4e3   : > { %v7311_v5 = vadd.f32 %v7096_v31, %v6616_v63  ;;  %v21118_v31 = vld [vmem:[%s18190_s17 + $0x108] sm:$0xff] }
 0x4e4   : > { %v16082_v42 = vpop.f32.mrf.mxu1  ;;  %16433 = vmatmul.mubr.msk.f32.gmra.mxu1 %vm594_vm1, %v20802_v34  ;;  %16023 = vmatmul.mubr.msk.f32.gmra.mxu0 %vm594_vm1, %v20923_v19 }
 0x4e5   : > { %7323 = vst [vmem:[#allocation2 + $0x120] sm:$0xff] %v7311_v5  ;;  %v7314_v32 = vadd.f32 %v16082_v42, %v15960_v62  ;;  %16435 = vmatprep.mubr.msk.f32.mxu1 %vm594_vm1, %v20807_v54  ;;  %16025 = vmatprep.mubr.msk.f32.mxu0 %vm594_vm1, %v20928_v61  ;;  %v21125_v5 = vld [vmem:[%s18190_s17 + $0x110] sm:$0xff] }
 0x4e6   : > { %v21069_v1 = vpop.f32.mrf.mxu1 }
 0x4e7   : > { %7326 = vst [vmem:[#allocation2 + $0x138] sm:$0xff] %v7314_v32 }
 0x4e8   : > { %v21071_v17 = vpop.f32.mrf.mxu1  ;;  %16436 = vmatmul.mubr.msk.f32.gmra.mxu1 %vm594_vm1, %v20815_v38  ;;  %16026 = vmatmul.mubr.msk.f32.gmra.mxu0 %vm594_vm1, %v20934_v26 }
 0x4e9   : > { %16438 = vmatprep.mubr.msk.f32.mxu1 %vm594_vm1, %v20820_v20  ;;  %16028 = vmatprep.mubr.msk.f32.mxu0 %vm594_vm1, %v20939_v57 }
 0x4ea   : > { %v21081_v63 = vpop.f32.mrf.mxu1 }
 0x4ec   : > { %v21083_v62 = vpop.f32.mrf.mxu1  ;;  %16439 = vmatmul.mubr.msk.f32.gmra.mxu1 %vm594_vm1, %v20827_v0  ;;  %16029 = vmatmul.mubr.msk.f32.gmra.mxu0 %vm594_vm1, %v20944_v45 }
 0x4ed   : > { %16441 = vmatprep.mubr.msk.f32.mxu1 %vm594_vm1, %v20832_v55  ;;  %16031 = vmatprep.mubr.msk.f32.mxu0 %vm594_vm1, %v20949_v11 }
 0x4ee   : > { %v7126_v8 = vpop.f32.mrf.mxu1 }
 0x4ef   : > { %v7317_v14 = vadd.f32 %v7126_v8, %v6646_v35 }
 0x4f0   : > { %v16091_v12 = vpop.f32.mrf.mxu1  ;;  %16442 = vmatmul.mubr.msk.f32.gmra.mxu1 %vm594_vm1, %v20839_v21  ;;  %16032 = vmatmul.mubr.msk.f32.gmra.mxu0 %vm594_vm1, %v20956_v51 }
 0x4f1   : > { %7329 = vst [vmem:[#allocation2 + $0x150] sm:$0xff] %v7317_v14  ;;  %v7320_v10 = vadd.f32 %v16091_v12, %v15969_v49  ;;  %16444 = vmatprep.mubr.msk.f32.mxu1 %vm594_vm1, %v20844_v47  ;;  %16034 = vmatprep.mubr.msk.f32.mxu0 %vm594_vm1, %v20963_v29 }
 0x4f2   : > { %v21101_v59 = vpop.f32.mrf.mxu1 }
 0x4f3   : > { %7332 = vst [vmem:[#allocation2 + $0x168] sm:$0xff] %v7320_v10 }
 0x4f4   : > { %v21103_v35 = vpop.f32.mrf.mxu1  ;;  %16445 = vmatmul.mubr.msk.f32.gmra.mxu1 %vm594_vm1, %v20851_v33  ;;  %16035 = vmatmul.mubr.msk.f32.gmra.mxu0 %vm594_vm1, %v20971_v18 }
 0x4f5   : > { %16447 = vmatprep.mubr.msk.f32.mxu1 %vm594_vm1, %v20856_v25  ;;  %16037 = vmatprep.mubr.msk.f32.mxu0 %vm594_vm1, %v20978_v43 }
 0x4f6   : > { %v21113_v49 = vpop.f32.mrf.mxu1 }
 0x4f8   : > { %v16097_v2 = vpop.f32.mrf.mxu1  ;;  %16448 = vmatmul.mubr.msk.f32.gmra.mxu1 %vm594_vm1, %v20863_v13  ;;  %16038 = vmatmul.mubr.msk.f32.gmra.mxu0 %vm594_vm1, %v21118_v31 }
 0x4f9   : > { %16450 = vmatprep.mubr.msk.f32.mxu1 %vm594_vm1, %v20868_v44  ;;  %16040 = vmatprep.mubr.msk.f32.mxu0 %vm594_vm1, %v21125_v5  ;;  %v23356_v2 = vld [vmem:[#allocation46_spill] sm:$0xff] }
 0x4fa   : > { %v7156_v42 = vpop.f32.mrf.mxu1 }
 0x4fc   : > { %v16100_v32 = vpop.f32.mrf.mxu1  ;;  %16451 = vmatmul.mubr.msk.f32.gmra.mxu1 %vm594_vm1, %v20875_v41  ;;  %16041 = vmatmul.mubr.msk.f32.gmra.mxu0 %vm594_vm1, %v20683_v28 }
 0x4fd   : > { %16453 = vmatprep.mubr.msk.f32.mxu1 %vm594_vm1, %v20880_v9  ;;  %16043 = vmatprep.mubr.msk.f32.mxu0 %vm594_vm1, %v20689_v50  ;;  %v9181_v32 = vld [vmem:[#allocation10 + $0x230] sm:$0xff] }
 0x4fe   : > { %v7164_v8 = vpop.f32.mrf.mxu1 }
 0x500   : > { %v16103_v14 = vpop.f32.mrf.mxu1  ;;  %16454 = vmatmul.mubr.msk.f32.gmra.mxu1 %vm594_vm1, %v20887_v4  ;;  %16044 = vmatmul.mubr.msk.f32.gmra.mxu0 %vm594_vm1, %v20697_v37  ;;  %v9182_v37 = vld [vmem:[#allocation10 + $0x238] sm:$0xff] }
 0x501   : > { %16456 = vmatprep.mubr.msk.f32.mxu1 %vm594_vm1, %v20892_v52  ;;  %16046 = vmatprep.mubr.msk.f32.mxu0 %vm594_vm1, %v20707_v23 }
 0x502   : > { %v7172_v28 = vpop.f32.mrf.mxu1  ;;  %16589 = vmatprep.subr.mxu1 %v9182_v37 }
 0x503   : > { %16590 = vmatpush3.msra.mxu1 %v9182_v37  ;;  %v8063_v37 = vld [vmem:[#allocation10 + $0x170] sm:$0xff] }
 0x504   : > { %v16106_v12 = vpop.f32.mrf.mxu1  ;;  %16457 = vmatmul.mubr.msk.f32.gmra.mxu1 %vm594_vm1, %v20899_v48  ;;  %16047 = vmatmul.mubr.msk.f32.gmra.mxu0 %vm594_vm1, %v20714_v39 }
 0x505   : > { %16459 = vmatprep.mubr.msk.f32.mxu1 %vm594_vm1, %v20904_v30  ;;  %16049 = vmatprep.mubr.msk.f32.mxu0 %vm594_vm1, %v20721_v60 }
 0x506   : > { %v7180_v50 = vpop.f32.mrf.mxu1  ;;  %16591 = vmatprep.subr.mxu1 %v9181_v32 }
 0x507   : > { %16592 = vmatpush3.msra.mxu1 %v9181_v32  ;;  %v23363_v32 = vld [vmem:[#allocation50_spill] sm:$0xff] }
 0x508   : > { %v16109_v10 = vpop.f32.mrf.mxu1  ;;  %16460 = vmatmul.mubr.msk.f32.gmra.mxu1 %vm594_vm1, %v20911_v36  ;;  %16050 = vmatmul.mubr.msk.f32.gmra.mxu0 %vm594_vm1, %v20730_v27 }
 0x509   : > { %16462 = vmatprep.mubr.msk.f32.mxu1 %vm594_vm1, %v20916_v6  ;;  %16052 = vmatprep.mubr.msk.f32.mxu0 %vm594_vm1, %v20736_v40  ;;  %v23360_v10 = vld [vmem:[#allocation48_spill] sm:$0xff] }
 0x50a   : > { %v7188_v23 = vpop.f32.mrf.mxu1 }
 0x50c   : > { %v16112_v39 = vpop.f32.mrf.mxu1  ;;  %16463 = vmatmul.mubr.msk.f32.gmra.mxu1 %vm594_vm1, %v20923_v19  ;;  %16053 = vmatmul.mubr.msk.f32.gmra.mxu0 %vm594_vm1, %v20744_v53  ;;  %v23355_v53 = vld [vmem:[#allocation63_spill] sm:$0xff] }
 0x50d   : > { %16465 = vmatprep.mubr.msk.f32.mxu1 %vm594_vm1, %v20928_v61  ;;  %16055 = vmatprep.mubr.msk.f32.mxu0 %vm594_vm1, %v20752_v46  ;;  %v1472_v42 = vadd.f32 %v23356_v2, %v23355_v53  ;;  %v1482_v23 = vadd.f32 %v23360_v10, %v23355_v53  ;;  %v8062_v39 = vld [vmem:[#allocation10 + $0x168] sm:$0xff] }
 0x50e   : > { %v7196_v60 = vpop.f32.mrf.mxu1 }
 0x510   : > { %v16115_v27 = vpop.f32.mrf.mxu1  ;;  %16466 = vmatmul.mubr.msk.f32.gmra.mxu1 %vm594_vm1, %v20934_v26  ;;  %16056 = vmatmul.mubr.msk.f32.gmra.mxu0 %vm594_vm1, %v20758_v24  ;;  %v23357_v24 = vld [vmem:[#allocation47_spill] sm:$0xff] }
 0x511   : > { %16468 = vmatprep.mubr.msk.f32.mxu1 %vm594_vm1, %v20939_v57  ;;  %16058 = vmatprep.mubr.msk.f32.mxu0 %vm594_vm1, %v20765_v16  ;;  %v1467_v14 = vadd.f32 %v23357_v24, %v23355_v53 }
 0x512   : > { %v7204_v40 = vpop.f32.mrf.mxu1 }
 0x513   : > { %v9180_v40 = vld [vmem:[#allocation10 + $0x228] sm:$0xff] }
 0x514   : > { %v16118_v46 = vpop.f32.mrf.mxu1  ;;  %16469 = vmatmul.mubr.msk.f32.gmra.mxu1 %vm594_vm1, %v20944_v45  ;;  %16059 = vmatmul.mubr.msk.f32.gmra.mxu0 %vm594_vm1, %v20774_v58  ;;  %v15815_v8 = vpop.f32.mrf.mxu0 }
 0x515   : > { %16471 = vmatprep.mubr.msk.f32.mxu1 %vm594_vm1, %v20949_v11  ;;  %16165 = vmatprep.mubr.msk.f32.mxu0 %vm594_vm1, %v20780_v15  ;;  %v21189_v16 = vadd.f32 %v15815_v8, %v1472_v42  ;;  %v1492_v46 = vadd.f32 %v23363_v32, %v23355_v53  ;;  %v8061_v8 = vld [vmem:[#allocation10 + $0x160] sm:$0xff] }
 0x516   : > { %v7212_v28 = vpop.f32.mrf.mxu1  ;;  %v6026_v12 = vpop.f32.mrf.mxu0  ;;  %16593 = vmatprep.subr.mxu1 %v9180_v40 }
 0x517   : > { %23358 = vst [vmem:[#allocation45_spill] sm:$0xff] %v21189_v16  ;;  %v21191_v50 = vadd.f32 %v6026_v12, %v1467_v14  ;;  %16594 = vmatpush3.msra.mxu1 %v9180_v40  ;;  %v21672_v16 = vld [vmem:[%s18190_s17 + $0xc8] sm:$0xff] }
 0x518   : > { %v16121_v58 = vpop.f32.mrf.mxu1  ;;  %16472 = vmatmul.mubr.msk.f32.gmra.mxu1 %vm594_vm1, %v20956_v51  ;;  %16166 = vmatmul.mubr.msk.f32.vlgmr.msra.gmra.mxu0 %vm594_vm1, %v20788_v3 }
 0x519   : > { %23359 = vst [vmem:[#allocation23_spill] sm:$0xff] %v21191_v50  ;;  %16474 = vmatprep.mubr.msk.f32.mxu1 %vm594_vm1, %v20963_v29  ;;  %16326 = vmatpush3.msra.mxu0 %v21024_v22  ;;  %v23361_v22 = vld [vmem:[#allocation49_spill] sm:$0xff]  ;;  %v7973_v50 = vld [vmem:[#allocation2 + $0xa4] sm:$0xf] }
 0x51a   : > { %v7220_v15 = vpop.f32.mrf.mxu1  ;;  %16168 = vmatprep.mubr.msk.f32.mxu0 %vm594_vm1, %v20795_v7  ;;  %16327 = vmatprep.subr.mxu0 %v8063_v37  ;;  %v1477_v27 = vadd.f32 %v23361_v22, %v23355_v53 }
 0x51b   : > { %16328 = vmatpush3.msra.mxu0 %v8063_v37  ;;  %v23367_v15 = vld [vmem:[#allocation52_spill] sm:$0xff] }
 0x51c   : > { %v16124_v60 = vpop.f32.mrf.mxu1  ;;  %16475 = vmatmul.mubr.msk.f32.gmra.mxu1 %vm594_vm1, %v20971_v18  ;;  %v15818_v3 = vpop.f32.mrf.mxu0  ;;  %16169 = vmatmul.mubr.msk.f32.gmra.mxu0 %vm594_vm1, %v20802_v34  ;;  %v1502_v10 = vadd.f32 %v23367_v15, %v23355_v53 }
 0x51d   : > { %16477 = vmatprep.mubr.msk.f32.mxu1 %vm594_vm1, %v20978_v43  ;;  %v21212_v7 = vadd.f32 %v15818_v3, %v1482_v23  ;;  %16171 = vmatprep.mubr.msk.f32.mxu0 %vm594_vm1, %v20807_v54  ;;  %v23365_v54 = vld [vmem:[#allocation51_spill] sm:$0xff]  ;;  %v21237_v60 = vld [vmem:[%s18190_s17 + $0x118] sm:$0xff] }
 0x51e   : > { %v7228_v2 = vpop.f32.mrf.mxu1  ;;  %v6036_v42 = vpop.f32.mrf.mxu0  ;;  %16329 = vmatprep.subr.mxu0 %v8062_v39  ;;  %v1487_v28 = vadd.f32 %v23365_v54, %v23355_v53  ;;  %v21259_v54 = vld [vmem:[%s18190_s17 + $0x128] sm:$0xff] }
 0x51f   : > { %23362 = vst [vmem:[#allocation24_spill] sm:$0xff] %v21212_v7  ;;  %v21218_v34 = vadd.f32 %v6036_v42, %v1477_v27  ;;  %16330 = vmatpush3.msra.mxu0 %v8062_v39  ;;  %v21246_v27 = vld [vmem:[%s18190_s17 + $0x120] sm:$0xff] }
 0x520   : > { %v16127_v24 = vpop.f32.mrf.mxu1  ;;  %16478 = vmatmul.mubr.msk.f32.gmra.mxu1 %vm594_vm1, %v21118_v31  ;;  %v15821_v14 = vpop.f32.mrf.mxu0  ;;  %16172 = vmatmul.mubr.msk.f32.gmra.mxu0 %vm594_vm1, %v20815_v38  ;;  %v8060_v38 = vld [vmem:[#allocation10 + $0x158] sm:$0xff]  ;;  %v9179_v2 = vld [vmem:[#allocation10 + $0x220] sm:$0xff] }
 0x521   : > { %23364 = vst [vmem:[#allocation25_spill] sm:$0xff] %v21218_v34  ;;  %16480 = vmatprep.mubr.msk.f32.mxu1 %vm594_vm1, %v21125_v5  ;;  %v21228_v12 = vadd.f32 %v15821_v14, %v1492_v46  ;;  %16174 = vmatprep.mubr.msk.f32.mxu0 %vm594_vm1, %v20820_v20  ;;  %v23369_v20 = vld [vmem:[#allocation53_spill] sm:$0xff] }
 0x522   : > { %v7236_v37 = vpop.f32.mrf.mxu1  ;;  %v6046_v58 = vpop.f32.mrf.mxu0  ;;  %16331 = vmatprep.subr.mxu0 %v8061_v8  ;;  %v1497_v22 = vadd.f32 %v23369_v20, %v23355_v53  ;;  %16595 = vmatprep.subr.mxu1 %v9179_v2  ;;  %v8059_v24 = vld [vmem:[#allocation10 + $0x150] sm:$0xff]  ;;  %v8058_v20 = vld [vmem:[#allocation10 + $0x148] sm:$0xff] }
 0x523   : > { %23366 = vst [vmem:[#allocation26_spill] sm:$0xff] %v21228_v12  ;;  %v21234_v23 = vadd.f32 %v6046_v58, %v1487_v28  ;;  %16332 = vmatpush3.msra.mxu0 %v8061_v8  ;;  %16596 = vmatpush3.msra.mxu1 %v9179_v2  ;;  %v23373_v28 = vld [vmem:[#allocation55_spill] sm:$0xff]  ;;  %v21268_v58 = vld [vmem:[%s18190_s17 + $0x130] sm:$0xff]  ;;  %v21281_v2 = vld [vmem:[%s18190_s17 + $0x138] sm:$0xff] }
 0x524   : > { %v16130_v39 = vpop.f32.mrf.mxu1  ;;  %16481 = vmatmul.mubr.msk.f32.gmra.mxu1 %vm594_vm1, %v21237_v60  ;;  %v15824_v3 = vpop.f32.mrf.mxu0  ;;  %16175 = vmatmul.mubr.msk.f32.gmra.mxu0 %vm594_vm1, %v20827_v0  ;;  %v23371_v0 = vld [vmem:[#allocation54_spill] sm:$0xff]  ;;  %v1507_v37 = vadd.f32 %v23373_v28, %v23355_v53 }
 0x525   : > { %23368 = vst [vmem:[#allocation27_spill] sm:$0xff] %v21234_v23  ;;  %16483 = vmatprep.mubr.msk.f32.mxu1 %vm594_vm1, %v21246_v27  ;;  %v21250_v40 = vadd.f32 %v15824_v3, %v1502_v10  ;;  %16177 = vmatprep.mubr.msk.f32.mxu0 %vm594_vm1, %v20832_v55  ;;  %v1512_v46 = vadd.f32 %v23371_v0, %v23355_v53  ;;  %v23375_v39 = vld [vmem:[#allocation56_spill] sm:$0xff]  ;;  %v21290_v0 = vld [vmem:[%s18190_s17 + $0x140] sm:$0xff] }
 0x526   : > { %v7244_v42 = vpop.f32.mrf.mxu1  ;;  %v6056_v32 = vpop.f32.mrf.mxu0  ;;  %16333 = vmatprep.subr.mxu0 %v8060_v38  ;;  %v7001_v12 = vld [vmem:[#allocation2 + $0x15c] sm:$0xff] }
 0x527   : > { %23370 = vst [vmem:[#allocation28_spill] sm:$0xff] %v21250_v40  ;;  %v21256_v8 = vadd.f32 %v6056_v32, %v1497_v22  ;;  %16334 = vmatpush3.msra.mxu0 %v8060_v38 }
 0x528   : > { %v16133_v14 = vpop.f32.mrf.mxu1  ;;  %16484 = vmatmul.mubr.msk.f32.gmra.mxu1 %vm594_vm1, %v21259_v54  ;;  %v15827_v55 = vpop.f32.mrf.mxu0  ;;  %16178 = vmatmul.mubr.msk.f32.gmra.mxu0 %vm594_vm1, %v20839_v21  ;;  %v1522_v21 = vadd.f32 %v23375_v39, %v23355_v53  ;;  %v21303_v39 = vld [vmem:[%s18190_s17 + $0x148] sm:$0xff] }
 0x529   : > { %23372 = vst [vmem:[#allocation34_spill] sm:$0xff] %v21256_v8  ;;  %16486 = vmatprep.mubr.msk.f32.mxu1 %vm594_vm1, %v21268_v58  ;;  %v21272_v15 = vadd.f32 %v15827_v55, %v1512_v46  ;;  %16180 = vmatprep.mubr.msk.f32.mxu0 %vm594_vm1, %v20844_v47  ;;  %v23377_v47 = vld [vmem:[#allocation57_spill] sm:$0xff]  ;;  %v9178_v55 = vld [vmem:[#allocation10 + $0x218] sm:$0xff] }
 0x52a   : > { %v7252_v10 = vpop.f32.mrf.mxu1  ;;  %v6066_v38 = vpop.f32.mrf.mxu0  ;;  %16335 = vmatprep.subr.mxu0 %v8059_v24  ;;  %v1517_v32 = vadd.f32 %v23377_v47, %v23355_v53  ;;  %16597 = vmatprep.subr.mxu1 %v9178_v55  ;;  %v7966_v8 = vld [vmem:[#allocation2 + $0x54] sm:$0xff] }
 0x52b   : > { %23374 = vst [vmem:[#allocation36_spill] sm:$0xff] %v21272_v15  ;;  %v21278_v3 = vadd.f32 %v6066_v38, %v1507_v37  ;;  %16336 = vmatpush3.msra.mxu0 %v8059_v24  ;;  %v8057_v10 = vld [vmem:[#allocation10 + $0x140] sm:$0xff]  ;;  %16598 = vmatpush3.msra.mxu1 %v9178_v55  ;;  %v23385_v55 = vld [vmem:[#allocation61_spill] sm:$0xff] }
 0x52c   : > { %v16136_v22 = vpop.f32.mrf.mxu1  ;;  %16487 = vmatmul.mubr.msk.f32.gmra.mxu1 %vm594_vm1, %v21281_v2  ;;  %v15830_v42 = vpop.f32.mrf.mxu0  ;;  %16181 = vmatmul.mubr.msk.f32.gmra.mxu0 %vm594_vm1, %v20851_v33  ;;  %v23379_v33 = vld [vmem:[#allocation58_spill] sm:$0xff] }
 0x52d   : > { %23376 = vst [vmem:[#allocation31_spill] sm:$0xff] %v21278_v3  ;;  %16489 = vmatprep.mubr.msk.f32.mxu1 %vm594_vm1, %v21290_v0  ;;  %v21294_v46 = vadd.f32 %v15830_v42, %v1522_v21  ;;  %16183 = vmatprep.mubr.msk.f32.mxu0 %vm594_vm1, %v20856_v25  ;;  %v1532_v28 = vadd.f32 %v23379_v33, %v23355_v53  ;;  %v23381_v21 = vld [vmem:[#allocation59_spill] sm:$0xff]  ;;  %v21312_v42 = vld [vmem:[%s18190_s17 + $0x150] sm:$0xff]  ;;  %v21324_v33 = vld [vmem:[#allocation10 + $0x1f8] sm:$0xff] }
 0x52e   : > { %v7260_v24 = vpop.f32.mrf.mxu1  ;;  %v6076_v14 = vpop.f32.mrf.mxu0  ;;  %16337 = vmatprep.subr.mxu0 %v8058_v20  ;;  %v1527_v22 = vadd.f32 %v23381_v21, %v23355_v53  ;;  %v21336_v21 = vld [vmem:[%s18190_s17 + $0x160] sm:$0xff] }
 0x52f   : > { %23378 = vst [vmem:[#allocation38_spill] sm:$0xff] %v21294_v46  ;;  %v21300_v37 = vadd.f32 %v6076_v14, %v1517_v32  ;;  %16338 = vmatpush3.msra.mxu0 %v8058_v20  ;;  %v23406_v3 = vld [vmem:[#allocation71_spill] sm:$0xff]  ;;  %v21642_v46 = vld [vmem:[%s18190_s17 + $0xa8] sm:$0xff] }
 0x530   : > { %v16139_v38 = vpop.f32.mrf.mxu1  ;;  %16490 = vmatmul.mubr.msk.f32.gmra.mxu1 %vm594_vm1, %v21303_v39  ;;  %v15833_v25 = vpop.f32.mrf.mxu0  ;;  %16184 = vmatmul.mubr.msk.f32.gmra.mxu0 %vm594_vm1, %v20863_v13  ;;  %v23383_v13 = vld [vmem:[#allocation60_spill] sm:$0xff] }
 0x531   : > { %23380 = vst [vmem:[#allocation29_spill] sm:$0xff] %v21300_v37  ;;  %16492 = vmatprep.mubr.msk.f32.mxu1 %vm594_vm1, %v21312_v42  ;;  %v21316_v20 = vadd.f32 %v15833_v25, %v1532_v28  ;;  %16186 = vmatprep.mubr.msk.f32.mxu0 %vm594_vm1, %v20868_v44  ;;  %v1542_v24 = vadd.f32 %v23383_v13, %v23355_v53  ;;  %v21327_v28 = vld [vmem:[%s18190_s17 + $0x158] sm:$0xff]  ;;  %v23398_v37 = vld [vmem:[#allocation67_spill] sm:$0xff] }
 0x532   : > { %v7268_v47 = vpop.f32.mrf.mxu1  ;;  %v6086_v32 = vpop.f32.mrf.mxu0  ;;  %16339 = vmatprep.subr.mxu0 %v8057_v10  ;;  %v1537_v25 = vadd.f32 %v23385_v55, %v23355_v53  ;;  %v21350_v55 = vld [vmem:[%s18190_s17 + $0x168] sm:$0xff] }
 0x533   : > { %23382 = vst [vmem:[#allocation30_spill] sm:$0xff] %v21316_v20  ;;  %v21322_v14 = vadd.f32 %v6086_v32, %v1527_v22  ;;  %16340 = vmatpush3.msra.mxu0 %v8057_v10  ;;  %v6999_v20 = vld [vmem:[#allocation2 + $0x144] sm:$0xff] }
 0x534   : > { %v16142_v38 = vpop.f32.mrf.mxu1  ;;  %16493 = vmatmul.mubr.msk.f32.gmra.mxu1 %vm594_vm1, %v21327_v28  ;;  %v15836_v44 = vpop.f32.mrf.mxu0  ;;  %16187 = vmatmul.mubr.msk.f32.gmra.mxu0 %vm594_vm1, %v20875_v41  ;;  %v23387_v41 = vld [vmem:[#allocation62_spill] sm:$0xff] }
 0x535   : > { %23384 = vst [vmem:[#allocation40_spill] sm:$0xff] %v21322_v14  ;;  %16495 = vmatprep.mubr.msk.f32.mxu1 %vm594_vm1, %v21336_v21  ;;  %v21340_v10 = vadd.f32 %v15836_v44, %v1542_v24  ;;  %16189 = vmatprep.mubr.msk.f32.mxu0 %vm594_vm1, %v20880_v9  ;;  %v1552_v32 = vadd.f32 %v23387_v41, %v23355_v53  ;;  %v21357_v9 = vld [vmem:[%s18190_s17 + $0x170] sm:$0xff] }
 0x536   : > { %v7276_v22 = vpop.f32.mrf.mxu1  ;;  %v6096_v47 = vpop.f32.mrf.mxu0  ;;  %16501 = vmatprep.subr.mxu0 %v21324_v33  ;;  %v7961_v14 = vld [vmem:[#allocation2 + $0x14] sm:$0xf] }
 0x537   : > { %23386 = vst [vmem:[#allocation41_spill] sm:$0xff] %v21340_v10  ;;  %v21347_v13 = vadd.f32 %v6096_v47, %v1537_v25  ;;  %v9177_v22 = vld [vmem:[#allocation10 + $0x210] sm:$0xff]  ;;  %v23390_v47 = vld [vmem:[#allocation64_spill] sm:$0xff] }
 0x538   : > { %v16145_v38 = vpop.f32.mrf.mxu1  ;;  %16496 = vmatmul.mubr.msk.f32.gmra.mxu1 %vm594_vm1, %v21350_v55  ;;  %v15839_v24 = vpop.f32.mrf.mxu0  ;;  %16190 = vmatmul.mubr.msk.f32.gmra.mxu0 %vm594_vm1, %v20887_v4  ;;  %v21369_v4 = vld [vmem:[%s18190_s17 + $0x178] sm:$0xff] }
 0x539   : > { %23388 = vst [vmem:[#allocation32_spill] sm:$0xff] %v21347_v13  ;;  %16498 = vmatprep.mubr.msk.f32.mxu1 %vm594_vm1, %v21357_v9  ;;  %v21361_v44 = vadd.f32 %v15839_v24, %v1552_v32  ;;  %16192 = vmatprep.mubr.msk.f32.mxu0 %vm594_vm1, %v20892_v52  ;;  %v23392_v32 = vld [vmem:[#allocation66_spill] sm:$0xff] }
 0x53a   : > { %v7284_v53 = vpop.f32.mrf.mxu1  ;;  %v6106_v25 = vpop.f32.mrf.mxu0  ;;  %16599 = vmatprep.subr.mxu1 %v9177_v22 }
 0x53b   : > { %23389 = vst [vmem:[#allocation33_spill] sm:$0xff] %v21361_v44  ;;  %v21366_v41 = vadd.f32 %v6106_v25, %v23390_v47  ;;  %16600 = vmatpush3.msra.mxu1 %v9177_v22  ;;  %v21381_v25 = vld [vmem:[%s18190_s17] sm:$0xff]  ;;  %v23394_v47 = vld [vmem:[#allocation65_spill] sm:$0xff] }
 0x53c   : > { %v16148_v38 = vpop.f32.mrf.mxu1  ;;  %16499 = vmatmul.mubr.msk.f32.gmra.mxu1 %vm594_vm1, %v21369_v4  ;;  %v15842_v13 = vpop.f32.mrf.mxu0  ;;  %16193 = vmatmul.mubr.msk.f32.gmra.mxu0 %vm594_vm1, %v20899_v48  ;;  %v7981_v44 = vld [vmem:[#allocation2 + $0x104] sm:$0xf] }
 0x53d   : > { %23391 = vst [vmem:[#allocation43_spill] sm:$0xff] %v21366_v41  ;;  %v21376_v52 = vadd.f32 %v15842_v13, %v23392_v32  ;;  %16195 = vmatprep.mubr.msk.f32.mxu0 %vm594_vm1, %v20904_v30  ;;  %16605 = vmatprep.mubr.msk.f32.mxu1 %vm594_vm1, %v21381_v25  ;;  %v23396_v32 = vld [vmem:[#allocation68_spill] sm:$0xff] }
 0x53e   : > { %v7292_v24 = vpop.f32.mrf.mxu1  ;;  %v6116_v53 = vpop.f32.mrf.mxu0 }
 0x53f   : > { %23393 = vst [vmem:[#allocation37_spill] sm:$0xff] %v21376_v52  ;;  %v21386_v38 = vadd.f32 %v6116_v53, %v23394_v47  ;;  %v21610_v52 = vld [vmem:[%s18190_s17 + $0x88] sm:$0xff] }
 0x540   : > { %v16255_v41 = vpop.f32.mrf.mxu1  ;;  %v15845_v48 = vpop.f32.mrf.mxu0  ;;  %16196 = vmatmul.mubr.msk.f32.gmra.mxu0 %vm594_vm1, %v20911_v36  ;;  %v23400_v36 = vld [vmem:[#allocation70_spill] sm:$0xff] }
 0x541   : > { %23395 = vst [vmem:[#allocation35_spill] sm:$0xff] %v21386_v38  ;;  %v7993_v13 = vadd.f32 %v16255_v41, %v7961_v14  ;;  %v21391_v30 = vadd.f32 %v15845_v48, %v23396_v32  ;;  %16198 = vmatprep.mubr.msk.f32.mxu0 %vm594_vm1, %v20916_v6  ;;  %v9176_v48 = vld [vmem:[#allocation10 + $0x208] sm:$0xff]  ;;  %v23402_v32 = vld [vmem:[#allocation69_spill] sm:$0xff] }
 0x542   : > { %v21395_v22 = vpop.f32.mrf.mxu1  ;;  %v6126_v24 = vpop.f32.mrf.mxu0  ;;  %16601 = vmatprep.subr.mxu1 %v9176_v48 }
 0x543   : > { %23397 = vst [vmem:[#allocation39_spill] sm:$0xff] %v21391_v30  ;;  %8025 = vst [vmem:[#allocation2 + $0x14] sm:$0xf] %v7993_v13  ;;  %v21398_v53 = vadd.f32 %v6126_v24, %v23398_v37  ;;  %16602 = vmatpush3.msra.mxu1 %v9176_v48  ;;  %v23408_v48 = vld [vmem:[#allocation74_spill] sm:$0xff] }
 0x544   : > { %v21400_v47 = vpop.f32.mrf.mxu1  ;;  %v15848_v38 = vpop.f32.mrf.mxu0  ;;  %16199 = vmatmul.mubr.msk.f32.gmra.mxu0 %vm594_vm1, %v20923_v19  ;;  %v23404_v19 = vld [vmem:[#allocation72_spill] sm:$0xff] }
 0x545   : > { %23399 = vst [vmem:[#allocation42_spill] sm:$0xff] %v21398_v53  ;;  %v21405_v14 = vadd.f32 %v15848_v38, %v23400_v36  ;;  %16201 = vmatprep.mubr.msk.f32.mxu0 %vm594_vm1, %v20928_v61  ;;  %v7963_v38 = vld [vmem:[#allocation2 + $0x2c] sm:$0xf] }
 0x546   : > { %v7747_v6 = vpop.f32.mrf.mxu1  ;;  %v6136_v41 = vpop.f32.mrf.mxu0 }
 0x547   : > { %23401 = vst [vmem:[#allocation44_spill] sm:$0xff] %v21405_v14  ;;  %v21410_v13 = vadd.f32 %v6136_v41, %v23402_v32  ;;  %v23449_v14 = vld [vmem:[#allocation93_spill] sm:$0xff] }
 0x548   : > { %v16261_v37 = vpop.f32.mrf.mxu1  ;;  %v15851_v24 = vpop.f32.mrf.mxu0  ;;  %16202 = vmatmul.mubr.msk.f32.gmra.mxu0 %vm594_vm1, %v20934_v26 }
 0x549   : > { %23403 = vst [vmem:[#allocation63_spill] sm:$0xff] %v21410_v13  ;;  %v21415_v53 = vadd.f32 %v15851_v24, %v23404_v19  ;;  %16204 = vmatprep.mubr.msk.f32.mxu0 %vm594_vm1, %v20939_v57  ;;  %v7965_v37 = vld [vmem:[#allocation2 + $0x44] sm:$0xf]  ;;  %v7964_v19 = vld [vmem:[#allocation2 + $0x3c] sm:$0xff] }
 0x54a   : > { %v7756_v61 = vpop.f32.mrf.mxu1  ;;  %v6146_v36 = vpop.f32.mrf.mxu0 }
 0x54b   : > { %23405 = vst [vmem:[#allocation46_spill] sm:$0xff] %v21415_v53  ;;  %v7995_v6 = vadd.f32 %v7963_v38, %v7756_v61  ;;  %v21420_v41 = vadd.f32 %v6146_v36, %v23406_v3  ;;  %v23410_v38 = vld [vmem:[#allocation73_spill] sm:$0xff]  ;;  %v21590_v53 = vld [vmem:[%s18190_s17 + $0x78] sm:$0xff] }
 0x54c   : > { %v16264_v32 = vpop.f32.mrf.mxu1  ;;  %v15854_v13 = vpop.f32.mrf.mxu0  ;;  %16205 = vmatmul.mubr.msk.f32.gmra.mxu0 %vm594_vm1, %v20944_v45 }
 0x54d   : > { %23407 = vst [vmem:[#allocation47_spill] sm:$0xff] %v21420_v41  ;;  %8027 = vst [vmem:[#allocation2 + $0x2c] sm:$0xf] %v7995_v6  ;;  %v7997_v26 = vadd.f32 %v16264_v32, %v7965_v37  ;;  %v21425_v24 = vadd.f32 %v15854_v13, %v23408_v48  ;;  %16207 = vmatprep.mubr.msk.f32.mxu0 %vm594_vm1, %v20949_v11  ;;  %v23412_v13 = vld [vmem:[#allocation76_spill] sm:$0xff]  ;;  %v9175_v37 = vld [vmem:[#allocation10 + $0x200] sm:$0xff] }
 0x54e   : > { %v7765_v57 = vpop.f32.mrf.mxu1  ;;  %v6156_v61 = vpop.f32.mrf.mxu0  ;;  %16603 = vmatprep.subr.mxu1 %v9175_v37 }
 0x54f   : > { %23409 = vst [vmem:[#allocation48_spill] sm:$0xff] %v21425_v24  ;;  %8029 = vst [vmem:[#allocation2 + $0x44] sm:$0xf] %v7997_v26  ;;  %v7996_v3 = vadd.f32 %v7964_v19, %v7765_v57  ;;  %v21430_v36 = vadd.f32 %v6156_v61, %v23410_v38  ;;  %v23414_v26 = vld [vmem:[#allocation75_spill] sm:$0xff]  ;;  %16604 = vmatpush3.msra.mxu1 %v9175_v37  ;;  %v7967_v19 = vld [vmem:[#allocation2 + $0x5c] sm:$0xf] }
 0x550   : > { %v16267_v41 = vpop.f32.mrf.mxu1  ;;  %v15857_v23 = vpop.f32.mrf.mxu0  ;;  %16208 = vmatmul.mubr.msk.f32.gmra.mxu0 %vm594_vm1, %v20956_v51  ;;  %v23418_v38 = vld [vmem:[#allocation77_spill] sm:$0xff]  ;;  %v23420_v37 = vld [vmem:[#allocation80_spill] sm:$0xff] }
 0x551   : > { %23411 = vst [vmem:[#allocation49_spill] sm:$0xff] %v21430_v36  ;;  %8028 = vst [vmem:[#allocation2 + $0x3c] sm:$0xff] %v7996_v3  ;;  %v7998_v45 = vadd.f32 %v16267_v41, %v7966_v8  ;;  %v21435_v6 = vadd.f32 %v15857_v23, %v23412_v13  ;;  %16210 = vmatprep.mubr.msk.f32.mxu0 %vm594_vm1, %v20963_v29  ;;  %v23416_v23 = vld [vmem:[#allocation78_spill] sm:$0xff]  ;;  %v21450_v29 = vld [vmem:[%s18190_s17 + $0x8] sm:$0xff] }
 0x552   : > { %v7775_v11 = vpop.f32.mrf.mxu1  ;;  %v6166_v32 = vpop.f32.mrf.mxu0  ;;  %16606 = vmatmul.mubr.msk.f32.vlgmr.msra.gmra.mxu1 %vm594_vm1, %v21450_v29  ;;  %v21455_v3 = vld [vmem:[%s18190_s17 + $0x10] sm:$0xff] }
 0x553   : > { %23413 = vst [vmem:[#allocation50_spill] sm:$0xff] %v21435_v6  ;;  %8030 = vst [vmem:[#allocation2 + $0x54] sm:$0xff] %v7998_v45  ;;  %v21440_v48 = vadd.f32 %v6166_v32, %v23414_v26  ;;  %16608 = vmatprep.mubr.msk.f32.mxu1 %vm594_vm1, %v21455_v3  ;;  %v7969_v13 = vld [vmem:[#allocation2 + $0x74] sm:$0xf]  ;;  %v23445_v6 = vld [vmem:[#allocation91_spill] sm:$0xff] }
 0x554   : > { %v16270_v57 = vpop.f32.mrf.mxu1  ;;  %v15860_v51 = vpop.f32.mrf.mxu0  ;;  %16211 = vmatmul.mubr.msk.f32.gmra.mxu0 %vm594_vm1, %v20971_v18 }
 0x555   : > { %23415 = vst [vmem:[#allocation51_spill] sm:$0xff] %v21440_v48  ;;  %v21445_v8 = vadd.f32 %v15860_v51, %v23416_v23  ;;  %16213 = vmatprep.mubr.msk.f32.mxu0 %vm594_vm1, %v20978_v43  ;;  %v21470_v57 = vld [vmem:[%s18190_s17 + $0x18] sm:$0xff]  ;;  %v7968_v23 = vld [vmem:[#allocation2 + $0x6c] sm:$0xff] }
 0x556   : > { %v7784_v41 = vpop.f32.mrf.mxu1  ;;  %v6176_v61 = vpop.f32.mrf.mxu0  ;;  %16609 = vmatmul.mubr.msk.f32.gmra.mxu1 %vm594_vm1, %v21470_v57 }
 0x557   : > { %23417 = vst [vmem:[#allocation52_spill] sm:$0xff] %v21445_v8  ;;  %v7999_v18 = vadd.f32 %v7967_v19, %v7784_v41  ;;  %v21460_v45 = vadd.f32 %v6176_v61, %v23418_v38  ;;  %v21475_v19 = vld [vmem:[%s18190_s17 + $0x20] sm:$0xff] }
 0x558   : > { %v16273_v43 = vpop.f32.mrf.mxu1  ;;  %v15863_v11 = vpop.f32.mrf.mxu0  ;;  %16214 = vmatmul.mubr.msk.f32.gmra.mxu0 %vm594_vm1, %v21118_v31  ;;  %16611 = vmatprep.mubr.msk.f32.mxu1 %vm594_vm1, %v21475_v19  ;;  %v23422_v61 = vld [vmem:[#allocation79_spill] sm:$0xff] }
 0x559   : > { %23419 = vst [vmem:[#allocation53_spill] sm:$0xff] %v21460_v45  ;;  %8031 = vst [vmem:[#allocation2 + $0x5c] sm:$0xf] %v7999_v18  ;;  %v8001_v32 = vadd.f32 %v16273_v43, %v7969_v13  ;;  %v21465_v26 = vadd.f32 %v15863_v11, %v23420_v37  ;;  %16216 = vmatprep.mubr.msk.f32.mxu0 %vm594_vm1, %v21125_v5  ;;  %v7970_v38 = vld [vmem:[#allocation2 + $0x84] sm:$0xff]  ;;  %v23424_v11 = vld [vmem:[#allocation82_spill] sm:$0xff] }
 0x55a   : > { %v7793_v51 = vpop.f32.mrf.mxu1  ;;  %v6186_v41 = vpop.f32.mrf.mxu0  ;;  %v23436_v45 = vld [vmem:[#allocation88_spill] sm:$0xff] }
 0x55b   : > { %23421 = vst [vmem:[#allocation54_spill] sm:$0xff] %v21465_v26  ;;  %8033 = vst [vmem:[#allocation2 + $0x74] sm:$0xf] %v8001_v32  ;;  %v8000_v31 = vadd.f32 %v7968_v23, %v7793_v51  ;;  %v21480_v18 = vadd.f32 %v6186_v41, %v23422_v61  ;;  %v21490_v32 = vld [vmem:[%s18190_s17 + $0x28] sm:$0xff]  ;;  %v21495_v41 = vld [vmem:[%s18190_s17 + $0x30] sm:$0xff] }
 0x55c   : > { %v16276_v5 = vpop.f32.mrf.mxu1  ;;  %v15866_v43 = vpop.f32.mrf.mxu0  ;;  %16217 = vmatmul.mubr.msk.f32.gmra.mxu0 %vm594_vm1, %v21237_v60  ;;  %16612 = vmatmul.mubr.msk.f32.gmra.mxu1 %vm594_vm1, %v21490_v32  ;;  %v21530_v26 = vld [vmem:[%s18190_s17 + $0x48] sm:$0xff] }
 0x55d   : > { %23423 = vst [vmem:[#allocation55_spill] sm:$0xff] %v21480_v18  ;;  %8032 = vst [vmem:[#allocation2 + $0x6c] sm:$0xff] %v8000_v31  ;;  %v8002_v13 = vadd.f32 %v16276_v5, %v7970_v38  ;;  %v21485_v37 = vadd.f32 %v15866_v43, %v23424_v11  ;;  %16219 = vmatprep.mubr.msk.f32.mxu0 %vm594_vm1, %v21246_v27  ;;  %16614 = vmatprep.mubr.msk.f32.mxu1 %vm594_vm1, %v21495_v41  ;;  %v23426_v31 = vld [vmem:[#allocation81_spill] sm:$0xff]  ;;  %v23428_v43 = vld [vmem:[#allocation84_spill] sm:$0xff] }
 0x55e   : > { %v7803_v51 = vpop.f32.mrf.mxu1  ;;  %v6196_v23 = vpop.f32.mrf.mxu0 }
 0x55f   : > { %23425 = vst [vmem:[#allocation56_spill] sm:$0xff] %v21485_v37  ;;  %8034 = vst [vmem:[#allocation2 + $0x84] sm:$0xff] %v8002_v13  ;;  %v21500_v61 = vadd.f32 %v6196_v23, %v23426_v31  ;;  %v21510_v51 = vld [vmem:[%s18190_s17 + $0x38] sm:$0xff]  ;;  %v7971_v23 = vld [vmem:[#allocation2 + $0x8c] sm:$0xf] }
 0x560   : > { %v16279_v5 = vpop.f32.mrf.mxu1  ;;  %v15869_v38 = vpop.f32.mrf.mxu0  ;;  %16220 = vmatmul.mubr.msk.f32.gmra.mxu0 %vm594_vm1, %v21259_v54  ;;  %16615 = vmatmul.mubr.msk.f32.gmra.mxu1 %vm594_vm1, %v21510_v51  ;;  %v23432_v37 = vld [vmem:[#allocation86_spill] sm:$0xff] }
 0x561   : > { %23427 = vst [vmem:[#allocation57_spill] sm:$0xff] %v21500_v61  ;;  %v21505_v11 = vadd.f32 %v15869_v38, %v23428_v43  ;;  %16222 = vmatprep.mubr.msk.f32.mxu0 %vm594_vm1, %v21268_v58  ;;  %v21515_v5 = vld [vmem:[%s18190_s17 + $0x40] sm:$0xff] }
 0x562   : > { %v7812_v13 = vpop.f32.mrf.mxu1  ;;  %v6206_v31 = vpop.f32.mrf.mxu0  ;;  %16617 = vmatprep.mubr.msk.f32.mxu1 %vm594_vm1, %v21515_v5  ;;  %v23430_v43 = vld [vmem:[#allocation83_spill] sm:$0xff] }
 0x563   : > { %23429 = vst [vmem:[#allocation58_spill] sm:$0xff] %v21505_v11  ;;  %v8003_v38 = vadd.f32 %v7971_v23, %v7812_v13  ;;  %v21520_v36 = vadd.f32 %v6206_v31, %v23430_v43  ;;  %v7972_v23 = vld [vmem:[#allocation2 + $0x9c] sm:$0xff]  ;;  %v21535_v43 = vld [vmem:[%s18190_s17 + $0x50] sm:$0xff] }
 0x564   : > { %v16282_v34 = vpop.f32.mrf.mxu1  ;;  %v15872_v11 = vpop.f32.mrf.mxu0  ;;  %16223 = vmatmul.mubr.msk.f32.gmra.mxu0 %vm594_vm1, %v21281_v2  ;;  %16618 = vmatmul.mubr.msk.f32.gmra.mxu1 %vm594_vm1, %v21530_v26 }
 0x565   : > { %23431 = vst [vmem:[#allocation59_spill] sm:$0xff] %v21520_v36  ;;  %8035 = vst [vmem:[#allocation2 + $0x8c] sm:$0xf] %v8003_v38  ;;  %v8005_v61 = vadd.f32 %v16282_v34, %v7973_v50  ;;  %v21525_v18 = vadd.f32 %v15872_v11, %v23432_v37  ;;  %16225 = vmatprep.mubr.msk.f32.mxu0 %vm594_vm1, %v21290_v0  ;;  %16620 = vmatprep.mubr.msk.f32.mxu1 %vm594_vm1, %v21535_v43  ;;  %v23434_v34 = vld [vmem:[#allocation85_spill] sm:$0xff] }
 0x566   : > { %v7821_v13 = vpop.f32.mrf.mxu1  ;;  %v6216_v31 = vpop.f32.mrf.mxu0  ;;  %v7974_v38 = vld [vmem:[#allocation2 + $0xb4] sm:$0xff] }
 0x567   : > { %23433 = vst [vmem:[#allocation60_spill] sm:$0xff] %v21525_v18  ;;  %8037 = vst [vmem:[#allocation2 + $0xa4] sm:$0xf] %v8005_v61  ;;  %v8004_v50 = vadd.f32 %v7972_v23, %v7821_v13  ;;  %v21540_v37 = vadd.f32 %v6216_v31, %v23434_v34  ;;  %v21550_v61 = vld [vmem:[%s18190_s17 + $0x58] sm:$0xff]  ;;  %v21555_v31 = vld [vmem:[%s18190_s17 + $0x60] sm:$0xff] }
 0x568   : > { %v16285_v11 = vpop.f32.mrf.mxu1  ;;  %v15875_v18 = vpop.f32.mrf.mxu0  ;;  %16226 = vmatmul.mubr.msk.f32.gmra.mxu0 %vm594_vm1, %v21303_v39  ;;  %16621 = vmatmul.mubr.msk.f32.gmra.mxu1 %vm594_vm1, %v21550_v61  ;;  %23438 = vst [vmem:[#allocation64_spill] sm:$0xff] %v21555_v31 }
 0x569   : > { %23435 = vst [vmem:[#allocation61_spill] sm:$0xff] %v21540_v37  ;;  %8036 = vst [vmem:[#allocation2 + $0x9c] sm:$0xff] %v8004_v50  ;;  %v8006_v36 = vadd.f32 %v16285_v11, %v7974_v38  ;;  %v21545_v8 = vadd.f32 %v15875_v18, %v23436_v45  ;;  %16228 = vmatprep.mubr.msk.f32.mxu0 %vm594_vm1, %v21312_v42  ;;  %16623 = vmatprep.mubr.msk.f32.mxu1 %vm594_vm1, %v21555_v31  ;;  %v23439_v50 = vld [vmem:[#allocation87_spill] sm:$0xff]  ;;  %v23441_v11 = vld [vmem:[#allocation90_spill] sm:$0xff] }
 0x56a   : > { %v7831_v13 = vpop.f32.mrf.mxu1  ;;  %v6226_v23 = vpop.f32.mrf.mxu0 }
 0x56b   : > { %23437 = vst [vmem:[#allocation62_spill] sm:$0xff] %v21545_v8  ;;  %8038 = vst [vmem:[#allocation2 + $0xb4] sm:$0xff] %v8006_v36  ;;  %v21560_v45 = vadd.f32 %v6226_v23, %v23439_v50  ;;  %v21570_v13 = vld [vmem:[%s18190_s17 + $0x68] sm:$0xff]  ;;  %v7975_v23 = vld [vmem:[#allocation2 + $0xbc] sm:$0xf] }
 0x56c   : > { %v16288_v18 = vpop.f32.mrf.mxu1  ;;  %v15878_v34 = vpop.f32.mrf.mxu0  ;;  %16229 = vmatmul.mubr.msk.f32.gmra.mxu0 %vm594_vm1, %v21327_v28  ;;  %16624 = vmatmul.mubr.msk.f32.gmra.mxu1 %vm594_vm1, %v21570_v13  ;;  %v7977_v8 = vld [vmem:[#allocation2 + $0xd4] sm:$0xf] }
 0x56d   : > { %23440 = vst [vmem:[#allocation66_spill] sm:$0xff] %v21560_v45  ;;  %v21565_v38 = vadd.f32 %v15878_v34, %v23441_v11  ;;  %16231 = vmatprep.mubr.msk.f32.mxu0 %vm594_vm1, %v21336_v21  ;;  %v21575_v18 = vld [vmem:[%s18190_s17 + $0x70] sm:$0xff] }
 0x56e   : > { %v7840_v36 = vpop.f32.mrf.mxu1  ;;  %v6236_v50 = vpop.f32.mrf.mxu0  ;;  %16626 = vmatprep.mubr.msk.f32.mxu1 %vm594_vm1, %v21575_v18  ;;  %v23443_v11 = vld [vmem:[#allocation89_spill] sm:$0xff] }
 0x56f   : > { %23442 = vst [vmem:[#allocation65_spill] sm:$0xff] %v21565_v38  ;;  %v8007_v34 = vadd.f32 %v7975_v23, %v7840_v36  ;;  %v21580_v38 = vadd.f32 %v6236_v50, %v23443_v11  ;;  %v7976_v23 = vld [vmem:[#allocation2 + $0xcc] sm:$0xff]  ;;  %v21595_v11 = vld [vmem:[%s18190_s17 + $0x80] sm:$0xff] }
 0x570   : > { %v16291_v45 = vpop.f32.mrf.mxu1  ;;  %v15881_v37 = vpop.f32.mrf.mxu0  ;;  %16232 = vmatmul.mubr.msk.f32.gmra.mxu0 %vm594_vm1, %v21350_v55  ;;  %16627 = vmatmul.mubr.msk.f32.gmra.mxu1 %vm594_vm1, %v21590_v53 }
 0x571   : > { %23444 = vst [vmem:[#allocation68_spill] sm:$0xff] %v21580_v38  ;;  %8039 = vst [vmem:[#allocation2 + $0xbc] sm:$0xf] %v8007_v34  ;;  %v8009_v48 = vadd.f32 %v16291_v45, %v7977_v8  ;;  %v21585_v24 = vadd.f32 %v15881_v37, %v23445_v6  ;;  %16234 = vmatprep.mubr.msk.f32.mxu0 %vm594_vm1, %v21357_v9  ;;  %16629 = vmatprep.mubr.msk.f32.mxu1 %vm594_vm1, %v21595_v11  ;;  %v23447_v8 = vld [vmem:[#allocation92_spill] sm:$0xff] }
 0x572   : > { %v7849_v36 = vpop.f32.mrf.mxu1  ;;  %v6246_v50 = vpop.f32.mrf.mxu0  ;;  %v7978_v34 = vld [vmem:[#allocation2 + $0xe4] sm:$0xff] }
 0x573   : > { %23446 = vst [vmem:[#allocation67_spill] sm:$0xff] %v21585_v24  ;;  %8041 = vst [vmem:[#allocation2 + $0xd4] sm:$0xf] %v8009_v48  ;;  %v8008_v6 = vadd.f32 %v7976_v23, %v7849_v36  ;;  %v21600_v37 = vadd.f32 %v6246_v50, %v23447_v8  ;;  %v21615_v23 = vld [vmem:[%s18190_s17 + $0x90] sm:$0xff]  ;;  %v23451_v50 = vld [vmem:[#allocation94_spill] sm:$0xff] }
 0x574   : > { %v16294_v45 = vpop.f32.mrf.mxu1  ;;  %v15884_v24 = vpop.f32.mrf.mxu0  ;;  %16235 = vmatmul.mubr.msk.f32.gmra.mxu0 %vm594_vm1, %v21369_v4  ;;  %16630 = vmatmul.mubr.msk.f32.gmra.mxu1 %vm594_vm1, %v21610_v52 }
 0x575   : > { %23448 = vst [vmem:[#allocation70_spill] sm:$0xff] %v21600_v37  ;;  %8040 = vst [vmem:[#allocation2 + $0xcc] sm:$0xff] %v8008_v6  ;;  %v8010_v38 = vadd.f32 %v16294_v45, %v7978_v34  ;;  %v21605_v30 = vadd.f32 %v15884_v24, %v23449_v14  ;;  %16341 = vmatprep.mubr.msk.f32.mxu0 %vm594_vm1, %v21381_v25  ;;  %16632 = vmatprep.mubr.msk.f32.mxu1 %vm594_vm1, %v21615_v23  ;;  %v8867_v24 = vld [vmem:[#allocation10 + $0x1f0] sm:$0xff] }
 0x576   : > { %v7859_v48 = vpop.f32.mrf.mxu1  ;;  %v6256_v36 = vpop.f32.mrf.mxu0  ;;  %v6998_v45 = vld [vmem:[#allocation2 + $0x134] sm:$0xf] }
 0x577   : > { %23450 = vst [vmem:[#allocation69_spill] sm:$0xff] %v21605_v30  ;;  %8042 = vst [vmem:[#allocation2 + $0xe4] sm:$0xff] %v8010_v38  ;;  %v21620_v14 = vadd.f32 %v6256_v36, %v23451_v50  ;;  %v8866_v48 = vld [vmem:[#allocation10 + $0x1e8] sm:$0xff]  ;;  %v21628_v50 = vld [vmem:[%s18190_s17 + $0x98] sm:$0xff] }
 0x578   : > { %v16297_v6 = vpop.f32.mrf.mxu1  ;;  %v15991_v8 = vpop.f32.mrf.mxu0  ;;  %16342 = vmatmul.mubr.msk.f32.vlgmr.msra.gmra.mxu0 %vm594_vm1, %v21450_v29  ;;  %v7979_v30 = vld [vmem:[#allocation2 + $0xec] sm:$0xf]  ;;  %16633 = vmatmul.mubr.msk.f32.gmra.mxu1 %vm594_vm1, %v21628_v50 }
 0x579   : > { %23452 = vst [vmem:[#allocation72_spill] sm:$0xff] %v21620_v14  ;;  %v7006_v34 = vadd.f32 %v15991_v8, %v6998_v45  ;;  %16502 = vmatpush3.msra.mxu0 %v21324_v33  ;;  %16344 = vmatprep.mubr.msk.f32.mxu0 %vm594_vm1, %v21455_v3  ;;  %v6997_v36 = vld [vmem:[#allocation2 + $0x12c] sm:$0xff]  ;;  %v8865_v45 = vld [vmem:[#allocation10 + $0x1e0] sm:$0xff] }
 0x57a   : > { %v7868_v38 = vpop.f32.mrf.mxu1  ;;  %v6797_v37 = vpop.f32.mrf.mxu0  ;;  %16503 = vmatprep.subr.mxu0 %v8867_v24  ;;  %v21633_v33 = vld [vmem:[%s18190_s17 + $0xa0] sm:$0xff] }
 0x57b   : > { %v8011_v6 = vadd.f32 %v7979_v30, %v7868_v38  ;;  %7014 = vst [vmem:[#allocation2 + $0x134] sm:$0xf] %v7006_v34  ;;  %v7005_v8 = vadd.f32 %v6997_v36, %v6797_v37  ;;  %16504 = vmatpush3.msra.mxu0 %v8867_v24  ;;  %16635 = vmatprep.mubr.msk.f32.mxu1 %vm594_vm1, %v21633_v33  ;;  %v8864_v24 = vld [vmem:[#allocation10 + $0x1d8] sm:$0xff] }
 0x57c   : > { %v16300_v14 = vpop.f32.mrf.mxu1  ;;  %v15994_v10 = vpop.f32.mrf.mxu0  ;;  %16345 = vmatmul.mubr.msk.f32.gmra.mxu0 %vm594_vm1, %v21470_v57  ;;  %16505 = vmatprep.subr.mxu0 %v8866_v48  ;;  %v7980_v38 = vld [vmem:[#allocation2 + $0xfc] sm:$0xff] }
 0x57d   : > { %8043 = vst [vmem:[#allocation2 + $0xec] sm:$0xf] %v8011_v6  ;;  %v8013_v30 = vadd.f32 %v16300_v14, %v7981_v44  ;;  %7013 = vst [vmem:[#allocation2 + $0x12c] sm:$0xff] %v7005_v8  ;;  %v7007_v37 = vadd.f32 %v15994_v10, %v6999_v20  ;;  %16347 = vmatprep.mubr.msk.f32.mxu0 %vm594_vm1, %v21475_v19  ;;  %16506 = vmatpush3.msra.mxu0 %v8866_v48  ;;  %v8863_v44 = vld [vmem:[#allocation10 + $0x1d0] sm:$0xff] }
 0x57e   : > { %v7877_v34 = vpop.f32.mrf.mxu1  ;;  %v6807_v36 = vpop.f32.mrf.mxu0  ;;  %16507 = vmatprep.subr.mxu0 %v8865_v45  ;;  %16636 = vmatmul.mubr.msk.f32.gmra.mxu1 %vm594_vm1, %v21642_v46  ;;  %v21647_v20 = vld [vmem:[%s18190_s17 + $0xb0] sm:$0xff] }
 0x57f   : > { %8045 = vst [vmem:[#allocation2 + $0x104] sm:$0xf] %v8013_v30  ;;  %v8012_v6 = vadd.f32 %v7980_v38, %v7877_v34  ;;  %7015 = vst [vmem:[#allocation2 + $0x144] sm:$0xff] %v7007_v37  ;;  %16508 = vmatpush3.msra.mxu0 %v8865_v45  ;;  %16638 = vmatprep.mubr.msk.f32.mxu1 %vm594_vm1, %v21647_v20  ;;  %v7982_v14 = vld [vmem:[#allocation2 + $0x114] sm:$0xff]  ;;  %v8862_v45 = vld [vmem:[#allocation10 + $0x1c8] sm:$0xff] }
 0x580   : > { %v16303_v10 = vpop.f32.mrf.mxu1  ;;  %v15997_v48 = vpop.f32.mrf.mxu0  ;;  %16348 = vmatmul.mubr.msk.f32.gmra.mxu0 %vm594_vm1, %v21490_v32  ;;  %16509 = vmatprep.subr.mxu0 %v8864_v24  ;;  %v7000_v34 = vld [vmem:[#allocation2 + $0x14c] sm:$0xf]  ;;  %v21656_v38 = vld [vmem:[%s18190_s17 + $0xb8] sm:$0xff] }
 0x581   : > { %8044 = vst [vmem:[#allocation2 + $0xfc] sm:$0xff] %v8012_v6  ;;  %v8014_v8 = vadd.f32 %v16303_v10, %v7982_v14  ;;  %16350 = vmatprep.mubr.msk.f32.mxu0 %vm594_vm1, %v21495_v41  ;;  %16510 = vmatpush3.msra.mxu0 %v8864_v24  ;;  %v8861_v48 = vld [vmem:[#allocation10 + $0x1c0] sm:$0xff] }
 0x582   : > { %v7887_v30 = vpop.f32.mrf.mxu1  ;;  %v6816_v37 = vpop.f32.mrf.mxu0  ;;  %16511 = vmatprep.subr.mxu0 %v8863_v44  ;;  %16639 = vmatmul.mubr.msk.f32.gmra.mxu1 %vm594_vm1, %v21656_v38  ;;  %v21661_v6 = vld [vmem:[%s18190_s17 + $0xc0] sm:$0xff] }
 0x583   : > { %8046 = vst [vmem:[#allocation2 + $0x114] sm:$0xff] %v8014_v8  ;;  %v7008_v36 = vadd.f32 %v7000_v34, %v6816_v37  ;;  %16512 = vmatpush3.msra.mxu0 %v8863_v44  ;;  %16641 = vmatprep.mubr.msk.f32.mxu1 %vm594_vm1, %v21661_v6  ;;  %v7002_v30 = vld [vmem:[#allocation2 + $0x164] sm:$0xf] }
 0x584   : > { %v7301_v24 = vld [vmem:[#allocation2 + $0x130] sm:$0xff]  ;;  %v16306_v10 = vpop.f32.mrf.mxu1  ;;  %v16000_v14 = vpop.f32.mrf.mxu0  ;;  %16351 = vmatmul.mubr.msk.f32.gmra.mxu0 %vm594_vm1, %v21510_v51  ;;  %v7300_v15 = vld [vmem:[#allocation2 + $0x128] sm:$0xff]  ;;  %16513 = vmatprep.subr.mxu0 %v8862_v45 }
 0x585   : > { %v7313_v8 = vadd.f32 %v7301_v24, %v21069_v1  ;;  %7016 = vst [vmem:[#allocation2 + $0x14c] sm:$0xf] %v7008_v36  ;;  %v7010_v44 = vadd.f32 %v16000_v14, %v7002_v30  ;;  %v7312_v37 = vadd.f32 %v21051_v56, %v7300_v15  ;;  %16353 = vmatprep.mubr.msk.f32.mxu0 %vm594_vm1, %v21515_v5  ;;  %v7983_v10 = vld [vmem:[#allocation2 + $0x11c] sm:$0xf]  ;;  %v7003_v14 = vld [vmem:[#allocation2 + $0x174] sm:$0xff] }
 0x586   : > { %16514 = vmatpush3.msra.mxu0 %v8862_v45  ;;  %v7896_v34 = vpop.f32.mrf.mxu1  ;;  %v6825_v40 = vpop.f32.mrf.mxu0  ;;  %v7303_v7 = vld [vmem:[#allocation2 + $0x140] sm:$0xff]  ;;  %16642 = vmatmul.mubr.msk.f32.gmra.mxu1 %vm594_vm1, %v21672_v16  ;;  %v21678_v45 = vld [vmem:[%s18190_s17 + $0xd0] sm:$0xff] }
 0x587   : > { %16515 = vmatprep.subr.mxu0 %v8861_v48  ;;  %7325 = vst [vmem:[#allocation2 + $0x130] sm:$0xff] %v7313_v8  ;;  %v8015_v1 = vadd.f32 %v7983_v10, %v7896_v34  ;;  %7018 = vst [vmem:[#allocation2 + $0x164] sm:$0xf] %v7010_v44  ;;  %v7009_v56 = vadd.f32 %v7001_v12, %v6825_v40  ;;  %v7315_v15 = vadd.f32 %v7303_v7, %v21081_v63  ;;  %v21687_v40 = vld [vmem:[%s18190_s17 + $0xd8] sm:$0xff] }
 0x588   : > { %7324 = vst [vmem:[#allocation2 + $0x128] sm:$0xff] %v7312_v37  ;;  %16516 = vmatpush3.msra.mxu0 %v8861_v48  ;;  %16644 = vmatprep.mubr.msk.f32.mxu1 %vm594_vm1, %v21678_v45  ;;  %v16309_v36 = vpop.f32.mrf.mxu1  ;;  %v16003_v24 = vpop.f32.mrf.mxu0  ;;  %v21692_v48 = vld [vmem:[%s18190_s17 + $0xe0] sm:$0xff] }
 0x589   : > { %16354 = vmatmul.mubr.msk.f32.gmra.mxu0 %vm594_vm1, %v21530_v26  ;;  %8047 = vst [vmem:[#allocation2 + $0x11c] sm:$0xf] %v8015_v1  ;;  %7017 = vst [vmem:[#allocation2 + $0x15c] sm:$0xff] %v7009_v56  ;;  %v7011_v12 = vadd.f32 %v16003_v24, %v7003_v14  ;;  %v21702_v24 = vld [vmem:[%s18190_s17 + $0xe8] sm:$0xff] }
 0x58a   : > { %7327 = vst [vmem:[#allocation2 + $0x140] sm:$0xff] %v7315_v15  ;;  %16356 = vmatprep.mubr.msk.f32.mxu0 %vm594_vm1, %v21535_v43  ;;  %v7905_v63 = vpop.f32.mrf.mxu1  ;;  %v6835_v7 = vpop.f32.mrf.mxu0  ;;  %16645 = vmatmul.mubr.msk.f32.gmra.mxu1 %vm594_vm1, %v21687_v40  ;;  %v7004_v15 = vld [vmem:[#allocation2 + $0x17c] sm:$0xf] }
 0x58b   : > { %7019 = vst [vmem:[#allocation2 + $0x174] sm:$0xff] %v7011_v12  ;;  %16647 = vmatprep.mubr.msk.f32.mxu1 %vm594_vm1, %v21692_v48 }
 0x58c   : > { %v7304_v30 = vld [vmem:[#allocation2 + $0x148] sm:$0xff]  ;;  %v16312_v8 = vpop.f32.mrf.mxu1  ;;  %v16006_v44 = vpop.f32.mrf.mxu0 }
 0x58d   : > { %16357 = vmatmul.mubr.msk.f32.gmra.mxu0 %vm594_vm1, %v21550_v61  ;;  %v7316_v37 = vadd.f32 %v21071_v17, %v7304_v30  ;;  %v21707_v44 = vld [vmem:[%s18190_s17 + $0xf0] sm:$0xff] }
 0x58e   : > { %16359 = vmatprep.mubr.msk.f32.mxu0 %vm594_vm1, %v21555_v31  ;;  %v7985_v34 = vld [vmem:[#allocation2 + $0x134] sm:$0xf]  ;;  %v7915_v1 = vpop.f32.mrf.mxu1  ;;  %v6844_v56 = vpop.f32.mrf.mxu0  ;;  %16648 = vmatmul.mubr.msk.f32.gmra.mxu1 %vm594_vm1, %v21702_v24 }
 0x58f   : > { %v7984_v10 = vld [vmem:[#allocation2 + $0x12c] sm:$0xff]  ;;  %v8017_v14 = vadd.f32 %v16309_v36, %v7985_v34  ;;  %7328 = vst [vmem:[#allocation2 + $0x148] sm:$0xff] %v7316_v37  ;;  %v7012_v7 = vadd.f32 %v7004_v15, %v6844_v56  ;;  %16650 = vmatprep.mubr.msk.f32.mxu1 %vm594_vm1, %v21707_v44  ;;  %v21718_v56 = vld [vmem:[%s18190_s17 + $0xf8] sm:$0xff]  ;;  %v21724_v15 = vld [vmem:[%s18190_s17 + $0x100] sm:$0xff] }
 0x590   : > { %v8016_v12 = vadd.f32 %v7984_v10, %v7905_v63  ;;  %v7307_v17 = vld [vmem:[#allocation2 + $0x160] sm:$0xff]  ;;  %v16315_v30 = vpop.f32.mrf.mxu1  ;;  %v16009_v1 = vpop.f32.mrf.mxu0  ;;  %v7306_v31 = vld [vmem:[#allocation2 + $0x158] sm:$0xff] }
 0x591   : > { %16360 = vmatmul.mubr.msk.f32.gmra.mxu0 %vm594_vm1, %v21570_v13  ;;  %8049 = vst [vmem:[#allocation2 + $0x134] sm:$0xf] %v8017_v14  ;;  %v7319_v36 = vadd.f32 %v7307_v17, %v21101_v59  ;;  %7020 = vst [vmem:[#allocation2 + $0x17c] sm:$0xf] %v7012_v7  ;;  %v7318_v63 = vadd.f32 %v21083_v62, %v7306_v31 }
 0x592   : > { %8048 = vst [vmem:[#allocation2 + $0x12c] sm:$0xff] %v8016_v12  ;;  %16362 = vmatprep.mubr.msk.f32.mxu0 %vm594_vm1, %v21575_v18  ;;  %v7924_v37 = vpop.f32.mrf.mxu1  ;;  %v6853_v34 = vpop.f32.mrf.mxu0  ;;  %v7309_v10 = vld [vmem:[#allocation2 + $0x170] sm:$0xff]  ;;  %16651 = vmatmul.mubr.msk.f32.gmra.mxu1 %vm594_vm1, %v21718_v56 }
 0x593   : > { %7331 = vst [vmem:[#allocation2 + $0x160] sm:$0xff] %v7319_v36  ;;  %7330 = vst [vmem:[#allocation2 + $0x158] sm:$0xff] %v7318_v63  ;;  %v7321_v59 = vadd.f32 %v7309_v10, %v21113_v49  ;;  %16653 = vmatprep.mubr.msk.f32.mxu1 %vm594_vm1, %v21724_v15  ;;  %v21733_v49 = vld [vmem:[%s18190_s17 + $0x108] sm:$0xff]  ;;  %v21738_v36 = vld [vmem:[%s18190_s17 + $0x110] sm:$0xff] }
 0x594   : > { %v16318_v62 = vpop.f32.mrf.mxu1  ;;  %v16012_v31 = vpop.f32.mrf.mxu0 }
 0x595   : > { %16363 = vmatmul.mubr.msk.f32.gmra.mxu0 %vm594_vm1, %v21590_v53  ;;  %7333 = vst [vmem:[#allocation2 + $0x170] sm:$0xff] %v7321_v59 }
 0x596   : > { %16365 = vmatprep.mubr.msk.f32.mxu0 %vm594_vm1, %v21595_v11  ;;  %v7986_v14 = vld [vmem:[#allocation2 + $0x144] sm:$0xff]  ;;  %v7987_v12 = vld [vmem:[#allocation2 + $0x14c] sm:$0xf]  ;;  %v7933_v7 = vpop.f32.mrf.mxu1  ;;  %v6861_v17 = vpop.f32.mrf.mxu0  ;;  %16654 = vmatmul.mubr.msk.f32.gmra.mxu1 %vm594_vm1, %v21733_v49 }
 0x597   : > { %v8018_v30 = vadd.f32 %v16312_v8, %v7986_v14  ;;  %v8019_v1 = vadd.f32 %v7987_v12, %v7924_v37  ;;  %16656 = vmatprep.mubr.msk.f32.mxu1 %vm594_vm1, %v21738_v36 }
 0x598   : > { %v7310_v63 = vld [vmem:[#allocation2 + $0x178] sm:$0xff]  ;;  %v16321_v34 = vpop.f32.mrf.mxu1  ;;  %v16015_v10 = vpop.f32.mrf.mxu0 }
 0x599   : > { %16366 = vmatmul.mubr.msk.f32.gmra.mxu0 %vm594_vm1, %v21610_v52  ;;  %8050 = vst [vmem:[#allocation2 + $0x144] sm:$0xff] %v8018_v30  ;;  %8051 = vst [vmem:[#allocation2 + $0x14c] sm:$0xf] %v8019_v1  ;;  %v7322_v59 = vadd.f32 %v21103_v35, %v7310_v63 }
 0x59a   : > { %16368 = vmatprep.mubr.msk.f32.mxu0 %vm594_vm1, %v21615_v23  ;;  %v7989_v8 = vld [vmem:[#allocation2 + $0x164] sm:$0xf]  ;;  %v7988_v37 = vld [vmem:[#allocation2 + $0x15c] sm:$0xff]  ;;  %v7943_v31 = vpop.f32.mrf.mxu1  ;;  %v6869_v14 = vpop.f32.mrf.mxu0  ;;  %16657 = vmatmul.mubr.msk.f32.gmra.mxu1 %vm594_vm1, %v21237_v60 }
 0x59b   : > { %v8021_v12 = vadd.f32 %v16318_v62, %v7989_v8  ;;  %v8020_v17 = vadd.f32 %v7988_v37, %v7933_v7  ;;  %7334 = vst [vmem:[#allocation2 + $0x178] sm:$0xff] %v7322_v59  ;;  %16659 = vmatprep.mubr.msk.f32.mxu1 %vm594_vm1, %v21246_v27 }
 0x59c   : > { %v16324_v30 = vpop.f32.mrf.mxu1  ;;  %v16018_v1 = vpop.f32.mrf.mxu0 }
 0x59d   : > { %16369 = vmatmul.mubr.msk.f32.gmra.mxu0 %vm594_vm1, %v21628_v50  ;;  %8053 = vst [vmem:[#allocation2 + $0x164] sm:$0xf] %v8021_v12  ;;  %8052 = vst [vmem:[#allocation2 + $0x15c] sm:$0xff] %v8020_v17 }
 0x59e   : > { %16371 = vmatprep.mubr.msk.f32.mxu0 %vm594_vm1, %v21633_v33  ;;  %v7952_v35 = vpop.f32.mrf.mxu1  ;;  %v6877_v63 = vpop.f32.mrf.mxu0  ;;  %16660 = vmatmul.mubr.msk.f32.gmra.mxu1 %vm594_vm1, %v21259_v54 }
 0x59f   : > { %16662 = vmatprep.mubr.msk.f32.mxu1 %vm594_vm1, %v21268_v58 }
 0x5a0   : > { %v16431_v60 = vpop.f32.mrf.mxu1  ;;  %v16021_v27 = vpop.f32.mrf.mxu0 }
 0x5a1   : > { %16372 = vmatmul.mubr.msk.f32.gmra.mxu0 %vm594_vm1, %v21642_v46 }
 0x5a2   : > { %16374 = vmatprep.mubr.msk.f32.mxu0 %vm594_vm1, %v21647_v20  ;;  %v7990_v62 = vld [vmem:[#allocation2 + $0x174] sm:$0xff]  ;;  %v7991_v7 = vld [vmem:[#allocation2 + $0x17c] sm:$0xf]  ;;  %v8637_v10 = vpop.f32.mrf.mxu1  ;;  %v6885_v59 = vpop.f32.mrf.mxu0  ;;  %16663 = vmatmul.mubr.msk.f32.gmra.mxu1 %vm594_vm1, %v21281_v2 }
 0x5a3   : > { %v8022_v8 = vadd.f32 %v16321_v34, %v7990_v62  ;;  %v8023_v54 = vadd.f32 %v7991_v7, %v7952_v35  ;;  %16665 = vmatprep.mubr.msk.f32.mxu1 %vm594_vm1, %v21290_v0 }
 0x5a4   : > { %v16434_v58 = vpop.f32.mrf.mxu1  ;;  %v16024_v37 = vpop.f32.mrf.mxu0 }
 0x5a5   : > { %16375 = vmatmul.mubr.msk.f32.gmra.mxu0 %vm594_vm1, %v21656_v38  ;;  %8054 = vst [vmem:[#allocation2 + $0x174] sm:$0xff] %v8022_v8  ;;  %8055 = vst [vmem:[#allocation2 + $0x17c] sm:$0xf] %v8023_v54 }
 0x5a6   : > { %16377 = vmatprep.mubr.msk.f32.mxu0 %vm594_vm1, %v21661_v6  ;;  %v8645_v31 = vpop.f32.mrf.mxu1  ;;  %v6893_v14 = vpop.f32.mrf.mxu0  ;;  %16666 = vmatmul.mubr.msk.f32.gmra.mxu1 %vm594_vm1, %v21303_v39 }
 0x5a7   : > { %16668 = vmatprep.mubr.msk.f32.mxu1 %vm594_vm1, %v21312_v42 }
 0x5a8   : > { %v16437_v34 = vpop.f32.mrf.mxu1  ;;  %v16027_v12 = vpop.f32.mrf.mxu0 }
 0x5a9   : > { %16378 = vmatmul.mubr.msk.f32.gmra.mxu0 %vm594_vm1, %v21672_v16 }
 0x5aa   : > { %16380 = vmatprep.mubr.msk.f32.mxu0 %vm594_vm1, %v21678_v45  ;;  %v8653_v17 = vpop.f32.mrf.mxu1  ;;  %v6901_v30 = vpop.f32.mrf.mxu0  ;;  %16669 = vmatmul.mubr.msk.f32.gmra.mxu1 %vm594_vm1, %v21327_v28 }
 0x5ab   : > { %16671 = vmatprep.mubr.msk.f32.mxu1 %vm594_vm1, %v21336_v21  ;;  %v21808_v30 = vld [vmem:[%s18190_s17 + $0x118] sm:$0xff] }
 0x5ac   : > { %v16440_v1 = vpop.f32.mrf.mxu1  ;;  %v16030_v35 = vpop.f32.mrf.mxu0 }
 0x5ad   : > { %16381 = vmatmul.mubr.msk.f32.gmra.mxu0 %vm594_vm1, %v21687_v40  ;;  %v21813_v1 = vld [vmem:[%s18190_s17 + $0x120] sm:$0xff] }
 0x5ae   : > { %16383 = vmatprep.mubr.msk.f32.mxu0 %vm594_vm1, %v21692_v48  ;;  %v8661_v63 = vpop.f32.mrf.mxu1  ;;  %v6909_v60 = vpop.f32.mrf.mxu0  ;;  %16672 = vmatmul.mubr.msk.f32.gmra.mxu1 %vm594_vm1, %v21350_v55 }
 0x5af   : > { %16674 = vmatprep.mubr.msk.f32.mxu1 %vm594_vm1, %v21357_v9 }
 0x5b0   : > { %v16443_v27 = vpop.f32.mrf.mxu1  ;;  %v16033_v62 = vpop.f32.mrf.mxu0 }
 0x5b1   : > { %16384 = vmatmul.mubr.msk.f32.gmra.mxu0 %vm594_vm1, %v21702_v24  ;;  %v21818_v62 = vld [vmem:[%s18190_s17 + $0x128] sm:$0xff] }
 0x5b2   : > { %16386 = vmatprep.mubr.msk.f32.mxu0 %vm594_vm1, %v21707_v44  ;;  %v8669_v7 = vpop.f32.mrf.mxu1  ;;  %v6917_v10 = vpop.f32.mrf.mxu0  ;;  %16675 = vmatmul.mubr.msk.f32.gmra.mxu1 %vm594_vm1, %v21369_v4 }
 0x5b3   : > { %16797 = vmatprep.mubr.msk.f32.mxu1 %vm594_vm1, %v21381_v25  ;;  %v21823_v7 = vld [vmem:[%s18190_s17 + $0x130] sm:$0xff] }
 0x5b4   : > { %v16446_v59 = vpop.f32.mrf.mxu1  ;;  %v16036_v8 = vpop.f32.mrf.mxu0 }
 0x5b5   : > { %16387 = vmatmul.mubr.msk.f32.gmra.mxu0 %vm594_vm1, %v21718_v56 }
 0x5b6   : > { %16389 = vmatprep.mubr.msk.f32.mxu0 %vm594_vm1, %v21724_v15  ;;  %v8677_v54 = vpop.f32.mrf.mxu1  ;;  %v6925_v58 = vpop.f32.mrf.mxu0 }
 0x5b8   : > { %v16449_v37 = vpop.f32.mrf.mxu1  ;;  %v16039_v31 = vpop.f32.mrf.mxu0 }
 0x5b9   : > { %16390 = vmatmul.mubr.msk.f32.gmra.mxu0 %vm594_vm1, %v21733_v49 }
 0x5ba   : > { %16392 = vmatprep.mubr.msk.f32.mxu0 %vm594_vm1, %v21738_v36  ;;  %v8685_v14 = vpop.f32.mrf.mxu1  ;;  %v6933_v34 = vpop.f32.mrf.mxu0 }
 0x5bc   : > { %v16452_v12 = vpop.f32.mrf.mxu1  ;;  %v16042_v17 = vpop.f32.mrf.mxu0 }
 0x5bd   : > { %16393 = vmatmul.mubr.msk.f32.gmra.mxu0 %vm594_vm1, %v21808_v30 }
 0x5be   : > { %16395 = vmatprep.mubr.msk.f32.mxu0 %vm594_vm1, %v21813_v1  ;;  %v8693_v35 = vpop.f32.mrf.mxu1  ;;  %v6941_v63 = vpop.f32.mrf.mxu0 }
 0x5c0   : > { %v16455_v60 = vpop.f32.mrf.mxu1  ;;  %v16045_v27 = vpop.f32.mrf.mxu0 }
 0x5c1   : > { %16396 = vmatmul.mubr.msk.f32.gmra.mxu0 %vm594_vm1, %v21818_v62 }
 0x5c2   : > { %16398 = vmatprep.mubr.msk.f32.mxu0 %vm594_vm1, %v21823_v7  ;;  %v8701_v10 = vpop.f32.mrf.mxu1  ;;  %v6949_v59 = vpop.f32.mrf.mxu0 }
 0x5c4   : > { %v16458_v8 = vpop.f32.mrf.mxu1  ;;  %v16048_v54 = vpop.f32.mrf.mxu0 }
 0x5c5   : > { %16399 = vmatmul.mubr.msk.f32.gmra.mxu0 %vm594_vm1, %v21281_v2 }
 0x5c6   : > { %16401 = vmatprep.mubr.msk.f32.mxu0 %vm594_vm1, %v21290_v0  ;;  %v8709_v58 = vpop.f32.mrf.mxu1  ;;  %v6957_v37 = vpop.f32.mrf.mxu0 }
 0x5c8   : > { %v16461_v31 = vpop.f32.mrf.mxu1  ;;  %v16051_v14 = vpop.f32.mrf.mxu0 }
 0x5c9   : > { %16402 = vmatmul.mubr.msk.f32.gmra.mxu0 %vm594_vm1, %v21303_v39 }
 0x5ca   : > { %16404 = vmatprep.mubr.msk.f32.mxu0 %vm594_vm1, %v21312_v42  ;;  %v8717_v34 = vpop.f32.mrf.mxu1  ;;  %v6965_v12 = vpop.f32.mrf.mxu0 }
 0x5cc   : > { %v16464_v17 = vpop.f32.mrf.mxu1  ;;  %v16054_v35 = vpop.f32.mrf.mxu0 }
 0x5cd   : > { %16405 = vmatmul.mubr.msk.f32.gmra.mxu0 %vm594_vm1, %v21327_v28 }
 0x5ce   : > { %16407 = vmatprep.mubr.msk.f32.mxu0 %vm594_vm1, %v21336_v21  ;;  %v8725_v2 = vpop.f32.mrf.mxu1  ;;  %v6973_v0 = vpop.f32.mrf.mxu0 }
 0x5d0   : > { %v16467_v63 = vpop.f32.mrf.mxu1  ;;  %v16057_v60 = vpop.f32.mrf.mxu0 }
 0x5d1   : > { %16408 = vmatmul.mubr.msk.f32.gmra.mxu0 %vm594_vm1, %v21350_v55 }
 0x5d2   : > { %16410 = vmatprep.mubr.msk.f32.mxu0 %vm594_vm1, %v21357_v9  ;;  %v8733_v39 = vpop.f32.mrf.mxu1  ;;  %v6981_v42 = vpop.f32.mrf.mxu0 }
 0x5d3   : > { %v7960_v42 = vld [vmem:[#allocation2 + $0xc] sm:$0xff] }
 0x5d4   : > { %v16470_v27 = vpop.f32.mrf.mxu1  ;;  %v16060_v10 = vpop.f32.mrf.mxu0 }
 0x5d5   : > { %16411 = vmatmul.mubr.msk.f32.gmra.mxu0 %vm594_vm1, %v21369_v4  ;;  %v8837_v10 = vld [vmem:[#allocation2 + $0x14] sm:$0xf] }
 0x5d6   : > { %16517 = vmatprep.mubr.msk.f32.mxu0 %vm594_vm1, %v21381_v25  ;;  %v8741_v28 = vpop.f32.mrf.mxu1  ;;  %v6989_v21 = vpop.f32.mrf.mxu0 }
 0x5d7   : > { %v7992_v21 = vadd.f32 %v7960_v42, %v21395_v22 }
 0x5d8   : > { %v16473_v59 = vpop.f32.mrf.mxu1  ;;  %v16167_v8 = vpop.f32.mrf.mxu0 }
 0x5d9   : > { %16518 = vmatmul.mubr.msk.f32.vlgmr.msra.gmra.mxu0 %vm594_vm1, %v21450_v29  ;;  %v7626_v37 = vrot.slane %v16167_v8, 4  ;;  %v7610_v29 = vld [vmem:[#allocation2 + $0x128] sm:$0xf] }
 0x5da   : > { %16520 = vmatprep.mubr.msk.f32.mxu0 %vm594_vm1, %v21455_v3  ;;  %v8749_v55 = vpop.f32.mrf.mxu1  ;;  %v7410_v9 = vpop.f32.mrf.mxu0 }
 0x5dc   : > { %v16476_v54 = vpop.f32.mrf.mxu1  ;;  %v16170_v58 = vpop.f32.mrf.mxu0 }
 0x5dd   : > { %16521 = vmatmul.mubr.msk.f32.gmra.mxu0 %vm594_vm1, %v21470_v57 }
 0x5de   : > { %16523 = vmatprep.mubr.msk.f32.mxu0 %vm594_vm1, %v21475_v19  ;;  %v8757_v4 = vpop.f32.mrf.mxu1  ;;  %v7419_v25 = vpop.f32.mrf.mxu0  ;;  %v7612_v19 = vld [vmem:[#allocation2 + $0x140] sm:$0xf] }
 0x5df   : > { %v7627_v31 = vrot.slane %v7419_v25, 4  ;;  %v7614_v25 = vld [vmem:[#allocation2 + $0x158] sm:$0xf] }
 0x5e0   : > { %v16479_v14 = vpop.f32.mrf.mxu1  ;;  %v16173_v34 = vpop.f32.mrf.mxu0 }
 0x5e1   : > { %16524 = vmatmul.mubr.msk.f32.gmra.mxu0 %vm594_vm1, %v21490_v32  ;;  %v21858_v3 = vsel %vm7625_vm3, %v7626_v37, %v7627_v31  ;;  %v7647_v12 = vadd.f32 %v7627_v31, %v7610_v29  ;;  %v7630_v17 = vrot.slane %v16173_v34, 4  ;;  %v23453_v14 = vld [vmem:[#allocation64_spill] sm:$0xff]  ;;  %v7616_v29 = vld [vmem:[#allocation2 + $0x170] sm:$0xf] }
 0x5e2   : > { %16526 = vmatprep.mubr.msk.f32.mxu0 %vm594_vm1, %v21495_v41  ;;  %v8765_v57 = vpop.f32.mrf.mxu1  ;;  %v7428_v35 = vpop.f32.mrf.mxu0 }
 0x5e3   : > { %7655 = vst [vmem:[#allocation2 + $0x128] sm:$0xf] %v7647_v12  ;;  %v7649_v2 = vadd.f32 %v7630_v17, %v7612_v19  ;;  %v7629_v0 = vrot.slane %v7428_v35, 4 }
 0x5e4   : > { %v16482_v63 = vpop.f32.mrf.mxu1  ;;  %v16176_v60 = vpop.f32.mrf.mxu0 }
 0x5e5   : > { %16527 = vmatmul.mubr.msk.f32.gmra.mxu0 %vm594_vm1, %v21510_v51  ;;  %7657 = vst [vmem:[#allocation2 + $0x140] sm:$0xf] %v7649_v2  ;;  %v21865_v32 = vsel %vm7625_vm3, %v7629_v0, %v7630_v17  ;;  %v7962_v51 = vld [vmem:[#allocation2 + $0x24] sm:$0xff]  ;;  %v7632_v9 = vrot.slane %v16176_v60, 4  ;;  %v8839_v2 = vld [vmem:[#allocation2 + $0x2c] sm:$0xf] }
 0x5e6   : > { %16529 = vmatprep.mubr.msk.f32.mxu0 %vm594_vm1, %v21515_v5  ;;  %v8773_v39 = vpop.f32.mrf.mxu1  ;;  %v7438_v41 = vpop.f32.mrf.mxu0  ;;  %v7994_v5 = vadd.f32 %v21400_v47, %v7962_v51  ;;  %v10125_v51 = vld [vmem:[#allocation12 + $0x138] sm:$0xff] }
 0x5e7   : > { %v8841_v39 = vld [vmem:[#allocation2 + $0x44] sm:$0xf]  ;;  %16781 = vmatprep.subr.mxu1 %v10125_v51 }
 0x5e8   : > { %v16485_v27 = vpop.f32.mrf.mxu1  ;;  %v16179_v28 = vpop.f32.mrf.mxu0  ;;  %16782 = vmatpush3.msra.mxu1 %v10125_v51  ;;  %v21956_v51 = vld [vmem:[%s18190_s17 + $0x38] sm:$0xff] }
 0x5e9   : > { %16530 = vmatmul.mubr.msk.f32.gmra.mxu0 %vm594_vm1, %v21530_v26  ;;  %v8845_v59 = vadd.f32 %v16485_v27, %v8837_v10  ;;  %v8840_v27 = vld [vmem:[#allocation2 + $0x3c] sm:$0xff] }
 0x5ea   : > { %16532 = vmatprep.mubr.msk.f32.mxu0 %vm594_vm1, %v21535_v43  ;;  %v8781_v8 = vpop.f32.mrf.mxu1  ;;  %v7447_v55 = vpop.f32.mrf.mxu0 }
 0x5eb   : > { %8853 = vst [vmem:[#allocation2 + $0x14] sm:$0xf] %v8845_v59  ;;  %v8844_v54 = vadd.f32 %v8781_v8, %v7992_v21  ;;  %v7633_v58 = vrot.slane %v7447_v55, 4  ;;  %v8842_v21 = vld [vmem:[#allocation2 + $0x54] sm:$0xff] }
 0x5ec   : > { %v16488_v4 = vpop.f32.mrf.mxu1  ;;  %v16182_v37 = vpop.f32.mrf.mxu0  ;;  %v10124_v8 = vld [vmem:[#allocation12 + $0x130] sm:$0xff] }
 0x5ed   : > { %16533 = vmatmul.mubr.msk.f32.gmra.mxu0 %vm594_vm1, %v21550_v61  ;;  %8852 = vst [vmem:[#allocation2 + $0xc] sm:$0xff] %v8844_v54  ;;  %v8846_v22 = vadd.f32 %v16488_v4, %v7994_v5  ;;  %v21878_v26 = vsel %vm7625_vm3, %v7632_v9, %v7633_v58  ;;  %v7651_v43 = vadd.f32 %v7633_v58, %v7614_v25  ;;  %v7636_v31 = vrot.slane %v16182_v37, 4  ;;  %v10123_v54 = vld [vmem:[#allocation12 + $0x128] sm:$0xff]  ;;  %v8843_v37 = vld [vmem:[#allocation2 + $0x5c] sm:$0xf] }
 0x5ee   : > { %16535 = vmatprep.mubr.msk.f32.mxu0 %vm594_vm1, %v23453_v14  ;;  %v8791_v47 = vpop.f32.mrf.mxu1  ;;  %v7456_v34 = vpop.f32.mrf.mxu0  ;;  %16783 = vmatprep.subr.mxu1 %v10124_v8  ;;  %v10122_v14 = vld [vmem:[#allocation12 + $0x120] sm:$0xff] }
 0x5ef   : > { %8854 = vst [vmem:[#allocation2 + $0x24] sm:$0xff] %v8846_v22  ;;  %7659 = vst [vmem:[#allocation2 + $0x158] sm:$0xf] %v7651_v43  ;;  %v7653_v12 = vadd.f32 %v7636_v31, %v7616_v29  ;;  %v7635_v17 = vrot.slane %v7456_v34, 4  ;;  %16784 = vmatpush3.msra.mxu1 %v10124_v8  ;;  %v10121_v47 = vld [vmem:[#allocation12 + $0x118] sm:$0xff] }
 0x5f0   : > { %v16491_v57 = vpop.f32.mrf.mxu1  ;;  %v16185_v19 = vpop.f32.mrf.mxu0  ;;  %16785 = vmatprep.subr.mxu1 %v10123_v54 }
 0x5f1   : > { %16536 = vmatmul.mubr.msk.f32.gmra.mxu0 %vm594_vm1, %v21570_v13  ;;  %7661 = vst [vmem:[#allocation2 + $0x170] sm:$0xf] %v7653_v12  ;;  %v21885_v61 = vsel %vm7625_vm3, %v7635_v17, %v7636_v31  ;;  %16786 = vmatpush3.msra.mxu1 %v10123_v54  ;;  %v10120_v12 = vld [vmem:[#allocation12 + $0x110] sm:$0xff]  ;;  %v10119_v17 = vld [vmem:[#allocation12 + $0x108] sm:$0xff]  ;;  %v10118_v19 = vld [vmem:[#allocation12 + $0x100] sm:$0xff] }
 0x5f2   : > { %16538 = vmatprep.mubr.msk.f32.mxu0 %vm594_vm1, %v21575_v18  ;;  %v8800_v35 = vpop.f32.mrf.mxu1  ;;  %v7466_v0 = vpop.f32.mrf.mxu0  ;;  %16787 = vmatprep.subr.mxu1 %v10122_v14 }
 0x5f3   : > { %v8847_v63 = vadd.f32 %v8839_v2, %v8800_v35  ;;  %16788 = vmatpush3.msra.mxu1 %v10122_v14  ;;  %v21914_v0 = vld [vmem:[%s18190_s17 + $0x8] sm:$0xff]  ;;  %v21984_v14 = vld [vmem:[%s18190_s17 + $0x58] sm:$0xff] }
 0x5f4   : > { %v16494_v60 = vpop.f32.mrf.mxu1  ;;  %v16188_v41 = vpop.f32.mrf.mxu0  ;;  %16789 = vmatprep.subr.mxu1 %v10121_v47 }
 0x5f5   : > { %16539 = vmatmul.mubr.msk.f32.gmra.mxu0 %vm594_vm1, %v21590_v53  ;;  %8855 = vst [vmem:[#allocation2 + $0x2c] sm:$0xf] %v8847_v63  ;;  %v8849_v42 = vadd.f32 %v16494_v60, %v8841_v39  ;;  %16790 = vmatpush3.msra.mxu1 %v10121_v47  ;;  %v21921_v60 = vld [vmem:[%s18190_s17 + $0x10] sm:$0xff]  ;;  %v21928_v41 = vld [vmem:[%s18190_s17 + $0x18] sm:$0xff] }
 0x5f6   : > { %16541 = vmatprep.mubr.msk.f32.mxu0 %vm594_vm1, %v21595_v11  ;;  %v8809_v13 = vpop.f32.mrf.mxu1  ;;  %v7474_v10 = vpop.f32.mrf.mxu0  ;;  %16791 = vmatprep.subr.mxu1 %v10120_v12 }
 0x5f7   : > { %8857 = vst [vmem:[#allocation2 + $0x44] sm:$0xf] %v8849_v42  ;;  %v8848_v18 = vadd.f32 %v8840_v27, %v8809_v13  ;;  %16792 = vmatpush3.msra.mxu1 %v10120_v12  ;;  %v21935_v13 = vld [vmem:[%s18190_s17 + $0x20] sm:$0xff]  ;;  %v21942_v10 = vld [vmem:[%s18190_s17 + $0x28] sm:$0xff] }
 0x5f8   : > { %v16497_v28 = vpop.f32.mrf.mxu1  ;;  %v16191_v59 = vpop.f32.mrf.mxu0  ;;  %16793 = vmatprep.subr.mxu1 %v10119_v17 }
 0x5f9   : > { %16542 = vmatmul.mubr.msk.f32.gmra.mxu0 %vm594_vm1, %v21610_v52  ;;  %8856 = vst [vmem:[#allocation2 + $0x3c] sm:$0xff] %v8848_v18  ;;  %v8850_v55 = vadd.f32 %v16497_v28, %v8842_v21  ;;  %16794 = vmatpush3.msra.mxu1 %v10119_v17  ;;  %v21949_v28 = vld [vmem:[%s18190_s17 + $0x30] sm:$0xff] }
 0x5fa   : > { %16544 = vmatprep.mubr.msk.f32.mxu0 %vm594_vm1, %v21615_v23  ;;  %v8819_v5 = vpop.f32.mrf.mxu1  ;;  %v7482_v9 = vpop.f32.mrf.mxu0  ;;  %16795 = vmatprep.subr.mxu1 %v10118_v19 }
 0x5fb   : > { %8858 = vst [vmem:[#allocation2 + $0x54] sm:$0xff] %v8850_v55  ;;  %16796 = vmatpush3.msra.mxu1 %v10118_v19  ;;  %v21963_v5 = vld [vmem:[%s18190_s17 + $0x40] sm:$0xff]  ;;  %v21998_v19 = vld [vmem:[%s18190_s17 + $0x68] sm:$0xff] }
 0x5fc   : > { %v16500_v58 = vpop.f32.mrf.mxu1  ;;  %v16194_v4 = vpop.f32.mrf.mxu0  ;;  %16798 = vmatmul.mubr.msk.f32.vlgmr.msra.gmra.mxu1 %vm594_vm1, %v21914_v0 }
 0x5fd   : > { %16545 = vmatmul.mubr.msk.f32.gmra.mxu0 %vm594_vm1, %v21628_v50  ;;  %16800 = vmatprep.mubr.msk.f32.mxu1 %vm594_vm1, %v21921_v60  ;;  %v21970_v58 = vld [vmem:[%s18190_s17 + $0x48] sm:$0xff] }
 0x5fe   : > { %16547 = vmatprep.mubr.msk.f32.mxu0 %vm594_vm1, %v21633_v33  ;;  %v8828_v25 = vpop.f32.mrf.mxu1  ;;  %v7490_v22 = vpop.f32.mrf.mxu0 }
 0x5ff   : > { %v8851_v43 = vadd.f32 %v8843_v37, %v8828_v25  ;;  %v21977_v37 = vld [vmem:[%s18190_s17 + $0x50] sm:$0xff]  ;;  %v9715_v22 = vld [vmem:[#allocation15 + $0x178] sm:$0xff] }
 0x600   : > { %v16197_v31 = vpop.f32.mrf.mxu0  ;;  %16801 = vmatmul.mubr.msk.f32.gmra.mxu1 %vm594_vm1, %v21928_v41  ;;  %16677 = vmatprep.subr.mxu0 %v9715_v22 }
 0x601   : > { %16548 = vmatmul.mubr.msk.f32.gmra.mxu0 %vm594_vm1, %v21642_v46  ;;  %8859 = vst [vmem:[#allocation2 + $0x5c] sm:$0xf] %v8851_v43  ;;  %16803 = vmatprep.mubr.msk.f32.mxu1 %vm594_vm1, %v21935_v13 }
 0x602   : > { %16550 = vmatprep.mubr.msk.f32.mxu0 %vm594_vm1, %v21647_v20  ;;  %v7498_v29 = vpop.f32.mrf.mxu0  ;;  %16678 = vmatpush3.msra.mxu0 %v9715_v22  ;;  %v22034_v22 = vld [vmem:[%s18190_s17 + $0x158] sm:$0xff] }
 0x604   : > { %v16200_v34 = vpop.f32.mrf.mxu0  ;;  %16804 = vmatmul.mubr.msk.f32.gmra.mxu1 %vm594_vm1, %v21942_v10 }
 0x605   : > { %16551 = vmatmul.mubr.msk.f32.gmra.mxu0 %vm594_vm1, %v21656_v38  ;;  %16806 = vmatprep.mubr.msk.f32.mxu1 %vm594_vm1, %v21949_v28  ;;  %v21991_v34 = vld [vmem:[%s18190_s17 + $0x60] sm:$0xff] }
 0x606   : > { %16553 = vmatprep.mubr.msk.f32.mxu0 %vm594_vm1, %v21661_v6  ;;  %v7506_v57 = vpop.f32.mrf.mxu0 }
 0x607   : > { %v9714_v57 = vld [vmem:[#allocation15 + $0x170] sm:$0xff] }
 0x608   : > { %v16203_v35 = vpop.f32.mrf.mxu0  ;;  %16807 = vmatmul.mubr.msk.f32.gmra.mxu1 %vm594_vm1, %v21956_v51  ;;  %16679 = vmatprep.subr.mxu0 %v9714_v57 }
 0x609   : > { %16554 = vmatmul.mubr.msk.f32.gmra.mxu0 %vm594_vm1, %v21672_v16  ;;  %16809 = vmatprep.mubr.msk.f32.mxu1 %vm594_vm1, %v21963_v5 }
 0x60a   : > { %16556 = vmatprep.mubr.msk.f32.mxu0 %vm594_vm1, %v21678_v45  ;;  %v7514_v2 = vpop.f32.mrf.mxu0  ;;  %16680 = vmatpush3.msra.mxu0 %v9714_v57 }
 0x60c   : > { %v16206_v63 = vpop.f32.mrf.mxu0  ;;  %16810 = vmatmul.mubr.msk.f32.gmra.mxu1 %vm594_vm1, %v21970_v58 }
 0x60d   : > { %16557 = vmatmul.mubr.msk.f32.gmra.mxu0 %vm594_vm1, %v21687_v40  ;;  %16812 = vmatprep.mubr.msk.f32.mxu1 %vm594_vm1, %v21977_v37  ;;  %v22003_v63 = vld [vmem:[%s18190_s17 + $0x138] sm:$0xff] }
 0x60e   : > { %16559 = vmatprep.mubr.msk.f32.mxu0 %vm594_vm1, %v21692_v48  ;;  %v7522_v39 = vpop.f32.mrf.mxu0 }
 0x60f   : > { %v22008_v39 = vld [vmem:[%s18190_s17 + $0x70] sm:$0xff] }
 0x610   : > { %v16209_v42 = vpop.f32.mrf.mxu0  ;;  %16813 = vmatmul.mubr.msk.f32.gmra.mxu1 %vm594_vm1, %v21984_v14 }
 0x611   : > { %16560 = vmatmul.mubr.msk.f32.gmra.mxu0 %vm594_vm1, %v21702_v24  ;;  %16815 = vmatprep.mubr.msk.f32.mxu1 %vm594_vm1, %v21991_v34  ;;  %v22013_v42 = vld [vmem:[%s18190_s17 + $0x140] sm:$0xff] }
 0x612   : > { %16562 = vmatprep.mubr.msk.f32.mxu0 %vm594_vm1, %v21707_v44  ;;  %v7530_v27 = vpop.f32.mrf.mxu0  ;;  %v16607_v21 = vpop.f32.mrf.mxu1 }
 0x614   : > { %v16212_v18 = vpop.f32.mrf.mxu0  ;;  %v9249_v8 = vpop.f32.mrf.mxu1  ;;  %16816 = vmatmul.mubr.msk.f32.gmra.mxu1 %vm594_vm1, %v21998_v19 }
 0x615   : > { %16563 = vmatmul.mubr.msk.f32.gmra.mxu0 %vm594_vm1, %v21718_v56  ;;  %16818 = vmatprep.mubr.msk.f32.mxu1 %vm594_vm1, %v22008_v39  ;;  %v22020_v8 = vld [vmem:[%s18190_s17 + $0x148] sm:$0xff] }
 0x616   : > { %16565 = vmatprep.mubr.msk.f32.mxu0 %vm594_vm1, %v21724_v15  ;;  %v7538_v59 = vpop.f32.mrf.mxu0  ;;  %v16610_v9 = vpop.f32.mrf.mxu1 }
 0x617   : > { %v22027_v9 = vld [vmem:[%s18190_s17 + $0x150] sm:$0xff] }
 0x618   : > { %v16215_v55 = vpop.f32.mrf.mxu0  ;;  %v9257_v4 = vpop.f32.mrf.mxu1  ;;  %16819 = vmatmul.mubr.msk.f32.gmra.mxu1 %vm594_vm1, %v21590_v53 }
 0x619   : > { %16566 = vmatmul.mubr.msk.f32.gmra.mxu0 %vm594_vm1, %v21733_v49  ;;  %16821 = vmatprep.mubr.msk.f32.mxu1 %vm594_vm1, %v21595_v11  ;;  %v9713_v55 = vld [vmem:[#allocation15 + $0x168] sm:$0xff]  ;;  %v22041_v11 = vld [vmem:[%s18190_s17 + $0x160] sm:$0xff] }
 0x61a   : > { %16568 = vmatprep.mubr.msk.f32.mxu0 %vm594_vm1, %v21738_v36  ;;  %v7546_v54 = vpop.f32.mrf.mxu0  ;;  %16681 = vmatprep.subr.mxu0 %v9713_v55 }
 0x61b   : > { %16682 = vmatpush3.msra.mxu0 %v9713_v55 }
 0x61c   : > { %v16218_v25 = vpop.f32.mrf.mxu0  ;;  %v16613_v43 = vpop.f32.mrf.mxu1  ;;  %16822 = vmatmul.mubr.msk.f32.gmra.mxu1 %vm594_vm1, %v21610_v52 }
 0x61d   : > { %16569 = vmatmul.mubr.msk.f32.gmra.mxu0 %vm594_vm1, %v21808_v30  ;;  %16824 = vmatprep.mubr.msk.f32.mxu1 %vm594_vm1, %v21615_v23  ;;  %v22055_v23 = vld [vmem:[%s18190_s17 + $0x170] sm:$0xff] }
 0x61e   : > { %16571 = vmatprep.mubr.msk.f32.mxu0 %vm594_vm1, %v21813_v1  ;;  %v7554_v31 = vpop.f32.mrf.mxu0  ;;  %v9265_v47 = vpop.f32.mrf.mxu1 }
 0x61f   : > { %v9712_v47 = vld [vmem:[#allocation15 + $0x160] sm:$0xff] }
 0x620   : > { %v16221_v29 = vpop.f32.mrf.mxu0  ;;  %v16616_v12 = vpop.f32.mrf.mxu1  ;;  %16825 = vmatmul.mubr.msk.f32.gmra.mxu1 %vm594_vm1, %v21628_v50  ;;  %16683 = vmatprep.subr.mxu0 %v9712_v47 }
 0x621   : > { %16572 = vmatmul.mubr.msk.f32.gmra.mxu0 %vm594_vm1, %v21818_v62  ;;  %v22048_v12 = vld [vmem:[%s18190_s17 + $0x168] sm:$0xff]  ;;  %16827 = vmatprep.mubr.msk.f32.mxu1 %vm594_vm1, %v21633_v33  ;;  %v9711_v33 = vld [vmem:[#allocation15 + $0x158] sm:$0xff] }
 0x622   : > { %16574 = vmatprep.mubr.msk.f32.mxu0 %vm594_vm1, %v21823_v7  ;;  %v7562_v17 = vpop.f32.mrf.mxu0  ;;  %v9273_v35 = vpop.f32.mrf.mxu1  ;;  %16684 = vmatpush3.msra.mxu0 %v9712_v47  ;;  %v9709_v47 = vld [vmem:[#allocation15 + $0x148] sm:$0xff] }
 0x623   : > { %16685 = vmatprep.subr.mxu0 %v9711_v33 }
 0x624   : > { %v16224_v2 = vpop.f32.mrf.mxu0  ;;  %v16619_v27 = vpop.f32.mrf.mxu1  ;;  %16828 = vmatmul.mubr.msk.f32.gmra.mxu1 %vm594_vm1, %v21642_v46  ;;  %16686 = vmatpush3.msra.mxu0 %v9711_v33 }
 0x625   : > { %16575 = vmatmul.mubr.msk.f32.gmra.mxu0 %vm594_vm1, %v22003_v63  ;;  %v22062_v2 = vld [vmem:[%s18190_s17 + $0x178] sm:$0xff]  ;;  %16830 = vmatprep.mubr.msk.f32.mxu1 %vm594_vm1, %v21647_v20 }
 0x626   : > { %16577 = vmatprep.mubr.msk.f32.mxu0 %vm594_vm1, %v22013_v42  ;;  %v7570_v18 = vpop.f32.mrf.mxu0  ;;  %v9281_v21 = vpop.f32.mrf.mxu1 }
 0x628   : > { %v16227_v59 = vpop.f32.mrf.mxu0  ;;  %v16622_v53 = vpop.f32.mrf.mxu1  ;;  %16831 = vmatmul.mubr.msk.f32.gmra.mxu1 %vm594_vm1, %v21656_v38 }
 0x629   : > { %16578 = vmatmul.mubr.msk.f32.gmra.mxu0 %vm594_vm1, %v22020_v8  ;;  %16833 = vmatprep.mubr.msk.f32.mxu1 %vm594_vm1, %v21661_v6  ;;  %v9710_v53 = vld [vmem:[#allocation15 + $0x150] sm:$0xff]  ;;  %v8355_v6 = vld [vmem:[#allocation2 + $0x8] sm:$0xf] }
 0x62a   : > { %16580 = vmatprep.mubr.msk.f32.mxu0 %vm594_vm1, %v22027_v9  ;;  %v7578_v54 = vpop.f32.mrf.mxu0  ;;  %v9289_v4 = vpop.f32.mrf.mxu1  ;;  %16687 = vmatprep.subr.mxu0 %v9710_v53 }
 0x62b   : > { %16688 = vmatpush3.msra.mxu0 %v9710_v53 }
 0x62c   : > { %v16230_v25 = vpop.f32.mrf.mxu0  ;;  %v16625_v43 = vpop.f32.mrf.mxu1  ;;  %16834 = vmatmul.mubr.msk.f32.gmra.mxu1 %vm594_vm1, %v21672_v16  ;;  %16689 = vmatprep.subr.mxu0 %v9709_v47 }
 0x62d   : > { %16581 = vmatmul.mubr.msk.f32.gmra.mxu0 %vm594_vm1, %v22034_v22  ;;  %16836 = vmatprep.mubr.msk.f32.mxu1 %vm594_vm1, %v21678_v45 }
 0x62e   : > { %16583 = vmatprep.mubr.msk.f32.mxu0 %vm594_vm1, %v22041_v11  ;;  %v7586_v31 = vpop.f32.mrf.mxu0  ;;  %v9297_v52 = vpop.f32.mrf.mxu1  ;;  %16690 = vmatpush3.msra.mxu0 %v9709_v47 }
 0x630   : > { %v16233_v29 = vpop.f32.mrf.mxu0  ;;  %v16628_v17 = vpop.f32.mrf.mxu1  ;;  %16837 = vmatmul.mubr.msk.f32.gmra.mxu1 %vm594_vm1, %v21687_v40 }
 0x631   : > { %16584 = vmatmul.mubr.msk.f32.gmra.mxu0 %vm594_vm1, %v22048_v12  ;;  %16839 = vmatprep.mubr.msk.f32.mxu1 %vm594_vm1, %v21692_v48  ;;  %v8357_v17 = vld [vmem:[#allocation2 + $0x20] sm:$0xf] }
 0x632   : > { %16586 = vmatprep.mubr.msk.f32.mxu0 %vm594_vm1, %v22055_v23  ;;  %v7594_v57 = vpop.f32.mrf.mxu0  ;;  %v9305_v50 = vpop.f32.mrf.mxu1 }
 0x634   : > { %v16236_v35 = vpop.f32.mrf.mxu0  ;;  %v16631_v27 = vpop.f32.mrf.mxu1  ;;  %16840 = vmatmul.mubr.msk.f32.gmra.mxu1 %vm594_vm1, %v21702_v24 }
 0x635   : > { %16587 = vmatmul.mubr.msk.f32.gmra.mxu0 %vm594_vm1, %v22062_v2  ;;  %16842 = vmatprep.mubr.msk.f32.mxu1 %vm594_vm1, %v21707_v44  ;;  %v8359_v44 = vld [vmem:[#allocation2 + $0x38] sm:$0xf] }
 0x636   : > { %v7602_v18 = vpop.f32.mrf.mxu0  ;;  %v9313_v21 = vpop.f32.mrf.mxu1 }
 0x637   : > { %v9708_v18 = vld [vmem:[#allocation15 + $0x140] sm:$0xff] }
 0x638   : > { %v16343_v46 = vpop.f32.mrf.mxu0  ;;  %v16634_v55 = vpop.f32.mrf.mxu1  ;;  %16843 = vmatmul.mubr.msk.f32.gmra.mxu1 %vm594_vm1, %v21718_v56  ;;  %16691 = vmatprep.subr.mxu0 %v9708_v18 }
 0x639   : > { %v8418_v25 = vrot.slane %v16343_v46, 4  ;;  %16845 = vmatprep.mubr.msk.f32.mxu1 %vm594_vm1, %v21724_v15  ;;  %16692 = vmatpush3.msra.mxu0 %v9708_v18 }
 0x63a   : > { %v8131_v59 = vpop.f32.mrf.mxu0  ;;  %v9321_v54 = vpop.f32.mrf.mxu1 }
 0x63b   : > { %v9707_v54 = vld [vmem:[#allocation15 + $0x138] sm:$0xff] }
 0x63c   : > { %v16346_v20 = vpop.f32.mrf.mxu0  ;;  %16846 = vmatmul.mubr.msk.f32.gmra.mxu1 %vm594_vm1, %v21733_v49  ;;  %16693 = vmatprep.subr.mxu0 %v9707_v54 }
 0x63d   : > { %16848 = vmatprep.mubr.msk.f32.mxu1 %vm594_vm1, %v21738_v36  ;;  %16694 = vmatpush3.msra.mxu0 %v9707_v54 }
 0x63e   : > { %v8140_v4 = vpop.f32.mrf.mxu0  ;;  %v16637_v38 = vpop.f32.mrf.mxu1 }
 0x63f   : > { %v8419_v43 = vrot.slane %v8140_v4, 4 }
 0x640   : > { %v22078_v31 = vpop.f32.mrf.mxu0  ;;  %v9329_v16 = vpop.f32.mrf.mxu1  ;;  %16849 = vmatmul.mubr.msk.f32.gmra.mxu1 %vm594_vm1, %v21808_v30  ;;  %v10817_v30 = vld [vmem:[#allocation12 + $0x178] sm:$0xff] }
 0x641   : > { %v22083_v52 = vsel %vm7625_vm3, %v8418_v25, %v8419_v43  ;;  %v8499_v45 = vadd.f32 %v8419_v43, %v8355_v6  ;;  %v8422_v29 = vrot.slane %v22078_v31, 4  ;;  %v8361_v25 = vld [vmem:[#allocation2 + $0x50] sm:$0xf]  ;;  %16851 = vmatprep.mubr.msk.f32.mxu1 %vm594_vm1, %v21813_v1  ;;  %16957 = vmatprep.subr.mxu1 %v10817_v30 }
 0x642   : > { %v22086_v57 = vpop.f32.mrf.mxu0  ;;  %v16640_v40 = vpop.f32.mrf.mxu1  ;;  %16958 = vmatpush3.msra.mxu1 %v10817_v30 }
 0x643   : > { %8531 = vst [vmem:[#allocation2 + $0x8] sm:$0xf] %v8499_v45  ;;  %v8501_v50 = vadd.f32 %v8422_v29, %v8357_v17  ;;  %v9706_v17 = vld [vmem:[#allocation15 + $0x130] sm:$0xff] }
 0x644   : > { %v16352_v48 = vpop.f32.mrf.mxu0  ;;  %v9337_v35 = vpop.f32.mrf.mxu1  ;;  %16852 = vmatmul.mubr.msk.f32.gmra.mxu1 %vm594_vm1, %v21818_v62  ;;  %16695 = vmatprep.subr.mxu0 %v9706_v17  ;;  %v8363_v62 = vld [vmem:[#allocation2 + $0x68] sm:$0xf] }
 0x645   : > { %8533 = vst [vmem:[#allocation2 + $0x20] sm:$0xf] %v8501_v50  ;;  %v8424_v55 = vrot.slane %v16352_v48, 4  ;;  %16854 = vmatprep.mubr.msk.f32.mxu1 %vm594_vm1, %v21823_v7  ;;  %16696 = vmatpush3.msra.mxu0 %v9706_v17  ;;  %v10816_v35 = vld [vmem:[#allocation12 + $0x170] sm:$0xff] }
 0x646   : > { %v8159_v33 = vpop.f32.mrf.mxu0  ;;  %v16643_v27 = vpop.f32.mrf.mxu1  ;;  %16959 = vmatprep.subr.mxu1 %v10816_v35 }
 0x647   : > { %16960 = vmatpush3.msra.mxu1 %v10816_v35 }
 0x648   : > { %v9345_v46 = vpop.f32.mrf.mxu1  ;;  %16855 = vmatmul.mubr.msk.f32.gmra.mxu1 %vm594_vm1, %v22003_v63 }
 0x649   : > { %v16355_v21 = vpop.f32.mrf.mxu0  ;;  %16857 = vmatprep.mubr.msk.f32.mxu1 %vm594_vm1, %v22013_v42  ;;  %v10815_v46 = vld [vmem:[#allocation12 + $0x168] sm:$0xff] }
 0x64a   : > { %v16646_v59 = vpop.f32.mrf.mxu1  ;;  %v9705_v21 = vld [vmem:[#allocation15 + $0x128] sm:$0xff]  ;;  %16961 = vmatprep.subr.mxu1 %v10815_v46 }
 0x64b   : > { %v8168_v24 = vpop.f32.mrf.mxu0  ;;  %16697 = vmatprep.subr.mxu0 %v9705_v21  ;;  %16962 = vmatpush3.msra.mxu1 %v10815_v46  ;;  %v10810_v46 = vld [vmem:[#allocation12 + $0x140] sm:$0xff] }
 0x64c   : > { %v8425_v53 = vrot.slane %v8168_v24, 4  ;;  %v9353_v56 = vpop.f32.mrf.mxu1  ;;  %v8362_v24 = vld [vmem:[#allocation2 + $0x60] sm:$0xff]  ;;  %16698 = vmatpush3.msra.mxu0 %v9705_v21  ;;  %16858 = vmatmul.mubr.msk.f32.gmra.mxu1 %vm594_vm1, %v22020_v8  ;;  %v10811_v21 = vld [vmem:[#allocation12 + $0x148] sm:$0xff] }
 0x64d   : > { %v22100_v20 = vpop.f32.mrf.mxu0  ;;  %v8365_v56 = vld [vmem:[#allocation2 + $0x80] sm:$0xf]  ;;  %16860 = vmatprep.mubr.msk.f32.mxu1 %vm594_vm1, %v22027_v9 }
 0x64e   : > { %v22105_v4 = vsel %vm7625_vm3, %v8424_v55, %v8425_v53  ;;  %v8503_v15 = vadd.f32 %v8425_v53, %v8359_v44  ;;  %v8428_v38 = vrot.slane %v22100_v20, 4  ;;  %v16649_v49 = vpop.f32.mrf.mxu1 }
 0x64f   : > { %v22108_v43 = vpop.f32.mrf.mxu0 }
 0x650   : > { %8535 = vst [vmem:[#allocation2 + $0x38] sm:$0xf] %v8503_v15  ;;  %v8505_v6 = vadd.f32 %v8428_v38, %v8361_v25  ;;  %v9361_v16 = vpop.f32.mrf.mxu1  ;;  %v10814_v25 = vld [vmem:[#allocation12 + $0x160] sm:$0xff]  ;;  %16861 = vmatmul.mubr.msk.f32.gmra.mxu1 %vm594_vm1, %v22034_v22 }
 0x651   : > { %v16361_v36 = vpop.f32.mrf.mxu0  ;;  %16963 = vmatprep.subr.mxu1 %v10814_v25  ;;  %16863 = vmatprep.mubr.msk.f32.mxu1 %vm594_vm1, %v22041_v11 }
 0x652   : > { %8537 = vst [vmem:[#allocation2 + $0x50] sm:$0xf] %v8505_v6  ;;  %v16652_v45 = vpop.f32.mrf.mxu1  ;;  %v8430_v33 = vrot.slane %v16361_v36, 4  ;;  %16964 = vmatpush3.msra.mxu1 %v10814_v25 }
 0x653   : > { %v8187_v47 = vpop.f32.mrf.mxu0  ;;  %v8364_v45 = vld [vmem:[#allocation2 + $0x78] sm:$0xff] }
 0x654   : > { %v9369_v50 = vpop.f32.mrf.mxu1  ;;  %v10813_v47 = vld [vmem:[#allocation12 + $0x158] sm:$0xff]  ;;  %16864 = vmatmul.mubr.msk.f32.gmra.mxu1 %vm594_vm1, %v22048_v12 }
 0x655   : > { %v16364_v40 = vpop.f32.mrf.mxu0  ;;  %16965 = vmatprep.subr.mxu1 %v10813_v47  ;;  %16866 = vmatprep.mubr.msk.f32.mxu1 %vm594_vm1, %v22055_v23 }
 0x656   : > { %v16655_v1 = vpop.f32.mrf.mxu1  ;;  %16966 = vmatpush3.msra.mxu1 %v10813_v47 }
 0x657   : > { %v8196_v48 = vpop.f32.mrf.mxu0  ;;  %v10812_v1 = vld [vmem:[#allocation12 + $0x150] sm:$0xff] }
 0x658   : > { %v8431_v27 = vrot.slane %v8196_v48, 4  ;;  %v9377_v7 = vpop.f32.mrf.mxu1  ;;  %v9704_v48 = vld [vmem:[#allocation15 + $0x120] sm:$0xff]  ;;  %16967 = vmatprep.subr.mxu1 %v10812_v1  ;;  %16867 = vmatmul.mubr.msk.f32.gmra.mxu1 %vm594_vm1, %v22062_v2 }
 0x659   : > { %v16367_v18 = vpop.f32.mrf.mxu0  ;;  %16699 = vmatprep.subr.mxu0 %v9704_v48  ;;  %16968 = vmatpush3.msra.mxu1 %v10812_v1 }
 0x65a   : > { %v8432_v59 = vsel %vm7625_vm3, %v8430_v33, %v8431_v27  ;;  %v8507_v55 = vadd.f32 %v8431_v27, %v8363_v62  ;;  %v8434_v53 = vrot.slane %v16367_v18, 4  ;;  %v16658_v15 = vpop.f32.mrf.mxu1  ;;  %16700 = vmatpush3.msra.mxu0 %v9704_v48  ;;  %16969 = vmatprep.subr.mxu1 %v10811_v21 }
 0x65b   : > { %v8506_v44 = vadd.f32 %v8432_v59, %v8362_v24  ;;  %v8205_v54 = vpop.f32.mrf.mxu0  ;;  %v8367_v24 = vld [vmem:[#allocation2 + $0x98] sm:$0xf]  ;;  %16970 = vmatpush3.msra.mxu1 %v10811_v21  ;;  %v8369_v15 = vld [vmem:[#allocation2 + $0xb0] sm:$0xf] }
 0x65c   : > { %8539 = vst [vmem:[#allocation2 + $0x68] sm:$0xf] %v8507_v55  ;;  %v8509_v49 = vadd.f32 %v8434_v53, %v8365_v56  ;;  %v8433_v6 = vrot.slane %v8205_v54, 4  ;;  %v9385_v16 = vpop.f32.mrf.mxu1  ;;  %v8366_v55 = vld [vmem:[#allocation2 + $0x90] sm:$0xff]  ;;  %16971 = vmatprep.subr.mxu1 %v10810_v46 }
 0x65d   : > { %8538 = vst [vmem:[#allocation2 + $0x60] sm:$0xff] %v8506_v44  ;;  %v16370_v36 = vpop.f32.mrf.mxu0  ;;  %16972 = vmatpush3.msra.mxu1 %v10810_v46 }
 0x65e   : > { %8541 = vst [vmem:[#allocation2 + $0x80] sm:$0xf] %v8509_v49  ;;  %v8435_v17 = vsel %vm7625_vm3, %v8433_v6, %v8434_v53  ;;  %v16661_v30 = vpop.f32.mrf.mxu1  ;;  %v8436_v18 = vrot.slane %v16370_v36, 4 }
 0x65f   : > { %v8508_v40 = vadd.f32 %v8435_v17, %v8364_v45  ;;  %v8215_v50 = vpop.f32.mrf.mxu0  ;;  %v9464_v47 = vrot.slane %v16661_v30, 4  ;;  %v17567_v45 = vld [vmem:[%s18190_s17] sm:$0xff]  ;;  %v8368_v17 = vld [vmem:[#allocation2 + $0xa8] sm:$0xff] }
 0x660   : > { %v9393_v33 = vpop.f32.mrf.mxu1  ;;  %16973 = vmatprep.mubr.msk.f32.mxu1 %vm594_vm1, %v17567_v45 }
 0x661   : > { %8540 = vst [vmem:[#allocation2 + $0x78] sm:$0xff] %v8508_v40  ;;  %v16373_v35 = vpop.f32.mrf.mxu0  ;;  %16974 = vmatmul.mubr.msk.f32.vlgmr.msra.gmra.mxu1 %vm594_vm1, %v21914_v0 }
 0x662   : > { %v16664_v62 = vpop.f32.mrf.mxu1  ;;  %16976 = vmatprep.mubr.msk.f32.mxu1 %vm594_vm1, %v21921_v60 }
 0x663   : > { %v8224_v27 = vpop.f32.mrf.mxu0 }
 0x664   : > { %v8437_v7 = vrot.slane %v8224_v27, 4  ;;  %v22141_v36 = vpop.f32.mrf.mxu1  ;;  %v9703_v27 = vld [vmem:[#allocation15 + $0x118] sm:$0xff] }
 0x665   : > { %v16376_v59 = vpop.f32.mrf.mxu0  ;;  %v9465_v1 = vrot.slane %v22141_v36, 4  ;;  %16701 = vmatprep.subr.mxu0 %v9703_v27  ;;  %16977 = vmatmul.mubr.msk.f32.gmra.mxu1 %vm594_vm1, %v21928_v41  ;;  %v8373_v41 = vld [vmem:[#allocation2 + $0xe0] sm:$0xf] }
 0x666   : > { %v8438_v53 = vsel %vm7625_vm3, %v8436_v18, %v8437_v7  ;;  %v8511_v44 = vadd.f32 %v8437_v7, %v8367_v24  ;;  %v8440_v56 = vrot.slane %v16376_v59, 4  ;;  %v22149_v35 = vpop.f32.mrf.mxu1  ;;  %16702 = vmatpush3.msra.mxu0 %v9703_v27  ;;  %v8371_v59 = vld [vmem:[#allocation2 + $0xc8] sm:$0xf]  ;;  %16979 = vmatprep.mubr.msk.f32.mxu1 %vm594_vm1, %v21935_v13  ;;  %v8372_v13 = vld [vmem:[#allocation2 + $0xd8] sm:$0xff] }
 0x667   : > { %v8510_v54 = vadd.f32 %v8438_v53, %v8366_v55  ;;  %v8233_v25 = vpop.f32.mrf.mxu0  ;;  %v22154_v30 = vsel %vm7625_vm3, %v9464_v47, %v9465_v1  ;;  %v9468_v62 = vrot.slane %v22149_v35, 4  ;;  %v8370_v53 = vld [vmem:[#allocation2 + $0xc0] sm:$0xff]  ;;  %v22351_v35 = vld [vmem:[#allocation2 + $0xb8] sm:$0xff] }
 0x668   : > { %8543 = vst [vmem:[#allocation2 + $0x98] sm:$0xf] %v8511_v44  ;;  %v8513_v49 = vadd.f32 %v8440_v56, %v8369_v15  ;;  %v8439_v6 = vrot.slane %v8233_v25, 4  ;;  %v9411_v18 = vpop.f32.mrf.mxu1 }
 0x669   : > { %8542 = vst [vmem:[#allocation2 + $0x90] sm:$0xff] %v8510_v54  ;;  %v16379_v16 = vpop.f32.mrf.mxu0  ;;  %v9467_v21 = vrot.slane %v9411_v18, 4  ;;  %16980 = vmatmul.mubr.msk.f32.gmra.mxu1 %vm594_vm1, %v21942_v10  ;;  %v9701_v10 = vld [vmem:[#allocation15 + $0x108] sm:$0xff] }
 0x66a   : > { %8545 = vst [vmem:[#allocation2 + $0xb0] sm:$0xf] %v8513_v49  ;;  %v8441_v40 = vsel %vm7625_vm3, %v8439_v6, %v8440_v56  ;;  %v8442_v0 = vrot.slane %v16379_v16, 4  ;;  %v22161_v24 = vpop.f32.mrf.mxu1  ;;  %16982 = vmatprep.mubr.msk.f32.mxu1 %vm594_vm1, %v21949_v28 }
 0x66b   : > { %v8512_v50 = vadd.f32 %v8441_v40, %v8368_v17  ;;  %v8243_v48 = vpop.f32.mrf.mxu0  ;;  %v22166_v60 = vsel %vm7625_vm3, %v9467_v21, %v9468_v62 }
 0x66c   : > { %v9421_v15 = vpop.f32.mrf.mxu1  ;;  %v9702_v48 = vld [vmem:[#allocation15 + $0x110] sm:$0xff] }
 0x66d   : > { %8544 = vst [vmem:[#allocation2 + $0xa8] sm:$0xff] %v8512_v50  ;;  %v16382_v33 = vpop.f32.mrf.mxu0  ;;  %16983 = vmatmul.mubr.msk.f32.gmra.mxu1 %vm594_vm1, %v21956_v51  ;;  %16703 = vmatprep.subr.mxu0 %v9702_v48  ;;  %v8374_v51 = vld [vmem:[#allocation2 + $0xf0] sm:$0xff] }
 0x66e   : > { %v16673_v47 = vpop.f32.mrf.mxu1  ;;  %16985 = vmatprep.mubr.msk.f32.mxu1 %vm594_vm1, %v21963_v5  ;;  %16704 = vmatpush3.msra.mxu0 %v9702_v48 }
 0x66f   : > { %v8252_v7 = vpop.f32.mrf.mxu0  ;;  %16705 = vmatprep.subr.mxu0 %v9701_v10 }
 0x670   : > { %v8443_v46 = vrot.slane %v8252_v7, 4  ;;  %16706 = vmatpush3.msra.mxu0 %v9701_v10  ;;  %v8375_v7 = vld [vmem:[#allocation2 + $0xf8] sm:$0xf]  ;;  %v8381_v10 = vld [vmem:[#allocation2 + $0x140] sm:$0xf] }
 0x671   : > { %v16385_v55 = vpop.f32.mrf.mxu0  ;;  %16986 = vmatmul.mubr.msk.f32.gmra.mxu1 %vm594_vm1, %v21970_v58 }
 0x672   : > { %v8444_v44 = vsel %vm7625_vm3, %v8442_v0, %v8443_v46  ;;  %v8515_v56 = vadd.f32 %v8443_v46, %v8371_v59  ;;  %v8446_v54 = vrot.slane %v16385_v55, 4  ;;  %16988 = vmatprep.mubr.msk.f32.mxu1 %vm594_vm1, %v21977_v37  ;;  %v8377_v55 = vld [vmem:[#allocation2 + $0x110] sm:$0xf]  ;;  %v8376_v37 = vld [vmem:[#allocation2 + $0x108] sm:$0xff] }
 0x673   : > { %v8514_v25 = vadd.f32 %v8444_v44, %v8370_v53  ;;  %v8261_v49 = vpop.f32.mrf.mxu0 }
 0x674   : > { %8547 = vst [vmem:[#allocation2 + $0xc8] sm:$0xf] %v8515_v56  ;;  %v8517_v6 = vadd.f32 %v8446_v54, %v8373_v41  ;;  %v8445_v16 = vrot.slane %v8261_v49, 4  ;;  %v22190_v49 = vld [vmem:[#allocation12 + $0xf8] sm:$0xff] }
 0x675   : > { %8546 = vst [vmem:[#allocation2 + $0xc0] sm:$0xff] %v8514_v25  ;;  %v16388_v45 = vpop.f32.mrf.mxu0  ;;  %16989 = vmatmul.mubr.msk.f32.gmra.mxu1 %vm594_vm1, %v21984_v14 }
 0x676   : > { %8549 = vst [vmem:[#allocation2 + $0xe0] sm:$0xf] %v8517_v6  ;;  %v8447_v17 = vsel %vm7625_vm3, %v8445_v16, %v8446_v54  ;;  %v8448_v28 = vrot.slane %v16388_v45, 4  ;;  %v9700_v54 = vld [vmem:[#allocation15 + $0x100] sm:$0xff]  ;;  %16991 = vmatprep.mubr.msk.f32.mxu1 %vm594_vm1, %v21991_v34  ;;  %v17568_v45 = vld [vmem:[%s18190_s17 + $0x78] sm:$0xff] }
 0x677   : > { %v8516_v40 = vadd.f32 %v8447_v17, %v8372_v13  ;;  %v8271_v50 = vpop.f32.mrf.mxu0  ;;  %16707 = vmatprep.subr.mxu0 %v9700_v54  ;;  %v7609_v6 = vld [vmem:[#allocation2 + $0x120] sm:$0xff]  ;;  %v8379_v17 = vld [vmem:[#allocation2 + $0x128] sm:$0xf] }
 0x678   : > { %16708 = vmatpush3.msra.mxu0 %v9700_v54  ;;  %v7646_v13 = vadd.f32 %v21858_v3, %v7609_v6  ;;  %v17570_v3 = vld [vmem:[%s18190_s17 + $0x88] sm:$0xff] }
 0x679   : > { %8548 = vst [vmem:[#allocation2 + $0xd8] sm:$0xff] %v8516_v40  ;;  %v16391_v33 = vpop.f32.mrf.mxu0  ;;  %16992 = vmatmul.mubr.msk.f32.gmra.mxu1 %vm594_vm1, %v21998_v19  ;;  %16869 = vmatprep.subr.mxu0 %v22190_v49  ;;  %v17569_v19 = vld [vmem:[%s18190_s17 + $0x80] sm:$0xff] }
 0x67a   : > { %16994 = vmatprep.mubr.msk.f32.mxu1 %vm594_vm1, %v22008_v39 }
 0x67b   : > { %v8280_v27 = vpop.f32.mrf.mxu0 }
 0x67c   : > { %v8449_v18 = vrot.slane %v8280_v27, 4 }
 0x67d   : > { %v16394_v21 = vpop.f32.mrf.mxu0  ;;  %16995 = vmatmul.mubr.msk.f32.gmra.mxu1 %vm594_vm1, %v17568_v45  ;;  %v8385_v45 = vld [vmem:[#allocation2 + $0x170] sm:$0xf] }
 0x67e   : > { %v8450_v0 = vsel %vm7625_vm3, %v8448_v28, %v8449_v18  ;;  %v8519_v46 = vadd.f32 %v8449_v18, %v8375_v7  ;;  %v8452_v5 = vrot.slane %v16394_v21, 4  ;;  %16997 = vmatprep.mubr.msk.f32.mxu1 %vm594_vm1, %v17569_v19  ;;  %v7611_v28 = vld [vmem:[#allocation2 + $0x138] sm:$0xff] }
 0x67f   : > { %v8518_v59 = vadd.f32 %v8450_v0, %v8374_v51  ;;  %v8289_v53 = vpop.f32.mrf.mxu0  ;;  %v7648_v21 = vadd.f32 %v21865_v32, %v7611_v28  ;;  %v17571_v0 = vld [vmem:[%s18190_s17 + $0x90] sm:$0xff]  ;;  %v17578_v28 = vld [vmem:[%s18190_s17 + $0xc8] sm:$0xff] }
 0x680   : > { %8551 = vst [vmem:[#allocation2 + $0xf8] sm:$0xf] %v8519_v46  ;;  %v8521_v44 = vadd.f32 %v8452_v5, %v8377_v55  ;;  %v8451_v56 = vrot.slane %v8289_v53, 4  ;;  %v17572_v55 = vld [vmem:[%s18190_s17 + $0x98] sm:$0xff] }
 0x681   : > { %8550 = vst [vmem:[#allocation2 + $0xf0] sm:$0xff] %v8518_v59  ;;  %v16397_v58 = vpop.f32.mrf.mxu0  ;;  %16998 = vmatmul.mubr.msk.f32.gmra.mxu1 %vm594_vm1, %v17570_v3  ;;  %v17580_v3 = vld [vmem:[%s18190_s17 + $0xd8] sm:$0xff] }
 0x682   : > { %8553 = vst [vmem:[#allocation2 + $0x110] sm:$0xf] %v8521_v44  ;;  %v8453_v15 = vsel %vm7625_vm3, %v8451_v56, %v8452_v5  ;;  %v8454_v16 = vrot.slane %v16397_v58, 4  ;;  %17000 = vmatprep.mubr.msk.f32.mxu1 %vm594_vm1, %v17571_v0  ;;  %v17573_v44 = vld [vmem:[%s18190_s17 + $0xa0] sm:$0xff]  ;;  %v7613_v56 = vld [vmem:[#allocation2 + $0x150] sm:$0xff] }
 0x683   : > { %v8520_v25 = vadd.f32 %v8453_v15, %v8376_v37  ;;  %v8299_v41 = vpop.f32.mrf.mxu0  ;;  %v17574_v37 = vld [vmem:[%s18190_s17 + $0xa8] sm:$0xff]  ;;  %v7650_v15 = vadd.f32 %v21878_v26, %v7613_v56  ;;  %v17576_v26 = vld [vmem:[%s18190_s17 + $0xb8] sm:$0xff] }
 0x685   : > { %8552 = vst [vmem:[#allocation2 + $0x108] sm:$0xff] %v8520_v25  ;;  %v16400_v14 = vpop.f32.mrf.mxu0  ;;  %17001 = vmatmul.mubr.msk.f32.gmra.mxu1 %vm594_vm1, %v17572_v55  ;;  %v8383_v25 = vld [vmem:[#allocation2 + $0x158] sm:$0xf] }
 0x686   : > { %17003 = vmatprep.mubr.msk.f32.mxu1 %vm594_vm1, %v17573_v44  ;;  %v17575_v14 = vld [vmem:[%s18190_s17 + $0xb0] sm:$0xff] }
 0x687   : > { %v8308_v34 = vpop.f32.mrf.mxu0 }
 0x688   : > { %v8455_v47 = vrot.slane %v8308_v34, 4 }
 0x689   : > { %v16403_v40 = vpop.f32.mrf.mxu0  ;;  %17004 = vmatmul.mubr.msk.f32.gmra.mxu1 %vm594_vm1, %v17574_v37  ;;  %v17587_v37 = vld [vmem:[%s18190_s17 + $0x110] sm:$0xff] }
 0x68a   : > { %v8456_v50 = vsel %vm7625_vm3, %v8454_v16, %v8455_v47  ;;  %v8523_v48 = vadd.f32 %v8455_v47, %v8379_v17  ;;  %v8458_v39 = vrot.slane %v16403_v40, 4  ;;  %17006 = vmatprep.mubr.msk.f32.mxu1 %vm594_vm1, %v17575_v14  ;;  %v7615_v17 = vld [vmem:[#allocation2 + $0x168] sm:$0xff]  ;;  %v17589_v14 = vld [vmem:[%s18190_s17 + $0x120] sm:$0xff] }
 0x68b   : > { %v8522_v33 = vadd.f32 %v8456_v50, %v7646_v13  ;;  %v8317_v27 = vpop.f32.mrf.mxu0  ;;  %v7652_v50 = vadd.f32 %v21885_v61, %v7615_v17  ;;  %v17579_v61 = vld [vmem:[%s18190_s17 + $0xd0] sm:$0xff] }
 0x68c   : > { %8555 = vst [vmem:[#allocation2 + $0x128] sm:$0xf] %v8523_v48  ;;  %v8525_v18 = vadd.f32 %v8458_v39, %v8381_v10  ;;  %v8457_v7 = vrot.slane %v8317_v27, 4 }
 0x68d   : > { %8554 = vst [vmem:[#allocation2 + $0x120] sm:$0xff] %v8522_v33  ;;  %v16406_v51 = vpop.f32.mrf.mxu0  ;;  %17007 = vmatmul.mubr.msk.f32.gmra.mxu1 %vm594_vm1, %v17576_v26 }
 0x68e   : > { %8557 = vst [vmem:[#allocation2 + $0x140] sm:$0xf] %v8525_v18  ;;  %v8459_v46 = vsel %vm7625_vm3, %v8457_v7, %v8458_v39  ;;  %v8460_v58 = vrot.slane %v16406_v51, 4  ;;  %v17577_v39 = vld [vmem:[%s18190_s17 + $0xc0] sm:$0xff] }
 0x68f   : > { %v8524_v5 = vadd.f32 %v8459_v46, %v7648_v21  ;;  %v8327_v59 = vpop.f32.mrf.mxu0  ;;  %17009 = vmatprep.mubr.msk.f32.mxu1 %vm594_vm1, %v17577_v39  ;;  %v17581_v51 = vld [vmem:[%s18190_s17 + $0xe0] sm:$0xff]  ;;  %v17582_v46 = vld [vmem:[%s18190_s17 + $0xe8] sm:$0xff] }
 0x690   : > { %v17583_v59 = vld [vmem:[%s18190_s17 + $0xf0] sm:$0xff] }
 0x691   : > { %8556 = vst [vmem:[#allocation2 + $0x138] sm:$0xff] %v8524_v5  ;;  %v16409_v53 = vpop.f32.mrf.mxu0  ;;  %17010 = vmatmul.mubr.msk.f32.gmra.mxu1 %vm594_vm1, %v17578_v28  ;;  %v8356_v28 = vld [vmem:[#allocation2 + $0x18] sm:$0xff] }
 0x692   : > { %17012 = vmatprep.mubr.msk.f32.mxu1 %vm594_vm1, %v17579_v61  ;;  %v17584_v53 = vld [vmem:[%s18190_s17 + $0xf8] sm:$0xff]  ;;  %v22279_v61 = vld [vmem:[#allocation2 + $0x10] sm:$0xff] }
 0x693   : > { %v8336_v32 = vpop.f32.mrf.mxu0 }
 0x694   : > { %v8461_v54 = vrot.slane %v8336_v32, 4  ;;  %v17585_v32 = vld [vmem:[%s18190_s17 + $0x100] sm:$0xff] }
 0x695   : > { %v16412_v41 = vpop.f32.mrf.mxu0  ;;  %17013 = vmatmul.mubr.msk.f32.gmra.mxu1 %vm594_vm1, %v17580_v3 }
 0x696   : > { %v8462_v34 = vsel %vm7625_vm3, %v8460_v58, %v8461_v54  ;;  %v8527_v6 = vadd.f32 %v8461_v54, %v8383_v25  ;;  %v8464_v16 = vrot.slane %v16412_v41, 4  ;;  %17015 = vmatprep.mubr.msk.f32.mxu1 %vm594_vm1, %v17581_v51  ;;  %v17586_v58 = vld [vmem:[%s18190_s17 + $0x108] sm:$0xff]  ;;  %v17588_v25 = vld [vmem:[%s18190_s17 + $0x118] sm:$0xff] }
 0x697   : > { %v8526_v47 = vadd.f32 %v8462_v34, %v7650_v15  ;;  %v8345_v13 = vpop.f32.mrf.mxu0 }
 0x698   : > { %8559 = vst [vmem:[#allocation2 + $0x158] sm:$0xf] %v8527_v6  ;;  %v8529_v40 = vadd.f32 %v8464_v16, %v8385_v45  ;;  %v8463_v19 = vrot.slane %v8345_v13, 4  ;;  %v17590_v6 = vld [vmem:[%s18190_s17 + $0x128] sm:$0xff] }
 0x699   : > { %8558 = vst [vmem:[#allocation2 + $0x150] sm:$0xff] %v8526_v47  ;;  %v16519_v48 = vpop.f32.mrf.mxu0  ;;  %17016 = vmatmul.mubr.msk.f32.gmra.mxu1 %vm594_vm1, %v17582_v46  ;;  %v17591_v47 = vld [vmem:[%s18190_s17 + $0x130] sm:$0xff] }
 0x69a   : > { %8561 = vst [vmem:[#allocation2 + $0x170] sm:$0xf] %v8529_v40  ;;  %v8465_v33 = vsel %vm7625_vm3, %v8463_v19, %v8464_v16  ;;  %17018 = vmatprep.mubr.msk.f32.mxu1 %vm594_vm1, %v17583_v59 }
 0x69b   : > { %v8528_v10 = vadd.f32 %v8465_v33, %v7652_v50  ;;  %v8935_v27 = vpop.f32.mrf.mxu0 }
 0x69d   : > { %8560 = vst [vmem:[#allocation2 + $0x168] sm:$0xff] %v8528_v10  ;;  %v16522_v18 = vpop.f32.mrf.mxu0  ;;  %17019 = vmatmul.mubr.msk.f32.gmra.mxu1 %vm594_vm1, %v17584_v53  ;;  %v8354_v10 = vld [vmem:[#allocation2] sm:$0xff] }
 0x69e   : > { %17021 = vmatprep.mubr.msk.f32.mxu1 %vm594_vm1, %v17585_v32  ;;  %v22287_v32 = vld [vmem:[#allocation2 + $0x48] sm:$0xff] }
 0x69f   : > { %v8943_v7 = vpop.f32.mrf.mxu0 }
 0x6a1   : > { %v16525_v21 = vpop.f32.mrf.mxu0  ;;  %17022 = vmatmul.mubr.msk.f32.gmra.mxu1 %vm594_vm1, %v17586_v58  ;;  %v8421_v58 = vrot.slane %v22086_v57, 4 }
 0x6a2   : > { %17024 = vmatprep.mubr.msk.f32.mxu1 %vm594_vm1, %v17587_v37  ;;  %v22290_v37 = vld [vmem:[#allocation2 + $0x40] sm:$0xff] }
 0x6a3   : > { %v8951_v0 = vpop.f32.mrf.mxu0 }
 0x6a5   : > { %v16528_v5 = vpop.f32.mrf.mxu0  ;;  %17025 = vmatmul.mubr.msk.f32.gmra.mxu1 %vm594_vm1, %v17588_v25 }
 0x6a6   : > { %17027 = vmatprep.mubr.msk.f32.mxu1 %vm594_vm1, %v17589_v14 }
 0x6a7   : > { %v8959_v55 = vpop.f32.mrf.mxu0 }
 0x6a8   : > { %v8358_v55 = vld [vmem:[#allocation2 + $0x30] sm:$0xff] }
 0x6a9   : > { %v16531_v44 = vpop.f32.mrf.mxu0  ;;  %17028 = vmatmul.mubr.msk.f32.gmra.mxu1 %vm594_vm1, %v17590_v6 }
 0x6aa   : > { %17030 = vmatprep.mubr.msk.f32.mxu1 %vm594_vm1, %v17591_v47  ;;  %v8498_v47 = vadd.f32 %v22083_v52, %v8354_v10  ;;  %v22308_v52 = vld [vmem:[%s23098_s6] ss:$0 sm:$0xff]  ;;  %v22314_v10 = vld [vmem:[#allocation2 + $0x78] sm:$0xff] }
 0x6ab   : > { %v8967_v56 = vpop.f32.mrf.mxu0 }
 0x6ad   : > { %v16534_v54 = vpop.f32.mrf.mxu0  ;;  %17031 = vmatmul.mubr.msk.f32.gmra.mxu1 %vm594_vm1, %v22003_v63  ;;  %v22265_v63 = vpop.f32.mrf.mxu1 }
 0x6ae   : > { %17033 = vmatprep.mubr.msk.f32.mxu1 %vm594_vm1, %v22013_v42 }
 0x6af   : > { %v8975_v15 = vpop.f32.mrf.mxu0 }
 0x6b1   : > { %v16537_v41 = vpop.f32.mrf.mxu0  ;;  %17034 = vmatmul.mubr.msk.f32.gmra.mxu1 %vm594_vm1, %v22020_v8  ;;  %v22271_v8 = vpop.f32.mrf.mxu1 }
 0x6b2   : > { %17036 = vmatprep.mubr.msk.f32.mxu1 %vm594_vm1, %v22027_v9  ;;  %v22292_v41 = vld [vmem:[#allocation2 + $0x58] sm:$0xff] }
 0x6b3   : > { %v8983_v34 = vpop.f32.mrf.mxu0  ;;  %v22275_v48 = vpop.f32.mrf.mxu1 }
 0x6b4   : > { %v8423_v34 = vsel %vm7625_vm3, %v8421_v58, %v8422_v29  ;;  %v8502_v58 = vadd.f32 %v22105_v4, %v8358_v55  ;;  %v22335_v55 = vld [vmem:[#allocation2 + $0x90] sm:$0xff]  ;;  %v9473_v20 = vrot.slane %v22275_v48, 4  ;;  %v10483_v48 = vld [vmem:[#allocation12 + $0xd8] sm:$0xff] }
 0x6b5   : > { %v16540_v16 = vpop.f32.mrf.mxu0  ;;  %17037 = vmatmul.mubr.msk.f32.gmra.mxu1 %vm594_vm1, %v22034_v22 }
 0x6b6   : > { %17039 = vmatprep.mubr.msk.f32.mxu1 %vm594_vm1, %v22041_v11  ;;  %v9139_v16 = vld [vmem:[#allocation2 + $0x8] sm:$0xff] }
 0x6b7   : > { %v8991_v45 = vpop.f32.mrf.mxu0 }
 0x6b9   : > { %v16543_v13 = vpop.f32.mrf.mxu0  ;;  %17040 = vmatmul.mubr.msk.f32.gmra.mxu1 %vm594_vm1, %v22048_v12 }
 0x6ba   : > { %17042 = vmatprep.mubr.msk.f32.mxu1 %vm594_vm1, %v22055_v23 }
 0x6bb   : > { %v8999_v17 = vpop.f32.mrf.mxu0 }
 0x6bc   : > { %v22277_v39 = vpop.f32.mrf.mxu1  ;;  %v8500_v17 = vadd.f32 %v8423_v34, %v8356_v28  ;;  %v22318_v28 = vld [vmem:[#allocation2 + $0x70] sm:$0xff] }
 0x6bd   : > { %v16546_v40 = vpop.f32.mrf.mxu0  ;;  %17043 = vmatmul.mubr.msk.f32.gmra.mxu1 %vm594_vm1, %v22062_v2  ;;  %v22281_v2 = vld [vmem:[#allocation2 + $0x28] sm:$0xff] }
 0x6be   : > { %v10192_v27 = vpop.f32.mrf.mxu1 }
 0x6bf   : > { %v9007_v19 = vpop.f32.mrf.mxu0  ;;  %10431 = vst [vmem:[#allocation2] sm:$0xff] %v10192_v27 }
 0x6c0   : > { %v16802_v18 = vpop.f32.mrf.mxu1  ;;  %v22300_v19 = vld [vmem:[#allocation2 + $0x68] sm:$0xff] }
 0x6c1   : > { %v16549_v26 = vpop.f32.mrf.mxu0  ;;  %10434 = vst [vmem:[#allocation2 + $0x18] sm:$0xff] %v16802_v18 }
 0x6c2   : > { %v10202_v7 = vpop.f32.mrf.mxu1 }
 0x6c3   : > { %v9015_v50 = vpop.f32.mrf.mxu0  ;;  %10433 = vst [vmem:[#allocation2 + $0x10] sm:$0xff] %v10202_v7 }
 0x6c4   : > { %v16805_v21 = vpop.f32.mrf.mxu1 }
 0x6c5   : > { %v16552_v42 = vpop.f32.mrf.mxu0  ;;  %10436 = vst [vmem:[#allocation2 + $0x28] sm:$0xff] %v16805_v21  ;;  %v9470_v21 = vrot.slane %v22161_v24, 4  ;;  %v22327_v24 = vld [vmem:[#allocation2 + $0x80] sm:$0xff] }
 0x6c6   : > { %v22283_v0 = vpop.f32.mrf.mxu1  ;;  %v22303_v42 = vld [vmem:[#allocation2 + $0x60] sm:$0xff] }
 0x6c7   : > { %v9023_v9 = vpop.f32.mrf.mxu0 }
 0x6c8   : > { %v22285_v5 = vpop.f32.mrf.mxu1 }
 0x6c9   : > { %v16555_v22 = vpop.f32.mrf.mxu0 }
 0x6ca   : > { %v10222_v53 = vpop.f32.mrf.mxu1 }
 0x6cb   : > { %v9031_v11 = vpop.f32.mrf.mxu0  ;;  %10437 = vst [vmem:[#allocation2 + $0x30] sm:$0xff] %v10222_v53 }
 0x6cc   : > { %v16811_v56 = vpop.f32.mrf.mxu1 }
 0x6cd   : > { %v16558_v33 = vpop.f32.mrf.mxu0  ;;  %10440 = vst [vmem:[#allocation2 + $0x48] sm:$0xff] %v16811_v56  ;;  %v9145_v56 = vld [vmem:[#allocation2 + $0x38] sm:$0xff] }
 0x6ce   : > { %v10232_v15 = vpop.f32.mrf.mxu1 }
 0x6cf   : > { %v9039_v12 = vpop.f32.mrf.mxu0  ;;  %10439 = vst [vmem:[#allocation2 + $0x40] sm:$0xff] %v10232_v15 }
 0x6d0   : > { %v16814_v14 = vpop.f32.mrf.mxu1 }
 0x6d1   : > { %v16561_v23 = vpop.f32.mrf.mxu0  ;;  %10442 = vst [vmem:[#allocation2 + $0x58] sm:$0xff] %v16814_v14 }
 0x6d2   : > { %v22298_v45 = vpop.f32.mrf.mxu1 }
 0x6d3   : > { %v9047_v3 = vpop.f32.mrf.mxu0 }
 0x6d4   : > { %v16817_v26 = vpop.f32.mrf.mxu1  ;;  %v9142_v3 = vld [vmem:[#allocation2 + $0x20] sm:$0xff] }
 0x6d5   : > { %v16564_v51 = vpop.f32.mrf.mxu0  ;;  %10444 = vst [vmem:[#allocation2 + $0x68] sm:$0xff] %v16817_v26 }
 0x6d6   : > { %v10252_v9 = vpop.f32.mrf.mxu1 }
 0x6d7   : > { %v9055_v46 = vpop.f32.mrf.mxu0  ;;  %10443 = vst [vmem:[#allocation2 + $0x60] sm:$0xff] %v10252_v9  ;;  %v22346_v9 = vld [vmem:[#allocation2 + $0xa0] sm:$0xff] }
 0x6d8   : > { %v16820_v27 = vpop.f32.mrf.mxu1 }
 0x6d9   : > { %v16567_v59 = vpop.f32.mrf.mxu0  ;;  %10446 = vst [vmem:[#allocation2 + $0x78] sm:$0xff] %v16820_v27 }
 0x6da   : > { %v10262_v18 = vpop.f32.mrf.mxu1  ;;  %v22324_v59 = vld [vmem:[#allocation2 + $0x88] sm:$0xff] }
 0x6db   : > { %v9063_v44 = vpop.f32.mrf.mxu0  ;;  %10445 = vst [vmem:[#allocation2 + $0x70] sm:$0xff] %v10262_v18 }
 0x6dc   : > { %v16823_v53 = vpop.f32.mrf.mxu1 }
 0x6dd   : > { %v16570_v54 = vpop.f32.mrf.mxu0  ;;  %10448 = vst [vmem:[#allocation2 + $0x88] sm:$0xff] %v16823_v53  ;;  %v9474_v53 = vrot.slane %v22271_v8, 4 }
 0x6df   : > { %v9071_v25 = vpop.f32.mrf.mxu0 }
 0x6e0   : > { %v22330_v25 = vld [vmem:[#allocation2 + $0x98] sm:$0xff] }
 0x6e1   : > { %v16573_v6 = vpop.f32.mrf.mxu0 }
 0x6e2   : > { %v9151_v57 = vadd.f32 %v16573_v6, %v9139_v16 }
 0x6e3   : > { %v9079_v13 = vpop.f32.mrf.mxu0 }
 0x6e4   : > { %9163 = vst [vmem:[#allocation2 + $0x8] sm:$0xff] %v9151_v57  ;;  %v9150_v40 = vadd.f32 %v9079_v13, %v8498_v47  ;;  %v22337_v57 = vld [vmem:[#allocation2 + $0xa8] sm:$0xff] }
 0x6e5   : > { %v16576_v50 = vpop.f32.mrf.mxu0 }
 0x6e6   : > { %v9153_v31 = vadd.f32 %v16576_v50, %v8500_v17  ;;  %v9484_v29 = vadd.f32 %v22154_v30, %v9150_v40 }
 0x6e7   : > { %v9089_v22 = vpop.f32.mrf.mxu0 }
 0x6e8   : > { %v22311_v11 = vadd.f32 %v22166_v60, %v9153_v31  ;;  %v9555_v33 = vadd.f32 %v22308_v52, %v9484_v29  ;;  %v9471_v60 = vrot.slane %v22265_v63, 4  ;;  %v10272_v63 = vpop.f32.mrf.mxu1  ;;  %v9152_v34 = vadd.f32 %v22279_v61, %v9089_v22 }
 0x6e9   : > { %v22316_v12 = vpop.f32.mrf.mxu0  ;;  %10447 = vst [vmem:[#allocation2 + $0x80] sm:$0xff] %v10272_v63  ;;  %v8427_v61 = vrot.slane %v22108_v43, 4 }
 0x6ea   : > { %v9603_v30 = vmax.f32 %v9555_v33, 0.0  ;;  %v9472_v36 = vsel %vm7625_vm3, %v9470_v21, %v9471_v60  ;;  %v16826_v14 = vpop.f32.mrf.mxu1  ;;  %v9557_v50 = vadd.f32 %v22308_v52, %v9152_v34  ;;  %v9558_v43 = vadd.f32 %v22308_v52, %v22311_v11  ;;  %v10486_v21 = vld [vmem:[#allocation12 + $0xf0] sm:$0xff]  ;;  %v10485_v11 = vld [vmem:[#allocation12 + $0xe8] sm:$0xff] }
 0x6eb   : > { %v9449_v23 = vld [vmem:[#allocation2 + $0x8] sm:$0xf]  ;;  %v9099_v7 = vpop.f32.mrf.mxu0  ;;  %10450 = vst [vmem:[#allocation2 + $0x98] sm:$0xff] %v16826_v14  ;;  %v22374_v14 = vld [vmem:[#allocation2 + $0xd8] sm:$0xff] }
 0x6ec   : > { %v9485_v51 = vadd.f32 %v9465_v1, %v9449_v23  ;;  %v9154_v46 = vadd.f32 %v9142_v3, %v9099_v7  ;;  %16709 = vmatprep.mubr.f32.mxu0 %v9603_v30  ;;  %v10282_v16 = vpop.f32.mrf.mxu1  ;;  %v9148_v30 = vld [vmem:[#allocation2 + $0x50] sm:$0xff]  ;;  %v9605_v3 = vmax.f32 %v9557_v50, 0.0 }
 0x6ed   : > { %v16582_v44 = vpop.f32.mrf.mxu0  ;;  %10449 = vst [vmem:[#allocation2 + $0x90] sm:$0xff] %v10282_v16 }
 0x6ee   : > { %9493 = vst [vmem:[#allocation2 + $0x8] sm:$0xf] %v9485_v51  ;;  %9166 = vst [vmem:[#allocation2 + $0x20] sm:$0xff] %v9154_v46  ;;  %v9157_v54 = vadd.f32 %v16582_v44, %v9145_v56  ;;  %v16829_v13 = vpop.f32.mrf.mxu1  ;;  %v22356_v51 = vld [vmem:[#allocation2 + $0xb0] sm:$0xff]  ;;  %v9155_v46 = vadd.f32 %v22316_v12, %v22281_v2  ;;  %v9606_v44 = vmax.f32 %v9558_v43, 0.0  ;;  %v22366_v2 = vld [vmem:[#allocation2 + $0xc0] sm:$0xff] }
 0x6ef   : > { %v9109_v15 = vpop.f32.mrf.mxu0  ;;  %10452 = vst [vmem:[#allocation2 + $0xa8] sm:$0xff] %v16829_v13  ;;  %v10482_v13 = vld [vmem:[#allocation12 + $0xd0] sm:$0xff] }
 0x6f0   : > { %9169 = vst [vmem:[#allocation2 + $0x38] sm:$0xff] %v9157_v54  ;;  %v9156_v1 = vadd.f32 %v9109_v15, %v8502_v58  ;;  %v10292_v22 = vpop.f32.mrf.mxu1  ;;  %v10484_v54 = vld [vmem:[#allocation12 + $0xe0] sm:$0xff]  ;;  %v9560_v8 = vadd.f32 %v22308_v52, %v9155_v46 }
 0x6f1   : > { %v16585_v6 = vpop.f32.mrf.mxu0  ;;  %10451 = vst [vmem:[#allocation2 + $0xa0] sm:$0xff] %v10292_v22  ;;  %v10481_v22 = vld [vmem:[#allocation12 + $0xc8] sm:$0xff] }
 0x6f2   : > { %v22333_v4 = vadd.f32 %v9472_v36, %v9156_v1  ;;  %v9475_v36 = vsel %vm7625_vm3, %v9473_v20, %v9474_v53  ;;  %v9608_v50 = vmax.f32 %v9560_v8, 0.0  ;;  %v22408_v8 = vld [vmem:[#allocation2 + $0x110] sm:$0xff] }
 0x6f3   : > { %v9119_v47 = vpop.f32.mrf.mxu0 }
 0x6f4   : > { %v9158_v15 = vadd.f32 %v22290_v37, %v9119_v47  ;;  %v9561_v1 = vadd.f32 %v22308_v52, %v22333_v4  ;;  %v22377_v47 = vld [vmem:[#allocation2 + $0xd0] sm:$0xff] }
 0x6f5   : > { %v9451_v17 = vld [vmem:[#allocation2 + $0x20] sm:$0xf]  ;;  %v22339_v40 = vpop.f32.mrf.mxu0  ;;  %v9501_v26 = vld [vmem:[#allocation2 + $0x8] sm:$0xff] }
 0x6f6   : > { %v9487_v31 = vadd.f32 %v9468_v62, %v9451_v17  ;;  %v9556_v29 = vadd.f32 %v22308_v52, %v9501_v26  ;;  %10432 = vst [vmem:[#allocation2 + $0x8] sm:$0xff] %v22277_v39  ;;  %v16832_v62 = vpop.f32.mrf.mxu1  ;;  %v8429_v39 = vsel %vm7625_vm3, %v8427_v61, %v8428_v38  ;;  %v22363_v38 = vld [vmem:[#allocation2 + $0xc8] sm:$0xff] }
 0x6f7   : > { %v9453_v33 = vld [vmem:[#allocation2 + $0x38] sm:$0xf]  ;;  %v9129_v27 = vpop.f32.mrf.mxu0  ;;  %10454 = vst [vmem:[#allocation2 + $0xb8] sm:$0xff] %v16832_v62  ;;  %v8504_v58 = vadd.f32 %v8429_v39, %v22287_v32 }
 0x6f8   : > { %9495 = vst [vmem:[#allocation2 + $0x20] sm:$0xf] %v9487_v31  ;;  %v9489_v18 = vadd.f32 %v9471_v60, %v9453_v33  ;;  %v9160_v23 = vadd.f32 %v9148_v30, %v9129_v27  ;;  %v9604_v7 = vmax.f32 %v9556_v29, 0.0  ;;  %v10302_v60 = vpop.f32.mrf.mxu1  ;;  %v9563_v31 = vadd.f32 %v22308_v52, %v9158_v15  ;;  %v22382_v29 = vld [vmem:[#allocation2 + $0xe8] sm:$0xff]  ;;  %v10480_v27 = vld [vmem:[#allocation12 + $0xc0] sm:$0xff]  ;;  %v22389_v62 = vld [vmem:[#allocation2 + $0xf8] sm:$0xff] }
 0x6f9   : > { %10453 = vst [vmem:[#allocation2 + $0xb0] sm:$0xff] %v10302_v60  ;;  %v9159_v12 = vadd.f32 %v16585_v6, %v8504_v58 }
 0x6fa   : > { %9497 = vst [vmem:[#allocation2 + $0x38] sm:$0xf] %v9489_v18  ;;  %9172 = vst [vmem:[#allocation2 + $0x50] sm:$0xff] %v9160_v23  ;;  %16710 = vmatmul.mubr.f32.vlgmr.msra.gmra.mxu0 %v9604_v7  ;;  %v16835_v56 = vpop.f32.mrf.mxu1  ;;  %v9161_v18 = vadd.f32 %v22339_v40, %v22292_v41  ;;  %v9611_v43 = vmax.f32 %v9563_v31, 0.0  ;;  %v22430_v31 = vld [vmem:[#allocation2 + $0x148] sm:$0xff] }
 0x6fb   : > { %16712 = vmatprep.mubr.f32.mxu0 %v9605_v3  ;;  %16870 = vmatpush3.msra.mxu0 %v22190_v49  ;;  %10456 = vst [vmem:[#allocation2 + $0xc8] sm:$0xff] %v16835_v56  ;;  %v9490_v4 = vadd.f32 %v9475_v36, %v9159_v12  ;;  %v22400_v56 = vld [vmem:[#allocation2 + $0x100] sm:$0xff]  ;;  %v9570_v36 = vadd.f32 %v22308_v52, %v22314_v10 }
 0x6fc   : > { %16871 = vmatprep.subr.mxu0 %v10486_v21  ;;  %v10312_v49 = vpop.f32.mrf.mxu1  ;;  %v9566_v40 = vadd.f32 %v22308_v52, %v9161_v18  ;;  %v9577_v18 = vadd.f32 %v22308_v52, %v22356_v51 }
 0x6fd   : > { %16872 = vmatpush3.msra.mxu0 %v10486_v21  ;;  %10455 = vst [vmem:[#allocation2 + $0xc0] sm:$0xff] %v10312_v49  ;;  %v9564_v7 = vadd.f32 %v22308_v52, %v9490_v4  ;;  %v22391_v21 = vld [vmem:[#allocation2 + $0xf0] sm:$0xff]  ;;  %v9568_v49 = vadd.f32 %v22308_v52, %v22300_v19 }
 0x6fe   : > { %16713 = vmatmul.mubr.f32.gmra.mxu0 %v9606_v44  ;;  %16873 = vmatprep.subr.mxu0 %v10485_v11  ;;  %v16838_v34 = vpop.f32.mrf.mxu1 }
 0x6ff   : > { %v9504_v63 = vld [vmem:[#allocation2 + $0x20] sm:$0xff]  ;;  %16874 = vmatpush3.msra.mxu0 %v10485_v11  ;;  %10458 = vst [vmem:[#allocation2 + $0xd8] sm:$0xff] %v16838_v34  ;;  %v9612_v60 = vmax.f32 %v9564_v7, 0.0  ;;  %v9567_v11 = vadd.f32 %v22308_v52, %v22303_v42  ;;  %v9569_v42 = vadd.f32 %v22308_v52, %v22318_v28  ;;  %v9616_v15 = vmax.f32 %v9568_v49, 0.0 }
 0x700   : > { %v9559_v32 = vadd.f32 %v22308_v52, %v9504_v63  ;;  %16875 = vmatprep.subr.mxu0 %v10484_v54  ;;  %10435 = vst [vmem:[#allocation2 + $0x20] sm:$0xff] %v22283_v0  ;;  %v10322_v26 = vpop.f32.mrf.mxu1  ;;  %v9609_v0 = vmax.f32 %v9561_v1, 0.0  ;;  %v22406_v63 = vld [vmem:[#allocation2 + $0x118] sm:$0xff]  ;;  %v22414_v1 = vld [vmem:[#allocation2 + $0x128] sm:$0xff]  ;;  %v22416_v34 = vld [vmem:[#allocation2 + $0x120] sm:$0xff] }
 0x701   : > { %v9455_v6 = vld [vmem:[#allocation2 + $0x50] sm:$0xf]  ;;  %v9507_v16 = vld [vmem:[#allocation2 + $0x38] sm:$0xff]  ;;  %16876 = vmatpush3.msra.mxu0 %v10484_v54  ;;  %10457 = vst [vmem:[#allocation2 + $0xd0] sm:$0xff] %v10322_v26  ;;  %v9614_v54 = vmax.f32 %v9566_v40, 0.0  ;;  %v9615_v12 = vmax.f32 %v9567_v11, 0.0  ;;  %v9579_v40 = vadd.f32 %v22308_v52, %v22366_v2 }
 0x702   : > { %v9491_v17 = vadd.f32 %v9474_v53, %v9455_v6  ;;  %v9607_v37 = vmax.f32 %v9559_v32, 0.0  ;;  %16877 = vmatprep.subr.mxu0 %v10483_v48  ;;  %10438 = vst [vmem:[#allocation2 + $0x38] sm:$0xff] %v22285_v5  ;;  %v9562_v61 = vadd.f32 %v22308_v52, %v9507_v16  ;;  %v16841_v33 = vpop.f32.mrf.mxu1  ;;  %v22384_v5 = vld [vmem:[#allocation2 + $0xe0] sm:$0xff]  ;;  %v22397_v53 = vld [vmem:[#allocation2 + $0x108] sm:$0xff]  ;;  %v9617_v19 = vmax.f32 %v9569_v42, 0.0  ;;  %v22424_v26 = vld [vmem:[#allocation2 + $0x130] sm:$0xff] }
 0x703   : > { %16878 = vmatpush3.msra.mxu0 %v10483_v48  ;;  %10460 = vst [vmem:[#allocation2 + $0xe8] sm:$0xff] %v16841_v33  ;;  %v9571_v32 = vadd.f32 %v22308_v52, %v22327_v24  ;;  %v9618_v16 = vmax.f32 %v9570_v36, 0.0  ;;  %v22434_v33 = vld [vmem:[#allocation2 + $0x140] sm:$0xff]  ;;  %v9627_v49 = vmax.f32 %v9579_v40, 0.0  ;;  %v22474_v42 = vld [vmem:[#allocation2 + $0x178] sm:$0xff]  ;;  %v22482_v36 = vld [vmem:[#allocation15 + $0x1c8] sm:$0xff]  ;;  %v9589_v40 = vadd.f32 %v22308_v52, %v22408_v8 }
 0x704   : > { %9499 = vst [vmem:[#allocation2 + $0x50] sm:$0xf] %v9491_v17  ;;  %16715 = vmatprep.mubr.f32.mxu0 %v9607_v37  ;;  %16879 = vmatprep.subr.mxu0 %v10482_v13  ;;  %v10332_v30 = vpop.f32.mrf.mxu1  ;;  %v9610_v23 = vmax.f32 %v9562_v61, 0.0  ;;  %v9573_v17 = vadd.f32 %v22308_v52, %v22335_v55  ;;  %v22422_v37 = vld [vmem:[#allocation2 + $0x138] sm:$0xff]  ;;  %v9574_v61 = vadd.f32 %v22308_v52, %v22330_v25 }
 0x705   : > { %16716 = vmatmul.mubr.f32.gmra.mxu0 %v9608_v50  ;;  %10459 = vst [vmem:[#allocation2 + $0xe0] sm:$0xff] %v10332_v30  ;;  %v9619_v10 = vmax.f32 %v9571_v32, 0.0  ;;  %v9576_v25 = vadd.f32 %v22308_v52, %v22337_v57  ;;  %v22448_v57 = vld [vmem:[#allocation2 + $0x150] sm:$0xff] }
 0x706   : > { %16718 = vmatprep.mubr.f32.mxu0 %v9609_v0  ;;  %16880 = vmatpush3.msra.mxu0 %v10482_v13  ;;  %v16844_v3 = vpop.f32.mrf.mxu1  ;;  %v9572_v13 = vadd.f32 %v22308_v52, %v22324_v59  ;;  %v9621_v59 = vmax.f32 %v9573_v17, 0.0  ;;  %v9575_v0 = vadd.f32 %v22308_v52, %v22346_v9  ;;  %v9622_v30 = vmax.f32 %v9574_v61, 0.0 }
 0x707   : > { %16881 = vmatprep.subr.mxu0 %v10481_v22  ;;  %10462 = vst [vmem:[#allocation2 + $0xf8] sm:$0xff] %v16844_v3  ;;  %v9624_v51 = vmax.f32 %v9576_v25, 0.0  ;;  %v9584_v17 = vadd.f32 %v22308_v52, %v22382_v29  ;;  %v22514_v25 = vld [vmem:[#allocation15 + $0x1a0] sm:$0xff] }
 0x708   : > { %16882 = vmatpush3.msra.mxu0 %v10481_v22  ;;  %v10342_v39 = vpop.f32.mrf.mxu1  ;;  %v9620_v50 = vmax.f32 %v9572_v13, 0.0  ;;  %v22432_v22 = vld [vmem:[#allocation15 + $0x1f8] sm:$0xff]  ;;  %v9623_v9 = vmax.f32 %v9575_v0, 0.0  ;;  %v22506_v0 = vld [vmem:[#allocation15 + $0x1a8] sm:$0xff] }
 0x709   : > { %16719 = vmatmul.mubr.f32.gmra.mxu0 %v9610_v23  ;;  %16883 = vmatprep.subr.mxu0 %v10480_v27  ;;  %10461 = vst [vmem:[#allocation2 + $0xf0] sm:$0xff] %v10342_v39  ;;  %v22442_v23 = vld [vmem:[#allocation2 + $0x158] sm:$0xff]  ;;  %v22450_v39 = vld [vmem:[#allocation15 + $0x1e8] sm:$0xff]  ;;  %v9632_v29 = vmax.f32 %v9584_v17, 0.0 }
 0x70a   : > { %16721 = vmatprep.mubr.f32.mxu0 %v9611_v43  ;;  %16884 = vmatpush3.msra.mxu0 %v10480_v27  ;;  %v16847_v20 = vpop.f32.mrf.mxu1  ;;  %v22444_v43 = vld [vmem:[#allocation15 + $0x1f0] sm:$0xff]  ;;  %v11094_v17 = vld [vmem:[#allocation2 + $0x48] sm:$0x3f] }
 0x70b   : > { %v9510_v41 = vld [vmem:[#allocation2 + $0x50] sm:$0xff]  ;;  %10464 = vst [vmem:[#allocation2 + $0x108] sm:$0xff] %v16847_v20  ;;  %17045 = vmatprep.subr.mxu0 %v22432_v22  ;;  %17149 = vmatprep.subr.mxu1 %v22432_v22  ;;  %v22460_v20 = vld [vmem:[#allocation15 + $0x1e0] sm:$0xff] }
 0x70c   : > { %v9565_v46 = vadd.f32 %v22308_v52, %v9510_v41  ;;  %10441 = vst [vmem:[#allocation2 + $0x50] sm:$0xff] %v22298_v45  ;;  %v10352_v58 = vpop.f32.mrf.mxu1  ;;  %17165 = vmatpush3.msra.mxu1 %v22432_v22  ;;  %v9625_v41 = vmax.f32 %v9577_v18, 0.0 }
 0x70d   : > { %16722 = vmatmul.mubr.f32.gmra.mxu0 %v9612_v60  ;;  %10463 = vst [vmem:[#allocation2 + $0x100] sm:$0xff] %v10352_v58  ;;  %17150 = vmatprep.subr.mxu1 %v22444_v43  ;;  %v9578_v60 = vadd.f32 %v22308_v52, %v22351_v35  ;;  %v22464_v35 = vld [vmem:[#allocation2 + $0x160] sm:$0xff]  ;;  %v22466_v58 = vld [vmem:[#allocation15 + $0x1d8] sm:$0xff] }
 0x70e   : > { %v9613_v44 = vmax.f32 %v9565_v46, 0.0  ;;  %v16850_v45 = vpop.f32.mrf.mxu1  ;;  %17166 = vmatpush3.msra.mxu1 %v22444_v43  ;;  %v22458_v46 = vld [vmem:[#allocation2 + $0x168] sm:$0xff] }
 0x70f   : > { %10466 = vst [vmem:[#allocation2 + $0x118] sm:$0xff] %v16850_v45  ;;  %17151 = vmatprep.subr.mxu1 %v22450_v39  ;;  %v9626_v2 = vmax.f32 %v9578_v60, 0.0 }
 0x710   : > { %16724 = vmatprep.mubr.f32.mxu0 %v9613_v44  ;;  %v10362_v48 = vpop.f32.mrf.mxu1  ;;  %17167 = vmatpush3.msra.mxu1 %v22450_v39 }
 0x711   : > { %16725 = vmatmul.mubr.f32.gmra.mxu0 %v9614_v54  ;;  %10465 = vst [vmem:[#allocation2 + $0x110] sm:$0xff] %v10362_v48  ;;  %17152 = vmatprep.subr.mxu1 %v22460_v20  ;;  %v9580_v54 = vadd.f32 %v22308_v52, %v22363_v38  ;;  %v22476_v48 = vld [vmem:[#allocation15 + $0x1d0] sm:$0xff] }
 0x712   : > { %16727 = vmatprep.mubr.f32.mxu0 %v9615_v12  ;;  %v16853_v28 = vpop.f32.mrf.mxu1  ;;  %17168 = vmatpush3.msra.mxu1 %v22460_v20  ;;  %v9581_v12 = vadd.f32 %v22308_v52, %v22377_v47  ;;  %v22480_v38 = vld [vmem:[#allocation2 + $0x170] sm:$0xff] }
 0x713   : > { %10468 = vst [vmem:[#allocation2 + $0x128] sm:$0xff] %v16853_v28  ;;  %17153 = vmatprep.subr.mxu1 %v22466_v58  ;;  %v9628_v47 = vmax.f32 %v9580_v54, 0.0  ;;  %v9583_v28 = vadd.f32 %v22308_v52, %v22384_v5 }
 0x714   : > { %v10372_v6 = vpop.f32.mrf.mxu1  ;;  %17169 = vmatpush3.msra.mxu1 %v22466_v58  ;;  %v9629_v32 = vmax.f32 %v9581_v12, 0.0  ;;  %v9637_v12 = vmax.f32 %v9589_v40, 0.0  ;;  %v11096_v40 = vld [vmem:[#allocation2 + $0x78] sm:$0x3f] }
 0x715   : > { %16728 = vmatmul.mubr.f32.gmra.mxu0 %v9616_v15  ;;  %10467 = vst [vmem:[#allocation2 + $0x120] sm:$0xff] %v10372_v6  ;;  %17154 = vmatprep.subr.mxu1 %v22476_v48  ;;  %v9631_v5 = vmax.f32 %v9583_v28, 0.0  ;;  %v11093_v28 = vld [vmem:[#allocation2 + $0x30] sm:$0x3f] }
 0x716   : > { %16730 = vmatprep.mubr.f32.mxu0 %v9617_v19  ;;  %v16856_v24 = vpop.f32.mrf.mxu1  ;;  %17170 = vmatpush3.msra.mxu1 %v22476_v48  ;;  %v9582_v19 = vadd.f32 %v22308_v52, %v22374_v14 }
 0x717   : > { %10470 = vst [vmem:[#allocation2 + $0x138] sm:$0xff] %v16856_v24  ;;  %17155 = vmatprep.subr.mxu1 %v22482_v36  ;;  %v9585_v24 = vadd.f32 %v22308_v52, %v22391_v21 }
 0x718   : > { %v10382_v4 = vpop.f32.mrf.mxu1  ;;  %17171 = vmatpush3.msra.mxu1 %v22482_v36  ;;  %v9630_v14 = vmax.f32 %v9582_v19, 0.0 }
 0x719   : > { %16731 = vmatmul.mubr.f32.gmra.mxu0 %v9618_v16  ;;  %10469 = vst [vmem:[#allocation2 + $0x130] sm:$0xff] %v10382_v4  ;;  %v22490_v16 = vld [vmem:[#allocation15 + $0x1c0] sm:$0xff] }
 0x71a   : > { %16733 = vmatprep.mubr.f32.mxu0 %v9619_v10  ;;  %v16859_v55 = vpop.f32.mrf.mxu1  ;;  %17156 = vmatprep.subr.mxu1 %v22490_v16  ;;  %v22494_v10 = vld [vmem:[#allocation15 + $0x1b8] sm:$0xff] }
 0x71b   : > { %10472 = vst [vmem:[#allocation2 + $0x148] sm:$0xff] %v16859_v55  ;;  %17172 = vmatpush3.msra.mxu1 %v22490_v16  ;;  %v9586_v55 = vadd.f32 %v22308_v52, %v22389_v62  ;;  %v22518_v62 = vld [vmem:[#allocation15 + $0x198] sm:$0xff] }
 0x71c   : > { %v10392_v27 = vpop.f32.mrf.mxu1  ;;  %17157 = vmatprep.subr.mxu1 %v22494_v10 }
 0x71d   : > { %16734 = vmatmul.mubr.f32.gmra.mxu0 %v9620_v50  ;;  %10471 = vst [vmem:[#allocation2 + $0x140] sm:$0xff] %v10392_v27  ;;  %v22502_v50 = vld [vmem:[#allocation15 + $0x1b0] sm:$0xff]  ;;  %17173 = vmatpush3.msra.mxu1 %v22494_v10  ;;  %v9633_v27 = vmax.f32 %v9585_v24, 0.0 }
 0x71e   : > { %16736 = vmatprep.mubr.f32.mxu0 %v9621_v59  ;;  %v16862_v7 = vpop.f32.mrf.mxu1  ;;  %17158 = vmatprep.subr.mxu1 %v22502_v50  ;;  %v11091_v59 = vld [vmem:[#allocation2] sm:$0x3f] }
 0x71f   : > { %10474 = vst [vmem:[#allocation2 + $0x158] sm:$0xff] %v16862_v7  ;;  %17174 = vmatpush3.msra.mxu1 %v22502_v50  ;;  %v11092_v7 = vld [vmem:[#allocation2 + $0x18] sm:$0x3f] }
 0x720   : > { %v10402_v3 = vpop.f32.mrf.mxu1  ;;  %17159 = vmatprep.subr.mxu1 %v22506_v0 }
 0x721   : > { %16737 = vmatmul.mubr.f32.gmra.mxu0 %v9622_v30  ;;  %10473 = vst [vmem:[#allocation2 + $0x150] sm:$0xff] %v10402_v3  ;;  %v9587_v30 = vadd.f32 %v22308_v52, %v22400_v56  ;;  %17175 = vmatpush3.msra.mxu1 %v22506_v0  ;;  %v9588_v56 = vadd.f32 %v22308_v52, %v22397_v53  ;;  %v22530_v53 = vld [vmem:[#allocation15 + $0x188] sm:$0xff] }
 0x722   : > { %16739 = vmatprep.mubr.f32.mxu0 %v9623_v9  ;;  %v16865_v11 = vpop.f32.mrf.mxu1  ;;  %17160 = vmatprep.subr.mxu1 %v22514_v25 }
 0x723   : > { %10476 = vst [vmem:[#allocation2 + $0x168] sm:$0xff] %v16865_v11  ;;  %17176 = vmatpush3.msra.mxu1 %v22514_v25  ;;  %v9636_v54 = vmax.f32 %v9588_v56, 0.0 }
 0x724   : > { %v10412_v44 = vpop.f32.mrf.mxu1  ;;  %17161 = vmatprep.subr.mxu1 %v22518_v62 }
 0x725   : > { %16740 = vmatmul.mubr.f32.gmra.mxu0 %v9624_v51  ;;  %10475 = vst [vmem:[#allocation2 + $0x160] sm:$0xff] %v10412_v44  ;;  %v9634_v51 = vmax.f32 %v9586_v55, 0.0  ;;  %v22526_v44 = vld [vmem:[#allocation15 + $0x190] sm:$0xff]  ;;  %17177 = vmatpush3.msra.mxu1 %v22518_v62 }
 0x726   : > { %16742 = vmatprep.mubr.f32.mxu0 %v9625_v41  ;;  %v16868_v45 = vpop.f32.mrf.mxu1  ;;  %v9635_v41 = vmax.f32 %v9587_v30, 0.0  ;;  %17162 = vmatprep.subr.mxu1 %v22526_v44 }
 0x727   : > { %10478 = vst [vmem:[#allocation2 + $0x178] sm:$0xff] %v16868_v45  ;;  %17178 = vmatpush3.msra.mxu1 %v22526_v44  ;;  %v9591_v45 = vadd.f32 %v22308_v52, %v22416_v34  ;;  %v9593_v34 = vadd.f32 %v22308_v52, %v22424_v26 }
 0x728   : > { %v10422_v15 = vpop.f32.mrf.mxu1  ;;  %17163 = vmatprep.subr.mxu1 %v22530_v53 }
 0x729   : > { %16743 = vmatmul.mubr.f32.gmra.mxu0 %v9626_v2  ;;  %10477 = vst [vmem:[#allocation2 + $0x170] sm:$0xff] %v10422_v15  ;;  %v22538_v15 = vld [vmem:[#allocation15 + $0x180] sm:$0xff]  ;;  %17179 = vmatpush3.msra.mxu1 %v22530_v53 }
 0x72a   : > { %16745 = vmatprep.mubr.f32.mxu0 %v9627_v49  ;;  %v16975_v6 = vpop.f32.mrf.mxu1  ;;  %v9590_v49 = vadd.f32 %v22308_v52, %v22406_v63  ;;  %17164 = vmatprep.subr.mxu1 %v22538_v15  ;;  %v9592_v63 = vadd.f32 %v22308_v52, %v22414_v1  ;;  %v9595_v1 = vadd.f32 %v22308_v52, %v22434_v33 }
 0x72b   : > { %17180 = vmatpush3.msra.mxu1 %v22538_v15  ;;  %v9639_v6 = vmax.f32 %v9591_v45, 0.0  ;;  %v9598_v33 = vadd.f32 %v22308_v52, %v22442_v23  ;;  %v9601_v23 = vadd.f32 %v22308_v52, %v22480_v38 }
 0x72c   : > { %v10884_v13 = vpop.f32.mrf.mxu1  ;;  %v9638_v19 = vmax.f32 %v9590_v49, 0.0 }
 0x72d   : > { %16746 = vmatmul.mubr.f32.gmra.mxu0 %v9628_v47 }
 0x72e   : > { %16748 = vmatprep.mubr.f32.mxu0 %v9629_v32  ;;  %v16978_v4 = vpop.f32.mrf.mxu1 }
 0x72f   : > { %v9640_v4 = vmax.f32 %v9592_v63, 0.0 }
 0x730   : > { %v10892_v61 = vpop.f32.mrf.mxu1 }
 0x731   : > { %16749 = vmatmul.mubr.f32.gmra.mxu0 %v9630_v14  ;;  %v11123_v21 = vrot.slane %v10892_v61, 2  ;;  %v9594_v61 = vadd.f32 %v22308_v52, %v22422_v37  ;;  %v9597_v37 = vadd.f32 %v22308_v52, %v22448_v57  ;;  %v9600_v57 = vadd.f32 %v22308_v52, %v22458_v46 }
 0x732   : > { %16751 = vmatprep.mubr.f32.mxu0 %v9631_v5  ;;  %v16981_v18 = vpop.f32.mrf.mxu1 }
 0x733   : > { %v11155_v9 = vadd.f32 %v11123_v21, %v11091_v59  ;;  %v11124_v3 = vrot.slane %v16981_v18, 2  ;;  %v9642_v21 = vmax.f32 %v9594_v61, 0.0  ;;  %v9648_v45 = vmax.f32 %v9600_v57, 0.0 }
 0x734   : > { %v10901_v60 = vpop.f32.mrf.mxu1 }
 0x735   : > { %16752 = vmatmul.mubr.f32.gmra.mxu0 %v9632_v29  ;;  %11171 = vst [vmem:[#allocation2] sm:$0x3f] %v11155_v9  ;;  %v11156_v11 = vadd.f32 %v11124_v3, %v11092_v7  ;;  %v9641_v29 = vmax.f32 %v9593_v34, 0.0  ;;  %v9643_v9 = vmax.f32 %v9595_v1, 0.0  ;;  %v9645_v3 = vmax.f32 %v9597_v37, 0.0  ;;  %v17592_v34 = vld [vmem:[%s18190_s17] sm:$0xff] }
 0x736   : > { %16754 = vmatprep.mubr.f32.mxu0 %v9633_v27  ;;  %v16984_v2 = vpop.f32.mrf.mxu1  ;;  %v9596_v27 = vadd.f32 %v22308_v52, %v22430_v31  ;;  %v11095_v60 = vld [vmem:[#allocation2 + $0x60] sm:$0x3f] }
 0x737   : > { %11172 = vst [vmem:[#allocation2 + $0x18] sm:$0x3f] %v11156_v11  ;;  %v9646_v11 = vmax.f32 %v9598_v33, 0.0  ;;  %v17596_v1 = vld [vmem:[%s18190_s17 + $0x20] sm:$0xff] }
 0x738   : > { %v10910_v8 = vpop.f32.mrf.mxu1  ;;  %v9644_v7 = vmax.f32 %v9596_v27, 0.0  ;;  %v17598_v27 = vld [vmem:[%s18190_s17 + $0x30] sm:$0xff]  ;;  %v17600_v33 = vld [vmem:[%s18190_s17 + $0x40] sm:$0xff] }
 0x739   : > { %16755 = vmatmul.mubr.f32.gmra.mxu0 %v9634_v51  ;;  %v9599_v51 = vadd.f32 %v22308_v52, %v22464_v35 }
 0x73a   : > { %16757 = vmatprep.mubr.f32.mxu0 %v9635_v41  ;;  %v16987_v47 = vpop.f32.mrf.mxu1 }
 0x73b   : > { %v9647_v49 = vmax.f32 %v9599_v51, 0.0  ;;  %v9602_v47 = vadd.f32 %v22308_v52, %v22474_v42  ;;  %v17602_v51 = vld [vmem:[%s18190_s17 + $0x50] sm:$0xff] }
 0x73c   : > { %v10918_v32 = vpop.f32.mrf.mxu1 }
 0x73d   : > { %16758 = vmatmul.mubr.f32.gmra.mxu0 %v9636_v54  ;;  %v11125_v13 = vrot.slane %v10918_v32, 2  ;;  %v9650_v32 = vmax.f32 %v9602_v47, 0.0  ;;  %v17610_v47 = vld [vmem:[%s18190_s17 + $0x90] sm:$0xff] }
 0x73e   : > { %16760 = vmatprep.mubr.f32.mxu0 %v9637_v12  ;;  %v16990_v14 = vpop.f32.mrf.mxu1 }
 0x73f   : > { %v11157_v5 = vadd.f32 %v11125_v13, %v11093_v28  ;;  %v11126_v24 = vrot.slane %v16990_v14, 2  ;;  %v11097_v28 = vld [vmem:[#allocation2 + $0x90] sm:$0x3f]  ;;  %v11098_v14 = vld [vmem:[#allocation2 + $0xa8] sm:$0x3f] }
 0x740   : > { %v10927_v59 = vpop.f32.mrf.mxu1 }
 0x741   : > { %16761 = vmatmul.mubr.f32.gmra.mxu0 %v9638_v19  ;;  %11173 = vst [vmem:[#allocation2 + $0x30] sm:$0x3f] %v11157_v5  ;;  %v11158_v55 = vadd.f32 %v11126_v24, %v11094_v17  ;;  %v9649_v19 = vmax.f32 %v9601_v23, 0.0  ;;  %v17593_v5 = vld [vmem:[%s18190_s17 + $0x8] sm:$0xff]  ;;  %v17607_v23 = vld [vmem:[%s18190_s17 + $0x78] sm:$0xff] }
 0x742   : > { %16763 = vmatprep.mubr.f32.mxu0 %v9639_v6  ;;  %v16993_v26 = vpop.f32.mrf.mxu1 }
 0x743   : > { %11174 = vst [vmem:[#allocation2 + $0x48] sm:$0x3f] %v11158_v55  ;;  %v17597_v26 = vld [vmem:[%s18190_s17 + $0x28] sm:$0xff] }
 0x744   : > { %v10936_v30 = vpop.f32.mrf.mxu1 }
 0x745   : > { %16764 = vmatmul.mubr.f32.gmra.mxu0 %v9640_v4  ;;  %v17594_v4 = vld [vmem:[%s18190_s17 + $0x10] sm:$0xff]  ;;  %v11100_v30 = vld [vmem:[#allocation2 + $0xd8] sm:$0x3f] }
 0x746   : > { %16766 = vmatprep.mubr.f32.mxu0 %v9641_v29  ;;  %v16996_v18 = vpop.f32.mrf.mxu1  ;;  %v17595_v29 = vld [vmem:[%s18190_s17 + $0x18] sm:$0xff] }
 0x747   : > { %v17599_v18 = vld [vmem:[%s18190_s17 + $0x38] sm:$0xff] }
 0x748   : > { %v10944_v56 = vpop.f32.mrf.mxu1 }
 0x749   : > { %16767 = vmatmul.mubr.f32.gmra.mxu0 %v9642_v21  ;;  %v11127_v31 = vrot.slane %v10944_v56, 2 }
 0x74a   : > { %16769 = vmatprep.mubr.f32.mxu0 %v9643_v9  ;;  %v16999_v41 = vpop.f32.mrf.mxu1 }
 0x74b   : > { %v11159_v2 = vadd.f32 %v11127_v31, %v11095_v60  ;;  %v11128_v54 = vrot.slane %v16999_v41, 2  ;;  %v17603_v60 = vld [vmem:[%s18190_s17 + $0x58] sm:$0xff]  ;;  %v17604_v41 = vld [vmem:[%s18190_s17 + $0x60] sm:$0xff] }
 0x74c   : > { %v10953_v8 = vpop.f32.mrf.mxu1 }
 0x74d   : > { %16770 = vmatmul.mubr.f32.gmra.mxu0 %v9644_v7  ;;  %11175 = vst [vmem:[#allocation2 + $0x60] sm:$0x3f] %v11159_v2  ;;  %v11160_v35 = vadd.f32 %v11128_v54, %v11096_v40  ;;  %v11102_v40 = vld [vmem:[#allocation2 + $0x108] sm:$0x3f]  ;;  %v17608_v8 = vld [vmem:[%s18190_s17 + $0x80] sm:$0xff] }
 0x74e   : > { %16772 = vmatprep.mubr.f32.mxu0 %v9645_v3  ;;  %v17002_v12 = vpop.f32.mrf.mxu1  ;;  %v17601_v3 = vld [vmem:[%s18190_s17 + $0x48] sm:$0xff] }
 0x74f   : > { %11176 = vst [vmem:[#allocation2 + $0x78] sm:$0x3f] %v11160_v35  ;;  %v17605_v2 = vld [vmem:[%s18190_s17 + $0x68] sm:$0xff] }
 0x750   : > { %v10962_v46 = vpop.f32.mrf.mxu1  ;;  %v17609_v12 = vld [vmem:[%s18190_s17 + $0x88] sm:$0xff] }
 0x751   : > { %16773 = vmatmul.mubr.f32.gmra.mxu0 %v9646_v11 }
 0x752   : > { %16775 = vmatprep.mubr.f32.mxu0 %v9647_v49  ;;  %v17005_v63 = vpop.f32.mrf.mxu1  ;;  %v17606_v49 = vld [vmem:[%s18190_s17 + $0x70] sm:$0xff] }
 0x754   : > { %v10970_v38 = vpop.f32.mrf.mxu1 }
 0x755   : > { %16776 = vmatmul.mubr.f32.gmra.mxu0 %v9648_v45  ;;  %v11129_v6 = vrot.slane %v10970_v38, 2  ;;  %v17611_v38 = vld [vmem:[%s18190_s17 + $0x98] sm:$0xff] }
 0x756   : > { %16778 = vmatprep.mubr.f32.mxu0 %v9649_v19  ;;  %v17008_v13 = vpop.f32.mrf.mxu1 }
 0x757   : > { %v11161_v52 = vadd.f32 %v11129_v6, %v11097_v28  ;;  %v11130_v42 = vrot.slane %v17008_v13, 2  ;;  %v17612_v28 = vld [vmem:[%s18190_s17 + $0xa0] sm:$0xff]  ;;  %v17613_v13 = vld [vmem:[%s18190_s17 + $0xa8] sm:$0xff] }
 0x758   : > { %v10979_v17 = vpop.f32.mrf.mxu1 }
 0x759   : > { %16779 = vmatmul.mubr.f32.gmra.mxu0 %v9650_v32  ;;  %11177 = vst [vmem:[#allocation2 + $0x90] sm:$0x3f] %v11161_v52  ;;  %v11162_v24 = vadd.f32 %v11130_v42, %v11098_v14  ;;  %v17614_v14 = vld [vmem:[%s18190_s17 + $0xb0] sm:$0xff] }
 0x75a   : > { %16885 = vmatprep.mubr.msk.f32.mxu0 %vm594_vm1, %v17592_v34  ;;  %v17011_v61 = vpop.f32.mrf.mxu1  ;;  %v11105_v17 = vld [vmem:[#allocation2 + $0x150] sm:$0x3f] }
 0x75b   : > { %11178 = vst [vmem:[#allocation2 + $0xa8] sm:$0x3f] %v11162_v24 }
 0x75c   : > { %v10988_v59 = vpop.f32.mrf.mxu1 }
 0x75d   : > { %16886 = vmatmul.mubr.msk.f32.vlgmr.msra.gmra.mxu0 %vm594_vm1, %v17593_v5  ;;  %v17615_v5 = vld [vmem:[%s18190_s17 + $0xb8] sm:$0xff] }
 0x75e   : > { %16888 = vmatprep.mubr.msk.f32.mxu0 %vm594_vm1, %v17594_v4  ;;  %17046 = vmatpush3.msra.mxu0 %v22432_v22  ;;  %v17014_v22 = vpop.f32.mrf.mxu1  ;;  %v17616_v4 = vld [vmem:[%s18190_s17 + $0xc0] sm:$0xff] }
 0x75f   : > { %17047 = vmatprep.subr.mxu0 %v22444_v43 }
 0x760   : > { %17048 = vmatpush3.msra.mxu0 %v22444_v43  ;;  %v10996_v55 = vpop.f32.mrf.mxu1  ;;  %v11099_v43 = vld [vmem:[#allocation2 + $0xc0] sm:$0x3f] }
 0x761   : > { %16889 = vmatmul.mubr.msk.f32.gmra.mxu0 %vm594_vm1, %v17595_v29  ;;  %17049 = vmatprep.subr.mxu0 %v22450_v39  ;;  %v11131_v21 = vrot.slane %v10996_v55, 2  ;;  %v11106_v29 = vld [vmem:[#allocation2 + $0x168] sm:$0x3f]  ;;  %v17618_v55 = vld [vmem:[%s18190_s17 + $0xd0] sm:$0xff] }
 0x762   : > { %16891 = vmatprep.mubr.msk.f32.mxu0 %vm594_vm1, %v17596_v1  ;;  %17050 = vmatpush3.msra.mxu0 %v22450_v39  ;;  %v17017_v39 = vpop.f32.mrf.mxu1  ;;  %v17617_v1 = vld [vmem:[%s18190_s17 + $0xc8] sm:$0xff] }
 0x763   : > { %17051 = vmatprep.subr.mxu0 %v22460_v20  ;;  %v11132_v9 = vrot.slane %v17017_v39, 2  ;;  %v17621_v39 = vld [vmem:[%s18190_s17 + $0xe8] sm:$0xff] }
 0x764   : > { %17052 = vmatpush3.msra.mxu0 %v22460_v20  ;;  %v11163_v20 = vadd.f32 %v11131_v21, %v11099_v43  ;;  %v11005_v37 = vpop.f32.mrf.mxu1  ;;  %v17619_v21 = vld [vmem:[%s18190_s17 + $0xd8] sm:$0xff] }
 0x765   : > { %16892 = vmatmul.mubr.msk.f32.gmra.mxu0 %vm594_vm1, %v17597_v26  ;;  %17053 = vmatprep.subr.mxu0 %v22466_v58  ;;  %v11164_v7 = vadd.f32 %v11132_v9, %v11100_v30  ;;  %v17622_v30 = vld [vmem:[%s18190_s17 + $0xf0] sm:$0xff]  ;;  %v17624_v9 = vld [vmem:[%s18190_s17 + $0x100] sm:$0xff]  ;;  %v17625_v37 = vld [vmem:[%s18190_s17 + $0x108] sm:$0xff] }
 0x766   : > { %16894 = vmatprep.mubr.msk.f32.mxu0 %vm594_vm1, %v17598_v27  ;;  %17054 = vmatpush3.msra.mxu0 %v22466_v58  ;;  %11179 = vst [vmem:[#allocation2 + $0xc0] sm:$0x3f] %v11163_v20  ;;  %v17020_v58 = vpop.f32.mrf.mxu1  ;;  %v17620_v27 = vld [vmem:[%s18190_s17 + $0xe0] sm:$0xff]  ;;  %v17623_v20 = vld [vmem:[%s18190_s17 + $0xf8] sm:$0xff] }
 0x767   : > { %17055 = vmatprep.subr.mxu0 %v22476_v48  ;;  %11180 = vst [vmem:[#allocation2 + $0xd8] sm:$0x3f] %v11164_v7  ;;  %v17627_v7 = vld [vmem:[%s18190_s17 + $0x118] sm:$0xff]  ;;  %v17629_v58 = vld [vmem:[%s18190_s17 + $0x128] sm:$0xff] }
 0x768   : > { %17056 = vmatpush3.msra.mxu0 %v22476_v48  ;;  %v11014_v48 = vpop.f32.mrf.mxu1 }
 0x769   : > { %16895 = vmatmul.mubr.msk.f32.gmra.mxu0 %vm594_vm1, %v17599_v18  ;;  %17057 = vmatprep.subr.mxu0 %v22482_v36  ;;  %v17626_v18 = vld [vmem:[%s18190_s17 + $0x110] sm:$0xff] }
 0x76a   : > { %16897 = vmatprep.mubr.msk.f32.mxu0 %vm594_vm1, %v17600_v33  ;;  %17058 = vmatpush3.msra.mxu0 %v22482_v36  ;;  %v17023_v36 = vpop.f32.mrf.mxu1  ;;  %v17628_v33 = vld [vmem:[%s18190_s17 + $0x120] sm:$0xff]  ;;  %v17630_v48 = vld [vmem:[%s18190_s17 + $0x130] sm:$0xff] }
 0x76b   : > { %17059 = vmatprep.subr.mxu0 %v22490_v16  ;;  %v17633_v36 = vld [vmem:[%s18190_s17 + $0x148] sm:$0xff] }
 0x76c   : > { %17060 = vmatpush3.msra.mxu0 %v22490_v16  ;;  %v11022_v56 = vpop.f32.mrf.mxu1  ;;  %v11101_v16 = vld [vmem:[#allocation2 + $0xf0] sm:$0x3f] }
 0x76d   : > { %16898 = vmatmul.mubr.msk.f32.gmra.mxu0 %vm594_vm1, %v17601_v3  ;;  %17061 = vmatprep.subr.mxu0 %v22494_v10  ;;  %v11133_v31 = vrot.slane %v11022_v56, 2  ;;  %v17631_v3 = vld [vmem:[%s18190_s17 + $0x138] sm:$0xff]  ;;  %v17634_v56 = vld [vmem:[%s18190_s17 + $0x150] sm:$0xff] }
 0x76e   : > { %16900 = vmatprep.mubr.msk.f32.mxu0 %vm594_vm1, %v17602_v51  ;;  %17062 = vmatpush3.msra.mxu0 %v22494_v10  ;;  %v17026_v10 = vpop.f32.mrf.mxu1  ;;  %v17632_v51 = vld [vmem:[%s18190_s17 + $0x140] sm:$0xff] }
 0x76f   : > { %17063 = vmatprep.subr.mxu0 %v22502_v50  ;;  %v11134_v11 = vrot.slane %v17026_v10, 2 }
 0x770   : > { %17064 = vmatpush3.msra.mxu0 %v22502_v50  ;;  %v11165_v50 = vadd.f32 %v11133_v31, %v11101_v16  ;;  %v11031_v57 = vpop.f32.mrf.mxu1  ;;  %v11187_v16 = vld [vmem:[#allocation2] sm:$0xff]  ;;  %v17635_v31 = vld [vmem:[%s18190_s17 + $0x158] sm:$0xff] }
 0x771   : > { %16901 = vmatmul.mubr.msk.f32.gmra.mxu0 %vm594_vm1, %v17603_v60  ;;  %17065 = vmatprep.subr.mxu0 %v22506_v0  ;;  %v11166_v54 = vadd.f32 %v11134_v11, %v11102_v40  ;;  %v22685_v60 = vld [vmem:[%s23100_s8] ss:$0 sm:$0xff]  ;;  %v17637_v40 = vld [vmem:[%s18190_s17 + $0x168] sm:$0xff] }
 0x772   : > { %16903 = vmatprep.mubr.msk.f32.mxu0 %vm594_vm1, %v17604_v41  ;;  %17066 = vmatpush3.msra.mxu0 %v22506_v0  ;;  %11181 = vst [vmem:[#allocation2 + $0xf0] sm:$0x3f] %v11165_v50  ;;  %v17029_v0 = vpop.f32.mrf.mxu1  ;;  %v17636_v41 = vld [vmem:[%s18190_s17 + $0x160] sm:$0xff]  ;;  %v11242_v10 = vadd.f32 %v22685_v60, %v11187_v16  ;;  %v17638_v50 = vld [vmem:[%s18190_s17 + $0x170] sm:$0xff]  ;;  %v17639_v57 = vld [vmem:[#allocation2 + $0x8] sm:$0xff] }
 0x773   : > { %17067 = vmatprep.subr.mxu0 %v22514_v25  ;;  %11182 = vst [vmem:[#allocation2 + $0x108] sm:$0x3f] %v11166_v54  ;;  %v17640_v54 = vld [vmem:[%s18190_s17 + $0x178] sm:$0xff]  ;;  %v23454_v0 = vld [vmem:[#allocation45_spill] sm:$0xff]  ;;  %s22887_s17 = scalar_lea.vmem [#allocation16], %s17183_s24  ;;  %s17184_s24 = smul.u32 6144, %s18015_s14 }
 0x774   : > { %17068 = vmatpush3.msra.mxu0 %v22514_v25  ;;  %v11040_v25 = vpop.f32.mrf.mxu1  ;;  %v11290_v11 = vmax.f32 %v11242_v10, 0.0  ;;  %s12017_s5 = sshll.u32 %s22887_s17, 4  ;;  %s12004_s14 = scalar_lea.sflag [#allocation6], %s18184_s23  ;;  %s23048_s5 = int_to_ptr.vmem [resolvable:$true] %s12017_s5 }
 0x775   : > { %16904 = vmatmul.mubr.msk.f32.gmra.mxu0 %vm594_vm1, %v17605_v2  ;;  %17069 = vmatprep.subr.mxu0 %v22518_v62  ;;  %v11243_v2 = vadd.f32 %v17639_v57, %v22685_v60  ;;  %s23045_s22 = scalar_lea.hbm %s23105_s13, %s17184_s24  ;;  %s17832_s18 = scalar_lea.vmem %s23048_s5, 6144 }
 0x776   : > { %16906 = vmatprep.mubr.msk.f32.mxu0 %vm594_vm1, %v17606_v49  ;;  %17070 = vmatpush3.msra.mxu0 %v22518_v62  ;;  %v17032_v62 = vpop.f32.mrf.mxu1  ;;  %p17833_p8 = scmp.ne.s32.totalorder %s23048_s5, %s17832_s18  ;;  %p17839_p13 = scmp.lt.s32.totalorder %s23048_s5, %s17837_s30 }
 0x777   : > { %17071 = vmatprep.subr.mxu0 %v22526_v44  ;;  %p17840_p5 = scmp.lt.s32.totalorder %s17838_s1, %s17832_s18 }
 0x778   : > { %17072 = vmatpush3.msra.mxu0 %v22526_v44  ;;  %v11048_v35 = vpop.f32.mrf.mxu1  ;;  %v11103_v44 = vld [vmem:[#allocation2 + $0x120] sm:$0x3f]  ;;  %p17834_p10 = pnand %p17833_p8, %p23512_p6 }
 0x779   : > { %16907 = vmatmul.mubr.msk.f32.gmra.mxu0 %vm594_vm1, %v17607_v23  ;;  %17073 = vmatprep.subr.mxu0 %v22530_v53  ;;  %v11135_v45 = vrot.slane %v11048_v35, 2  ;;  %v11291_v23 = vmax.f32 %v11243_v2, 0.0  ;;  %v23455_v35 = vld [vmem:[#allocation24_spill] sm:$0xff]  ;;  %v23469_v2 = vld [vmem:[#allocation51_spill] sm:$0xff]  ;;  %p17841_p1 = por %p17840_p5, %p17839_p13 }
 0x77a   : > { %16909 = vmatprep.mubr.msk.f32.mxu0 %vm594_vm1, %v17608_v8  ;;  %17074 = vmatpush3.msra.mxu0 %v22530_v53  ;;  %v17035_v19 = vpop.f32.mrf.mxu1  ;;  %v11104_v53 = vld [vmem:[#allocation2 + $0x138] sm:$0x3f]  ;;  %p17835_p11 = pneg %p17834_p10 }
 0x77b   : > { %17075 = vmatprep.subr.mxu0 %v22538_v15  ;;  %v11167_v46 = vadd.f32 %v11135_v45, %v11103_v44  ;;  %v11136_v63 = vrot.slane %v17035_v19, 2 }
 0x77c   : > { %17076 = vmatpush3.msra.mxu0 %v22538_v15  ;;  %v11057_v32 = vpop.f32.mrf.mxu1  ;;  %p17842_p3 = pnand %p17841_p1, %p17835_p11 }
 0x77d   : > { %16910 = vmatmul.mubr.msk.f32.gmra.mxu0 %vm594_vm1, %v17609_v12  ;;  %11183 = vst [vmem:[#allocation2 + $0x120] sm:$0x3f] %v11167_v46  ;;  %v11168_v15 = vadd.f32 %v11136_v63, %v11104_v53  ;;  %v23457_v63 = vld [vmem:[#allocation28_spill] sm:$0xff] }
 0x77e   : > { %16912 = vmatprep.mubr.msk.f32.mxu0 %vm594_vm1, %v17610_v47  ;;  %v17038_v6 = vpop.f32.mrf.mxu1  ;;  %v23456_v47 = vld [vmem:[#allocation26_spill] sm:$0xff] }
 0x77f   : > { %11184 = vst [vmem:[#allocation2 + $0x138] sm:$0x3f] %v11168_v15 }
 0x780   : > { %v11066_v34 = vpop.f32.mrf.mxu1 }
 0x781   : > { %16913 = vmatmul.mubr.msk.f32.gmra.mxu0 %vm594_vm1, %v17611_v38 }
 0x782   : > { %16915 = vmatprep.mubr.msk.f32.mxu0 %vm594_vm1, %v17612_v28  ;;  %v17041_v52 = vpop.f32.mrf.mxu1  ;;  %v23458_v28 = vld [vmem:[#allocation36_spill] sm:$0xff] }
 0x784   : > { %v11074_v42 = vpop.f32.mrf.mxu1 }
 0x785   : > { %16916 = vmatmul.mubr.msk.f32.gmra.mxu0 %vm594_vm1, %v17613_v13  ;;  %v11137_v24 = vrot.slane %v11074_v42, 2 }
 0x786   : > { %16918 = vmatprep.mubr.msk.f32.mxu0 %vm594_vm1, %v17614_v14  ;;  %v17044_v59 = vpop.f32.mrf.mxu1  ;;  %v23459_v14 = vld [vmem:[#allocation38_spill] sm:$0xff] }
 0x787   : > { %v11169_v61 = vadd.f32 %v11137_v24, %v11105_v17  ;;  %v11138_v22 = vrot.slane %v17044_v59, 2  ;;  %v23461_v59 = vld [vmem:[#allocation41_spill] sm:$0xff] }
 0x788   : > { %v11083_v43 = vpop.f32.mrf.mxu1 }
 0x789   : > { %16919 = vmatmul.mubr.msk.f32.gmra.mxu0 %vm594_vm1, %v17615_v5  ;;  %11185 = vst [vmem:[#allocation2 + $0x150] sm:$0x3f] %v11169_v61  ;;  %v11170_v26 = vadd.f32 %v11138_v22, %v11106_v29  ;;  %v23460_v5 = vld [vmem:[#allocation30_spill] sm:$0xff] }
 0x78a   : > { %16921 = vmatprep.mubr.msk.f32.mxu0 %vm594_vm1, %v17616_v4 }
 0x78b   : > { %11186 = vst [vmem:[#allocation2 + $0x168] sm:$0x3f] %v11170_v26 }
 0x78d   : > { %16922 = vmatmul.mubr.msk.f32.gmra.mxu0 %vm594_vm1, %v17617_v1 }
 0x78e   : > { %16924 = vmatprep.mubr.msk.f32.mxu0 %vm594_vm1, %v17618_v55  ;;  %v23462_v55 = vld [vmem:[#allocation33_spill] sm:$0xff] }
 0x791   : > { %16925 = vmatmul.mubr.msk.f32.gmra.mxu0 %vm594_vm1, %v17619_v21 }
 0x792   : > { %16927 = vmatprep.mubr.msk.f32.mxu0 %vm594_vm1, %v17620_v27  ;;  %v23463_v27 = vld [vmem:[#allocation37_spill] sm:$0xff] }
 0x795   : > { %16928 = vmatmul.mubr.msk.f32.gmra.mxu0 %vm594_vm1, %v17621_v39 }
 0x796   : > { %16930 = vmatprep.mubr.msk.f32.mxu0 %vm594_vm1, %v17622_v30 }
 0x799   : > { %16931 = vmatmul.mubr.msk.f32.gmra.mxu0 %vm594_vm1, %v17623_v20 }
 0x79a   : > { %16933 = vmatprep.mubr.msk.f32.mxu0 %vm594_vm1, %v17624_v9  ;;  %v23464_v9 = vld [vmem:[#allocation39_spill] sm:$0xff] }
 0x79d   : > { %16934 = vmatmul.mubr.msk.f32.gmra.mxu0 %vm594_vm1, %v17625_v37 }
 0x79e   : > { %16936 = vmatprep.mubr.msk.f32.mxu0 %vm594_vm1, %v17626_v18 }
 0x7a1   : > { %16937 = vmatmul.mubr.msk.f32.gmra.mxu0 %vm594_vm1, %v17627_v7 }
 0x7a2   : > { %16939 = vmatprep.mubr.msk.f32.mxu0 %vm594_vm1, %v17628_v33  ;;  %v23465_v33 = vld [vmem:[#allocation44_spill] sm:$0xff] }
 0x7a5   : > { %16940 = vmatmul.mubr.msk.f32.gmra.mxu0 %vm594_vm1, %v17629_v58 }
 0x7a6   : > { %16942 = vmatprep.mubr.msk.f32.mxu0 %vm594_vm1, %v17630_v48 }
 0x7a9   : > { %16943 = vmatmul.mubr.msk.f32.gmra.mxu0 %vm594_vm1, %v17631_v3 }
 0x7aa   : > { %16945 = vmatprep.mubr.msk.f32.mxu0 %vm594_vm1, %v17632_v51  ;;  %v23466_v51 = vld [vmem:[#allocation46_spill] sm:$0xff] }
 0x7ad   : > { %16946 = vmatmul.mubr.msk.f32.gmra.mxu0 %vm594_vm1, %v17633_v36 }
 0x7ae   : > { %16948 = vmatprep.mubr.msk.f32.mxu0 %vm594_vm1, %v17634_v56 }
 0x7b1   : > { %16949 = vmatmul.mubr.msk.f32.gmra.mxu0 %vm594_vm1, %v17635_v31  ;;  %v23467_v31 = vld [vmem:[#allocation48_spill] sm:$0xff] }
 0x7b2   : > { %16951 = vmatprep.mubr.msk.f32.mxu0 %vm594_vm1, %v17636_v41 }
 0x7b5   : > { %16952 = vmatmul.mubr.msk.f32.gmra.mxu0 %vm594_vm1, %v17637_v40 }
 0x7b6   : > { %16954 = vmatprep.mubr.msk.f32.mxu0 %vm594_vm1, %v17638_v50  ;;  %v23468_v50 = vld [vmem:[#allocation50_spill] sm:$0xff] }
 0x7b9   : > { %16955 = vmatmul.mubr.msk.f32.gmra.mxu0 %vm594_vm1, %v17640_v54 }
 0x7ba   : > { %17077 = vmatprep.mubr.f32.mxu0 %v11290_v11  ;;  %v16711_v49 = vpop.f32.mrf.mxu0 }
 0x7bb   : > { %v22700_v25 = vadd.f32 %v16711_v49, %v23454_v0  ;;  %v23470_v0 = vld [vmem:[#allocation52_spill] sm:$0xff] }
 0x7bc   : > { %v22702_v8 = vpop.f32.mrf.mxu0 }
 0x7bd   : > { %17078 = vmatmul.mubr.f32.vlgmr.msra.gmra.mxu0 %v11291_v23 }
 0x7be   : > { %v16714_v62 = vpop.f32.mrf.mxu0 }
 0x7bf   : > { %v22705_v44 = vadd.f32 %v16714_v62, %v23455_v35  ;;  %v23471_v35 = vld [vmem:[#allocation53_spill] sm:$0xff] }
 0x7c0   : > { %v22707_v12 = vpop.f32.mrf.mxu0 }
 0x7c5   : > { %v16717_v45 = vpop.f32.mrf.mxu0 }
 0x7c6   : > { %v22710_v19 = vadd.f32 %v16717_v45, %v23456_v47 }
 0x7c7   : > { %v22712_v53 = vpop.f32.mrf.mxu0 }
 0x7c9   : > { %v16720_v46 = vpop.f32.mrf.mxu0 }
 0x7ca   : > { %v22715_v32 = vadd.f32 %v16720_v46, %v23457_v63  ;;  %v23472_v46 = vld [vmem:[#allocation54_spill] sm:$0xff] }
 0x7cb   : > { %v22717_v38 = vpop.f32.mrf.mxu0 }
 0x7cd   : > { %v16723_v15 = vpop.f32.mrf.mxu0 }
 0x7ce   : > { %v22720_v6 = vadd.f32 %v16723_v15, %v23458_v28  ;;  %v23473_v28 = vld [vmem:[#allocation55_spill] sm:$0xff] }
 0x7cf   : > { %v22722_v34 = vpop.f32.mrf.mxu0 }
 0x7d1   : > { %v16726_v13 = vpop.f32.mrf.mxu0 }
 0x7d2   : > { %v22725_v52 = vadd.f32 %v16726_v13, %v23459_v14 }
 0x7d3   : > { %v22727_v42 = vpop.f32.mrf.mxu0 }
 0x7d5   : > { %v16729_v17 = vpop.f32.mrf.mxu0 }
 0x7d6   : > { %v22730_v24 = vadd.f32 %v16729_v17, %v23460_v5  ;;  %v23474_v17 = vld [vmem:[#allocation56_spill] sm:$0xff] }
 0x7d7   : > { %v22732_v4 = vpop.f32.mrf.mxu0 }
 0x7d9   : > { %v16732_v61 = vpop.f32.mrf.mxu0 }
 0x7da   : > { %v22735_v29 = vadd.f32 %v16732_v61, %v23461_v59  ;;  %v23475_v59 = vld [vmem:[#allocation57_spill] sm:$0xff] }
 0x7db   : > { %v22737_v1 = vpop.f32.mrf.mxu0 }
 0x7dd   : > { %v16735_v22 = vpop.f32.mrf.mxu0 }
 0x7de   : > { %v22740_v43 = vadd.f32 %v16735_v22, %v23462_v55 }
 0x7df   : > { %v22742_v26 = vpop.f32.mrf.mxu0 }
 0x7e1   : > { %v16738_v21 = vpop.f32.mrf.mxu0 }
 0x7e2   : > { %v22745_v39 = vadd.f32 %v16738_v21, %v23463_v27  ;;  %v23476_v21 = vld [vmem:[#allocation58_spill] sm:$0xff] }
 0x7e3   : > { %v22747_v30 = vpop.f32.mrf.mxu0 }
 0x7e5   : > { %v16741_v20 = vpop.f32.mrf.mxu0 }
 0x7e6   : > { %v22750_v37 = vadd.f32 %v16741_v20, %v23464_v9  ;;  %v23477_v9 = vld [vmem:[#allocation59_spill] sm:$0xff] }
 0x7e7   : > { %v22752_v18 = vpop.f32.mrf.mxu0 }
 0x7e9   : > { %v16744_v7 = vpop.f32.mrf.mxu0 }
 0x7ea   : > { %v22755_v58 = vadd.f32 %v16744_v7, %v23465_v33 }
 0x7eb   : > { %v22757_v48 = vpop.f32.mrf.mxu0 }
 0x7ed   : > { %v16747_v3 = vpop.f32.mrf.mxu0 }
 0x7ee   : > { %v22760_v36 = vadd.f32 %v16747_v3, %v23466_v51  ;;  %v23478_v3 = vld [vmem:[#allocation60_spill] sm:$0xff] }
 0x7ef   : > { %v22762_v56 = vpop.f32.mrf.mxu0 }
 0x7f1   : > { %v16750_v16 = vpop.f32.mrf.mxu0 }
 0x7f2   : > { %v22765_v41 = vadd.f32 %v16750_v16, %v23467_v31  ;;  %v23479_v31 = vld [vmem:[#allocation61_spill] sm:$0xff] }
 0x7f3   : > { %v22767_v10 = vpop.f32.mrf.mxu0 }
 0x7f5   : > { %v16753_v40 = vpop.f32.mrf.mxu0 }
 0x7f6   : > { %v22770_v11 = vadd.f32 %v16753_v40, %v23468_v50 }
 0x7f7   : > { %v9922_v57 = vpop.f32.mrf.mxu0 }
 0x7f8   : > { %v22773_v54 = vadd.f32 %v9922_v57, %v23469_v2  ;;  %v23480_v57 = vld [vmem:[#allocation62_spill] sm:$0xff] }
 0x7f9   : > { %v16756_v49 = vpop.f32.mrf.mxu0 }
 0x7fa   : > { %v22776_v23 = vadd.f32 %v16756_v49, %v23470_v0  ;;  %v23481_v0 = vld [vmem:[#allocation66_spill] sm:$0xff] }
 0x7fb   : > { %v9932_v62 = vpop.f32.mrf.mxu0 }
 0x7fc   : > { %v22779_v45 = vadd.f32 %v9932_v62, %v23471_v35 }
 0x7fd   : > { %v16759_v47 = vpop.f32.mrf.mxu0 }
 0x7fe   : > { %v22782_v63 = vadd.f32 %v16759_v47, %v23472_v46  ;;  %v23482_v47 = vld [vmem:[#allocation65_spill] sm:$0xff] }
 0x7ff   : > { %v9942_v15 = vpop.f32.mrf.mxu0 }
 0x800   : > { %v22785_v13 = vadd.f32 %v9942_v15, %v23473_v28  ;;  %v23483_v28 = vld [vmem:[#allocation68_spill] sm:$0xff] }
 0x801   : > { %v16762_v14 = vpop.f32.mrf.mxu0 }
 0x802   : > { %v22788_v5 = vadd.f32 %v16762_v14, %v23474_v17 }
 0x803   : > { %v9952_v61 = vpop.f32.mrf.mxu0 }
 0x804   : > { %v22791_v22 = vadd.f32 %v9952_v61, %v23475_v59  ;;  %v23485_v61 = vld [vmem:[#allocation67_spill] sm:$0xff] }
 0x805   : > { %v16765_v55 = vpop.f32.mrf.mxu0 }
 0x806   : > { %v22794_v27 = vadd.f32 %v16765_v55, %v23476_v21  ;;  %v23487_v21 = vld [vmem:[#allocation70_spill] sm:$0xff] }
 0x807   : > { %v9962_v20 = vpop.f32.mrf.mxu0 }
 0x808   : > { %v22797_v7 = vadd.f32 %v9962_v20, %v23477_v9 }
 0x809   : > { %v16768_v33 = vpop.f32.mrf.mxu0 }
 0x80a   : > { %v22800_v51 = vadd.f32 %v16768_v33, %v23478_v3  ;;  %v23489_v33 = vld [vmem:[#allocation69_spill] sm:$0xff] }
 0x80b   : > { %v9972_v16 = vpop.f32.mrf.mxu0 }
 0x80c   : > { %v22803_v40 = vadd.f32 %v9972_v16, %v23479_v31  ;;  %v23491_v31 = vld [vmem:[#allocation72_spill] sm:$0xff] }
 0x80d   : > { %v16771_v50 = vpop.f32.mrf.mxu0 }
 0x80e   : > { %v22806_v2 = vadd.f32 %v16771_v50, %v23480_v57 }
 0x80f   : > { %v9982_v49 = vpop.f32.mrf.mxu0 }
 0x810   : > { %v22809_v62 = vadd.f32 %v9982_v49, %v23481_v0  ;;  %v10761_v0 = vld [vmem:[#allocation2 + $0x12] sm:$0x3f] }
 0x811   : > { %v16774_v35 = vpop.f32.mrf.mxu0 }
 0x812   : > { %v22812_v46 = vadd.f32 %v16774_v35, %v23482_v47 }
 0x813   : > { %v9992_v15 = vpop.f32.mrf.mxu0 }
 0x814   : > { %v22815_v14 = vadd.f32 %v9992_v15, %v23483_v28  ;;  %v10762_v15 = vld [vmem:[#allocation2 + $0x2a] sm:$0x3f] }
 0x815   : > { %v16777_v17 = vpop.f32.mrf.mxu0 }
 0x816   : > { %23484 = vst [vmem:[#allocation71_spill] sm:$0xff] %v22815_v14  ;;  %v22818_v59 = vadd.f32 %v16777_v17, %v23485_v61  ;;  %v17642_v14 = vld [vmem:[#allocation2 + $0x38] sm:$0xff] }
 0x817   : > { %v10002_v55 = vpop.f32.mrf.mxu0 }
 0x818   : > { %23486 = vst [vmem:[#allocation74_spill] sm:$0xff] %v22818_v59  ;;  %v22821_v20 = vadd.f32 %v10002_v55, %v23487_v21  ;;  %v11190_v55 = vld [vmem:[#allocation2 + $0x18] sm:$0xff] }
 0x819   : > { %v16780_v9 = vpop.f32.mrf.mxu0 }
 0x81a   : > { %23488 = vst [vmem:[#allocation73_spill] sm:$0xff] %v22821_v20  ;;  %v22824_v3 = vadd.f32 %v16780_v9, %v23489_v33  ;;  %v11245_v33 = vadd.f32 %v22685_v60, %v11190_v55 }
 0x81b   : > { %v10012_v16 = vpop.f32.mrf.mxu0 }
 0x81c   : > { %23490 = vst [vmem:[#allocation76_spill] sm:$0xff] %v22824_v3  ;;  %v22827_v50 = vadd.f32 %v10012_v16, %v23491_v31  ;;  %v17641_v31 = vld [vmem:[#allocation2 + $0x20] sm:$0xff]  ;;  %v11193_v3 = vld [vmem:[#allocation2 + $0x30] sm:$0xff] }
 0x81d   : > { %v16887_v57 = vpop.f32.mrf.mxu0 }
 0x81e   : > { %23492 = vst [vmem:[#allocation75_spill] sm:$0xff] %v22827_v50  ;;  %v11246_v57 = vadd.f32 %v17641_v31, %v22685_v60 }
 0x81f   : > { %v10554_v49 = vpop.f32.mrf.mxu0 }
 0x820   : > { %v10777_v35 = vadd.f32 %v10761_v0, %v10554_v49  ;;  %v10763_v49 = vld [vmem:[#allocation2 + $0x42] sm:$0x3f]  ;;  %v11294_v55 = vmax.f32 %v11246_v57, 0.0 }
 0x821   : > { %v16890_v47 = vpop.f32.mrf.mxu0 }
 0x822   : > { %10793 = vst [vmem:[#allocation2 + $0x12] sm:$0x3f] %v10777_v35  ;;  %v10778_v28 = vadd.f32 %v16890_v47, %v10762_v15 }
 0x823   : > { %v10563_v17 = vpop.f32.mrf.mxu0 }
 0x824   : > { %10794 = vst [vmem:[#allocation2 + $0x2a] sm:$0x3f] %v10778_v28  ;;  %v10764_v28 = vld [vmem:[#allocation2 + $0x5a] sm:$0x3f]  ;;  %v11293_v17 = vmax.f32 %v11245_v33, 0.0 }
 0x825   : > { %v16893_v61 = vpop.f32.mrf.mxu0 }
 0x827   : > { %v10572_v21 = vpop.f32.mrf.mxu0 }
 0x828   : > { %v11248_v21 = vadd.f32 %v22685_v60, %v11193_v3 }
 0x829   : > { %v16896_v20 = vpop.f32.mrf.mxu0  ;;  %v11189_v9 = vld [vmem:[#allocation2 + $0x10] sm:$0xff] }
 0x82a   : > { %v11244_v16 = vadd.f32 %v22685_v60, %v11189_v9 }
 0x82b   : > { %v10580_v50 = vpop.f32.mrf.mxu0  ;;  %v11192_v0 = vld [vmem:[#allocation2 + $0x28] sm:$0xff] }
 0x82c   : > { %v10779_v35 = vadd.f32 %v10763_v49, %v10580_v50  ;;  %v11292_v47 = vmax.f32 %v11244_v16, 0.0  ;;  %v11247_v61 = vadd.f32 %v22685_v60, %v11192_v0  ;;  %v11249_v50 = vadd.f32 %v17642_v14, %v22685_v60  ;;  %v11196_v49 = vld [vmem:[#allocation2 + $0x48] sm:$0xff]  ;;  %v11199_v14 = vld [vmem:[#allocation2 + $0x60] sm:$0xff] }
 0x82d   : > { %v16899_v15 = vpop.f32.mrf.mxu0  ;;  %v11296_v16 = vmax.f32 %v11248_v21, 0.0  ;;  %v11251_v57 = vadd.f32 %v22685_v60, %v11196_v49 }
 0x82e   : > { %10795 = vst [vmem:[#allocation2 + $0x42] sm:$0x3f] %v10779_v35  ;;  %v10780_v20 = vadd.f32 %v16899_v15, %v10764_v28  ;;  %17080 = vmatprep.mubr.f32.mxu0 %v11292_v47  ;;  %v11295_v59 = vmax.f32 %v11247_v61, 0.0  ;;  %v11297_v35 = vmax.f32 %v11249_v50, 0.0  ;;  %v17643_v15 = vld [vmem:[#allocation2 + $0x50] sm:$0xff] }
 0x82f   : > { %v10589_v9 = vpop.f32.mrf.mxu0  ;;  %17081 = vmatmul.mubr.f32.gmra.mxu0 %v11293_v17  ;;  %v11252_v28 = vadd.f32 %v17643_v15, %v22685_v60  ;;  %v10765_v61 = vld [vmem:[#allocation2 + $0x72] sm:$0x3f]  ;;  %v17644_v15 = vld [vmem:[#allocation2 + $0x68] sm:$0xff] }
 0x830   : > { %10796 = vst [vmem:[#allocation2 + $0x5a] sm:$0x3f] %v10780_v20  ;;  %17083 = vmatprep.mubr.f32.mxu0 %v11294_v55 }
 0x831   : > { %v16902_v31 = vpop.f32.mrf.mxu0  ;;  %v11300_v49 = vmax.f32 %v11252_v28, 0.0 }
 0x832   : > { %v11299_v31 = vmax.f32 %v11251_v57, 0.0 }
 0x833   : > { %v10598_v33 = vpop.f32.mrf.mxu0  ;;  %17084 = vmatmul.mubr.f32.gmra.mxu0 %v11295_v59  ;;  %v10766_v59 = vld [vmem:[#allocation2 + $0x8a] sm:$0x3f] }
 0x834   : > { %17086 = vmatprep.mubr.f32.mxu0 %v11296_v16  ;;  %v11254_v33 = vadd.f32 %v22685_v60, %v11199_v14 }
 0x835   : > { %v16905_v0 = vpop.f32.mrf.mxu0  ;;  %v11195_v47 = vld [vmem:[#allocation2 + $0x40] sm:$0xff] }
 0x836   : > { %v11250_v3 = vadd.f32 %v22685_v60, %v11195_v47 }
 0x837   : > { %v10606_v17 = vpop.f32.mrf.mxu0  ;;  %17087 = vmatmul.mubr.f32.gmra.mxu0 %v11297_v35  ;;  %v11198_v20 = vld [vmem:[#allocation2 + $0x58] sm:$0xff] }
 0x838   : > { %v10781_v55 = vadd.f32 %v10765_v61, %v10606_v17  ;;  %v11298_v21 = vmax.f32 %v11250_v3, 0.0  ;;  %v11253_v50 = vadd.f32 %v22685_v60, %v11198_v20  ;;  %v11255_v3 = vadd.f32 %v17644_v15, %v22685_v60  ;;  %v11202_v61 = vld [vmem:[#allocation2 + $0x78] sm:$0xff] }
 0x839   : > { %v16908_v9 = vpop.f32.mrf.mxu0  ;;  %v11302_v17 = vmax.f32 %v11254_v33, 0.0  ;;  %v11257_v28 = vadd.f32 %v22685_v60, %v11202_v61 }
 0x83a   : > { %10797 = vst [vmem:[#allocation2 + $0x72] sm:$0x3f] %v10781_v55  ;;  %v10782_v16 = vadd.f32 %v16908_v9, %v10766_v59  ;;  %17089 = vmatprep.mubr.f32.mxu0 %v11298_v21  ;;  %v11301_v47 = vmax.f32 %v11253_v50, 0.0  ;;  %v11303_v55 = vmax.f32 %v11255_v3, 0.0  ;;  %v17645_v9 = vld [vmem:[#allocation2 + $0x80] sm:$0xff] }
 0x83b   : > { %v10615_v0 = vpop.f32.mrf.mxu0  ;;  %17090 = vmatmul.mubr.f32.gmra.mxu0 %v11299_v31  ;;  %v11258_v59 = vadd.f32 %v17645_v9, %v22685_v60  ;;  %v10767_v50 = vld [vmem:[#allocation2 + $0xa2] sm:$0x3f]  ;;  %v11305_v15 = vmax.f32 %v11257_v28, 0.0  ;;  %v17646_v9 = vld [vmem:[#allocation2 + $0x98] sm:$0xff] }
 0x83c   : > { %10798 = vst [vmem:[#allocation2 + $0x8a] sm:$0x3f] %v10782_v16  ;;  %17092 = vmatprep.mubr.f32.mxu0 %v11300_v49  ;;  %v11205_v49 = vld [vmem:[#allocation2 + $0x90] sm:$0xff] }
 0x83d   : > { %v16911_v35 = vpop.f32.mrf.mxu0  ;;  %v11306_v61 = vmax.f32 %v11258_v59, 0.0 }
 0x83f   : > { %v10624_v57 = vpop.f32.mrf.mxu0  ;;  %17093 = vmatmul.mubr.f32.gmra.mxu0 %v11301_v47  ;;  %v10768_v47 = vld [vmem:[#allocation2 + $0xba] sm:$0x3f] }
 0x840   : > { %17095 = vmatprep.mubr.f32.mxu0 %v11302_v17  ;;  %v11260_v57 = vadd.f32 %v22685_v60, %v11205_v49 }
 0x841   : > { %v16914_v20 = vpop.f32.mrf.mxu0  ;;  %v11201_v21 = vld [vmem:[#allocation2 + $0x70] sm:$0xff] }
 0x842   : > { %v11256_v14 = vadd.f32 %v22685_v60, %v11201_v21 }
 0x843   : > { %v10632_v31 = vpop.f32.mrf.mxu0  ;;  %17096 = vmatmul.mubr.f32.gmra.mxu0 %v11303_v55  ;;  %v11204_v16 = vld [vmem:[#allocation2 + $0x88] sm:$0xff] }
 0x844   : > { %v10783_v33 = vadd.f32 %v10767_v50, %v10632_v31  ;;  %v11304_v0 = vmax.f32 %v11256_v14, 0.0  ;;  %v11259_v3 = vadd.f32 %v22685_v60, %v11204_v16  ;;  %v11261_v14 = vadd.f32 %v17646_v9, %v22685_v60  ;;  %v11208_v50 = vld [vmem:[#allocation2 + $0xa8] sm:$0xff] }
 0x845   : > { %v16917_v35 = vpop.f32.mrf.mxu0  ;;  %v11308_v31 = vmax.f32 %v11260_v57, 0.0  ;;  %v11263_v59 = vadd.f32 %v22685_v60, %v11208_v50 }
 0x846   : > { %10799 = vst [vmem:[#allocation2 + $0xa2] sm:$0x3f] %v10783_v33  ;;  %v10784_v17 = vadd.f32 %v16917_v35, %v10768_v47  ;;  %17098 = vmatprep.mubr.f32.mxu0 %v11304_v0  ;;  %v11307_v21 = vmax.f32 %v11259_v3, 0.0  ;;  %v11309_v33 = vmax.f32 %v11261_v14, 0.0  ;;  %v17647_v35 = vld [vmem:[#allocation2 + $0xb0] sm:$0xff] }
 0x847   : > { %v10641_v20 = vpop.f32.mrf.mxu0  ;;  %17099 = vmatmul.mubr.f32.gmra.mxu0 %v11305_v15  ;;  %v11264_v47 = vadd.f32 %v17647_v35, %v22685_v60  ;;  %v10769_v3 = vld [vmem:[#allocation2 + $0xd2] sm:$0x3f]  ;;  %v11311_v9 = vmax.f32 %v11263_v59, 0.0 }
 0x848   : > { %10800 = vst [vmem:[#allocation2 + $0xba] sm:$0x3f] %v10784_v17  ;;  %17101 = vmatprep.mubr.f32.mxu0 %v11306_v61  ;;  %v11211_v61 = vld [vmem:[#allocation2 + $0xc0] sm:$0xff] }
 0x849   : > { %v16920_v55 = vpop.f32.mrf.mxu0  ;;  %v11312_v50 = vmax.f32 %v11264_v47, 0.0 }
 0x84b   : > { %v10650_v28 = vpop.f32.mrf.mxu0  ;;  %17102 = vmatmul.mubr.f32.gmra.mxu0 %v11307_v21  ;;  %v10770_v21 = vld [vmem:[#allocation2 + $0xea] sm:$0x3f] }
 0x84c   : > { %17104 = vmatprep.mubr.f32.mxu0 %v11308_v31  ;;  %v11266_v28 = vadd.f32 %v22685_v60, %v11211_v61 }
 0x84d   : > { %v16923_v16 = vpop.f32.mrf.mxu0  ;;  %v11207_v0 = vld [vmem:[#allocation2 + $0xa0] sm:$0xff] }
 0x84e   : > { %v11262_v49 = vadd.f32 %v22685_v60, %v11207_v0  ;;  %v11212_v16 = vld [vmem:[#allocation2 + $0xc8] sm:$0xff] }
 0x84f   : > { %v10658_v15 = vpop.f32.mrf.mxu0  ;;  %17105 = vmatmul.mubr.f32.gmra.mxu0 %v11309_v33  ;;  %v11210_v17 = vld [vmem:[#allocation2 + $0xb8] sm:$0xff] }
 0x850   : > { %v10785_v57 = vadd.f32 %v10769_v3, %v10658_v15  ;;  %v11310_v20 = vmax.f32 %v11262_v49, 0.0  ;;  %v11265_v14 = vadd.f32 %v22685_v60, %v11210_v17  ;;  %v11267_v49 = vadd.f32 %v22685_v60, %v11212_v16  ;;  %v11214_v3 = vld [vmem:[#allocation2 + $0xd8] sm:$0xff]  ;;  %v11215_v17 = vld [vmem:[#allocation2 + $0xe0] sm:$0xff] }
 0x851   : > { %v16926_v55 = vpop.f32.mrf.mxu0  ;;  %v11314_v15 = vmax.f32 %v11266_v28, 0.0  ;;  %v11269_v61 = vadd.f32 %v22685_v60, %v11214_v3 }
 0x852   : > { %10801 = vst [vmem:[#allocation2 + $0xd2] sm:$0x3f] %v10785_v57  ;;  %v10786_v31 = vadd.f32 %v16926_v55, %v10770_v21  ;;  %17107 = vmatprep.mubr.f32.mxu0 %v11310_v20  ;;  %v11313_v35 = vmax.f32 %v11265_v14, 0.0  ;;  %v11315_v20 = vmax.f32 %v11267_v49, 0.0  ;;  %v11270_v21 = vadd.f32 %v22685_v60, %v11215_v17 }
 0x853   : > { %v10667_v0 = vpop.f32.mrf.mxu0  ;;  %17108 = vmatmul.mubr.f32.gmra.mxu0 %v11311_v9 }
 0x854   : > { %10802 = vst [vmem:[#allocation2 + $0xea] sm:$0x3f] %v10786_v31  ;;  %17110 = vmatprep.mubr.f32.mxu0 %v11312_v50  ;;  %v10771_v31 = vld [vmem:[#allocation2 + $0x102] sm:$0x3f]  ;;  %v11217_v50 = vld [vmem:[#allocation2 + $0xf0] sm:$0xff]  ;;  %v11318_v3 = vmax.f32 %v11270_v21, 0.0 }
 0x855   : > { %v16929_v33 = vpop.f32.mrf.mxu0 }
 0x856   : > { %v10772_v33 = vld [vmem:[#allocation2 + $0x11a] sm:$0x3f] }
 0x857   : > { %v10676_v59 = vpop.f32.mrf.mxu0  ;;  %17111 = vmatmul.mubr.f32.gmra.mxu0 %v11313_v35  ;;  %v11317_v35 = vmax.f32 %v11269_v61, 0.0 }
 0x858   : > { %17113 = vmatprep.mubr.f32.mxu0 %v11314_v15  ;;  %v11272_v59 = vadd.f32 %v22685_v60, %v11217_v50 }
 0x859   : > { %v16932_v57 = vpop.f32.mrf.mxu0  ;;  %v11213_v47 = vld [vmem:[#allocation2 + $0xd0] sm:$0xff] }
 0x85a   : > { %v11268_v55 = vadd.f32 %v22685_v60, %v11213_v47  ;;  %v11218_v57 = vld [vmem:[#allocation2 + $0xf8] sm:$0xff] }
 0x85b   : > { %v10684_v9 = vpop.f32.mrf.mxu0  ;;  %17114 = vmatmul.mubr.f32.gmra.mxu0 %v11315_v20  ;;  %v11216_v14 = vld [vmem:[#allocation2 + $0xe8] sm:$0xff] }
 0x85c   : > { %v10787_v28 = vadd.f32 %v10771_v31, %v10684_v9  ;;  %v11316_v16 = vmax.f32 %v11268_v55, 0.0  ;;  %v11271_v15 = vadd.f32 %v22685_v60, %v11216_v14  ;;  %v11273_v55 = vadd.f32 %v22685_v60, %v11218_v57  ;;  %v11220_v31 = vld [vmem:[#allocation2 + $0x108] sm:$0xff]  ;;  %v11221_v14 = vld [vmem:[#allocation2 + $0x110] sm:$0xff] }
 0x85d   : > { %v16935_v0 = vpop.f32.mrf.mxu0  ;;  %v11320_v9 = vmax.f32 %v11272_v59, 0.0  ;;  %v11275_v50 = vadd.f32 %v22685_v60, %v11220_v31 }
 0x85e   : > { %10803 = vst [vmem:[#allocation2 + $0x102] sm:$0x3f] %v10787_v28  ;;  %v10788_v49 = vadd.f32 %v16935_v0, %v10772_v33  ;;  %17116 = vmatprep.mubr.f32.mxu0 %v11316_v16  ;;  %v11319_v47 = vmax.f32 %v11271_v15, 0.0  ;;  %v11321_v16 = vmax.f32 %v11273_v55, 0.0  ;;  %v11276_v33 = vadd.f32 %v22685_v60, %v11221_v14 }
 0x85f   : > { %v10693_v17 = vpop.f32.mrf.mxu0  ;;  %17117 = vmatmul.mubr.f32.gmra.mxu0 %v11317_v35 }
 0x860   : > { %10804 = vst [vmem:[#allocation2 + $0x11a] sm:$0x3f] %v10788_v49  ;;  %17119 = vmatprep.mubr.f32.mxu0 %v11318_v3  ;;  %v10773_v49 = vld [vmem:[#allocation2 + $0x132] sm:$0x3f]  ;;  %v11223_v3 = vld [vmem:[#allocation2 + $0x120] sm:$0xff]  ;;  %v11324_v31 = vmax.f32 %v11276_v33, 0.0 }
 0x861   : > { %v16938_v20 = vpop.f32.mrf.mxu0 }
 0x862   : > { %v10774_v20 = vld [vmem:[#allocation2 + $0x14a] sm:$0x3f] }
 0x863   : > { %v10702_v61 = vpop.f32.mrf.mxu0  ;;  %17120 = vmatmul.mubr.f32.gmra.mxu0 %v11319_v47  ;;  %v11323_v47 = vmax.f32 %v11275_v50, 0.0 }
 0x864   : > { %17122 = vmatprep.mubr.f32.mxu0 %v11320_v9  ;;  %v11278_v61 = vadd.f32 %v22685_v60, %v11223_v3 }
 0x865   : > { %v16941_v28 = vpop.f32.mrf.mxu0  ;;  %v11219_v21 = vld [vmem:[#allocation2 + $0x100] sm:$0xff] }
 0x866   : > { %v11274_v0 = vadd.f32 %v22685_v60, %v11219_v21  ;;  %v11224_v28 = vld [vmem:[#allocation2 + $0x128] sm:$0xff] }
 0x867   : > { %v10710_v35 = vpop.f32.mrf.mxu0  ;;  %17123 = vmatmul.mubr.f32.gmra.mxu0 %v11321_v16  ;;  %v11222_v15 = vld [vmem:[#allocation2 + $0x118] sm:$0xff] }
 0x868   : > { %v10789_v59 = vadd.f32 %v10773_v49, %v10710_v35  ;;  %v11322_v57 = vmax.f32 %v11274_v0, 0.0  ;;  %v11277_v9 = vadd.f32 %v22685_v60, %v11222_v15  ;;  %v11279_v0 = vadd.f32 %v22685_v60, %v11224_v28  ;;  %v11226_v49 = vld [vmem:[#allocation2 + $0x138] sm:$0xff]  ;;  %v11227_v15 = vld [vmem:[#allocation2 + $0x140] sm:$0xff] }
 0x869   : > { %v16944_v17 = vpop.f32.mrf.mxu0  ;;  %v11326_v35 = vmax.f32 %v11278_v61, 0.0  ;;  %v11281_v3 = vadd.f32 %v22685_v60, %v11226_v49 }
 0x86a   : > { %10805 = vst [vmem:[#allocation2 + $0x132] sm:$0x3f] %v10789_v59  ;;  %v10790_v55 = vadd.f32 %v16944_v17, %v10774_v20  ;;  %17125 = vmatprep.mubr.f32.mxu0 %v11322_v57  ;;  %v11325_v21 = vmax.f32 %v11277_v9, 0.0  ;;  %v11327_v57 = vmax.f32 %v11279_v0, 0.0  ;;  %v11282_v20 = vadd.f32 %v22685_v60, %v11227_v15 }
 0x86b   : > { %v10719_v14 = vpop.f32.mrf.mxu0  ;;  %17126 = vmatmul.mubr.f32.gmra.mxu0 %v11323_v47 }
 0x86c   : > { %10806 = vst [vmem:[#allocation2 + $0x14a] sm:$0x3f] %v10790_v55  ;;  %17128 = vmatprep.mubr.f32.mxu0 %v11324_v31  ;;  %v10775_v55 = vld [vmem:[#allocation2 + $0x162] sm:$0x3f]  ;;  %v11229_v31 = vld [vmem:[#allocation2 + $0x150] sm:$0xff]  ;;  %v11330_v49 = vmax.f32 %v11282_v20, 0.0 }
 0x86d   : > { %v16947_v16 = vpop.f32.mrf.mxu0  ;;  %v22874_v20 = vld [vmem:[%s23104_s12] ss:$0 sm:$0xff] }
 0x86e   : > { %v10776_v16 = vld [vmem:[#allocation2 + $0x17a] sm:$0x3f] }
 0x86f   : > { %v10728_v50 = vpop.f32.mrf.mxu0  ;;  %17129 = vmatmul.mubr.f32.gmra.mxu0 %v11325_v21  ;;  %v11329_v21 = vmax.f32 %v11281_v3, 0.0 }
 0x870   : > { %17131 = vmatprep.mubr.f32.mxu0 %v11326_v35  ;;  %v11284_v50 = vadd.f32 %v22685_v60, %v11229_v31 }
 0x871   : > { %v16950_v59 = vpop.f32.mrf.mxu0  ;;  %v11225_v33 = vld [vmem:[#allocation2 + $0x130] sm:$0xff] }
 0x872   : > { %v11280_v17 = vadd.f32 %v22685_v60, %v11225_v33  ;;  %v11230_v59 = vld [vmem:[#allocation2 + $0x158] sm:$0xff] }
 0x873   : > { %v10736_v47 = vpop.f32.mrf.mxu0  ;;  %17132 = vmatmul.mubr.f32.gmra.mxu0 %v11327_v57  ;;  %v11228_v9 = vld [vmem:[#allocation2 + $0x148] sm:$0xff] }
 0x874   : > { %v10791_v61 = vadd.f32 %v10775_v55, %v10736_v47  ;;  %v11328_v28 = vmax.f32 %v11280_v17, 0.0  ;;  %v11283_v35 = vadd.f32 %v22685_v60, %v11228_v9  ;;  %v11285_v17 = vadd.f32 %v22685_v60, %v11230_v59  ;;  %v11232_v55 = vld [vmem:[#allocation2 + $0x168] sm:$0xff]  ;;  %v11233_v9 = vld [vmem:[#allocation2 + $0x170] sm:$0xff] }
 0x875   : > { %v16953_v14 = vpop.f32.mrf.mxu0  ;;  %v11332_v47 = vmax.f32 %v11284_v50, 0.0 }
 0x876   : > { %10807 = vst [vmem:[#allocation2 + $0x162] sm:$0x3f] %v10791_v61  ;;  %v10792_v0 = vadd.f32 %v16953_v14, %v10776_v16  ;;  %17134 = vmatprep.mubr.f32.mxu0 %v11328_v28  ;;  %v11331_v33 = vmax.f32 %v11283_v35, 0.0  ;;  %v11333_v31 = vmax.f32 %v11285_v17, 0.0  ;;  %v11287_v14 = vadd.f32 %v22685_v60, %v11232_v55  ;;  %v23493_v16 = vld [vmem:[#allocation23_spill] sm:$0xff] }
 0x877   : > { %v10745_v15 = vpop.f32.mrf.mxu0  ;;  %17135 = vmatmul.mubr.f32.gmra.mxu0 %v11329_v21  ;;  %v10021_v21 = vadd.f32 %v22702_v8, %v23493_v16 }
 0x878   : > { %10808 = vst [vmem:[#allocation2 + $0x17a] sm:$0x3f] %v10792_v0  ;;  %17137 = vmatprep.mubr.f32.mxu0 %v11330_v49  ;;  %v11288_v49 = vadd.f32 %v22685_v60, %v11233_v9  ;;  %v11335_v17 = vmax.f32 %v11287_v14, 0.0 }
 0x879   : > { %v16956_v57 = vpop.f32.mrf.mxu0 }
 0x87b   : > { %v10754_v3 = vpop.f32.mrf.mxu0  ;;  %17138 = vmatmul.mubr.f32.gmra.mxu0 %v11331_v33 }
 0x87c   : > { %17140 = vmatprep.mubr.f32.mxu0 %v11332_v47 }
 0x87d   : > { %v17079_v61 = vpop.f32.mrf.mxu0  ;;  %v11231_v28 = vld [vmem:[#allocation2 + $0x160] sm:$0xff] }
 0x87e   : > { %v11709_v35 = vadd.f32 %v17079_v61, %v22700_v25  ;;  %v11286_v0 = vadd.f32 %v22685_v60, %v11231_v28  ;;  %v11336_v25 = vmax.f32 %v11288_v49, 0.0 }
 0x87f   : > { %v11469_v50 = vpop.f32.mrf.mxu0  ;;  %17141 = vmatmul.mubr.f32.gmra.mxu0 %v11333_v31  ;;  %v11234_v59 = vld [vmem:[#allocation2 + $0x178] sm:$0xff] }
 0x880   : > { %v11860_v15 = vadd.f32 %v22874_v20, %v11709_v35  ;;  %v11708_v57 = vadd.f32 %v11469_v50, %v10021_v21  ;;  %v11334_v33 = vmax.f32 %v11286_v0, 0.0  ;;  %v11289_v47 = vadd.f32 %v22685_v60, %v11234_v59  ;;  %v23494_v60 = vld [vmem:[#allocation25_spill] sm:$0xff]  ;;  %v23495_v0 = vld [vmem:[#allocation27_spill] sm:$0xff] }
 0x881   : > { %v10023_v31 = vadd.f32 %v22707_v12, %v23494_v60  ;;  %v10025_v49 = vadd.f32 %v22712_v53, %v23495_v0 }
 0x882   : > { %v11908_v55 = vmax.f32 %v11860_v15, 0.0  ;;  %v11859_v8 = vadd.f32 %v22874_v20, %v11708_v57  ;;  %17143 = vmatprep.mubr.f32.mxu1 %v11334_v33  ;;  %v11337_v9 = vmax.f32 %v11289_v47, 0.0  ;;  %v23496_v47 = vld [vmem:[#allocation34_spill] sm:$0xff] }
 0x883   : > { %17144 = vmatmul.mubr.f32.vlgmr.msra.gmra.mxu1 %v11335_v17 }
 0x884   : > { %11956 = vst [vmem:[%s22887_s17 + $0x8] sm:$0xff] %v11908_v55  ;;  %v11907_v3 = vmax.f32 %v11859_v8, 0.0  ;;  %17146 = vmatprep.mubr.f32.mxu1 %v11336_v25  ;;  %v10027_v55 = vadd.f32 %v22717_v38, %v23496_v47  ;;  %v23499_v47 = vld [vmem:[#allocation40_spill] sm:$0xff] }
 0x886   : > { %11955 = vst [vmem:[%s22887_s17] sm:$0xff] %v11907_v3 }
 0x887   : > { %17147 = vmatmul.mubr.f32.gmra.mxu1 %v11337_v9 }
 0x8ef   : > { %v17082_v61 = vpop.f32.mrf.mxu0 }
 0x8f0   : > { %v11711_v28 = vadd.f32 %v17082_v61, %v22705_v44 }
 0x8f1   : > { %v11479_v14 = vpop.f32.mrf.mxu0 }
 0x8f2   : > { %v11862_v16 = vadd.f32 %v22874_v20, %v11711_v28  ;;  %v11710_v21 = vadd.f32 %v11479_v14, %v10023_v31  ;;  %v23497_v31 = vld [vmem:[#allocation31_spill] sm:$0xff] }
 0x8f3   : > { %v17085_v35 = vpop.f32.mrf.mxu0  ;;  %v10029_v28 = vadd.f32 %v22722_v34, %v23497_v31 }
 0x8f4   : > { %v11910_v50 = vmax.f32 %v11862_v16, 0.0  ;;  %v11861_v59 = vadd.f32 %v22874_v20, %v11710_v21  ;;  %v11713_v15 = vadd.f32 %v17085_v35, %v22710_v19 }
 0x8f5   : > { %v11489_v57 = vpop.f32.mrf.mxu0 }
 0x8f6   : > { %11958 = vst [vmem:[%s22887_s17 + $0x18] sm:$0xff] %v11910_v50  ;;  %v11909_v12 = vmax.f32 %v11861_v59, 0.0  ;;  %v11864_v44 = vadd.f32 %v22874_v20, %v11713_v15  ;;  %v11712_v33 = vadd.f32 %v11489_v57, %v10025_v49  ;;  %v23498_v50 = vld [vmem:[#allocation29_spill] sm:$0xff] }
 0x8f7   : > { %v17088_v17 = vpop.f32.mrf.mxu0  ;;  %v10031_v59 = vadd.f32 %v22727_v42, %v23498_v50 }
 0x8f8   : > { %11957 = vst [vmem:[%s22887_s17 + $0x10] sm:$0xff] %v11909_v12  ;;  %v11912_v53 = vmax.f32 %v11864_v44, 0.0  ;;  %v11863_v8 = vadd.f32 %v22874_v20, %v11712_v33  ;;  %v11715_v25 = vadd.f32 %v17088_v17, %v22715_v32 }
 0x8f9   : > { %v11499_v3 = vpop.f32.mrf.mxu0 }
 0x8fa   : > { %11960 = vst [vmem:[%s22887_s17 + $0x28] sm:$0xff] %v11912_v53  ;;  %v11911_v19 = vmax.f32 %v11863_v8, 0.0  ;;  %v11866_v9 = vadd.f32 %v22874_v20, %v11715_v25  ;;  %v11714_v61 = vadd.f32 %v11499_v3, %v10027_v55  ;;  %v10033_v55 = vadd.f32 %v22732_v4, %v23499_v47 }
 0x8fb   : > { %v17091_v60 = vpop.f32.mrf.mxu0 }
 0x8fc   : > { %11959 = vst [vmem:[%s22887_s17 + $0x20] sm:$0xff] %v11911_v19  ;;  %v11914_v38 = vmax.f32 %v11866_v9, 0.0  ;;  %v11865_v14 = vadd.f32 %v22874_v20, %v11714_v61  ;;  %v11717_v16 = vadd.f32 %v17091_v60, %v22720_v6  ;;  %v23500_v61 = vld [vmem:[#allocation32_spill] sm:$0xff] }
 0x8fd   : > { %v11509_v21 = vpop.f32.mrf.mxu0  ;;  %v10035_v60 = vadd.f32 %v22737_v1, %v23500_v61  ;;  %v23504_v61 = vld [vmem:[#allocation63_spill] sm:$0xff] }
 0x8fe   : > { %11962 = vst [vmem:[%s22887_s17 + $0x38] sm:$0xff] %v11914_v38  ;;  %v11913_v32 = vmax.f32 %v11865_v14, 0.0  ;;  %v11868_v35 = vadd.f32 %v22874_v20, %v11717_v16  ;;  %v11716_v0 = vadd.f32 %v11509_v21, %v10029_v28 }
 0x8ff   : > { %v17094_v49 = vpop.f32.mrf.mxu0 }
 0x900   : > { %11961 = vst [vmem:[%s22887_s17 + $0x30] sm:$0xff] %v11913_v32  ;;  %v11916_v34 = vmax.f32 %v11868_v35, 0.0  ;;  %v11867_v15 = vadd.f32 %v22874_v20, %v11716_v0  ;;  %v11719_v57 = vadd.f32 %v17094_v49, %v22725_v52  ;;  %v23501_v32 = vld [vmem:[#allocation43_spill] sm:$0xff] }
 0x901   : > { %v11519_v12 = vpop.f32.mrf.mxu0  ;;  %v10037_v35 = vadd.f32 %v22742_v26, %v23501_v32 }
 0x902   : > { %11964 = vst [vmem:[%s22887_s17 + $0x48] sm:$0xff] %v11916_v34  ;;  %v11915_v6 = vmax.f32 %v11867_v15, 0.0  ;;  %v11870_v44 = vadd.f32 %v22874_v20, %v11719_v57  ;;  %v11718_v33 = vadd.f32 %v11519_v12, %v10031_v59  ;;  %v23502_v57 = vld [vmem:[#allocation35_spill] sm:$0xff] }
 0x903   : > { %v17097_v17 = vpop.f32.mrf.mxu0  ;;  %v10039_v12 = vadd.f32 %v22747_v30, %v23502_v57 }
 0x904   : > { %11963 = vst [vmem:[%s22887_s17 + $0x40] sm:$0xff] %v11915_v6  ;;  %v11918_v42 = vmax.f32 %v11870_v44, 0.0  ;;  %v11869_v53 = vadd.f32 %v22874_v20, %v11718_v33  ;;  %v11721_v8 = vadd.f32 %v17097_v17, %v22730_v24 }
 0x905   : > { %v11529_v25 = vpop.f32.mrf.mxu0 }
 0x906   : > { %11966 = vst [vmem:[%s22887_s17 + $0x58] sm:$0xff] %v11918_v42  ;;  %v11917_v52 = vmax.f32 %v11869_v53, 0.0  ;;  %v11872_v3 = vadd.f32 %v22874_v20, %v11721_v8  ;;  %v11720_v19 = vadd.f32 %v11529_v25, %v10033_v55  ;;  %v23503_v42 = vld [vmem:[#allocation42_spill] sm:$0xff] }
 0x907   : > { %v17100_v9 = vpop.f32.mrf.mxu0  ;;  %v10041_v53 = vadd.f32 %v22752_v18, %v23503_v42 }
 0x908   : > { %11965 = vst [vmem:[%s22887_s17 + $0x50] sm:$0xff] %v11917_v52  ;;  %v11920_v4 = vmax.f32 %v11872_v3, 0.0  ;;  %v11871_v31 = vadd.f32 %v22874_v20, %v11720_v19  ;;  %v11723_v28 = vadd.f32 %v17100_v9, %v22735_v29 }
 0x909   : > { %v11539_v38 = vpop.f32.mrf.mxu0 }
 0x90a   : > { %11968 = vst [vmem:[%s22887_s17 + $0x68] sm:$0xff] %v11920_v4  ;;  %v11919_v24 = vmax.f32 %v11871_v31, 0.0  ;;  %v11874_v14 = vadd.f32 %v22874_v20, %v11723_v28  ;;  %v11722_v16 = vadd.f32 %v11539_v38, %v10035_v60  ;;  %v10043_v60 = vadd.f32 %v22757_v48, %v23504_v61 }
 0x90b   : > { %v17103_v21 = vpop.f32.mrf.mxu0 }
 0x90c   : > { %11967 = vst [vmem:[%s22887_s17 + $0x60] sm:$0xff] %v11919_v24  ;;  %v11922_v1 = vmax.f32 %v11874_v14, 0.0  ;;  %v11873_v0 = vadd.f32 %v22874_v20, %v11722_v16  ;;  %v11725_v49 = vadd.f32 %v17103_v21, %v22740_v43  ;;  %v23505_v16 = vld [vmem:[#allocation47_spill] sm:$0xff] }
 0x90d   : > { %v11549_v50 = vpop.f32.mrf.mxu0  ;;  %v10045_v21 = vadd.f32 %v22762_v56, %v23505_v16 }
 0x90e   : > { %11970 = vst [vmem:[%s22887_s17 + $0x78] sm:$0xff] %v11922_v1  ;;  %v11921_v29 = vmax.f32 %v11873_v0, 0.0  ;;  %v11876_v59 = vadd.f32 %v22874_v20, %v11725_v49  ;;  %v11724_v34 = vadd.f32 %v11549_v50, %v10037_v35 }
 0x90f   : > { %v17106_v15 = vpop.f32.mrf.mxu0 }
 0x910   : > { %11969 = vst [vmem:[%s22887_s17 + $0x70] sm:$0xff] %v11921_v29  ;;  %v11924_v26 = vmax.f32 %v11876_v59, 0.0  ;;  %v11875_v6 = vadd.f32 %v22874_v20, %v11724_v34  ;;  %v11727_v44 = vadd.f32 %v17106_v15, %v22745_v39  ;;  %v23506_v29 = vld [vmem:[#allocation49_spill] sm:$0xff] }
 0x911   : > { %v11559_v33 = vpop.f32.mrf.mxu0  ;;  %v10047_v59 = vadd.f32 %v22767_v10, %v23506_v29 }
 0x912   : > { %11972 = vst [vmem:[%s22887_s17 + $0x88] sm:$0xff] %v11924_v26  ;;  %v11923_v43 = vmax.f32 %v11875_v6, 0.0  ;;  %v11878_v17 = vadd.f32 %v22874_v20, %v11727_v44  ;;  %v11726_v47 = vadd.f32 %v11559_v33, %v10039_v12 }
 0x913   : > { %v17109_v55 = vpop.f32.mrf.mxu0 }
 0x914   : > { %11971 = vst [vmem:[%s22887_s17 + $0x80] sm:$0xff] %v11923_v43  ;;  %v11926_v30 = vmax.f32 %v11878_v17, 0.0  ;;  %v11877_v8 = vadd.f32 %v22874_v20, %v11726_v47  ;;  %v11729_v25 = vadd.f32 %v17109_v55, %v22750_v37 }
 0x915   : > { %v11569_v52 = vpop.f32.mrf.mxu0 }
 0x916   : > { %11974 = vst [vmem:[%s22887_s17 + $0x98] sm:$0xff] %v11926_v30  ;;  %v11925_v39 = vmax.f32 %v11877_v8, 0.0  ;;  %v11880_v3 = vadd.f32 %v22874_v20, %v11729_v25  ;;  %v11728_v19 = vadd.f32 %v11569_v52, %v10041_v53 }
 0x917   : > { %v17112_v9 = vpop.f32.mrf.mxu0 }
 0x918   : > { %11973 = vst [vmem:[%s22887_s17 + $0x90] sm:$0xff] %v11925_v39  ;;  %v11928_v18 = vmax.f32 %v11880_v3, 0.0  ;;  %v11879_v4 = vadd.f32 %v22874_v20, %v11728_v19  ;;  %v11731_v31 = vadd.f32 %v17112_v9, %v22755_v58 }
 0x919   : > { %v11579_v28 = vpop.f32.mrf.mxu0 }
 0x91a   : > { %11976 = vst [vmem:[%s22887_s17 + $0xa8] sm:$0xff] %v11928_v18  ;;  %v11927_v37 = vmax.f32 %v11879_v4, 0.0  ;;  %v11882_v38 = vadd.f32 %v22874_v20, %v11731_v31  ;;  %v11730_v24 = vadd.f32 %v11579_v28, %v10043_v60 }
 0x91b   : > { %v17115_v14 = vpop.f32.mrf.mxu0 }
 0x91c   : > { %11975 = vst [vmem:[%s22887_s17 + $0xa0] sm:$0xff] %v11927_v37  ;;  %v11930_v48 = vmax.f32 %v11882_v38, 0.0  ;;  %v11881_v32 = vadd.f32 %v22874_v20, %v11730_v24  ;;  %v11733_v35 = vadd.f32 %v17115_v14, %v22760_v36 }
 0x91d   : > { %v11589_v1 = vpop.f32.mrf.mxu0 }
 0x91e   : > { %11978 = vst [vmem:[%s22887_s17 + $0xb8] sm:$0xff] %v11930_v48  ;;  %v11929_v58 = vmax.f32 %v11881_v32, 0.0  ;;  %v11884_v0 = vadd.f32 %v22874_v20, %v11733_v35  ;;  %v11732_v49 = vadd.f32 %v11589_v1, %v10045_v21 }
 0x91f   : > { %v17118_v50 = vpop.f32.mrf.mxu0 }
 0x920   : > { %11977 = vst [vmem:[%s22887_s17 + $0xb0] sm:$0xff] %v11929_v58  ;;  %v11932_v56 = vmax.f32 %v11884_v0, 0.0  ;;  %v11883_v34 = vadd.f32 %v22874_v20, %v11732_v49  ;;  %v11735_v15 = vadd.f32 %v17118_v50, %v22765_v41 }
 0x921   : > { %v11599_v57 = vpop.f32.mrf.mxu0 }
 0x922   : > { %11980 = vst [vmem:[%s22887_s17 + $0xc8] sm:$0xff] %v11932_v56  ;;  %v11931_v36 = vmax.f32 %v11883_v34, 0.0  ;;  %v11886_v12 = vadd.f32 %v22874_v20, %v11735_v15  ;;  %v11734_v26 = vadd.f32 %v11599_v57, %v10047_v59 }
 0x923   : > { %v17121_v6 = vpop.f32.mrf.mxu0 }
 0x924   : > { %11979 = vst [vmem:[%s22887_s17 + $0xc0] sm:$0xff] %v11931_v36  ;;  %v11934_v44 = vmax.f32 %v11886_v12, 0.0  ;;  %v11885_v10 = vadd.f32 %v22874_v20, %v11734_v26  ;;  %v11737_v33 = vadd.f32 %v17121_v6, %v22770_v11 }
 0x925   : > { %v11609_v43 = vpop.f32.mrf.mxu0 }
 0x926   : > { %11982 = vst [vmem:[%s22887_s17 + $0xd8] sm:$0xff] %v11934_v44  ;;  %v11933_v17 = vmax.f32 %v11885_v10, 0.0  ;;  %v11888_v41 = vadd.f32 %v22874_v20, %v11737_v33  ;;  %v11736_v47 = vadd.f32 %v11609_v43, %v22773_v54  ;;  %v23507_v10 = vld [vmem:[#allocation71_spill] sm:$0xff] }
 0x927   : > { %v17124_v55 = vpop.f32.mrf.mxu0 }
 0x928   : > { %11981 = vst [vmem:[%s22887_s17 + $0xd0] sm:$0xff] %v11933_v17  ;;  %v11936_v42 = vmax.f32 %v11888_v41, 0.0  ;;  %v11887_v53 = vadd.f32 %v22874_v20, %v11736_v47  ;;  %v11739_v30 = vadd.f32 %v17124_v55, %v22776_v23  ;;  %v23508_v41 = vld [vmem:[#allocation74_spill] sm:$0xff] }
 0x929   : > { %v11619_v8 = vpop.f32.mrf.mxu0 }
 0x92a   : > { %11984 = vst [vmem:[%s22887_s17 + $0xe8] sm:$0xff] %v11936_v42  ;;  %v11935_v11 = vmax.f32 %v11887_v53, 0.0  ;;  %v11890_v25 = vadd.f32 %v22874_v20, %v11739_v30  ;;  %v11738_v52 = vadd.f32 %v11619_v8, %v22779_v45  ;;  %v23509_v53 = vld [vmem:[#allocation73_spill] sm:$0xff] }
 0x92b   : > { %v17127_v39 = vpop.f32.mrf.mxu0 }
 0x92c   : > { %11983 = vst [vmem:[%s22887_s17 + $0xe0] sm:$0xff] %v11935_v11  ;;  %v11938_v54 = vmax.f32 %v11890_v25, 0.0  ;;  %v11889_v3 = vadd.f32 %v22874_v20, %v11738_v52  ;;  %v11741_v19 = vadd.f32 %v17127_v39, %v22782_v63  ;;  %v23510_v52 = vld [vmem:[#allocation76_spill] sm:$0xff] }
 0x92d   : > { %v11629_v9 = vpop.f32.mrf.mxu0 }
 0x92e   : > { %11986 = vst [vmem:[%s22887_s17 + $0xf8] sm:$0xff] %v11938_v54  ;;  %v11937_v23 = vmax.f32 %v11889_v3, 0.0  ;;  %v11892_v61 = vadd.f32 %v22874_v20, %v11741_v19  ;;  %v11740_v60 = vadd.f32 %v11629_v9, %v22785_v13  ;;  %v23511_v9 = vld [vmem:[#allocation75_spill] sm:$0xff] }
 0x92f   : > { %v17130_v18 = vpop.f32.mrf.mxu0 }
 0x930   : > { %11985 = vst [vmem:[%s22887_s17 + $0xf0] sm:$0xff] %v11937_v23  ;;  %v11940_v45 = vmax.f32 %v11892_v61, 0.0  ;;  %v11891_v4 = vadd.f32 %v22874_v20, %v11740_v60  ;;  %v11743_v31 = vadd.f32 %v17130_v18, %v22788_v5 }
 0x931   : > { %v11639_v28 = vpop.f32.mrf.mxu0 }
 0x932   : > { %11988 = vst [vmem:[%s22887_s17 + $0x108] sm:$0xff] %v11940_v45  ;;  %v11939_v63 = vmax.f32 %v11891_v4, 0.0  ;;  %v11894_v37 = vadd.f32 %v22874_v20, %v11743_v31  ;;  %v11742_v38 = vadd.f32 %v11639_v28, %v22791_v22 }
 0x933   : > { %v17133_v24 = vpop.f32.mrf.mxu0 }
 0x934   : > { %11987 = vst [vmem:[%s22887_s17 + $0x100] sm:$0xff] %v11939_v63  ;;  %v11942_v13 = vmax.f32 %v11894_v37, 0.0  ;;  %v11893_v14 = vadd.f32 %v22874_v20, %v11742_v38  ;;  %v11745_v16 = vadd.f32 %v17133_v24, %v22794_v27 }
 0x935   : > { %v11649_v21 = vpop.f32.mrf.mxu0 }
 0x936   : > { %11990 = vst [vmem:[%s22887_s17 + $0x118] sm:$0xff] %v11942_v13  ;;  %v11941_v5 = vmax.f32 %v11893_v14, 0.0  ;;  %v11896_v48 = vadd.f32 %v22874_v20, %v11745_v16  ;;  %v11744_v32 = vadd.f32 %v11649_v21, %v22797_v7 }
 0x937   : > { %v17136_v35 = vpop.f32.mrf.mxu0 }
 0x938   : > { %11989 = vst [vmem:[%s22887_s17 + $0x110] sm:$0xff] %v11941_v5  ;;  %v11944_v22 = vmax.f32 %v11896_v48, 0.0  ;;  %v11895_v1 = vadd.f32 %v22874_v20, %v11744_v32  ;;  %v11747_v58 = vadd.f32 %v17136_v35, %v22800_v51 }
 0x939   : > { %v11659_v0 = vpop.f32.mrf.mxu0 }
 0x93a   : > { %11992 = vst [vmem:[%s22887_s17 + $0x128] sm:$0xff] %v11944_v22  ;;  %v11943_v27 = vmax.f32 %v11895_v1, 0.0  ;;  %v11898_v49 = vadd.f32 %v22874_v20, %v11747_v58  ;;  %v11746_v50 = vadd.f32 %v11659_v0, %v22803_v40 }
 0x93b   : > { %v17139_v29 = vpop.f32.mrf.mxu0 }
 0x93c   : > { %11991 = vst [vmem:[%s22887_s17 + $0x120] sm:$0xff] %v11943_v27  ;;  %v11946_v7 = vmax.f32 %v11898_v49, 0.0  ;;  %v11897_v59 = vadd.f32 %v22874_v20, %v11746_v50  ;;  %v11749_v56 = vadd.f32 %v17139_v29, %v22806_v2 }
 0x93d   : > { %v11669_v34 = vpop.f32.mrf.mxu0 }
 0x93e   : > { %11994 = vst [vmem:[%s22887_s17 + $0x138] sm:$0xff] %v11946_v7  ;;  %v11945_v51 = vmax.f32 %v11897_v59, 0.0  ;;  %v11900_v15 = vadd.f32 %v22874_v20, %v11749_v56  ;;  %v11748_v57 = vadd.f32 %v11669_v34, %v22809_v62 }
 0x93f   : > { %v17142_v36 = vpop.f32.mrf.mxu0 }
 0x940   : > { %11993 = vst [vmem:[%s22887_s17 + $0x130] sm:$0xff] %v11945_v51  ;;  %v11948_v40 = vmax.f32 %v11900_v15, 0.0  ;;  %v11899_v12 = vadd.f32 %v22874_v20, %v11748_v57  ;;  %v11751_v26 = vadd.f32 %v17142_v36, %v22812_v46 }
 0x941   : > { %v11679_v6 = vpop.f32.mrf.mxu0 }
 0x942   : > { %11996 = vst [vmem:[%s22887_s17 + $0x148] sm:$0xff] %v11948_v40  ;;  %v11947_v2 = vmax.f32 %v11899_v12, 0.0  ;;  %v11902_v44 = vadd.f32 %v22874_v20, %v11751_v26  ;;  %v11750_v33 = vadd.f32 %v11679_v6, %v23507_v10 }
 0x943   : > { %v17145_v43 = vpop.f32.mrf.mxu1 }
 0x944   : > { %11995 = vst [vmem:[%s22887_s17 + $0x140] sm:$0xff] %v11947_v2  ;;  %v11950_v62 = vmax.f32 %v11902_v44, 0.0  ;;  %v11901_v17 = vadd.f32 %v22874_v20, %v11750_v33  ;;  %v11753_v47 = vadd.f32 %v17145_v43, %v23508_v41 }
 0x945   : > { %v11689_v55 = vpop.f32.mrf.mxu1 }
 0x946   : > { %11998 = vst [vmem:[%s22887_s17 + $0x158] sm:$0xff] %v11950_v62  ;;  %v11949_v46 = vmax.f32 %v11901_v17, 0.0  ;;  %v11904_v42 = vadd.f32 %v22874_v20, %v11753_v47  ;;  %v11752_v30 = vadd.f32 %v11689_v55, %v23509_v53 }
 0x947   : > { %v17148_v8 = vpop.f32.mrf.mxu1 }
 0x948   : > { %11997 = vst [vmem:[%s22887_s17 + $0x150] sm:$0xff] %v11949_v46  ;;  %v11952_v11 = vmax.f32 %v11904_v42, 0.0  ;;  %v11903_v25 = vadd.f32 %v22874_v20, %v11752_v30  ;;  %v11755_v39 = vadd.f32 %v17148_v8, %v23510_v52 }
 0x949   : > { %v11699_v54 = vpop.f32.mrf.mxu1 }
 0x94a   : > { %12000 = vst [vmem:[%s22887_s17 + $0x168] sm:$0xff] %v11952_v11  ;;  %v11951_v3 = vmax.f32 %v11903_v25, 0.0  ;;  %v11906_v19 = vadd.f32 %v22874_v20, %v11755_v39  ;;  %v11754_v23 = vadd.f32 %v11699_v54, %v23511_v9 }
 0x94c   : > { %11999 = vst [vmem:[%s22887_s17 + $0x160] sm:$0xff] %v11951_v3  ;;  %v11954_v61 = vmax.f32 %v11906_v19, 0.0  ;;  %v11905_v60 = vadd.f32 %v22874_v20, %v11754_v23 }
 0x94e   : > { %12002 = vst [vmem:[%s22887_s17 + $0x178] sm:$0xff] %v11954_v61  ;;  %v11953_v18 = vmax.f32 %v11905_v60, 0.0 }
 0x950   : > { %12001 = vst [vmem:[%s22887_s17 + $0x170] sm:$0xff] %v11953_v18 }
 0x951   : > { %17845 = shalt.err (!%p17842_p3)
}
 0x952   : > { %s17846_s11 = scalar_lea.hbm %s23045_s22, 6144  ;;  %s17850_s19 = scalar_lea.hbm %s23105_s13, 12288 }
 0x953   : > { %p17847_p4 = scmp.ne.s32.totalorder %s23045_s22, %s17846_s11  ;;  %p17851_p0 = scmp.lt.s32.totalorder %s23045_s22, %s23105_s13 }
 0x954   : > { %p17852_p7 = scmp.lt.s32.totalorder %s17850_s19, %s17846_s11 }
 0x955   : > { %p17848_p9 = pnand %p17847_p4, %p23512_p6 }
 0x956   : > { %p17853_p2 = por %p17852_p7, %p17851_p0 }
 0x957   : > { %p17849_p12 = pneg %p17848_p9 }
 0x959   : > { %p17854_p8 = pnand %p17853_p2, %p17849_p12 }
 0x95b   : > { %17857 = shalt.err (!%p17854_p8)
}
 0x95c   : > { %s17922_s7 = smov 128   ;;  %s17923_s15 = smov 8  }
 0x95d   : > { %17211 = dma.vmem_to_hbm [thread:$0]  (%p23512_p6), %s23048_s5, 6144, %s23045_s22, %s12004_s14, %s17922_s7, %s17922_s7, %s17923_s15  }
 0x95e PF: > { %s12032_s18 = sand.u32 1, %s17896_s25   ;;  %p23513_p10 = scmp.ne.s32.totalorder %s23193_s16, 0 }
 0x95f   : > { %p23514_p11 = scmp.ge.s32.totalorder %s17908_s28, 2  ;;  %s12033_s3 = scalar_lea.sflag [#allocation6], %s12032_s18 }
 0x961   : > { %p17237_p13 = pnand %p23514_p11, %p23513_p10 }
 0x963   : > { %p17238_p5 = pneg %p17237_p13 }
 0x965   : > { %17891 = dma.done.wait (%p17238_p5), %s12033_s3, 6144  }
 0x966   : > { %17893 = vsyncadd (%p17238_p5), %s12033_s3, 4294961152  ;;  %s23515_s30 = sld [smem:[#allocation22_spill]]  ;;  %p29_p1 = scmp.ge.s32.totalorder %s18115_s21, 4  }
 0x967   : > { %s23516_s25 = smov %s17900_s26  ;;  %s23517_s26 = smov %s17904_s27 }
 0x968   : > { %s23519_s28 = smov %s18115_s21  ;;  %31 = sbr.rel (!%p29_p1) target bundleno = 15 (0xf), region = 166 }
 0x96c   : > { %s23518_s27 = smov %s23515_s30 }
 0x96d   :  { %12038 = vsyncpa [#allocation5], 1 }
 0x96e   :  { %12040 = vsyncpa [#allocation5 + $0x1], 1 }
 0x96f   :  { %12041 = vsyncpa [#allocation8], 1 }
 0x970   :  { %12042 = vsyncpa [#allocation11], 1 }
 0x971   :  { %12043 = vsyncpa [#allocation14], 1 }
 0x972   :  { %12044 = vsyncpa [#allocation6], 1 }
 0x973   :  { %12046 = vsyncpa [#allocation6 + $0x1], 1 }

</bundles_post_ra>
